<compile_context>
chip_gen: v6e
topology: v6e:2x2x1
jax: 0.10.0
libtpu: 0.0.40
codegen_flags: <defaults>
</compile_context>

<pallas_src>
import numpy as np
import jax
import jax.numpy as jnp
from jax.experimental import pallas as pl
from jax.experimental.pallas import tpu as pltpu


def _gaussian_taps_1d(kernel_size: int, sigma: float) -> np.ndarray:
    """Normalized 1-D Gaussian taps; the normalized 3-D kernel used by the
    PyTorch module factorizes exactly into their outer product."""
    coords = np.arange(kernel_size, dtype=np.float32) - kernel_size // 2
    taps = np.exp(-(coords ** 2) / (2.0 * np.float32(sigma) ** 2)).astype(np.float32)
    taps /= taps.sum()
    return taps


def _gaussian_kernel_3d(kernel_size: int, sigma: float) -> np.ndarray:
    """Same construction as the PyTorch __init__ (used only by the reference)."""
    coords = np.arange(kernel_size, dtype=np.float32) - kernel_size // 2
    gx, gy, gz = np.meshgrid(coords, coords, coords, indexing="ij")
    k = np.exp(-(gx ** 2 + gy ** 2 + gz ** 2) / (2.0 * sigma ** 2))
    k /= k.sum()
    return k.astype(np.float32)


def _make_separable_kernel(taps_np: np.ndarray, BC: int, D: int, H: int, W: int, K: int):
    """Kernel body: halo-only zero pad in VMEM + three separable 1-D passes.

    Layout: x_ref / o_ref are (D, H, W, BC) with the channel block BC on lanes,
    W on sublanes, D and H as leading axes.  pad_ref is (Dp, Hp, Wp, BC) f32
    (the lane axis is never padded)."""
    P = K // 2
    taps = [float(t) for t in taps_np]
    Dp, Hp, Wp = D + 2 * P, H + 2 * P, W + 2 * P

    def kernel(x_ref, o_ref, pad_ref):
        # --- halo-only zeroing (interior is overwritten right below) ---------
        zd = jnp.zeros((P, Hp, Wp, BC), jnp.float32)
        pad_ref[0:P, :, :, :] = zd
        pad_ref[P + D:Dp, :, :, :] = zd
        zh = jnp.zeros((D, P, Wp, BC), jnp.float32)
        pad_ref[P:P + D, 0:P, :, :] = zh
        pad_ref[P:P + D, P + H:Hp, :, :] = zh
        zw = jnp.zeros((D, H, P, BC), jnp.float32)
        pad_ref[P:P + D, P:P + H, 0:P, :] = zw
        pad_ref[P:P + D, P:P + H, P + W:Wp, :] = zw

        # Interior.
        pad_ref[P:P + D, P:P + H, P:P + W, :] = x_ref[...].astype(jnp.float32)

        # --- pass along D (leading axis: shifted slices are free addressing) -
        t = taps[0] * pad_ref[0:D, :, :, :]
        for k in range(1, K):
            t = t + taps[k] * pad_ref[k:k + D, :, :, :]
        # Reuse the scratch (H/W halos of t are still exactly zero).
        pad_ref[0:D, :, :, :] = t

        # --- pass along H (second leading axis) ------------------------------
        u = taps[0] * pad_ref[0:D, 0:H, :, :]
        for k in range(1, K):
            u = u + taps[k] * pad_ref[0:D, k:k + H, :, :]
        # Reuse the scratch (W halos of u are still exactly zero).
        pad_ref[0:D, 0:H, :, :] = u

        # --- pass along W (sublane axis; lane axis untouched) ----------------
        v = taps[0] * pad_ref[0:D, 0:H, 0:W, :]
        for k in range(1, K):
            v = v + taps[k] * pad_ref[0:D, 0:H, k:k + W, :]

        o_ref[...] = v.astype(o_ref.dtype)

    return kernel


def _ceil_to(x: int, m: int) -> int:
    return -(-x // m) * m


def _vmem_tile_bytes(shape, itemsize: int) -> int:
    """Conservative VMEM footprint: last two dims padded to the native tile."""
    *lead, s2, s1 = shape
    n = 1
    for d in lead:
        n *= d
    sub = max(8, 32 // max(itemsize, 1))        # 8 sublanes for f32, 16 for bf16
    return n * _ceil_to(s2, sub) * _ceil_to(s1, 128) * itemsize


def _vmem_budgets():
    """Generation-aware (block_budget, vmem_limit_bytes)."""
    cap = 64 * 1024 * 1024                      # conservative default (v7x/TC)
    try:
        info = pltpu.get_tpu_info()
        cap = int(getattr(info, "vmem_capacity_bytes", cap)) or cap
    except Exception:
        pass
    vmem_limit = int(min(max(cap - (16 << 20), 32 << 20), 96 << 20))
    block_budget = int(min(max(cap * 3 // 8, 12 << 20), 48 << 20))
    return block_budget, vmem_limit


def _pick_channel_block(nc: int, D: int, H: int, W: int, K: int,
                        itemsize: int, budget: int) -> int:
    """Largest lane-dense channel block whose working set fits the budget."""
    P = K // 2

    def footprint(bc: int) -> int:
        io = _vmem_tile_bytes((D, H, W, bc), itemsize)                # one in/out tile
        pad = _vmem_tile_bytes((D + 2 * P, H + 2 * P, W + 2 * P, bc), 4)
        # 2x double-buffered input + 2x double-buffered output + pad scratch
        # + one live pass temporary (buffers are reused across passes).
        return 4 * io + 2 * pad

    # Valid (lane-dense) block sizes: the full channel count, or multiples of
    # 128 that divide it (block lane dim is either full or a tile multiple).
    cands = {nc}
    cands.update(d for d in range(128, nc, 128) if nc % d == 0)
    cands = sorted(cands, reverse=True)

    fitting = [d for d in cands if footprint(d) <= budget]
    if not fitting:
        # TODO(synk): D-axis halo tiling for volumes whose full (D,H,W) slab
        # exceeds the VMEM budget even at the smallest lane-dense block.
        return cands[-1]

    best = fitting[0]
    # Prefer an even number of grid steps (v7x: two TensorCores split the
    # "parallel" axis) when it costs at most a 2x smaller block.
    for d in fitting:
        if (nc // d) % 2 == 0 and 2 * d >= best:
            return d
    return best


def gaussian_smoothing_3d(x: jax.Array, kernel_size: int = 5, sigma: float = 1.0) -> jax.Array:
    """Forward pass of GaussianSmoothing3D.  x: (N, C, D, H, W)."""
    N, C, D, H, W = x.shape
    K = kernel_size
    P = K // 2
    taps = _gaussian_taps_1d(K, sigma)
    NC = N * C

    # Channels-last layout plumbing: (N, C, D, H, W) -> (D, H, W, N*C).
    xcl = jnp.transpose(x.reshape(NC, D, H, W), (1, 2, 3, 0))

    itemsize = jnp.dtype(x.dtype).itemsize
    budget, vmem_limit = _vmem_budgets()
    BC = _pick_channel_block(NC, D, H, W, K, itemsize, budget)
    num_blocks = NC // BC

    out_cl = pl.pallas_call(
        _make_separable_kernel(taps, BC, D, H, W, K),
        out_shape=jax.ShapeDtypeStruct((D, H, W, NC), x.dtype),
        grid=(num_blocks,),
        in_specs=[pl.BlockSpec((D, H, W, BC), lambda i: (0, 0, 0, i))],
        out_specs=pl.BlockSpec((D, H, W, BC), lambda i: (0, 0, 0, i)),
        scratch_shapes=[pltpu.VMEM((D + 2 * P, H + 2 * P, W + 2 * P, BC), jnp.float32)],
        compiler_params=pltpu.CompilerParams(
            dimension_semantics=("parallel",),
            vmem_limit_bytes=vmem_limit,
        ),
    )(xcl)

    return jnp.transpose(out_cl, (3, 0, 1, 2)).reshape(N, C, D, H, W)


def _reference(x: jax.Array, kernel_size: int = 5, sigma: float = 1.0) -> jax.Array:
    """Pure-JAX reference (depthwise Conv3d), mirrors the PyTorch module."""
    C = x.shape[1]
    k = jnp.asarray(_gaussian_kernel_3d(kernel_size, sigma))
    w = jnp.broadcast_to(k, (C, 1, kernel_size, kernel_size, kernel_size))
    p = kernel_size // 2
    return jax.lax.conv_general_dilated(
        x, w,
        window_strides=(1, 1, 1),
        padding=[(p, p)] * 3,
        dimension_numbers=("NCDHW", "OIDHW", "NCDHW"),
        feature_group_count=C,
        precision=jax.lax.Precision.HIGHEST,
    )


if __name__ == "__main__":
    key = jax.random.PRNGKey(0)
    N, C, D, H, W = 2, 4, 8, 8, 8
    x = jax.random.normal(key, (N, C, D, H, W), dtype=jnp.float32)

    out = jax.block_until_ready(gaussian_smoothing_3d(x, kernel_size=5, sigma=1.0))
    ref = jax.block_until_ready(_reference(x, kernel_size=5, sigma=1.0))

    assert out.shape == (N, C, D, H, W)
    np.testing.assert_allclose(np.asarray(out), np.asarray(ref), rtol=1e-5, atol=1e-5)

    print("KERNEL_OK")
</pallas_src>

<mosaic_0001>
module attributes {stable_mosaic.version = 11 : i64} {
  func.func @kernel(%arg0: i32, %arg1: memref<8x8x8x8xf32, #tpu.memory_space<vmem>>, %arg2: memref<8x8x8x8xf32, #tpu.memory_space<vmem>>, %arg3: memref<12x12x12x8xf32, #tpu.memory_space<vmem>>) attributes {dimension_semantics = [#tpu.dimension_semantics<parallel>], iteration_bounds = array<i64: 1>, scalar_prefetch = 0 : i64, scratch_operands = 1 : i64, tpu.core_type = #tpu.core_type<tc>, window_params = [{transform_indices = @transform_0, window_bounds = array<i64: 8, 8, 8, 8>}, {transform_indices = @transform_1, window_bounds = array<i64: 8, 8, 8, 8>}]} {
    %cst = arith.constant 0.000000e+00 : f32
    %0 = vector.broadcast %cst : f32 to vector<2x12x12x8xf32>
    %c0 = arith.constant 0 : index
    %c0_0 = arith.constant 0 : index
    %c0_1 = arith.constant 0 : index
    %c0_2 = arith.constant 0 : index
    %1 = vector.load %arg3[%c0, %c0_0, %c0_1, %c0_2] : memref<12x12x12x8xf32, #tpu.memory_space<vmem>>, vector<2x12x12x8xf32>
    tpu.vector_store %arg3[%c0, %c0_0, %c0_1, %c0_2], %0 {strides = array<i32>} : memref<12x12x12x8xf32, #tpu.memory_space<vmem>>, vector<2x12x12x8xf32>,
    %c10 = arith.constant 10 : index
    %c0_3 = arith.constant 0 : index
    %c0_4 = arith.constant 0 : index
    %c0_5 = arith.constant 0 : index
    %2 = vector.load %arg3[%c10, %c0_3, %c0_4, %c0_5] : memref<12x12x12x8xf32, #tpu.memory_space<vmem>>, vector<2x12x12x8xf32>
    tpu.vector_store %arg3[%c10, %c0_3, %c0_4, %c0_5], %0 {strides = array<i32>} : memref<12x12x12x8xf32, #tpu.memory_space<vmem>>, vector<2x12x12x8xf32>,
    %cst_6 = arith.constant 0.000000e+00 : f32
    %3 = vector.broadcast %cst_6 : f32 to vector<8x2x12x8xf32>
    %c2 = arith.constant 2 : index
    %c0_7 = arith.constant 0 : index
    %c0_8 = arith.constant 0 : index
    %c0_9 = arith.constant 0 : index
    %4 = vector.load %arg3[%c2, %c0_7, %c0_8, %c0_9] : memref<12x12x12x8xf32, #tpu.memory_space<vmem>>, vector<8x2x12x8xf32>
    tpu.vector_store %arg3[%c2, %c0_7, %c0_8, %c0_9], %3 {strides = array<i32>} : memref<12x12x12x8xf32, #tpu.memory_space<vmem>>, vector<8x2x12x8xf32>,
    %c2_10 = arith.constant 2 : index
    %c10_11 = arith.constant 10 : index
    %c0_12 = arith.constant 0 : index
    %c0_13 = arith.constant 0 : index
    %5 = vector.load %arg3[%c2_10, %c10_11, %c0_12, %c0_13] : memref<12x12x12x8xf32, #tpu.memory_space<vmem>>, vector<8x2x12x8xf32>
    tpu.vector_store %arg3[%c2_10, %c10_11, %c0_12, %c0_13], %3 {strides = array<i32>} : memref<12x12x12x8xf32, #tpu.memory_space<vmem>>, vector<8x2x12x8xf32>,
    %cst_14 = arith.constant 0.000000e+00 : f32
    %6 = vector.broadcast %cst_14 : f32 to vector<8x8x2x8xf32>
    %c2_15 = arith.constant 2 : index
    %c2_16 = arith.constant 2 : index
    %c0_17 = arith.constant 0 : index
    %c0_18 = arith.constant 0 : index
    %7 = vector.load %arg3[%c2_15, %c2_16, %c0_17, %c0_18] : memref<12x12x12x8xf32, #tpu.memory_space<vmem>>, vector<8x8x2x8xf32>
    tpu.vector_store %arg3[%c2_15, %c2_16, %c0_17, %c0_18], %6 {strides = array<i32>} : memref<12x12x12x8xf32, #tpu.memory_space<vmem>>, vector<8x8x2x8xf32>,
    %c2_19 = arith.constant 2 : index
    %c2_20 = arith.constant 2 : index
    %c10_21 = arith.constant 10 : index
    %c0_22 = arith.constant 0 : index
    %8 = vector.load %arg3[%c2_19, %c2_20, %c10_21, %c0_22] : memref<12x12x12x8xf32, #tpu.memory_space<vmem>>, vector<8x8x2x8xf32>
    tpu.vector_store %arg3[%c2_19, %c2_20, %c10_21, %c0_22], %6 {strides = array<i32>} : memref<12x12x12x8xf32, #tpu.memory_space<vmem>>, vector<8x8x2x8xf32>,
    %c0_23 = arith.constant 0 : index
    %c0_24 = arith.constant 0 : index
    %c0_25 = arith.constant 0 : index
    %c0_26 = arith.constant 0 : index
    %9 = vector.load %arg1[%c0_23, %c0_24, %c0_25, %c0_26] : memref<8x8x8x8xf32, #tpu.memory_space<vmem>>, vector<8x8x8x8xf32>
    %c2_27 = arith.constant 2 : index
    %c2_28 = arith.constant 2 : index
    %c2_29 = arith.constant 2 : index
    %c0_30 = arith.constant 0 : index
    %10 = vector.load %arg3[%c2_27, %c2_28, %c2_29, %c0_30] : memref<12x12x12x8xf32, #tpu.memory_space<vmem>>, vector<8x8x8x8xf32>
    tpu.vector_store %arg3[%c2_27, %c2_28, %c2_29, %c0_30], %9 {strides = array<i32>} : memref<12x12x12x8xf32, #tpu.memory_space<vmem>>, vector<8x8x8x8xf32>,
    %c0_31 = arith.constant 0 : index
    %c0_32 = arith.constant 0 : index
    %c0_33 = arith.constant 0 : index
    %c0_34 = arith.constant 0 : index
    %11 = vector.load %arg3[%c0_31, %c0_32, %c0_33, %c0_34] : memref<12x12x12x8xf32, #tpu.memory_space<vmem>>, vector<8x12x12x8xf32>
    %cst_35 = arith.constant 0.0544886887 : f32
    %12 = vector.broadcast %cst_35 : f32 to vector<8x12x12x8xf32>
    %13 = arith.mulf %12, %11 : vector<8x12x12x8xf32>
    %c1 = arith.constant 1 : index
    %c0_36 = arith.constant 0 : index
    %c0_37 = arith.constant 0 : index
    %c0_38 = arith.constant 0 : index
    %14 = vector.load %arg3[%c1, %c0_36, %c0_37, %c0_38] : memref<12x12x12x8xf32, #tpu.memory_space<vmem>>, vector<8x12x12x8xf32>
    %cst_39 = arith.constant 0.244201362 : f32
    %15 = vector.broadcast %cst_39 : f32 to vector<8x12x12x8xf32>
    %16 = arith.mulf %15, %14 : vector<8x12x12x8xf32>
    %17 = arith.addf %13, %16 : vector<8x12x12x8xf32>
    %c2_40 = arith.constant 2 : index
    %c0_41 = arith.constant 0 : index
    %c0_42 = arith.constant 0 : index
    %c0_43 = arith.constant 0 : index
    %18 = vector.load %arg3[%c2_40, %c0_41, %c0_42, %c0_43] : memref<12x12x12x8xf32, #tpu.memory_space<vmem>>, vector<8x12x12x8xf32>
    %cst_44 = arith.constant 0.402619958 : f32
    %19 = vector.broadcast %cst_44 : f32 to vector<8x12x12x8xf32>
    %20 = arith.mulf %19, %18 : vector<8x12x12x8xf32>
    %21 = arith.addf %17, %20 : vector<8x12x12x8xf32>
    %c3 = arith.constant 3 : index
    %c0_45 = arith.constant 0 : index
    %c0_46 = arith.constant 0 : index
    %c0_47 = arith.constant 0 : index
    %22 = vector.load %arg3[%c3, %c0_45, %c0_46, %c0_47] : memref<12x12x12x8xf32, #tpu.memory_space<vmem>>, vector<8x12x12x8xf32>
    %cst_48 = arith.constant 0.244201362 : f32
    %23 = vector.broadcast %cst_48 : f32 to vector<8x12x12x8xf32>
    %24 = arith.mulf %23, %22 : vector<8x12x12x8xf32>
    %25 = arith.addf %21, %24 : vector<8x12x12x8xf32>
    %c4 = arith.constant 4 : index
    %c0_49 = arith.constant 0 : index
    %c0_50 = arith.constant 0 : index
    %c0_51 = arith.constant 0 : index
    %26 = vector.load %arg3[%c4, %c0_49, %c0_50, %c0_51] : memref<12x12x12x8xf32, #tpu.memory_space<vmem>>, vector<8x12x12x8xf32>
    %cst_52 = arith.constant 0.0544886887 : f32
    %27 = vector.broadcast %cst_52 : f32 to vector<8x12x12x8xf32>
    %28 = arith.mulf %27, %26 : vector<8x12x12x8xf32>
    %29 = arith.addf %25, %28 : vector<8x12x12x8xf32>
    %c0_53 = arith.constant 0 : index
    %c0_54 = arith.constant 0 : index
    %c0_55 = arith.constant 0 : index
    %c0_56 = arith.constant 0 : index
    %30 = vector.load %arg3[%c0_53, %c0_54, %c0_55, %c0_56] : memref<12x12x12x8xf32, #tpu.memory_space<vmem>>, vector<8x12x12x8xf32>
    tpu.vector_store %arg3[%c0_53, %c0_54, %c0_55, %c0_56], %29 {strides = array<i32>} : memref<12x12x12x8xf32, #tpu.memory_space<vmem>>, vector<8x12x12x8xf32>,
    %c0_57 = arith.constant 0 : index
    %c0_58 = arith.constant 0 : index
    %c0_59 = arith.constant 0 : index
    %c0_60 = arith.constant 0 : index
    %31 = vector.load %arg3[%c0_57, %c0_58, %c0_59, %c0_60] : memref<12x12x12x8xf32, #tpu.memory_space<vmem>>, vector<8x8x12x8xf32>
    %cst_61 = arith.constant 0.0544886887 : f32
    %32 = vector.broadcast %cst_61 : f32 to vector<8x8x12x8xf32>
    %33 = arith.mulf %32, %31 : vector<8x8x12x8xf32>
    %c0_62 = arith.constant 0 : index
    %c1_63 = arith.constant 1 : index
    %c0_64 = arith.constant 0 : index
    %c0_65 = arith.constant 0 : index
    %34 = vector.load %arg3[%c0_62, %c1_63, %c0_64, %c0_65] : memref<12x12x12x8xf32, #tpu.memory_space<vmem>>, vector<8x8x12x8xf32>
    %cst_66 = arith.constant 0.244201362 : f32
    %35 = vector.broadcast %cst_66 : f32 to vector<8x8x12x8xf32>
    %36 = arith.mulf %35, %34 : vector<8x8x12x8xf32>
    %37 = arith.addf %33, %36 : vector<8x8x12x8xf32>
    %c0_67 = arith.constant 0 : index
    %c2_68 = arith.constant 2 : index
    %c0_69 = arith.constant 0 : index
    %c0_70 = arith.constant 0 : index
    %38 = vector.load %arg3[%c0_67, %c2_68, %c0_69, %c0_70] : memref<12x12x12x8xf32, #tpu.memory_space<vmem>>, vector<8x8x12x8xf32>
    %cst_71 = arith.constant 0.402619958 : f32
    %39 = vector.broadcast %cst_71 : f32 to vector<8x8x12x8xf32>
    %40 = arith.mulf %39, %38 : vector<8x8x12x8xf32>
    %41 = arith.addf %37, %40 : vector<8x8x12x8xf32>
    %c0_72 = arith.constant 0 : index
    %c3_73 = arith.constant 3 : index
    %c0_74 = arith.constant 0 : index
    %c0_75 = arith.constant 0 : index
    %42 = vector.load %arg3[%c0_72, %c3_73, %c0_74, %c0_75] : memref<12x12x12x8xf32, #tpu.memory_space<vmem>>, vector<8x8x12x8xf32>
    %cst_76 = arith.constant 0.244201362 : f32
    %43 = vector.broadcast %cst_76 : f32 to vector<8x8x12x8xf32>
    %44 = arith.mulf %43, %42 : vector<8x8x12x8xf32>
    %45 = arith.addf %41, %44 : vector<8x8x12x8xf32>
    %c0_77 = arith.constant 0 : index
    %c4_78 = arith.constant 4 : index
    %c0_79 = arith.constant 0 : index
    %c0_80 = arith.constant 0 : index
    %46 = vector.load %arg3[%c0_77, %c4_78, %c0_79, %c0_80] : memref<12x12x12x8xf32, #tpu.memory_space<vmem>>, vector<8x8x12x8xf32>
    %cst_81 = arith.constant 0.0544886887 : f32
    %47 = vector.broadcast %cst_81 : f32 to vector<8x8x12x8xf32>
    %48 = arith.mulf %47, %46 : vector<8x8x12x8xf32>
    %49 = arith.addf %45, %48 : vector<8x8x12x8xf32>
    %c0_82 = arith.constant 0 : index
    %c0_83 = arith.constant 0 : index
    %c0_84 = arith.constant 0 : index
    %c0_85 = arith.constant 0 : index
    %50 = vector.load %arg3[%c0_82, %c0_83, %c0_84, %c0_85] : memref<12x12x12x8xf32, #tpu.memory_space<vmem>>, vector<8x8x12x8xf32>
    tpu.vector_store %arg3[%c0_82, %c0_83, %c0_84, %c0_85], %49 {strides = array<i32>} : memref<12x12x12x8xf32, #tpu.memory_space<vmem>>, vector<8x8x12x8xf32>,
    %c0_86 = arith.constant 0 : index
    %c0_87 = arith.constant 0 : index
    %c0_88 = arith.constant 0 : index
    %c0_89 = arith.constant 0 : index
    %51 = vector.load %arg3[%c0_86, %c0_87, %c0_88, %c0_89] : memref<12x12x12x8xf32, #tpu.memory_space<vmem>>, vector<8x8x8x8xf32>
    %cst_90 = arith.constant 0.0544886887 : f32
    %52 = vector.broadcast %cst_90 : f32 to vector<8x8x8x8xf32>
    %53 = arith.mulf %52, %51 : vector<8x8x8x8xf32>
    %c0_91 = arith.constant 0 : index
    %c0_92 = arith.constant 0 : index
    %c1_93 = arith.constant 1 : index
    %c0_94 = arith.constant 0 : index
    %54 = vector.load %arg3[%c0_91, %c0_92, %c1_93, %c0_94] : memref<12x12x12x8xf32, #tpu.memory_space<vmem>>, vector<8x8x8x8xf32>
    %cst_95 = arith.constant 0.244201362 : f32
    %55 = vector.broadcast %cst_95 : f32 to vector<8x8x8x8xf32>
    %56 = arith.mulf %55, %54 : vector<8x8x8x8xf32>
    %57 = arith.addf %53, %56 : vector<8x8x8x8xf32>
    %c0_96 = arith.constant 0 : index
    %c0_97 = arith.constant 0 : index
    %c2_98 = arith.constant 2 : index
    %c0_99 = arith.constant 0 : index
    %58 = vector.load %arg3[%c0_96, %c0_97, %c2_98, %c0_99] : memref<12x12x12x8xf32, #tpu.memory_space<vmem>>, vector<8x8x8x8xf32>
    %cst_100 = arith.constant 0.402619958 : f32
    %59 = vector.broadcast %cst_100 : f32 to vector<8x8x8x8xf32>
    %60 = arith.mulf %59, %58 : vector<8x8x8x8xf32>
    %61 = arith.addf %57, %60 : vector<8x8x8x8xf32>
    %c0_101 = arith.constant 0 : index
    %c0_102 = arith.constant 0 : index
    %c3_103 = arith.constant 3 : index
    %c0_104 = arith.constant 0 : index
    %62 = vector.load %arg3[%c0_101, %c0_102, %c3_103, %c0_104] : memref<12x12x12x8xf32, #tpu.memory_space<vmem>>, vector<8x8x8x8xf32>
    %cst_105 = arith.constant 0.244201362 : f32
    %63 = vector.broadcast %cst_105 : f32 to vector<8x8x8x8xf32>
    %64 = arith.mulf %63, %62 : vector<8x8x8x8xf32>
    %65 = arith.addf %61, %64 : vector<8x8x8x8xf32>
    %c0_106 = arith.constant 0 : index
    %c0_107 = arith.constant 0 : index
    %c4_108 = arith.constant 4 : index
    %c0_109 = arith.constant 0 : index
    %66 = vector.load %arg3[%c0_106, %c0_107, %c4_108, %c0_109] : memref<12x12x12x8xf32, #tpu.memory_space<vmem>>, vector<8x8x8x8xf32>
    %cst_110 = arith.constant 0.0544886887 : f32
    %67 = vector.broadcast %cst_110 : f32 to vector<8x8x8x8xf32>
    %68 = arith.mulf %67, %66 : vector<8x8x8x8xf32>
    %69 = arith.addf %65, %68 : vector<8x8x8x8xf32>
    %c0_111 = arith.constant 0 : index
    %c0_112 = arith.constant 0 : index
    %c0_113 = arith.constant 0 : index
    %c0_114 = arith.constant 0 : index
    %70 = vector.load %arg2[%c0_111, %c0_112, %c0_113, %c0_114] : memref<8x8x8x8xf32, #tpu.memory_space<vmem>>, vector<8x8x8x8xf32>
    tpu.vector_store %arg2[%c0_111, %c0_112, %c0_113, %c0_114], %69 {strides = array<i32>} : memref<8x8x8x8xf32, #tpu.memory_space<vmem>>, vector<8x8x8x8xf32>,
    return
  }
  func.func @transform_0(%arg0: i32) -> (i32, i32, i32, i32) {
    %c0_i32 = arith.constant 0 : i32
    %c0_i32_0 = arith.constant 0 : i32
    %c0_i32_1 = arith.constant 0 : i32
    %c0_i32_2 = arith.constant 0 : i32
    return %c0_i32, %c0_i32_0, %c0_i32_1, %arg0 : i32, i32, i32, i32
  }
  func.func @transform_1(%arg0: i32) -> (i32, i32, i32, i32) {
    %c0_i32 = arith.constant 0 : i32
    %c0_i32_0 = arith.constant 0 : i32
    %c0_i32_1 = arith.constant 0 : i32
    %c0_i32_2 = arith.constant 0 : i32
    return %c0_i32, %c0_i32_0, %c0_i32_1, %arg0 : i32, i32, i32, i32
  }
}

</mosaic_0001>

<bundles_post_ra>
// kernel: tpu_custom_call.1
= control target key start
LH: loop header
LB: loop body
LE: loop exit
PB: predicated region body
PF: predicated region fallthrough
CT: control target
= control target key end

     0   :  { %6 = vsyncpa [#allocation4], 0  ;;  %s8845_s0 = inlined_call_operand.hbm [shape: f32[8,8,8,8], index: 0, kind: input, shape index: {}]   ;;  %s8846_s1 = inlined_call_operand.hbm [shape: f32[8,8,8,8], index: 1, kind: output, shape index: {}]  }
   0x1   :  { %7 = vsyncpa [#allocation5], 0  ;;  %s6312_s6 = smov [#allocation3]  }
   0x2   :  { %s13_s7 = sshll.u32 %s6312_s6, 4  ;;  %s14_s7 = int_to_ptr.vmem [resolvable:$true] %s13_s7 }
   0x3   :  { %s6276_s8 = scalar_lea.vmem %s14_s7, 8192  ;;  %p6281_p1 = scmp.lt.s32.totalorder %s14_s7, %s14_s7 }
   0x4   :  { %p6277_p0 = scmp.ne.s32.totalorder %s14_s7, %s6276_s8  ;;  %p6282_p2 = scmp.lt.s32.totalorder %s6276_s8, %s6276_s8 }
   0x6   :  { %p6283_p3 = por %p6282_p2, %p6281_p1 }
   0x8   :  { %p6284_p4 = pnand %p6283_p3, %p6277_p0 }
   0xa   :  { %6287 = shalt.err (!%p6284_p4)
}
   0xb   :  { %s6313_s9 = smov 128   ;;  %s6314_s10 = smov 8  }
   0xc   :  { %19 = dma.hbm_to_vmem [thread:$0]  %s8845_s0, 8192, %s14_s7, [#allocation4], %s6313_s9, %s6313_s9, %s6314_s10  }
   0xd   :  { %6308 = dma.done.wait [#allocation4], 8192  }
   0xe   :  { %6309 = vsyncadd [#allocation4], 4294959104  ;;  %vm23_vm0 = vcmask 64512   ;;  %vm25_vm1 = vcmask 60416   ;;  %vm189_vm2 = vcmask 58368   ;;  %v6315_v0 = vmov 0.0  }
   0xf   :  { %24 = vst.msk [vmem:[#allocation2] sm:$0xff] %vm23_vm0, %v6315_v0  ;;  %27 = vst.msk [vmem:[#allocation2 + $0x10] sm:$0xff] %vm23_vm0, %v6315_v0  ;;  %v318_v1 = vld [vmem:[#allocation3] sm:$0xff]  ;;  %v319_v2 = vld [vmem:[#allocation3 + $0x8] sm:$0xff]  ;;  %s6316_s0 = smov [#allocation6]  }
  0x10   :  { %29 = vst.msk [vmem:[#allocation2 + $0x20] sm:$0xff] %vm23_vm0, %v6315_v0  ;;  %31 = vst.msk [vmem:[#allocation2 + $0x30] sm:$0xff] %vm23_vm0, %v6315_v0  ;;  %v320_v3 = vld [vmem:[#allocation3 + $0x10] sm:$0xff]  ;;  %v321_v4 = vld [vmem:[#allocation3 + $0x18] sm:$0xff]  ;;  %s6218_s13 = sshll.u32 %s6316_s0, 4  ;;  %s6219_s13 = int_to_ptr.vmem [resolvable:$true] %s6218_s13 }
  0x11   :  { %33 = vst.msk [vmem:[#allocation2 + $0x40] sm:$0xff] %vm23_vm0, %v6315_v0  ;;  %35 = vst.msk [vmem:[#allocation2 + $0x50] sm:$0xff] %vm23_vm0, %v6315_v0  ;;  %v322_v5 = vld [vmem:[#allocation3 + $0x20] sm:$0xff]  ;;  %v323_v6 = vld [vmem:[#allocation3 + $0x28] sm:$0xff]  ;;  %s6288_s14 = scalar_lea.vmem %s6219_s13, 8192  ;;  %p6293_p6 = scmp.lt.s32.totalorder %s6219_s13, %s6219_s13 }
  0x12   :  { %37 = vst.msk [vmem:[#allocation2 + $0x60] sm:$0xff] %vm23_vm0, %v6315_v0  ;;  %39 = vst.msk [vmem:[#allocation2 + $0x70] sm:$0xff] %vm23_vm0, %v6315_v0  ;;  %v324_v7 = vld [vmem:[#allocation3 + $0x30] sm:$0xff]  ;;  %v325_v8 = vld [vmem:[#allocation3 + $0x38] sm:$0xff]  ;;  %p6289_p5 = scmp.ne.s32.totalorder %s6219_s13, %s6288_s14  ;;  %p6294_p7 = scmp.lt.s32.totalorder %s6288_s14, %s6288_s14 }
  0x13   :  { %41 = vst.msk [vmem:[#allocation2 + $0x80] sm:$0xff] %vm23_vm0, %v6315_v0  ;;  %43 = vst.msk [vmem:[#allocation2 + $0x90] sm:$0xff] %vm23_vm0, %v6315_v0  ;;  %v326_v9 = vld [vmem:[#allocation3 + $0x40] sm:$0xff]  ;;  %v327_v10 = vld [vmem:[#allocation3 + $0x48] sm:$0xff] }
  0x14   :  { %45 = vst.msk [vmem:[#allocation2 + $0xa0] sm:$0xff] %vm23_vm0, %v6315_v0  ;;  %47 = vst.msk [vmem:[#allocation2 + $0xb0] sm:$0xff] %vm23_vm0, %v6315_v0  ;;  %v328_v11 = vld [vmem:[#allocation3 + $0x50] sm:$0xff]  ;;  %v329_v12 = vld [vmem:[#allocation3 + $0x58] sm:$0xff]  ;;  %p6295_p8 = por %p6294_p7, %p6293_p6 }
  0x15   :  { %49 = vst.msk [vmem:[#allocation2 + $0xc0] sm:$0xff] %vm23_vm0, %v6315_v0  ;;  %51 = vst.msk [vmem:[#allocation2 + $0xd0] sm:$0xff] %vm23_vm0, %v6315_v0  ;;  %v330_v13 = vld [vmem:[#allocation3 + $0x60] sm:$0xff]  ;;  %v331_v14 = vld [vmem:[#allocation3 + $0x68] sm:$0xff] }
  0x16   :  { %53 = vst.msk [vmem:[#allocation2 + $0xe0] sm:$0xff] %vm23_vm0, %v6315_v0  ;;  %55 = vst.msk [vmem:[#allocation2 + $0xf0] sm:$0xff] %vm23_vm0, %v6315_v0  ;;  %v332_v15 = vld [vmem:[#allocation3 + $0x70] sm:$0xff]  ;;  %v333_v16 = vld [vmem:[#allocation3 + $0x78] sm:$0xff]  ;;  %p6296_p9 = pnand %p6295_p8, %p6289_p5 }
  0x17   :  { %57 = vst.msk [vmem:[#allocation2 + $0x100] sm:$0xff] %vm23_vm0, %v6315_v0  ;;  %59 = vst.msk [vmem:[#allocation2 + $0x110] sm:$0xff] %vm23_vm0, %v6315_v0  ;;  %v334_v17 = vld [vmem:[#allocation3 + $0x80] sm:$0xff]  ;;  %v335_v18 = vld [vmem:[#allocation3 + $0x88] sm:$0xff] }
  0x18   :  { %61 = vst.msk [vmem:[#allocation2 + $0x120] sm:$0xff] %vm23_vm0, %v6315_v0  ;;  %63 = vst.msk [vmem:[#allocation2 + $0x130] sm:$0xff] %vm23_vm0, %v6315_v0  ;;  %v336_v19 = vld [vmem:[#allocation3 + $0x90] sm:$0xff]  ;;  %v337_v20 = vld [vmem:[#allocation3 + $0x98] sm:$0xff] }
  0x19   :  { %65 = vst.msk [vmem:[#allocation2 + $0x140] sm:$0xff] %vm23_vm0, %v6315_v0  ;;  %67 = vst.msk [vmem:[#allocation2 + $0x150] sm:$0xff] %vm23_vm0, %v6315_v0  ;;  %v338_v21 = vld [vmem:[#allocation3 + $0xa0] sm:$0xff]  ;;  %v339_v22 = vld [vmem:[#allocation3 + $0xa8] sm:$0xff] }
  0x1a   :  { %69 = vst.msk [vmem:[#allocation2 + $0x160] sm:$0xff] %vm23_vm0, %v6315_v0  ;;  %71 = vst.msk [vmem:[#allocation2 + $0x170] sm:$0xff] %vm23_vm0, %v6315_v0  ;;  %v340_v23 = vld [vmem:[#allocation3 + $0xb0] sm:$0xff]  ;;  %v341_v24 = vld [vmem:[#allocation3 + $0xb8] sm:$0xff] }
  0x1b   :  { %74 = vst.msk [vmem:[#allocation2 + $0x780] sm:$0xff] %vm23_vm0, %v6315_v0  ;;  %76 = vst.msk [vmem:[#allocation2 + $0x790] sm:$0xff] %vm23_vm0, %v6315_v0  ;;  %v342_v25 = vld [vmem:[#allocation3 + $0xc0] sm:$0xff]  ;;  %v343_v26 = vld [vmem:[#allocation3 + $0xc8] sm:$0xff] }
  0x1c   :  { %78 = vst.msk [vmem:[#allocation2 + $0x7a0] sm:$0xff] %vm23_vm0, %v6315_v0  ;;  %80 = vst.msk [vmem:[#allocation2 + $0x7b0] sm:$0xff] %vm23_vm0, %v6315_v0  ;;  %v344_v27 = vld [vmem:[#allocation3 + $0xd0] sm:$0xff]  ;;  %v345_v28 = vld [vmem:[#allocation3 + $0xd8] sm:$0xff] }
  0x1d   :  { %82 = vst.msk [vmem:[#allocation2 + $0x7c0] sm:$0xff] %vm23_vm0, %v6315_v0  ;;  %84 = vst.msk [vmem:[#allocation2 + $0x7d0] sm:$0xff] %vm23_vm0, %v6315_v0  ;;  %v346_v29 = vld [vmem:[#allocation3 + $0xe0] sm:$0xff]  ;;  %v347_v30 = vld [vmem:[#allocation3 + $0xe8] sm:$0xff] }
  0x1e   :  { %86 = vst.msk [vmem:[#allocation2 + $0x7e0] sm:$0xff] %vm23_vm0, %v6315_v0  ;;  %88 = vst.msk [vmem:[#allocation2 + $0x7f0] sm:$0xff] %vm23_vm0, %v6315_v0  ;;  %v348_v31 = vld [vmem:[#allocation3 + $0xf0] sm:$0xff]  ;;  %v349_v32 = vld [vmem:[#allocation3 + $0xf8] sm:$0xff] }
  0x1f   :  { %90 = vst.msk [vmem:[#allocation2 + $0x800] sm:$0xff] %vm23_vm0, %v6315_v0  ;;  %92 = vst.msk [vmem:[#allocation2 + $0x810] sm:$0xff] %vm23_vm0, %v6315_v0  ;;  %v350_v33 = vld [vmem:[#allocation3 + $0x100] sm:$0xff]  ;;  %v351_v34 = vld [vmem:[#allocation3 + $0x108] sm:$0xff] }
  0x20   :  { %94 = vst.msk [vmem:[#allocation2 + $0x820] sm:$0xff] %vm23_vm0, %v6315_v0  ;;  %96 = vst.msk [vmem:[#allocation2 + $0x830] sm:$0xff] %vm23_vm0, %v6315_v0  ;;  %v352_v35 = vld [vmem:[#allocation3 + $0x110] sm:$0xff]  ;;  %v353_v36 = vld [vmem:[#allocation3 + $0x118] sm:$0xff] }
  0x21   :  { %98 = vst.msk [vmem:[#allocation2 + $0x840] sm:$0xff] %vm23_vm0, %v6315_v0  ;;  %100 = vst.msk [vmem:[#allocation2 + $0x850] sm:$0xff] %vm23_vm0, %v6315_v0  ;;  %v354_v37 = vld [vmem:[#allocation3 + $0x120] sm:$0xff]  ;;  %v355_v38 = vld [vmem:[#allocation3 + $0x128] sm:$0xff] }
  0x22   :  { %102 = vst.msk [vmem:[#allocation2 + $0x860] sm:$0xff] %vm23_vm0, %v6315_v0  ;;  %104 = vst.msk [vmem:[#allocation2 + $0x870] sm:$0xff] %vm23_vm0, %v6315_v0  ;;  %v356_v39 = vld [vmem:[#allocation3 + $0x130] sm:$0xff]  ;;  %v357_v40 = vld [vmem:[#allocation3 + $0x138] sm:$0xff] }
  0x23   :  { %106 = vst.msk [vmem:[#allocation2 + $0x880] sm:$0xff] %vm23_vm0, %v6315_v0  ;;  %108 = vst.msk [vmem:[#allocation2 + $0x890] sm:$0xff] %vm23_vm0, %v6315_v0  ;;  %v358_v41 = vld [vmem:[#allocation3 + $0x140] sm:$0xff]  ;;  %v359_v42 = vld [vmem:[#allocation3 + $0x148] sm:$0xff] }
  0x24   :  { %110 = vst.msk [vmem:[#allocation2 + $0x8a0] sm:$0xff] %vm23_vm0, %v6315_v0  ;;  %112 = vst.msk [vmem:[#allocation2 + $0x8b0] sm:$0xff] %vm23_vm0, %v6315_v0  ;;  %v360_v43 = vld [vmem:[#allocation3 + $0x150] sm:$0xff]  ;;  %v361_v44 = vld [vmem:[#allocation3 + $0x158] sm:$0xff] }
  0x25   :  { %114 = vst.msk [vmem:[#allocation2 + $0x8c0] sm:$0xff] %vm23_vm0, %v6315_v0  ;;  %116 = vst.msk [vmem:[#allocation2 + $0x8d0] sm:$0xff] %vm23_vm0, %v6315_v0  ;;  %v362_v45 = vld [vmem:[#allocation3 + $0x160] sm:$0xff]  ;;  %v363_v46 = vld [vmem:[#allocation3 + $0x168] sm:$0xff] }
  0x26   :  { %118 = vst.msk [vmem:[#allocation2 + $0x8e0] sm:$0xff] %vm23_vm0, %v6315_v0  ;;  %120 = vst.msk [vmem:[#allocation2 + $0x8f0] sm:$0xff] %vm23_vm0, %v6315_v0  ;;  %v364_v47 = vld [vmem:[#allocation3 + $0x170] sm:$0xff]  ;;  %v365_v48 = vld [vmem:[#allocation3 + $0x178] sm:$0xff] }
  0x27   :  { %123 = vst.msk [vmem:[#allocation2 + $0x180] sm:$0xff] %vm23_vm0, %v6315_v0  ;;  %125 = vst.msk [vmem:[#allocation2 + $0x190] sm:$0xff] %vm23_vm0, %v6315_v0  ;;  %v366_v49 = vld [vmem:[#allocation3 + $0x180] sm:$0xff]  ;;  %v367_v50 = vld [vmem:[#allocation3 + $0x188] sm:$0xff] }
  0x28   :  { %127 = vst.msk [vmem:[#allocation2 + $0x240] sm:$0xff] %vm23_vm0, %v6315_v0  ;;  %129 = vst.msk [vmem:[#allocation2 + $0x250] sm:$0xff] %vm23_vm0, %v6315_v0  ;;  %v2156_v51 = vld [vmem:[#allocation2 + $0x7a0] sm:$0xff]  ;;  %v2158_v53 = vld [vmem:[#allocation2 + $0x7b0] sm:$0xff] }
  0x29   :  { %131 = vst.msk [vmem:[#allocation2 + $0x300] sm:$0xff] %vm23_vm0, %v6315_v0  ;;  %133 = vst.msk [vmem:[#allocation2 + $0x310] sm:$0xff] %vm23_vm0, %v6315_v0  ;;  %v2160_v55 = vld [vmem:[#allocation2 + $0x7c0] sm:$0xff]  ;;  %v2162_v57 = vld [vmem:[#allocation2 + $0x7d0] sm:$0xff]  ;;  %v6959_v60 = vmul.f32 0.24420136, %v2156_v51 }
  0x2a   :  { %135 = vst.msk [vmem:[#allocation2 + $0x3c0] sm:$0xff] %vm23_vm0, %v6315_v0  ;;  %137 = vst.msk [vmem:[#allocation2 + $0x3d0] sm:$0xff] %vm23_vm0, %v6315_v0  ;;  %v2164_v59 = vld [vmem:[#allocation2 + $0x7e0] sm:$0xff]  ;;  %v2166_v62 = vld [vmem:[#allocation2 + $0x7f0] sm:$0xff] }
  0x2b   :  { %139 = vst.msk [vmem:[#allocation2 + $0x480] sm:$0xff] %vm23_vm0, %v6315_v0  ;;  %141 = vst.msk [vmem:[#allocation2 + $0x490] sm:$0xff] %vm23_vm0, %v6315_v0 }
  0x2c   :  { %143 = vst.msk [vmem:[#allocation2 + $0x540] sm:$0xff] %vm23_vm0, %v6315_v0  ;;  %145 = vst.msk [vmem:[#allocation2 + $0x550] sm:$0xff] %vm23_vm0, %v6315_v0 }
  0x2d   :  { %147 = vst.msk [vmem:[#allocation2 + $0x600] sm:$0xff] %vm23_vm0, %v6315_v0  ;;  %149 = vst.msk [vmem:[#allocation2 + $0x610] sm:$0xff] %vm23_vm0, %v6315_v0 }
  0x2e   :  { %151 = vst.msk [vmem:[#allocation2 + $0x6c0] sm:$0xff] %vm23_vm0, %v6315_v0  ;;  %153 = vst.msk [vmem:[#allocation2 + $0x6d0] sm:$0xff] %vm23_vm0, %v6315_v0 }
  0x2f   :  { %156 = vst.msk [vmem:[#allocation2 + $0x220] sm:$0xff] %vm23_vm0, %v6315_v0  ;;  %158 = vst.msk [vmem:[#allocation2 + $0x230] sm:$0xff] %vm23_vm0, %v6315_v0 }
  0x30   :  { %160 = vst.msk [vmem:[#allocation2 + $0x2e0] sm:$0xff] %vm23_vm0, %v6315_v0  ;;  %162 = vst.msk [vmem:[#allocation2 + $0x2f0] sm:$0xff] %vm23_vm0, %v6315_v0 }
  0x31   :  { %164 = vst.msk [vmem:[#allocation2 + $0x3a0] sm:$0xff] %vm23_vm0, %v6315_v0  ;;  %166 = vst.msk [vmem:[#allocation2 + $0x3b0] sm:$0xff] %vm23_vm0, %v6315_v0 }
  0x32   :  { %168 = vst.msk [vmem:[#allocation2 + $0x460] sm:$0xff] %vm23_vm0, %v6315_v0  ;;  %170 = vst.msk [vmem:[#allocation2 + $0x470] sm:$0xff] %vm23_vm0, %v6315_v0 }
  0x33   :  { %172 = vst.msk [vmem:[#allocation2 + $0x520] sm:$0xff] %vm23_vm0, %v6315_v0  ;;  %174 = vst.msk [vmem:[#allocation2 + $0x530] sm:$0xff] %vm23_vm0, %v6315_v0 }
  0x34   :  { %176 = vst.msk [vmem:[#allocation2 + $0x5e0] sm:$0xff] %vm23_vm0, %v6315_v0  ;;  %178 = vst.msk [vmem:[#allocation2 + $0x5f0] sm:$0xff] %vm23_vm0, %v6315_v0 }
  0x35   :  { %180 = vst.msk [vmem:[#allocation2 + $0x6a0] sm:$0xff] %vm23_vm0, %v6315_v0  ;;  %182 = vst.msk [vmem:[#allocation2 + $0x6b0] sm:$0xff] %vm23_vm0, %v6315_v0 }
  0x36   :  { %184 = vst.msk [vmem:[#allocation2 + $0x760] sm:$0xff] %vm23_vm0, %v6315_v0  ;;  %186 = vst.msk [vmem:[#allocation2 + $0x770] sm:$0xff] %vm23_vm0, %v6315_v0 }
  0x37   :  { %26 = vst.msk [vmem:[#allocation2 + $0x8] sm:$0xf] %vm25_vm1, %v6315_v0  ;;  %28 = vst.msk [vmem:[#allocation2 + $0x18] sm:$0xf] %vm25_vm1, %v6315_v0 }
  0x38   :  { %30 = vst.msk [vmem:[#allocation2 + $0x28] sm:$0xf] %vm25_vm1, %v6315_v0  ;;  %32 = vst.msk [vmem:[#allocation2 + $0x38] sm:$0xf] %vm25_vm1, %v6315_v0 }
  0x39   :  { %34 = vst.msk [vmem:[#allocation2 + $0x48] sm:$0xf] %vm25_vm1, %v6315_v0  ;;  %36 = vst.msk [vmem:[#allocation2 + $0x58] sm:$0xf] %vm25_vm1, %v6315_v0 }
  0x3a   :  { %38 = vst.msk [vmem:[#allocation2 + $0x68] sm:$0xf] %vm25_vm1, %v6315_v0  ;;  %40 = vst.msk [vmem:[#allocation2 + $0x78] sm:$0xf] %vm25_vm1, %v6315_v0 }
  0x3b   :  { %42 = vst.msk [vmem:[#allocation2 + $0x88] sm:$0xf] %vm25_vm1, %v6315_v0  ;;  %44 = vst.msk [vmem:[#allocation2 + $0x98] sm:$0xf] %vm25_vm1, %v6315_v0 }
  0x3c   :  { %46 = vst.msk [vmem:[#allocation2 + $0xa8] sm:$0xf] %vm25_vm1, %v6315_v0  ;;  %48 = vst.msk [vmem:[#allocation2 + $0xb8] sm:$0xf] %vm25_vm1, %v6315_v0 }
  0x3d   :  { %50 = vst.msk [vmem:[#allocation2 + $0xc8] sm:$0xf] %vm25_vm1, %v6315_v0  ;;  %52 = vst.msk [vmem:[#allocation2 + $0xd8] sm:$0xf] %vm25_vm1, %v6315_v0 }
  0x3e   :  { %54 = vst.msk [vmem:[#allocation2 + $0xe8] sm:$0xf] %vm25_vm1, %v6315_v0  ;;  %56 = vst.msk [vmem:[#allocation2 + $0xf8] sm:$0xf] %vm25_vm1, %v6315_v0 }
  0x3f   :  { %58 = vst.msk [vmem:[#allocation2 + $0x108] sm:$0xf] %vm25_vm1, %v6315_v0  ;;  %60 = vst.msk [vmem:[#allocation2 + $0x118] sm:$0xf] %vm25_vm1, %v6315_v0 }
  0x40   :  { %62 = vst.msk [vmem:[#allocation2 + $0x128] sm:$0xf] %vm25_vm1, %v6315_v0  ;;  %64 = vst.msk [vmem:[#allocation2 + $0x138] sm:$0xf] %vm25_vm1, %v6315_v0 }
  0x41   :  { %66 = vst.msk [vmem:[#allocation2 + $0x148] sm:$0xf] %vm25_vm1, %v6315_v0  ;;  %68 = vst.msk [vmem:[#allocation2 + $0x158] sm:$0xf] %vm25_vm1, %v6315_v0 }
  0x42   :  { %70 = vst.msk [vmem:[#allocation2 + $0x168] sm:$0xf] %vm25_vm1, %v6315_v0  ;;  %72 = vst.msk [vmem:[#allocation2 + $0x178] sm:$0xf] %vm25_vm1, %v6315_v0 }
  0x43   :  { %75 = vst.msk [vmem:[#allocation2 + $0x788] sm:$0xf] %vm25_vm1, %v6315_v0  ;;  %77 = vst.msk [vmem:[#allocation2 + $0x798] sm:$0xf] %vm25_vm1, %v6315_v0 }
  0x44   :  { %79 = vst.msk [vmem:[#allocation2 + $0x7a8] sm:$0xf] %vm25_vm1, %v6315_v0  ;;  %81 = vst.msk [vmem:[#allocation2 + $0x7b8] sm:$0xf] %vm25_vm1, %v6315_v0 }
  0x45   :  { %83 = vst.msk [vmem:[#allocation2 + $0x7c8] sm:$0xf] %vm25_vm1, %v6315_v0  ;;  %85 = vst.msk [vmem:[#allocation2 + $0x7d8] sm:$0xf] %vm25_vm1, %v6315_v0 }
  0x46   :  { %87 = vst.msk [vmem:[#allocation2 + $0x7e8] sm:$0xf] %vm25_vm1, %v6315_v0  ;;  %89 = vst.msk [vmem:[#allocation2 + $0x7f8] sm:$0xf] %vm25_vm1, %v6315_v0 }
  0x47   :  { %91 = vst.msk [vmem:[#allocation2 + $0x808] sm:$0xf] %vm25_vm1, %v6315_v0  ;;  %93 = vst.msk [vmem:[#allocation2 + $0x818] sm:$0xf] %vm25_vm1, %v6315_v0 }
  0x48   :  { %95 = vst.msk [vmem:[#allocation2 + $0x828] sm:$0xf] %vm25_vm1, %v6315_v0  ;;  %97 = vst.msk [vmem:[#allocation2 + $0x838] sm:$0xf] %vm25_vm1, %v6315_v0 }
  0x49   :  { %99 = vst.msk [vmem:[#allocation2 + $0x848] sm:$0xf] %vm25_vm1, %v6315_v0  ;;  %101 = vst.msk [vmem:[#allocation2 + $0x858] sm:$0xf] %vm25_vm1, %v6315_v0 }
  0x4a   :  { %103 = vst.msk [vmem:[#allocation2 + $0x868] sm:$0xf] %vm25_vm1, %v6315_v0  ;;  %105 = vst.msk [vmem:[#allocation2 + $0x878] sm:$0xf] %vm25_vm1, %v6315_v0 }
  0x4b   :  { %107 = vst.msk [vmem:[#allocation2 + $0x888] sm:$0xf] %vm25_vm1, %v6315_v0  ;;  %109 = vst.msk [vmem:[#allocation2 + $0x898] sm:$0xf] %vm25_vm1, %v6315_v0  ;;  %v2157_v52 = vld [vmem:[#allocation2 + $0x7a8] sm:$0xf] }
  0x4c   :  { %111 = vst.msk [vmem:[#allocation2 + $0x8a8] sm:$0xf] %vm25_vm1, %v6315_v0  ;;  %113 = vst.msk [vmem:[#allocation2 + $0x8b8] sm:$0xf] %vm25_vm1, %v6315_v0  ;;  %v2159_v54 = vld [vmem:[#allocation2 + $0x7b8] sm:$0xf] }
  0x4d   :  { %115 = vst.msk [vmem:[#allocation2 + $0x8c8] sm:$0xf] %vm25_vm1, %v6315_v0  ;;  %117 = vst.msk [vmem:[#allocation2 + $0x8d8] sm:$0xf] %vm25_vm1, %v6315_v0  ;;  %v2161_v56 = vld [vmem:[#allocation2 + $0x7c8] sm:$0xf] }
  0x4e   :  { %119 = vst.msk [vmem:[#allocation2 + $0x8e8] sm:$0xf] %vm25_vm1, %v6315_v0  ;;  %121 = vst.msk [vmem:[#allocation2 + $0x8f8] sm:$0xf] %vm25_vm1, %v6315_v0  ;;  %v2163_v58 = vld [vmem:[#allocation2 + $0x7d8] sm:$0xf] }
  0x4f   :  { %124 = vst.msk [vmem:[#allocation2 + $0x188] sm:$0xf] %vm25_vm1, %v6315_v0  ;;  %126 = vst.msk [vmem:[#allocation2 + $0x198] sm:$0xf] %vm25_vm1, %v6315_v0  ;;  %v2165_v61 = vld [vmem:[#allocation2 + $0x7e8] sm:$0xf] }
  0x50   :  { %128 = vst.msk [vmem:[#allocation2 + $0x248] sm:$0xf] %vm25_vm1, %v6315_v0  ;;  %130 = vst.msk [vmem:[#allocation2 + $0x258] sm:$0xf] %vm25_vm1, %v6315_v0  ;;  %v2167_v63 = vld [vmem:[#allocation2 + $0x7f8] sm:$0xf] }
  0x51   :  { %132 = vst.msk [vmem:[#allocation2 + $0x308] sm:$0xf] %vm25_vm1, %v6315_v0  ;;  %134 = vst.msk [vmem:[#allocation2 + $0x318] sm:$0xf] %vm25_vm1, %v6315_v0 }
  0x52   :  { %136 = vst.msk [vmem:[#allocation2 + $0x3c8] sm:$0xf] %vm25_vm1, %v6315_v0  ;;  %138 = vst.msk [vmem:[#allocation2 + $0x3d8] sm:$0xf] %vm25_vm1, %v6315_v0 }
  0x53   :  { %140 = vst.msk [vmem:[#allocation2 + $0x488] sm:$0xf] %vm25_vm1, %v6315_v0  ;;  %142 = vst.msk [vmem:[#allocation2 + $0x498] sm:$0xf] %vm25_vm1, %v6315_v0 }
  0x54   :  { %144 = vst.msk [vmem:[#allocation2 + $0x548] sm:$0xf] %vm25_vm1, %v6315_v0  ;;  %146 = vst.msk [vmem:[#allocation2 + $0x558] sm:$0xf] %vm25_vm1, %v6315_v0 }
  0x55   :  { %148 = vst.msk [vmem:[#allocation2 + $0x608] sm:$0xf] %vm25_vm1, %v6315_v0  ;;  %150 = vst.msk [vmem:[#allocation2 + $0x618] sm:$0xf] %vm25_vm1, %v6315_v0 }
  0x56   :  { %152 = vst.msk [vmem:[#allocation2 + $0x6c8] sm:$0xf] %vm25_vm1, %v6315_v0  ;;  %154 = vst.msk [vmem:[#allocation2 + $0x6d8] sm:$0xf] %vm25_vm1, %v6315_v0 }
  0x57   :  { %157 = vst.msk [vmem:[#allocation2 + $0x228] sm:$0xf] %vm25_vm1, %v6315_v0  ;;  %159 = vst.msk [vmem:[#allocation2 + $0x238] sm:$0xf] %vm25_vm1, %v6315_v0 }
  0x58   :  { %161 = vst.msk [vmem:[#allocation2 + $0x2e8] sm:$0xf] %vm25_vm1, %v6315_v0  ;;  %163 = vst.msk [vmem:[#allocation2 + $0x2f8] sm:$0xf] %vm25_vm1, %v6315_v0 }
  0x59   :  { %165 = vst.msk [vmem:[#allocation2 + $0x3a8] sm:$0xf] %vm25_vm1, %v6315_v0  ;;  %167 = vst.msk [vmem:[#allocation2 + $0x3b8] sm:$0xf] %vm25_vm1, %v6315_v0 }
  0x5a   :  { %169 = vst.msk [vmem:[#allocation2 + $0x468] sm:$0xf] %vm25_vm1, %v6315_v0  ;;  %171 = vst.msk [vmem:[#allocation2 + $0x478] sm:$0xf] %vm25_vm1, %v6315_v0 }
  0x5b   :  { %173 = vst.msk [vmem:[#allocation2 + $0x528] sm:$0xf] %vm25_vm1, %v6315_v0  ;;  %175 = vst.msk [vmem:[#allocation2 + $0x538] sm:$0xf] %vm25_vm1, %v6315_v0 }
  0x5c   :  { %177 = vst.msk [vmem:[#allocation2 + $0x5e8] sm:$0xf] %vm25_vm1, %v6315_v0  ;;  %179 = vst.msk [vmem:[#allocation2 + $0x5f8] sm:$0xf] %vm25_vm1, %v6315_v0 }
  0x5d   :  { %181 = vst.msk [vmem:[#allocation2 + $0x6a8] sm:$0xf] %vm25_vm1, %v6315_v0  ;;  %183 = vst.msk [vmem:[#allocation2 + $0x6b8] sm:$0xf] %vm25_vm1, %v6315_v0 }
  0x5e   :  { %185 = vst.msk [vmem:[#allocation2 + $0x768] sm:$0xf] %vm25_vm1, %v6315_v0  ;;  %187 = vst.msk [vmem:[#allocation2 + $0x778] sm:$0xf] %vm25_vm1, %v6315_v0 }
  0x5f   :  { %190 = vst.msk [vmem:[#allocation2 + $0x1a0] sm:$0x3] %vm189_vm2, %v6315_v0  ;;  %191 = vst.msk [vmem:[#allocation2 + $0x1b0] sm:$0x3] %vm189_vm2, %v6315_v0 }
  0x60   :  { %192 = vst.msk [vmem:[#allocation2 + $0x1c0] sm:$0x3] %vm189_vm2, %v6315_v0  ;;  %193 = vst.msk [vmem:[#allocation2 + $0x1d0] sm:$0x3] %vm189_vm2, %v6315_v0 }
  0x61   :  { %194 = vst.msk [vmem:[#allocation2 + $0x1e0] sm:$0x3] %vm189_vm2, %v6315_v0  ;;  %195 = vst.msk [vmem:[#allocation2 + $0x1f0] sm:$0x3] %vm189_vm2, %v6315_v0 }
  0x62   :  { %196 = vst.msk [vmem:[#allocation2 + $0x200] sm:$0x3] %vm189_vm2, %v6315_v0  ;;  %197 = vst.msk [vmem:[#allocation2 + $0x210] sm:$0x3] %vm189_vm2, %v6315_v0 }
  0x63   :  { %198 = vst.msk [vmem:[#allocation2 + $0x260] sm:$0x3] %vm189_vm2, %v6315_v0  ;;  %199 = vst.msk [vmem:[#allocation2 + $0x270] sm:$0x3] %vm189_vm2, %v6315_v0 }
  0x64   :  { %200 = vst.msk [vmem:[#allocation2 + $0x280] sm:$0x3] %vm189_vm2, %v6315_v0  ;;  %201 = vst.msk [vmem:[#allocation2 + $0x290] sm:$0x3] %vm189_vm2, %v6315_v0 }
  0x65   :  { %202 = vst.msk [vmem:[#allocation2 + $0x2a0] sm:$0x3] %vm189_vm2, %v6315_v0  ;;  %203 = vst.msk [vmem:[#allocation2 + $0x2b0] sm:$0x3] %vm189_vm2, %v6315_v0 }
  0x66   :  { %204 = vst.msk [vmem:[#allocation2 + $0x2c0] sm:$0x3] %vm189_vm2, %v6315_v0  ;;  %205 = vst.msk [vmem:[#allocation2 + $0x2d0] sm:$0x3] %vm189_vm2, %v6315_v0 }
  0x67   :  { %206 = vst.msk [vmem:[#allocation2 + $0x320] sm:$0x3] %vm189_vm2, %v6315_v0  ;;  %207 = vst.msk [vmem:[#allocation2 + $0x330] sm:$0x3] %vm189_vm2, %v6315_v0 }
  0x68   :  { %208 = vst.msk [vmem:[#allocation2 + $0x340] sm:$0x3] %vm189_vm2, %v6315_v0  ;;  %209 = vst.msk [vmem:[#allocation2 + $0x350] sm:$0x3] %vm189_vm2, %v6315_v0 }
  0x69   :  { %210 = vst.msk [vmem:[#allocation2 + $0x360] sm:$0x3] %vm189_vm2, %v6315_v0  ;;  %211 = vst.msk [vmem:[#allocation2 + $0x370] sm:$0x3] %vm189_vm2, %v6315_v0 }
  0x6a   :  { %212 = vst.msk [vmem:[#allocation2 + $0x380] sm:$0x3] %vm189_vm2, %v6315_v0  ;;  %213 = vst.msk [vmem:[#allocation2 + $0x390] sm:$0x3] %vm189_vm2, %v6315_v0 }
  0x6b   :  { %214 = vst.msk [vmem:[#allocation2 + $0x3e0] sm:$0x3] %vm189_vm2, %v6315_v0  ;;  %215 = vst.msk [vmem:[#allocation2 + $0x3f0] sm:$0x3] %vm189_vm2, %v6315_v0 }
  0x6c   :  { %216 = vst.msk [vmem:[#allocation2 + $0x400] sm:$0x3] %vm189_vm2, %v6315_v0  ;;  %217 = vst.msk [vmem:[#allocation2 + $0x410] sm:$0x3] %vm189_vm2, %v6315_v0 }
  0x6d   :  { %218 = vst.msk [vmem:[#allocation2 + $0x420] sm:$0x3] %vm189_vm2, %v6315_v0  ;;  %219 = vst.msk [vmem:[#allocation2 + $0x430] sm:$0x3] %vm189_vm2, %v6315_v0 }
  0x6e   :  { %220 = vst.msk [vmem:[#allocation2 + $0x440] sm:$0x3] %vm189_vm2, %v6315_v0  ;;  %221 = vst.msk [vmem:[#allocation2 + $0x450] sm:$0x3] %vm189_vm2, %v6315_v0 }
  0x6f   :  { %222 = vst.msk [vmem:[#allocation2 + $0x4a0] sm:$0x3] %vm189_vm2, %v6315_v0  ;;  %223 = vst.msk [vmem:[#allocation2 + $0x4b0] sm:$0x3] %vm189_vm2, %v6315_v0 }
  0x70   :  { %224 = vst.msk [vmem:[#allocation2 + $0x4c0] sm:$0x3] %vm189_vm2, %v6315_v0  ;;  %225 = vst.msk [vmem:[#allocation2 + $0x4d0] sm:$0x3] %vm189_vm2, %v6315_v0 }
  0x71   :  { %226 = vst.msk [vmem:[#allocation2 + $0x4e0] sm:$0x3] %vm189_vm2, %v6315_v0  ;;  %227 = vst.msk [vmem:[#allocation2 + $0x4f0] sm:$0x3] %vm189_vm2, %v6315_v0 }
  0x72   :  { %228 = vst.msk [vmem:[#allocation2 + $0x500] sm:$0x3] %vm189_vm2, %v6315_v0  ;;  %229 = vst.msk [vmem:[#allocation2 + $0x510] sm:$0x3] %vm189_vm2, %v6315_v0 }
  0x73   :  { %230 = vst.msk [vmem:[#allocation2 + $0x560] sm:$0x3] %vm189_vm2, %v6315_v0  ;;  %231 = vst.msk [vmem:[#allocation2 + $0x570] sm:$0x3] %vm189_vm2, %v6315_v0 }
  0x74   :  { %232 = vst.msk [vmem:[#allocation2 + $0x580] sm:$0x3] %vm189_vm2, %v6315_v0  ;;  %233 = vst.msk [vmem:[#allocation2 + $0x590] sm:$0x3] %vm189_vm2, %v6315_v0 }
  0x75   :  { %234 = vst.msk [vmem:[#allocation2 + $0x5a0] sm:$0x3] %vm189_vm2, %v6315_v0  ;;  %235 = vst.msk [vmem:[#allocation2 + $0x5b0] sm:$0x3] %vm189_vm2, %v6315_v0 }
  0x76   :  { %236 = vst.msk [vmem:[#allocation2 + $0x5c0] sm:$0x3] %vm189_vm2, %v6315_v0  ;;  %237 = vst.msk [vmem:[#allocation2 + $0x5d0] sm:$0x3] %vm189_vm2, %v6315_v0 }
  0x77   :  { %238 = vst.msk [vmem:[#allocation2 + $0x620] sm:$0x3] %vm189_vm2, %v6315_v0  ;;  %239 = vst.msk [vmem:[#allocation2 + $0x630] sm:$0x3] %vm189_vm2, %v6315_v0 }
  0x78   :  { %240 = vst.msk [vmem:[#allocation2 + $0x640] sm:$0x3] %vm189_vm2, %v6315_v0  ;;  %241 = vst.msk [vmem:[#allocation2 + $0x650] sm:$0x3] %vm189_vm2, %v6315_v0 }
  0x79   :  { %242 = vst.msk [vmem:[#allocation2 + $0x660] sm:$0x3] %vm189_vm2, %v6315_v0  ;;  %243 = vst.msk [vmem:[#allocation2 + $0x670] sm:$0x3] %vm189_vm2, %v6315_v0 }
  0x7a   :  { %244 = vst.msk [vmem:[#allocation2 + $0x680] sm:$0x3] %vm189_vm2, %v6315_v0  ;;  %245 = vst.msk [vmem:[#allocation2 + $0x690] sm:$0x3] %vm189_vm2, %v6315_v0 }
  0x7b   :  { %246 = vst.msk [vmem:[#allocation2 + $0x6e0] sm:$0x3] %vm189_vm2, %v6315_v0  ;;  %247 = vst.msk [vmem:[#allocation2 + $0x6f0] sm:$0x3] %vm189_vm2, %v6315_v0 }
  0x7c   :  { %248 = vst.msk [vmem:[#allocation2 + $0x700] sm:$0x3] %vm189_vm2, %v6315_v0  ;;  %249 = vst.msk [vmem:[#allocation2 + $0x710] sm:$0x3] %vm189_vm2, %v6315_v0 }
  0x7d   :  { %250 = vst.msk [vmem:[#allocation2 + $0x720] sm:$0x3] %vm189_vm2, %v6315_v0  ;;  %251 = vst.msk [vmem:[#allocation2 + $0x730] sm:$0x3] %vm189_vm2, %v6315_v0 }
  0x7e   :  { %252 = vst.msk [vmem:[#allocation2 + $0x740] sm:$0x3] %vm189_vm2, %v6315_v0  ;;  %253 = vst.msk [vmem:[#allocation2 + $0x750] sm:$0x3] %vm189_vm2, %v6315_v0 }
  0x7f   :  { %254 = vst.msk [vmem:[#allocation2 + $0x1aa] sm:$0x3] %vm189_vm2, %v6315_v0  ;;  %255 = vst.msk [vmem:[#allocation2 + $0x1ba] sm:$0x3] %vm189_vm2, %v6315_v0 }
  0x80   :  { %256 = vst.msk [vmem:[#allocation2 + $0x1ca] sm:$0x3] %vm189_vm2, %v6315_v0  ;;  %257 = vst.msk [vmem:[#allocation2 + $0x1da] sm:$0x3] %vm189_vm2, %v6315_v0 }
  0x81   :  { %258 = vst.msk [vmem:[#allocation2 + $0x1ea] sm:$0x3] %vm189_vm2, %v6315_v0  ;;  %259 = vst.msk [vmem:[#allocation2 + $0x1fa] sm:$0x3] %vm189_vm2, %v6315_v0 }
  0x82   :  { %260 = vst.msk [vmem:[#allocation2 + $0x20a] sm:$0x3] %vm189_vm2, %v6315_v0  ;;  %261 = vst.msk [vmem:[#allocation2 + $0x21a] sm:$0x3] %vm189_vm2, %v6315_v0 }
  0x83   :  { %262 = vst.msk [vmem:[#allocation2 + $0x26a] sm:$0x3] %vm189_vm2, %v6315_v0  ;;  %263 = vst.msk [vmem:[#allocation2 + $0x27a] sm:$0x3] %vm189_vm2, %v6315_v0 }
  0x84   :  { %264 = vst.msk [vmem:[#allocation2 + $0x28a] sm:$0x3] %vm189_vm2, %v6315_v0  ;;  %265 = vst.msk [vmem:[#allocation2 + $0x29a] sm:$0x3] %vm189_vm2, %v6315_v0 }
  0x85   :  { %266 = vst.msk [vmem:[#allocation2 + $0x2aa] sm:$0x3] %vm189_vm2, %v6315_v0  ;;  %267 = vst.msk [vmem:[#allocation2 + $0x2ba] sm:$0x3] %vm189_vm2, %v6315_v0 }
  0x86   :  { %268 = vst.msk [vmem:[#allocation2 + $0x2ca] sm:$0x3] %vm189_vm2, %v6315_v0  ;;  %269 = vst.msk [vmem:[#allocation2 + $0x2da] sm:$0x3] %vm189_vm2, %v6315_v0 }
  0x87   :  { %270 = vst.msk [vmem:[#allocation2 + $0x32a] sm:$0x3] %vm189_vm2, %v6315_v0  ;;  %271 = vst.msk [vmem:[#allocation2 + $0x33a] sm:$0x3] %vm189_vm2, %v6315_v0 }
  0x88   :  { %272 = vst.msk [vmem:[#allocation2 + $0x34a] sm:$0x3] %vm189_vm2, %v6315_v0  ;;  %273 = vst.msk [vmem:[#allocation2 + $0x35a] sm:$0x3] %vm189_vm2, %v6315_v0 }
  0x89   :  { %274 = vst.msk [vmem:[#allocation2 + $0x36a] sm:$0x3] %vm189_vm2, %v6315_v0  ;;  %275 = vst.msk [vmem:[#allocation2 + $0x37a] sm:$0x3] %vm189_vm2, %v6315_v0 }
  0x8a   :  { %276 = vst.msk [vmem:[#allocation2 + $0x38a] sm:$0x3] %vm189_vm2, %v6315_v0  ;;  %277 = vst.msk [vmem:[#allocation2 + $0x39a] sm:$0x3] %vm189_vm2, %v6315_v0 }
  0x8b   :  { %278 = vst.msk [vmem:[#allocation2 + $0x3ea] sm:$0x3] %vm189_vm2, %v6315_v0  ;;  %279 = vst.msk [vmem:[#allocation2 + $0x3fa] sm:$0x3] %vm189_vm2, %v6315_v0 }
  0x8c   :  { %280 = vst.msk [vmem:[#allocation2 + $0x40a] sm:$0x3] %vm189_vm2, %v6315_v0  ;;  %281 = vst.msk [vmem:[#allocation2 + $0x41a] sm:$0x3] %vm189_vm2, %v6315_v0 }
  0x8d   :  { %282 = vst.msk [vmem:[#allocation2 + $0x42a] sm:$0x3] %vm189_vm2, %v6315_v0  ;;  %283 = vst.msk [vmem:[#allocation2 + $0x43a] sm:$0x3] %vm189_vm2, %v6315_v0 }
  0x8e   :  { %284 = vst.msk [vmem:[#allocation2 + $0x44a] sm:$0x3] %vm189_vm2, %v6315_v0  ;;  %285 = vst.msk [vmem:[#allocation2 + $0x45a] sm:$0x3] %vm189_vm2, %v6315_v0 }
  0x8f   :  { %286 = vst.msk [vmem:[#allocation2 + $0x4aa] sm:$0x3] %vm189_vm2, %v6315_v0  ;;  %287 = vst.msk [vmem:[#allocation2 + $0x4ba] sm:$0x3] %vm189_vm2, %v6315_v0 }
  0x90   :  { %288 = vst.msk [vmem:[#allocation2 + $0x4ca] sm:$0x3] %vm189_vm2, %v6315_v0  ;;  %289 = vst.msk [vmem:[#allocation2 + $0x4da] sm:$0x3] %vm189_vm2, %v6315_v0 }
  0x91   :  { %290 = vst.msk [vmem:[#allocation2 + $0x4ea] sm:$0x3] %vm189_vm2, %v6315_v0  ;;  %291 = vst.msk [vmem:[#allocation2 + $0x4fa] sm:$0x3] %vm189_vm2, %v6315_v0 }
  0x92   :  { %292 = vst.msk [vmem:[#allocation2 + $0x50a] sm:$0x3] %vm189_vm2, %v6315_v0  ;;  %293 = vst.msk [vmem:[#allocation2 + $0x51a] sm:$0x3] %vm189_vm2, %v6315_v0 }
  0x93   :  { %294 = vst.msk [vmem:[#allocation2 + $0x56a] sm:$0x3] %vm189_vm2, %v6315_v0  ;;  %295 = vst.msk [vmem:[#allocation2 + $0x57a] sm:$0x3] %vm189_vm2, %v6315_v0 }
  0x94   :  { %296 = vst.msk [vmem:[#allocation2 + $0x58a] sm:$0x3] %vm189_vm2, %v6315_v0  ;;  %297 = vst.msk [vmem:[#allocation2 + $0x59a] sm:$0x3] %vm189_vm2, %v6315_v0 }
  0x95   :  { %298 = vst.msk [vmem:[#allocation2 + $0x5aa] sm:$0x3] %vm189_vm2, %v6315_v0  ;;  %299 = vst.msk [vmem:[#allocation2 + $0x5ba] sm:$0x3] %vm189_vm2, %v6315_v0 }
  0x96   :  { %300 = vst.msk [vmem:[#allocation2 + $0x5ca] sm:$0x3] %vm189_vm2, %v6315_v0  ;;  %301 = vst.msk [vmem:[#allocation2 + $0x5da] sm:$0x3] %vm189_vm2, %v6315_v0 }
  0x97   :  { %302 = vst.msk [vmem:[#allocation2 + $0x62a] sm:$0x3] %vm189_vm2, %v6315_v0  ;;  %303 = vst.msk [vmem:[#allocation2 + $0x63a] sm:$0x3] %vm189_vm2, %v6315_v0 }
  0x98   :  { %304 = vst.msk [vmem:[#allocation2 + $0x64a] sm:$0x3] %vm189_vm2, %v6315_v0  ;;  %305 = vst.msk [vmem:[#allocation2 + $0x65a] sm:$0x3] %vm189_vm2, %v6315_v0 }
  0x99   :  { %306 = vst.msk [vmem:[#allocation2 + $0x66a] sm:$0x3] %vm189_vm2, %v6315_v0  ;;  %307 = vst.msk [vmem:[#allocation2 + $0x67a] sm:$0x3] %vm189_vm2, %v6315_v0 }
  0x9a   :  { %308 = vst.msk [vmem:[#allocation2 + $0x68a] sm:$0x3] %vm189_vm2, %v6315_v0  ;;  %309 = vst.msk [vmem:[#allocation2 + $0x69a] sm:$0x3] %vm189_vm2, %v6315_v0 }
  0x9b   :  { %310 = vst.msk [vmem:[#allocation2 + $0x6ea] sm:$0x3] %vm189_vm2, %v6315_v0  ;;  %311 = vst.msk [vmem:[#allocation2 + $0x6fa] sm:$0x3] %vm189_vm2, %v6315_v0 }
  0x9c   :  { %312 = vst.msk [vmem:[#allocation2 + $0x70a] sm:$0x3] %vm189_vm2, %v6315_v0  ;;  %313 = vst.msk [vmem:[#allocation2 + $0x71a] sm:$0x3] %vm189_vm2, %v6315_v0 }
  0x9d   :  { %314 = vst.msk [vmem:[#allocation2 + $0x72a] sm:$0x3] %vm189_vm2, %v6315_v0  ;;  %315 = vst.msk [vmem:[#allocation2 + $0x73a] sm:$0x3] %vm189_vm2, %v6315_v0 }
  0x9e   :  { %316 = vst.msk [vmem:[#allocation2 + $0x74a] sm:$0x3] %vm189_vm2, %v6315_v0  ;;  %317 = vst.msk [vmem:[#allocation2 + $0x75a] sm:$0x3] %vm189_vm2, %v6315_v0  ;;  %v2168_v0 = vld [vmem:[#allocation2 + $0x800] sm:$0xff] }
  0x9f   :  { %382 = vst.msk [vmem:[#allocation2 + $0x1a2] sm:$0xff] %vm23_vm0, %v318_v1  ;;  %383 = vst.msk [vmem:[#allocation2 + $0x1b2] sm:$0xff] %vm23_vm0, %v319_v2  ;;  %v2169_v1 = vld [vmem:[#allocation2 + $0x808] sm:$0xf]  ;;  %v6961_v2 = vld [vmem:[#allocation2 + $0x810] sm:$0xff] }
  0xa0   :  { %384 = vst.msk [vmem:[#allocation2 + $0x1c2] sm:$0xff] %vm23_vm0, %v320_v3  ;;  %385 = vst.msk [vmem:[#allocation2 + $0x1d2] sm:$0xff] %vm23_vm0, %v321_v4  ;;  %v6963_v3 = vmul.f32 0.24420136, %v2157_v52  ;;  %v2171_v4 = vld [vmem:[#allocation2 + $0x818] sm:$0xf] }
  0xa1   :  { %386 = vst.msk [vmem:[#allocation2 + $0x1e2] sm:$0xff] %vm23_vm0, %v322_v5  ;;  %387 = vst.msk [vmem:[#allocation2 + $0x1f2] sm:$0xff] %vm23_vm0, %v323_v6  ;;  %v6965_v5 = vmul.f32 0.24420136, %v2158_v53  ;;  %v6967_v6 = vmul.f32 0.24420136, %v2159_v54 }
  0xa2   :  { %388 = vst.msk [vmem:[#allocation2 + $0x202] sm:$0xff] %vm23_vm0, %v324_v7  ;;  %389 = vst.msk [vmem:[#allocation2 + $0x212] sm:$0xff] %vm23_vm0, %v325_v8  ;;  %v6969_v7 = vmul.f32 0.24420136, %v2160_v55  ;;  %v6971_v8 = vmul.f32 0.24420136, %v2161_v56 }
  0xa3   :  { %390 = vst.msk [vmem:[#allocation2 + $0x262] sm:$0xff] %vm23_vm0, %v326_v9  ;;  %391 = vst.msk [vmem:[#allocation2 + $0x272] sm:$0xff] %vm23_vm0, %v327_v10  ;;  %v6973_v9 = vmul.f32 0.24420136, %v2162_v57  ;;  %v6975_v10 = vmul.f32 0.24420136, %v2163_v58 }
  0xa4   :  { %392 = vst.msk [vmem:[#allocation2 + $0x282] sm:$0xff] %vm23_vm0, %v328_v11  ;;  %393 = vst.msk [vmem:[#allocation2 + $0x292] sm:$0xff] %vm23_vm0, %v329_v12  ;;  %v6977_v11 = vmul.f32 0.24420136, %v2164_v59  ;;  %v6979_v12 = vmul.f32 0.24420136, %v2165_v61 }
  0xa5   :  { %394 = vst.msk [vmem:[#allocation2 + $0x2a2] sm:$0xff] %vm23_vm0, %v330_v13  ;;  %395 = vst.msk [vmem:[#allocation2 + $0x2b2] sm:$0xff] %vm23_vm0, %v331_v14  ;;  %v6981_v13 = vmul.f32 0.24420136, %v2166_v62  ;;  %v6983_v14 = vmul.f32 0.24420136, %v2167_v63 }
  0xa6   :  { %396 = vst.msk [vmem:[#allocation2 + $0x2c2] sm:$0xff] %vm23_vm0, %v332_v15  ;;  %397 = vst.msk [vmem:[#allocation2 + $0x2d2] sm:$0xff] %vm23_vm0, %v333_v16  ;;  %v6985_v15 = vmul.f32 0.24420136, %v2168_v0  ;;  %v6987_v16 = vmul.f32 0.24420136, %v2169_v1 }
  0xa7   :  { %398 = vst.msk [vmem:[#allocation2 + $0x322] sm:$0xff] %vm23_vm0, %v334_v17  ;;  %399 = vst.msk [vmem:[#allocation2 + $0x332] sm:$0xff] %vm23_vm0, %v335_v18  ;;  %v6990_v17 = vmul.f32 0.24420136, %v6961_v2  ;;  %v6992_v18 = vmul.f32 0.24420136, %v2171_v4 }
  0xa8   :  { %400 = vst.msk [vmem:[#allocation2 + $0x342] sm:$0xff] %vm23_vm0, %v336_v19  ;;  %401 = vst.msk [vmem:[#allocation2 + $0x352] sm:$0xff] %vm23_vm0, %v337_v20  ;;  %v2658_v19 = vld [vmem:[#allocation2 + $0x608] sm:$0xf]  ;;  %v2660_v20 = vld [vmem:[#allocation2 + $0x618] sm:$0xf] }
  0xa9   :  { %402 = vst.msk [vmem:[#allocation2 + $0x362] sm:$0xff] %vm23_vm0, %v338_v21  ;;  %403 = vst.msk [vmem:[#allocation2 + $0x372] sm:$0xff] %vm23_vm0, %v339_v22  ;;  %v2682_v21 = vld [vmem:[#allocation2 + $0x6c8] sm:$0xf]  ;;  %v2684_v22 = vld [vmem:[#allocation2 + $0x6d8] sm:$0xf] }
  0xaa   :  { %404 = vst.msk [vmem:[#allocation2 + $0x382] sm:$0xff] %vm23_vm0, %v340_v23  ;;  %405 = vst.msk [vmem:[#allocation2 + $0x392] sm:$0xff] %vm23_vm0, %v341_v24  ;;  %v2706_v23 = vld [vmem:[#allocation2 + $0x788] sm:$0xf]  ;;  %v2708_v24 = vld [vmem:[#allocation2 + $0x798] sm:$0xf] }
  0xab   :  { %406 = vst.msk [vmem:[#allocation2 + $0x3e2] sm:$0xff] %vm23_vm0, %v342_v25  ;;  %407 = vst.msk [vmem:[#allocation2 + $0x3f2] sm:$0xff] %vm23_vm0, %v343_v26  ;;  %v2710_v25 = vld [vmem:[#allocation2 + $0x7a8] sm:$0xf]  ;;  %v2712_v26 = vld [vmem:[#allocation2 + $0x7b8] sm:$0xf] }
  0xac   :  { %408 = vst.msk [vmem:[#allocation2 + $0x402] sm:$0xff] %vm23_vm0, %v344_v27  ;;  %409 = vst.msk [vmem:[#allocation2 + $0x412] sm:$0xff] %vm23_vm0, %v345_v28  ;;  %v2714_v27 = vld [vmem:[#allocation2 + $0x7c8] sm:$0xf]  ;;  %v2716_v28 = vld [vmem:[#allocation2 + $0x7d8] sm:$0xf] }
  0xad   :  { %410 = vst.msk [vmem:[#allocation2 + $0x422] sm:$0xff] %vm23_vm0, %v346_v29  ;;  %411 = vst.msk [vmem:[#allocation2 + $0x432] sm:$0xff] %vm23_vm0, %v347_v30  ;;  %v2718_v29 = vld [vmem:[#allocation2 + $0x7e8] sm:$0xf]  ;;  %v6994_v30 = vmul.f32 0.05448869, %v2658_v19 }
  0xae   :  { %412 = vst.msk [vmem:[#allocation2 + $0x442] sm:$0xff] %vm23_vm0, %v348_v31  ;;  %413 = vst.msk [vmem:[#allocation2 + $0x452] sm:$0xff] %vm23_vm0, %v349_v32  ;;  %v2720_v31 = vld [vmem:[#allocation2 + $0x7f8] sm:$0xf]  ;;  %v6996_v32 = vmul.f32 0.05448869, %v2660_v20 }
  0xaf   :  { %414 = vst.msk [vmem:[#allocation2 + $0x4a2] sm:$0xff] %vm23_vm0, %v350_v33  ;;  %415 = vst.msk [vmem:[#allocation2 + $0x4b2] sm:$0xff] %vm23_vm0, %v351_v34  ;;  %v6998_v33 = vmul.f32 0.05448869, %v2682_v21  ;;  %v7000_v34 = vmul.f32 0.05448869, %v2684_v22 }
  0xb0   :  { %416 = vst.msk [vmem:[#allocation2 + $0x4c2] sm:$0xff] %vm23_vm0, %v352_v35  ;;  %417 = vst.msk [vmem:[#allocation2 + $0x4d2] sm:$0xff] %vm23_vm0, %v353_v36  ;;  %v2722_v35 = vld [vmem:[#allocation2 + $0x808] sm:$0xf]  ;;  %v2724_v36 = vld [vmem:[#allocation2 + $0x818] sm:$0xf] }
  0xb1   :  { %418 = vst.msk [vmem:[#allocation2 + $0x4e2] sm:$0xff] %vm23_vm0, %v354_v37  ;;  %419 = vst.msk [vmem:[#allocation2 + $0x4f2] sm:$0xff] %vm23_vm0, %v355_v38  ;;  %v7002_v37 = vmul.f32 0.05448869, %v2706_v23  ;;  %v7004_v38 = vmul.f32 0.05448869, %v2708_v24 }
  0xb2   :  { %420 = vst.msk [vmem:[#allocation2 + $0x502] sm:$0xff] %vm23_vm0, %v356_v39  ;;  %421 = vst.msk [vmem:[#allocation2 + $0x512] sm:$0xff] %vm23_vm0, %v357_v40  ;;  %v7006_v39 = vmul.f32 0.05448869, %v2156_v51  ;;  %v2730_v40 = vld [vmem:[#allocation2 + $0x848] sm:$0xf] }
  0xb3   :  { %422 = vst.msk [vmem:[#allocation2 + $0x562] sm:$0xff] %vm23_vm0, %v358_v41  ;;  %423 = vst.msk [vmem:[#allocation2 + $0x572] sm:$0xff] %vm23_vm0, %v359_v42  ;;  %v2732_v41 = vld [vmem:[#allocation2 + $0x858] sm:$0xf]  ;;  %v2733_v42 = vld [vmem:[#allocation2 + $0x860] sm:$0xff] }
  0xb4   :  { %424 = vst.msk [vmem:[#allocation2 + $0x582] sm:$0xff] %vm23_vm0, %v360_v43  ;;  %425 = vst.msk [vmem:[#allocation2 + $0x592] sm:$0xff] %vm23_vm0, %v361_v44  ;;  %v7008_v43 = vmul.f32 0.05448869, %v2710_v25  ;;  %v7010_v44 = vmul.f32 0.05448869, %v2158_v53 }
  0xb5   :  { %426 = vst.msk [vmem:[#allocation2 + $0x5a2] sm:$0xff] %vm23_vm0, %v362_v45  ;;  %427 = vst.msk [vmem:[#allocation2 + $0x5b2] sm:$0xff] %vm23_vm0, %v363_v46  ;;  %v7012_v45 = vmul.f32 0.05448869, %v2712_v26  ;;  %v2734_v46 = vld [vmem:[#allocation2 + $0x868] sm:$0xf] }
  0xb6   :  { %428 = vst.msk [vmem:[#allocation2 + $0x5c2] sm:$0xff] %vm23_vm0, %v364_v47  ;;  %429 = vst.msk [vmem:[#allocation2 + $0x5d2] sm:$0xff] %vm23_vm0, %v365_v48  ;;  %v2735_v47 = vld [vmem:[#allocation2 + $0x870] sm:$0xff]  ;;  %v7014_v48 = vmul.f32 0.05448869, %v2160_v55  ;;  %v2737_v51 = vld [vmem:[#allocation2 + $0x880] sm:$0xff] }
  0xb7   :  { %430 = vst.msk [vmem:[#allocation2 + $0x622] sm:$0xff] %vm23_vm0, %v366_v49  ;;  %431 = vst.msk [vmem:[#allocation2 + $0x632] sm:$0xff] %vm23_vm0, %v367_v50  ;;  %v7016_v49 = vmul.f32 0.05448869, %v2714_v27  ;;  %v7018_v50 = vmul.f32 0.05448869, %v2162_v57 }
  0xb8   :  { %8847 = vst [vmem:[#allocation9_spill] sm:$0xff] %v6959_v60  ;;  %8848 = vst [vmem:[#allocation10_spill] sm:$0xff] %v6963_v3  ;;  %v2736_v52 = vld [vmem:[#allocation2 + $0x878] sm:$0xf]  ;;  %v2738_v54 = vld [vmem:[#allocation2 + $0x888] sm:$0xf] }
  0xb9   :  { %8849 = vst [vmem:[#allocation11_spill] sm:$0xff] %v6965_v5  ;;  %8850 = vst [vmem:[#allocation12_spill] sm:$0xff] %v6967_v6  ;;  %v7020_v56 = vmul.f32 0.05448869, %v2716_v28  ;;  %v7022_v58 = vmul.f32 0.05448869, %v2164_v59 }
  0xba   :  { %8851 = vst [vmem:[#allocation13_spill] sm:$0xff] %v6969_v7  ;;  %8852 = vst [vmem:[#allocation14_spill] sm:$0xff] %v6971_v8  ;;  %v7024_v61 = vmul.f32 0.05448869, %v2718_v29  ;;  %v2739_v53 = vld [vmem:[#allocation2 + $0x890] sm:$0xff]  ;;  %v2741_v1 = vld [vmem:[#allocation2 + $0x8a0] sm:$0xff] }
  0xbb   :  { %8853 = vst [vmem:[#allocation15_spill] sm:$0xff] %v6973_v9  ;;  %8854 = vst [vmem:[#allocation16_spill] sm:$0xff] %v6975_v10  ;;  %v2740_v63 = vld [vmem:[#allocation2 + $0x898] sm:$0xf]  ;;  %v7026_v4 = vmul.f32 0.05448869, %v2166_v62 }
  0xbc   :  { %8855 = vst [vmem:[#allocation17_spill] sm:$0xff] %v6977_v11  ;;  %8856 = vst [vmem:[#allocation18_spill] sm:$0xff] %v6979_v12  ;;  %v7028_v55 = vmul.f32 0.05448869, %v2720_v31  ;;  %v7030_v19 = vmul.f32 0.05448869, %v2168_v0 }
  0xbd   :  { %8857 = vst [vmem:[#allocation19_spill] sm:$0xff] %v6981_v13  ;;  %8858 = vst [vmem:[#allocation20_spill] sm:$0xff] %v6983_v14  ;;  %v2742_v57 = vld [vmem:[#allocation2 + $0x8a8] sm:$0xf]  ;;  %v2743_v20 = vld [vmem:[#allocation2 + $0x8b0] sm:$0xff] }
  0xbe   :  { %8859 = vst [vmem:[#allocation21_spill] sm:$0xff] %v6985_v15  ;;  %8860 = vst [vmem:[#allocation22_spill] sm:$0xff] %v6987_v16  ;;  %v7032_v21 = vmul.f32 0.05448869, %v2722_v35  ;;  %v7035_v22 = vmul.f32 0.05448869, %v6961_v2 }
  0xbf   :  { %8861 = vst [vmem:[#allocation23_spill] sm:$0xff] %v6990_v17  ;;  %8862 = vst [vmem:[#allocation24_spill] sm:$0xff] %v6992_v18  ;;  %v7037_v59 = vmul.f32 0.05448869, %v2724_v36  ;;  %v2744_v23 = vld [vmem:[#allocation2 + $0x8b8] sm:$0xf] }
  0xc0   :  { %8863 = vst [vmem:[#allocation25_spill] sm:$0xff] %v7006_v39  ;;  %8864 = vst [vmem:[#allocation26_spill] sm:$0xff] %v7008_v43  ;;  %v7039_v24 = vmul.f32 0.05448869, %v2730_v40  ;;  %v7041_v25 = vmul.f32 0.05448869, %v2732_v41 }
  0xc1   :  { %8865 = vst [vmem:[#allocation27_spill] sm:$0xff] %v7010_v44  ;;  %8866 = vst [vmem:[#allocation28_spill] sm:$0xff] %v7012_v45  ;;  %v7043_v62 = vmul.f32 0.05448869, %v2733_v42  ;;  %v2745_v26 = vld [vmem:[#allocation2 + $0x8c0] sm:$0xff]  ;;  %v368_v28 = vld [vmem:[#allocation3 + $0x190] sm:$0xff] }
  0xc2   :  { %8867 = vst [vmem:[#allocation29_spill] sm:$0xff] %v7014_v48  ;;  %8868 = vst [vmem:[#allocation30_spill] sm:$0xff] %v7016_v49  ;;  %v7045_v27 = vmul.f32 0.05448869, %v2734_v46  ;;  %v7047_v0 = vmul.f32 0.05448869, %v2735_v47 }
  0xc3   :  { %8869 = vst [vmem:[#allocation31_spill] sm:$0xff] %v7018_v50  ;;  %8870 = vst [vmem:[#allocation32_spill] sm:$0xff] %v7020_v56  ;;  %v2746_v29 = vld [vmem:[#allocation2 + $0x8c8] sm:$0xf]  ;;  %v7049_v31 = vmul.f32 0.05448869, %v2736_v52 }
  0xc4   :  { %8871 = vst [vmem:[#allocation33_spill] sm:$0xff] %v7022_v58  ;;  %8872 = vst [vmem:[#allocation34_spill] sm:$0xff] %v7024_v61  ;;  %v7051_v2 = vmul.f32 0.05448869, %v2737_v51  ;;  %v7053_v35 = vmul.f32 0.05448869, %v2738_v54 }
  0xc5   :  { %8873 = vst [vmem:[#allocation35_spill] sm:$0xff] %v7026_v4  ;;  %8874 = vst [vmem:[#allocation36_spill] sm:$0xff] %v7028_v55  ;;  %v2747_v36 = vld [vmem:[#allocation2 + $0x8d0] sm:$0xff]  ;;  %v7056_v40 = vmul.f32 0.05448869, %v2739_v53  ;;  %v369_v52 = vld [vmem:[#allocation3 + $0x198] sm:$0xff] }
  0xc6   :  { %8875 = vst [vmem:[#allocation37_spill] sm:$0xff] %v7030_v19  ;;  %8876 = vst [vmem:[#allocation38_spill] sm:$0xff] %v7032_v21  ;;  %v7058_v41 = vmul.f32 0.05448869, %v2740_v63  ;;  %v7060_v42 = vmul.f32 0.05448869, %v2741_v1 }
  0xc7   :  { %8877 = vst [vmem:[#allocation39_spill] sm:$0xff] %v7035_v22  ;;  %8878 = vst [vmem:[#allocation40_spill] sm:$0xff] %v7037_v59  ;;  %v2748_v46 = vld [vmem:[#allocation2 + $0x8d8] sm:$0xf]  ;;  %v7062_v47 = vmul.f32 0.05448869, %v2742_v57 }
  0xc8   :  { %8879 = vst [vmem:[#allocation41_spill] sm:$0xff] %v7043_v62  ;;  %8880 = vst [vmem:[#allocation42_spill] sm:$0xff] %v7045_v27  ;;  %v7064_v18 = vmul.f32 0.05448869, %v2743_v20  ;;  %v370_v17 = vld [vmem:[#allocation3 + $0x1a0] sm:$0xff]  ;;  %v371_v53 = vld [vmem:[#allocation3 + $0x1a8] sm:$0xff] }
  0xc9   :  { %8881 = vst [vmem:[#allocation43_spill] sm:$0xff] %v7047_v0  ;;  %8882 = vst [vmem:[#allocation44_spill] sm:$0xff] %v7049_v31  ;;  %v2081_v51 = vld [vmem:[#allocation2 + $0x548] sm:$0xf]  ;;  %v2083_v16 = vld [vmem:[#allocation2 + $0x558] sm:$0xf] }
  0xca   :  { %8883 = vst [vmem:[#allocation45_spill] sm:$0xff] %v7051_v2  ;;  %8884 = vst [vmem:[#allocation46_spill] sm:$0xff] %v7053_v35  ;;  %v7066_v54 = vmul.f32 0.05448869, %v2744_v23  ;;  %v372_v63 = vld [vmem:[#allocation3 + $0x1b0] sm:$0xff]  ;;  %v374_v57 = vld [vmem:[#allocation3 + $0x1c0] sm:$0xff] }
  0xcb   :  { %432 = vst.msk [vmem:[#allocation2 + $0x642] sm:$0xff] %vm23_vm0, %v368_v28  ;;  %8885 = vst [vmem:[#allocation47_spill] sm:$0xff] %v7056_v40  ;;  %v373_v28 = vld [vmem:[#allocation3 + $0x1b8] sm:$0xff]  ;;  %v7070_v1 = vmul.f32 0.05448869, %v2745_v26  ;;  %v375_v20 = vld [vmem:[#allocation3 + $0x1c8] sm:$0xff] }
  0xcc   :  { %8886 = vst [vmem:[#allocation48_spill] sm:$0xff] %v7058_v41  ;;  %8887 = vst [vmem:[#allocation49_spill] sm:$0xff] %v7060_v42  ;;  %v376_v15 = vld [vmem:[#allocation3 + $0x1d0] sm:$0xff]  ;;  %v7075_v23 = vmul.f32 0.05448869, %v2746_v29  ;;  %v378_v26 = vld [vmem:[#allocation3 + $0x1e0] sm:$0xff] }
  0xcd   :  { %8888 = vst [vmem:[#allocation50_spill] sm:$0xff] %v7062_v47  ;;  %8889 = vst [vmem:[#allocation51_spill] sm:$0xff] %v7064_v18  ;;  %v380_v29 = vld [vmem:[#allocation3 + $0x1f0] sm:$0xff]  ;;  %v2093_v18 = vld [vmem:[#allocation2 + $0x5a8] sm:$0xf] }
  0xce   :  { %8890 = vst [vmem:[#allocation52_spill] sm:$0xff] %v7066_v54  ;;  %433 = vst.msk [vmem:[#allocation2 + $0x652] sm:$0xff] %vm23_vm0, %v369_v52  ;;  %v379_v52 = vld [vmem:[#allocation3 + $0x1e8] sm:$0xff]  ;;  %v1541_v13 = vld [vmem:[#allocation2 + $0x5b0] sm:$0xff] }
  0xcf   :  { %434 = vst.msk [vmem:[#allocation2 + $0x662] sm:$0xff] %vm23_vm0, %v370_v17  ;;  %8891 = vst [vmem:[#allocation53_spill] sm:$0xff] %v7070_v1  ;;  %v377_v17 = vld [vmem:[#allocation3 + $0x1d8] sm:$0xff]  ;;  %v7080_v1 = vmul.f32 0.05448869, %v2747_v36  ;;  %v446_v62 = vld [vmem:[#allocation2] sm:$0xff] }
  0xd0   :  { %435 = vst.msk [vmem:[#allocation2 + $0x672] sm:$0xff] %vm23_vm0, %v371_v53  ;;  %436 = vst.msk [vmem:[#allocation2 + $0x682] sm:$0xff] %vm23_vm0, %v372_v63  ;;  %v1531_v53 = vld [vmem:[#allocation2 + $0x560] sm:$0xff]  ;;  %v381_v63 = vld [vmem:[#allocation3 + $0x1f8] sm:$0xff]  ;;  %v7089_v36 = vmul.f32 0.24420136, %v2081_v51 }
  0xd1   :  { %437 = vst.msk [vmem:[#allocation2 + $0x692] sm:$0xff] %vm23_vm0, %v373_v28  ;;  %8892 = vst [vmem:[#allocation54_spill] sm:$0xff] %v7075_v23  ;;  %v7085_v28 = vmul.f32 0.05448869, %v2748_v46  ;;  %v2089_v23 = vld [vmem:[#allocation2 + $0x588] sm:$0xf] }
  0xd2   :  { %438 = vst.msk [vmem:[#allocation2 + $0x6e2] sm:$0xff] %vm23_vm0, %v374_v57  ;;  %439 = vst.msk [vmem:[#allocation2 + $0x6f2] sm:$0xff] %vm23_vm0, %v375_v20  ;;  %v2085_v57 = vld [vmem:[#allocation2 + $0x568] sm:$0xf]  ;;  %v1533_v20 = vld [vmem:[#allocation2 + $0x570] sm:$0xff] }
  0xd3   :  { %440 = vst.msk [vmem:[#allocation2 + $0x702] sm:$0xff] %vm23_vm0, %v376_v15  ;;  %8893 = vst [vmem:[#allocation55_spill] sm:$0xff] %v7080_v1  ;;  %v2087_v15 = vld [vmem:[#allocation2 + $0x578] sm:$0xf]  ;;  %v7091_v1 = vmul.f32 0.24420136, %v2083_v16 }
  0xd4   :  { %441 = vst.msk [vmem:[#allocation2 + $0x712] sm:$0xff] %vm23_vm0, %v377_v17  ;;  %442 = vst.msk [vmem:[#allocation2 + $0x722] sm:$0xff] %vm23_vm0, %v378_v26  ;;  %v7093_v17 = vmul.f32 0.24420136, %v1531_v53  ;;  %v1535_v26 = vld [vmem:[#allocation2 + $0x580] sm:$0xff] }
  0xd5   :  { %443 = vst.msk [vmem:[#allocation2 + $0x732] sm:$0xff] %vm23_vm0, %v379_v52  ;;  %8894 = vst [vmem:[#allocation56_spill] sm:$0xff] %v7085_v28  ;;  %v1537_v52 = vld [vmem:[#allocation2 + $0x590] sm:$0xff]  ;;  %v7095_v54 = vmul.f32 0.24420136, %v2085_v57 }
  0xd6   :  { %444 = vst.msk [vmem:[#allocation2 + $0x742] sm:$0xff] %vm23_vm0, %v380_v29  ;;  %445 = vst.msk [vmem:[#allocation2 + $0x752] sm:$0xff] %vm23_vm0, %v381_v63  ;;  %v7097_v46 = vmul.f32 0.24420136, %v1533_v20  ;;  %v2091_v28 = vld [vmem:[#allocation2 + $0x598] sm:$0xf] }
  0xd7   :  { %v7099_v14 = vmul.f32 0.24420136, %v2087_v15  ;;  %v1539_v29 = vld [vmem:[#allocation2 + $0x5a0] sm:$0xff]  ;;  %v7101_v63 = vmul.f32 0.24420136, %v1535_v26  ;;  %v1545_v15 = vld [vmem:[#allocation2 + $0x5d0] sm:$0xff] }
  0xd8   :  { %8895 = vst [vmem:[#allocation57_spill] sm:$0xff] %v7097_v46  ;;  %v7103_v51 = vmul.f32 0.24420136, %v2089_v23  ;;  %v7105_v16 = vmul.f32 0.24420136, %v1537_v52  ;;  %v1543_v20 = vld [vmem:[#allocation2 + $0x5c0] sm:$0xff] }
  0xd9   :  { %8896 = vst [vmem:[#allocation58_spill] sm:$0xff] %v7099_v14  ;;  %8897 = vst [vmem:[#allocation59_spill] sm:$0xff] %v7101_v63  ;;  %v7107_v53 = vmul.f32 0.24420136, %v2091_v28  ;;  %v2095_v47 = vld [vmem:[#allocation2 + $0x5b8] sm:$0xf] }
  0xda   :  { %8898 = vst [vmem:[#allocation60_spill] sm:$0xff] %v7103_v51  ;;  %8899 = vst [vmem:[#allocation61_spill] sm:$0xff] %v7105_v16  ;;  %v7109_v12 = vmul.f32 0.24420136, %v1539_v29  ;;  %v7111_v57 = vmul.f32 0.24420136, %v2093_v18 }
  0xdb   :  { %8900 = vst [vmem:[#allocation62_spill] sm:$0xff] %v7107_v53  ;;  %v2097_v42 = vld [vmem:[#allocation2 + $0x5c8] sm:$0xf]  ;;  %v2099_v11 = vld [vmem:[#allocation2 + $0x5d8] sm:$0xf]  ;;  %v1555_v52 = vld [vmem:[#allocation2 + $0x620] sm:$0xff] }
  0xdc   :  { %8901 = vst [vmem:[#allocation63_spill] sm:$0xff] %v7109_v12  ;;  %8902 = vst [vmem:[#allocation64_spill] sm:$0xff] %v7111_v57  ;;  %v7113_v41 = vmul.f32 0.24420136, %v1541_v13  ;;  %v7115_v26 = vmul.f32 0.24420136, %v2095_v47 }
  0xdd   :  { %v1556_v23 = vld [vmem:[#allocation2 + $0x628] sm:$0xf]  ;;  %v7117_v40 = vmul.f32 0.24420136, %v1543_v20  ;;  %v7119_v10 = vmul.f32 0.24420136, %v2097_v42 }
  0xde   :  { %8903 = vst [vmem:[#allocation65_spill] sm:$0xff] %v7113_v41  ;;  %8904 = vst [vmem:[#allocation66_spill] sm:$0xff] %v7115_v26  ;;  %v2109_v28 = vld [vmem:[#allocation2 + $0x628] sm:$0xf]  ;;  %v7121_v9 = vmul.f32 0.24420136, %v1545_v15 }
  0xdf   :  { %8905 = vst [vmem:[#allocation67_spill] sm:$0xff] %v7117_v40  ;;  %8906 = vst [vmem:[#allocation68_spill] sm:$0xff] %v7119_v10  ;;  %v7123_v29 = vmul.f32 0.24420136, %v2099_v11  ;;  %v7125_v18 = vmul.f32 0.40261996, %v1556_v23 }
  0xe0   :  { %8907 = vst [vmem:[#allocation69_spill] sm:$0xff] %v7121_v9  ;;  %v2662_v35 = vld [vmem:[#allocation2 + $0x628] sm:$0xf]  ;;  %v1558_v8 = vld [vmem:[#allocation2 + $0x638] sm:$0xf]  ;;  %v1557_v47 = vld [vmem:[#allocation2 + $0x630] sm:$0xff] }
  0xe1   :  { %8908 = vst [vmem:[#allocation70_spill] sm:$0xff] %v7123_v29  ;;  %8909 = vst [vmem:[#allocation71_spill] sm:$0xff] %v7125_v18  ;;  %v7127_v2 = vmul.f32 0.24420136, %v1555_v52  ;;  %v7129_v13 = vmul.f32 0.24420136, %v2109_v28 }
  0xe2   :  { %v7131_v7 = vmul.f32 0.05448869, %v1555_v52  ;;  %v2111_v20 = vld [vmem:[#allocation2 + $0x638] sm:$0xf]  ;;  %v7133_v6 = vmul.f32 0.05448869, %v2662_v35 }
  0xe3   :  { %8910 = vst [vmem:[#allocation72_spill] sm:$0xff] %v7127_v2  ;;  %8911 = vst [vmem:[#allocation73_spill] sm:$0xff] %v7129_v13  ;;  %v2664_v31 = vld [vmem:[#allocation2 + $0x638] sm:$0xf]  ;;  %v7135_v42 = vmul.f32 0.40261996, %v1558_v8 }
  0xe4   :  { %v1560_v15 = vld [vmem:[#allocation2 + $0x648] sm:$0xf]  ;;  %v7137_v11 = vmul.f32 0.24420136, %v1557_v47  ;;  %v1559_v23 = vld [vmem:[#allocation2 + $0x640] sm:$0xff]  ;;  %v1561_v22 = vld [vmem:[#allocation2 + $0x650] sm:$0xff] }
  0xe5   :  { %8912 = vst [vmem:[#allocation74_spill] sm:$0xff] %v7135_v42  ;;  %v2113_v0 = vld [vmem:[#allocation2 + $0x648] sm:$0xf]  ;;  %v7139_v27 = vmul.f32 0.24420136, %v2111_v20  ;;  %v833_v9 = vld [vmem:[#allocation2 + $0xd0] sm:$0xff] }
  0xe6   :  { %8913 = vst [vmem:[#allocation75_spill] sm:$0xff] %v7137_v11  ;;  %v7141_v5 = vmul.f32 0.05448869, %v1557_v47  ;;  %v7143_v28 = vmul.f32 0.05448869, %v2664_v31  ;;  %v1563_v31 = vld [vmem:[#allocation2 + $0x660] sm:$0xff] }
  0xe7   :  { %8914 = vst [vmem:[#allocation76_spill] sm:$0xff] %v7139_v27  ;;  %v7145_v3 = vmul.f32 0.40261996, %v1560_v15  ;;  %v2666_v52 = vld [vmem:[#allocation2 + $0x648] sm:$0xf]  ;;  %v7219_v27 = vld [vmem:[#allocation2 + $0x300] sm:$0xff] }
  0xe8   :  { %8915 = vst [vmem:[#allocation77_spill] sm:$0xff] %v7141_v5  ;;  %8916 = vst [vmem:[#allocation78_spill] sm:$0xff] %v7143_v28  ;;  %v7147_v59 = vmul.f32 0.24420136, %v1559_v23  ;;  %v7149_v35 = vmul.f32 0.24420136, %v2113_v0 }
  0xe9   :  { %8917 = vst [vmem:[#allocation79_spill] sm:$0xff] %v7145_v3  ;;  %v1562_v8 = vld [vmem:[#allocation2 + $0x658] sm:$0xf]  ;;  %v7151_v60 = vmul.f32 0.05448869, %v1559_v23  ;;  %v7577_v16 = vld [vmem:[#allocation2 + $0x440] sm:$0xff] }
  0xea   :  { %8918 = vst [vmem:[#allocation80_spill] sm:$0xff] %v7147_v59  ;;  %8919 = vst [vmem:[#allocation81_spill] sm:$0xff] %v7149_v35  ;;  %v2115_v21 = vld [vmem:[#allocation2 + $0x658] sm:$0xf]  ;;  %v7153_v19 = vmul.f32 0.05448869, %v2666_v52 }
  0xeb   :  { %8920 = vst [vmem:[#allocation82_spill] sm:$0xff] %v7151_v60  ;;  %v2668_v20 = vld [vmem:[#allocation2 + $0x658] sm:$0xf]  ;;  %v638_v47 = vmul.f32 0.05448869, %v446_v62  ;;  %v7215_v59 = vld [vmem:[#allocation2 + $0x180] sm:$0xff] }
  0xec   :  { %8921 = vst [vmem:[#allocation83_spill] sm:$0xff] %v7153_v19  ;;  %v7155_v55 = vmul.f32 0.40261996, %v1562_v8  ;;  %v1564_v15 = vld [vmem:[#allocation2 + $0x668] sm:$0xf]  ;;  %v1565_v8 = vld [vmem:[#allocation2 + $0x670] sm:$0xff] }
  0xed   :  { %v7157_v4 = vmul.f32 0.24420136, %v1561_v22  ;;  %v7159_v61 = vmul.f32 0.24420136, %v2115_v21  ;;  %v2117_v58 = vld [vmem:[#allocation2 + $0x668] sm:$0xf] }
  0xee   :  { %8922 = vst [vmem:[#allocation84_spill] sm:$0xff] %v7155_v55  ;;  %v7161_v0 = vmul.f32 0.05448869, %v1561_v22  ;;  %v7163_v56 = vmul.f32 0.05448869, %v2668_v20  ;;  %v1567_v21 = vld [vmem:[#allocation2 + $0x680] sm:$0xff] }
  0xef   :  { %8923 = vst [vmem:[#allocation85_spill] sm:$0xff] %v7157_v4  ;;  %8924 = vst [vmem:[#allocation86_spill] sm:$0xff] %v7159_v61  ;;  %v2670_v23 = vld [vmem:[#allocation2 + $0x668] sm:$0xf]  ;;  %v7165_v50 = vmul.f32 0.40261996, %v1564_v15 }
  0xf0   :  { %8925 = vst [vmem:[#allocation87_spill] sm:$0xff] %v7161_v0  ;;  %8926 = vst [vmem:[#allocation88_spill] sm:$0xff] %v7163_v56  ;;  %v7167_v52 = vmul.f32 0.24420136, %v1563_v31  ;;  %v1566_v49 = vld [vmem:[#allocation2 + $0x678] sm:$0xf] }
  0xf1   :  { %8927 = vst [vmem:[#allocation89_spill] sm:$0xff] %v7165_v50  ;;  %v7169_v62 = vmul.f32 0.24420136, %v2117_v58  ;;  %v2119_v55 = vld [vmem:[#allocation2 + $0x678] sm:$0xf]  ;;  %v1569_v58 = vld [vmem:[#allocation2 + $0x690] sm:$0xff] }
  0xf2   :  { %8928 = vst [vmem:[#allocation90_spill] sm:$0xff] %v7167_v52  ;;  %v7171_v48 = vmul.f32 0.05448869, %v1563_v31  ;;  %v7173_v45 = vmul.f32 0.05448869, %v2670_v23  ;;  %v1581_v61 = vld [vmem:[#allocation2 + $0x6f0] sm:$0xff] }
  0xf3   :  { %8929 = vst [vmem:[#allocation91_spill] sm:$0xff] %v7169_v62  ;;  %v7175_v3 = vmul.f32 0.40261996, %v1566_v49  ;;  %v2672_v22 = vld [vmem:[#allocation2 + $0x678] sm:$0xf]  ;;  %v488_v51 = vld [vmem:[#allocation2 + $0x150] sm:$0xff] }
  0xf4   :  { %8930 = vst [vmem:[#allocation92_spill] sm:$0xff] %v7171_v48  ;;  %8931 = vst [vmem:[#allocation93_spill] sm:$0xff] %v7173_v45  ;;  %v2121_v20 = vld [vmem:[#allocation2 + $0x688] sm:$0xf]  ;;  %v7177_v44 = vmul.f32 0.24420136, %v1565_v8 }
  0xf5   :  { %8932 = vst [vmem:[#allocation94_spill] sm:$0xff] %v7175_v3  ;;  %v7179_v15 = vmul.f32 0.24420136, %v2119_v55  ;;  %v2674_v50 = vld [vmem:[#allocation2 + $0x688] sm:$0xf]  ;;  %v1579_v3 = vld [vmem:[#allocation2 + $0x6e0] sm:$0xff] }
  0xf6   :  { %8933 = vst [vmem:[#allocation95_spill] sm:$0xff] %v7177_v44  ;;  %v7181_v42 = vmul.f32 0.05448869, %v1565_v8  ;;  %v2123_v43 = vld [vmem:[#allocation2 + $0x698] sm:$0xf] }
  0xf7   :  { %8934 = vst [vmem:[#allocation96_spill] sm:$0xff] %v7179_v15  ;;  %v7183_v18 = vmul.f32 0.05448869, %v2672_v22  ;;  %v7185_v31 = vmul.f32 0.24420136, %v1567_v21 }
  0xf8   :  { %8935 = vst [vmem:[#allocation97_spill] sm:$0xff] %v7181_v42  ;;  %v7187_v23 = vmul.f32 0.24420136, %v2121_v20  ;;  %v7189_v39 = vmul.f32 0.05448869, %v1567_v21  ;;  %v831_v21 = vld [vmem:[#allocation2 + $0xc0] sm:$0xff] }
  0xf9   :  { %8936 = vst [vmem:[#allocation98_spill] sm:$0xff] %v7183_v18  ;;  %8937 = vst [vmem:[#allocation99_spill] sm:$0xff] %v7185_v31  ;;  %v7191_v49 = vmul.f32 0.05448869, %v2674_v50  ;;  %v7193_v62 = vmul.f32 0.24420136, %v1569_v58 }
  0xfa   :  { %8938 = vst [vmem:[#allocation100_spill] sm:$0xff] %v7187_v23  ;;  %8939 = vst [vmem:[#allocation101_spill] sm:$0xff] %v7189_v39  ;;  %v7195_v55 = vmul.f32 0.24420136, %v2123_v43  ;;  %v2676_v15 = vld [vmem:[#allocation2 + $0x698] sm:$0xf] }
  0xfb   :  { %8940 = vst [vmem:[#allocation102_spill] sm:$0xff] %v7191_v49  ;;  %8941 = vst [vmem:[#allocation103_spill] sm:$0xff] %v7193_v62  ;;  %v7197_v8 = vmul.f32 0.05448869, %v1569_v58  ;;  %v1580_v44 = vld [vmem:[#allocation2 + $0x6e8] sm:$0xf] }
  0xfc   :  { %8942 = vst [vmem:[#allocation104_spill] sm:$0xff] %v7195_v55  ;;  %v2133_v52 = vld [vmem:[#allocation2 + $0x6e8] sm:$0xf]  ;;  %v1582_v4 = vld [vmem:[#allocation2 + $0x6f8] sm:$0xf]  ;;  %v7229_v49 = vld [vmem:[#allocation2 + $0x190] sm:$0xff] }
  0xfd   :  { %8943 = vst [vmem:[#allocation105_spill] sm:$0xff] %v7197_v8  ;;  %v2686_v22 = vld [vmem:[#allocation2 + $0x6e8] sm:$0xf]  ;;  %v7199_v31 = vmul.f32 0.05448869, %v2676_v15  ;;  %v7217_v15 = vld [vmem:[#allocation2 + $0x240] sm:$0xff] }
  0xfe   :  { %v7201_v20 = vmul.f32 0.24420136, %v1579_v3  ;;  %v7203_v50 = vmul.f32 0.40261996, %v1580_v44  ;;  %v7205_v23 = vmul.f32 0.24420136, %v2133_v52 }
  0xff   :  { %8944 = vst [vmem:[#allocation106_spill] sm:$0xff] %v7199_v31  ;;  %v7207_v62 = vmul.f32 0.05448869, %v1579_v3  ;;  %v7209_v43 = vmul.f32 0.05448869, %v2686_v22 }
 0x100   :  { %8945 = vst [vmem:[#allocation107_spill] sm:$0xff] %v7201_v20  ;;  %8946 = vst [vmem:[#allocation108_spill] sm:$0xff] %v7203_v50  ;;  %v7211_v58 = vmul.f32 0.40261996, %v1582_v4  ;;  %v7213_v55 = vmul.f32 0.24420136, %v1581_v61 }
 0x101   :  { %8947 = vst [vmem:[#allocation109_spill] sm:$0xff] %v7205_v23  ;;  %8948 = vst [vmem:[#allocation110_spill] sm:$0xff] %v7207_v62  ;;  %v1023_v35 = vmul.f32 0.24420136, %v831_v21  ;;  %v1599_v44 = vmul.f32 0.40261996, %v7215_v59 }
 0x102   :  { %8949 = vst [vmem:[#allocation111_spill] sm:$0xff] %v7209_v43  ;;  %8950 = vst [vmem:[#allocation112_spill] sm:$0xff] %v7211_v58  ;;  %v7223_v52 = vmul.f32 0.24420136, %v7217_v15  ;;  %v7226_v3 = vmul.f32 0.05448869, %v7219_v27 }
 0x103   :  { %8951 = vst [vmem:[#allocation113_spill] sm:$0xff] %v7213_v55  ;;  %v1215_v22 = vadd.f32 %v1023_v35, %v638_v47  ;;  %v447_v4 = vld [vmem:[#allocation2 + $0x8] sm:$0xf]  ;;  %v448_v62 = vld [vmem:[#allocation2 + $0x10] sm:$0xff]  ;;  %v662_v47 = vmul.f32 0.05448869, %v831_v21 }
 0x104   :  { %v832_v58 = vld [vmem:[#allocation2 + $0xc8] sm:$0xf]  ;;  %v639_v50 = vmul.f32 0.05448869, %v447_v4  ;;  %v640_v29 = vmul.f32 0.05448869, %v448_v62 }
 0x105   :  { %v1408_v61 = vld [vmem:[#allocation2 + $0x188] sm:$0xf]  ;;  %v1024_v55 = vmul.f32 0.24420136, %v832_v58  ;;  %v1791_v20 = vadd.f32 %v1599_v44, %v1215_v22  ;;  %v7231_v35 = vld [vmem:[#allocation2 + $0x250] sm:$0xff] }
 0x106   :  { %v1600_v23 = vmul.f32 0.40261996, %v1408_v61  ;;  %v1985_v11 = vld [vmem:[#allocation2 + $0x248] sm:$0xf]  ;;  %v1025_v4 = vmul.f32 0.24420136, %v833_v9 }
 0x107   :  { %v2562_v43 = vld [vmem:[#allocation2 + $0x308] sm:$0xf]  ;;  %v1216_v13 = vadd.f32 %v1024_v55, %v639_v50  ;;  %v2177_v2 = vmul.f32 0.24420136, %v1985_v11  ;;  %v2368_v8 = vadd.f32 %v7223_v52, %v1791_v20  ;;  %v1601_v58 = vmul.f32 0.40261996, %v7229_v49 }
 0x108   :  { %v2754_v31 = vmul.f32 0.05448869, %v2562_v43  ;;  %v7235_v44 = vmul.f32 0.24420136, %v7231_v35  ;;  %v7238_v11 = vld [vmem:[#allocation2 + $0x310] sm:$0xff]  ;;  %v1217_v43 = vadd.f32 %v1025_v4, %v640_v29 }
 0x109   :  { %v1792_v10 = vadd.f32 %v1600_v23, %v1216_v13  ;;  %v2945_v55 = vadd.f32 %v7226_v3, %v2368_v8  ;;  %v449_v62 = vld [vmem:[#allocation2 + $0x18] sm:$0xf]  ;;  %v7241_v22 = vmul.f32 0.05448869, %v7238_v11  ;;  %v1047_v42 = vmul.f32 0.24420136, %v7215_v59 }
 0x10a   :  { %v834_v50 = vld [vmem:[#allocation2 + $0xd8] sm:$0xf]  ;;  %v641_v61 = vmul.f32 0.05448869, %v449_v62  ;;  %v1793_v40 = vadd.f32 %v1601_v58, %v1217_v43  ;;  %v856_v58 = vld [vmem:[#allocation2 + $0x188] sm:$0xf] }
 0x10b   :  { %v2369_v20 = vadd.f32 %v2177_v2, %v1792_v10  ;;  %v1410_v21 = vld [vmem:[#allocation2 + $0x198] sm:$0xf]  ;;  %3137 = vst.msk [vmem:[#allocation2] sm:$0xff] %vm23_vm0, %v2945_v55  ;;  %v1026_v13 = vmul.f32 0.24420136, %v834_v50  ;;  %v1239_v4 = vadd.f32 %v1047_v42, %v662_v47  ;;  %v7251_v55 = vld [vmem:[#allocation2 + $0x3c0] sm:$0xff] }
 0x10c   :  { %v1602_v23 = vmul.f32 0.40261996, %v1410_v21  ;;  %v1987_v39 = vld [vmem:[#allocation2 + $0x258] sm:$0xf]  ;;  %v1623_v10 = vmul.f32 0.40261996, %v7217_v15  ;;  %v2370_v29 = vadd.f32 %v7235_v44, %v1793_v40 }
 0x10d   :  { %v2946_v18 = vadd.f32 %v2754_v31, %v2369_v20  ;;  %v2179_v26 = vmul.f32 0.24420136, %v1987_v39  ;;  %v2564_v8 = vld [vmem:[#allocation2 + $0x318] sm:$0xf]  ;;  %v1218_v41 = vadd.f32 %v1026_v13, %v641_v61  ;;  %v7247_v2 = vmul.f32 0.24420136, %v7219_v27 }
 0x10e   :  { %v2756_v45 = vmul.f32 0.05448869, %v2564_v8  ;;  %v471_v31 = vld [vmem:[#allocation2 + $0xc8] sm:$0xf]  ;;  %v7254_v62 = vmul.f32 0.05448869, %v7251_v55  ;;  %v2947_v43 = vadd.f32 %v7241_v22, %v2370_v29  ;;  %v1815_v61 = vadd.f32 %v1623_v10, %v1239_v4 }
 0x10f   :  { %3138 = vst.msk [vmem:[#allocation2 + $0x8] sm:$0xf] %vm25_vm1, %v2946_v18  ;;  %v1794_v39 = vadd.f32 %v1602_v23, %v1218_v41  ;;  %v663_v50 = vmul.f32 0.05448869, %v471_v31  ;;  %v1048_v20 = vmul.f32 0.24420136, %v856_v58 }
 0x110   :  { %v1432_v21 = vld [vmem:[#allocation2 + $0x248] sm:$0xf]  ;;  %v7257_v47 = vld [vmem:[#allocation2 + $0x3d0] sm:$0xff]  ;;  %3139 = vst.msk [vmem:[#allocation2 + $0x10] sm:$0xff] %vm23_vm0, %v2947_v43  ;;  %v2392_v41 = vadd.f32 %v7247_v2, %v1815_v61  ;;  %v664_v48 = vmul.f32 0.05448869, %v833_v9 }
 0x111   :  { %v2009_v13 = vld [vmem:[#allocation2 + $0x308] sm:$0xf]  ;;  %v2371_v18 = vadd.f32 %v2179_v26, %v1794_v39  ;;  %v1240_v57 = vadd.f32 %v1048_v20, %v663_v50  ;;  %v1624_v40 = vmul.f32 0.40261996, %v1432_v21  ;;  %v1049_v31 = vmul.f32 0.24420136, %v7229_v49 }
 0x112   :  { %v2586_v8 = vld [vmem:[#allocation2 + $0x3c8] sm:$0xf]  ;;  %v2201_v42 = vmul.f32 0.24420136, %v2009_v13  ;;  %v1625_v10 = vmul.f32 0.40261996, %v7231_v35  ;;  %v2969_v39 = vadd.f32 %v7254_v62, %v2392_v41 }
 0x113   :  { %v2778_v23 = vmul.f32 0.05448869, %v2586_v8  ;;  %v2948_v58 = vadd.f32 %v2756_v45, %v2371_v18  ;;  %v1816_v29 = vadd.f32 %v1624_v40, %v1240_v57  ;;  %v7264_v4 = vmul.f32 0.24420136, %v7238_v11  ;;  %v473_v26 = vld [vmem:[#allocation2 + $0xd8] sm:$0xf] }
 0x114   :  { %v1241_v50 = vadd.f32 %v1049_v31, %v664_v48  ;;  %v7268_v20 = vmul.f32 0.05448869, %v7257_v47  ;;  %v665_v43 = vmul.f32 0.05448869, %v473_v26  ;;  %v858_v61 = vld [vmem:[#allocation2 + $0x198] sm:$0xf] }
 0x115   :  { %3140 = vst.msk [vmem:[#allocation2 + $0x18] sm:$0xf] %vm25_vm1, %v2948_v58  ;;  %v2393_v9 = vadd.f32 %v2201_v42, %v1816_v29  ;;  %v1050_v21 = vmul.f32 0.24420136, %v858_v61  ;;  %v1434_v45 = vld [vmem:[#allocation2 + $0x258] sm:$0xf] }
 0x116   :  { %v2011_v57 = vld [vmem:[#allocation2 + $0x318] sm:$0xf]  ;;  %v7271_v13 = vld [vmem:[#allocation2 + $0x480] sm:$0xff]  ;;  %3161 = vst.msk [vmem:[#allocation2 + $0xc0] sm:$0xff] %vm23_vm0, %v2969_v39  ;;  %v1817_v8 = vadd.f32 %v1625_v10, %v1241_v50  ;;  %v1626_v18 = vmul.f32 0.40261996, %v1434_v45 }
 0x117   :  { %v2203_v40 = vmul.f32 0.24420136, %v2011_v57  ;;  %v2588_v41 = vld [vmem:[#allocation2 + $0x3d8] sm:$0xf]  ;;  %v2970_v48 = vadd.f32 %v2778_v23, %v2393_v9  ;;  %v1242_v31 = vadd.f32 %v1050_v21, %v665_v43  ;;  %v686_v26 = vmul.f32 0.05448869, %v7215_v59 }
 0x118   :  { %v2780_v56 = vmul.f32 0.05448869, %v2588_v41  ;;  %v495_v12 = vld [vmem:[#allocation2 + $0x188] sm:$0xf]  ;;  %v2394_v58 = vadd.f32 %v7264_v4, %v1817_v8  ;;  %v1647_v42 = vmul.f32 0.40261996, %v7219_v27 }
 0x119   :  { %v7278_v29 = vmul.f32 0.24420136, %v7251_v55  ;;  %v2801_v61 = vmul.f32 0.05448869, %v7271_v13  ;;  %3162 = vst.msk [vmem:[#allocation2 + $0xc8] sm:$0xf] %vm25_vm1, %v2970_v48  ;;  %v1818_v10 = vadd.f32 %v1626_v18, %v1242_v31  ;;  %v1263_v39 = vadd.f32 %v7223_v52, %v686_v26 }
 0x11a   :  { %v687_v23 = vmul.f32 0.05448869, %v495_v12  ;;  %v880_v50 = vld [vmem:[#allocation2 + $0x248] sm:$0xf]  ;;  %v2971_v59 = vadd.f32 %v7268_v20, %v2394_v58  ;;  %v688_v0 = vmul.f32 0.05448869, %v7229_v49 }
 0x11b   :  { %v1456_v43 = vld [vmem:[#allocation2 + $0x308] sm:$0xf]  ;;  %v1072_v9 = vmul.f32 0.24420136, %v880_v50  ;;  %v2395_v57 = vadd.f32 %v2203_v40, %v1818_v10  ;;  %v1839_v27 = vadd.f32 %v1647_v42, %v1263_v39  ;;  %v1649_v52 = vmul.f32 0.40261996, %v7238_v11 }
 0x11c   :  { %v1648_v21 = vmul.f32 0.40261996, %v1456_v43  ;;  %v2033_v45 = vld [vmem:[#allocation2 + $0x3c8] sm:$0xf]  ;;  %3163 = vst.msk [vmem:[#allocation2 + $0xd0] sm:$0xff] %vm23_vm0, %v2971_v59  ;;  %v1265_v58 = vadd.f32 %v7235_v44, %v688_v0  ;;  %v7292_v40 = vld [vmem:[#allocation2 + $0x490] sm:$0xff] }
 0x11d   :  { %v2225_v8 = vmul.f32 0.24420136, %v2033_v45  ;;  %v2610_v41 = vld [vmem:[#allocation2 + $0x488] sm:$0xf]  ;;  %v1264_v48 = vadd.f32 %v1072_v9, %v687_v23  ;;  %v7288_v12 = vmul.f32 0.24420136, %v7257_v47  ;;  %v2972_v31 = vadd.f32 %v2780_v56, %v2395_v57 }
 0x11e   :  { %v2802_v18 = vmul.f32 0.05448869, %v2610_v41  ;;  %v2416_v26 = vadd.f32 %v7278_v29, %v1839_v27  ;;  %v497_v42 = vld [vmem:[#allocation2 + $0x198] sm:$0xf]  ;;  %v2803_v49 = vmul.f32 0.05448869, %v7292_v40  ;;  %v1841_v43 = vadd.f32 %v1649_v52, %v1265_v58 }
 0x11f   :  { %v882_v10 = vld [vmem:[#allocation2 + $0x258] sm:$0xf]  ;;  %v1840_v39 = vadd.f32 %v1648_v21, %v1264_v48  ;;  %v689_v50 = vmul.f32 0.05448869, %v497_v42  ;;  %3164 = vst.msk [vmem:[#allocation2 + $0xd8] sm:$0xf] %vm25_vm1, %v2972_v31 }
 0x120   :  { %v1074_v23 = vmul.f32 0.24420136, %v882_v10  ;;  %v2993_v11 = vadd.f32 %v2801_v61, %v2416_v26  ;;  %v1458_v59 = vld [vmem:[#allocation2 + $0x318] sm:$0xf]  ;;  %v7296_v44 = vld [vmem:[#allocation2 + $0x540] sm:$0xff]  ;;  %v2418_v21 = vadd.f32 %v7288_v12, %v1841_v43 }
 0x121   :  { %v2035_v9 = vld [vmem:[#allocation2 + $0x3d8] sm:$0xf]  ;;  %v2417_v45 = vadd.f32 %v2225_v8, %v1840_v39  ;;  %v1650_v27 = vmul.f32 0.40261996, %v1458_v59  ;;  %v710_v48 = vmul.f32 0.05448869, %v7217_v15 }
 0x122   :  { %v2612_v56 = vld [vmem:[#allocation2 + $0x498] sm:$0xf]  ;;  %v1266_v57 = vadd.f32 %v1074_v23, %v689_v50  ;;  %v2227_v0 = vmul.f32 0.24420136, %v2035_v9  ;;  %3185 = vst.msk [vmem:[#allocation2 + $0x180] sm:$0xff] %vm23_vm0, %v2993_v11  ;;  %v2995_v42 = vadd.f32 %v2803_v49, %v2418_v21 }
 0x123   :  { %v2804_v41 = vmul.f32 0.05448869, %v2612_v56  ;;  %v1671_v31 = vmul.f32 0.40261996, %v7251_v55  ;;  %v2994_v61 = vadd.f32 %v2802_v18, %v2417_v45  ;;  %v2248_v26 = vmul.f32 0.24420136, %v7271_v13 }
 0x124   :  { %v1842_v52 = vadd.f32 %v1650_v27, %v1266_v57  ;;  %v2825_v8 = vmul.f32 0.05448869, %v7296_v44  ;;  %v519_v58 = vld [vmem:[#allocation2 + $0x248] sm:$0xf]  ;;  %v1287_v10 = vadd.f32 %v7247_v2, %v710_v48  ;;  %v7306_v55 = vld [vmem:[#allocation2 + $0x550] sm:$0xff]  ;;  %3187 = vst.msk [vmem:[#allocation2 + $0x190] sm:$0xff] %vm23_vm0, %v2995_v42 }
 0x125   :  { %v711_v39 = vmul.f32 0.05448869, %v519_v58  ;;  %v904_v50 = vld [vmem:[#allocation2 + $0x308] sm:$0xf]  ;;  %3186 = vst.msk [vmem:[#allocation2 + $0x188] sm:$0xf] %vm25_vm1, %v2994_v61 }
 0x126   :  { %v1480_v23 = vld [vmem:[#allocation2 + $0x3c8] sm:$0xf]  ;;  %v2419_v11 = vadd.f32 %v2227_v0, %v1842_v52  ;;  %v1096_v43 = vmul.f32 0.24420136, %v904_v50  ;;  %v1863_v18 = vadd.f32 %v1671_v31, %v1287_v10  ;;  %v712_v49 = vmul.f32 0.05448869, %v7231_v35 }
 0x127   :  { %v1672_v15 = vmul.f32 0.40261996, %v1480_v23  ;;  %v2057_v59 = vld [vmem:[#allocation2 + $0x488] sm:$0xf]  ;;  %v1673_v27 = vmul.f32 0.40261996, %v7257_v47 }
 0x128   :  { %v2249_v9 = vmul.f32 0.24420136, %v2057_v59  ;;  %v2634_v56 = vld [vmem:[#allocation2 + $0x548] sm:$0xf]  ;;  %v2996_v45 = vadd.f32 %v2804_v41, %v2419_v11  ;;  %v1288_v2 = vadd.f32 %v1096_v43, %v711_v39  ;;  %v521_v21 = vld [vmem:[#allocation2 + $0x258] sm:$0xf]  ;;  %v2440_v48 = vadd.f32 %v2248_v26, %v1863_v18 }
 0x129   :  { %v2826_v57 = vmul.f32 0.05448869, %v2634_v56  ;;  %v1289_v0 = vadd.f32 %v7264_v4, %v712_v49  ;;  %v7313_v61 = vmul.f32 0.24420136, %v7292_v40  ;;  %v2827_v52 = vmul.f32 0.05448869, %v7306_v55 }
 0x12a   :  { %v906_v58 = vld [vmem:[#allocation2 + $0x318] sm:$0xf]  ;;  %3188 = vst.msk [vmem:[#allocation2 + $0x198] sm:$0xf] %vm25_vm1, %v2996_v45  ;;  %v1864_v31 = vadd.f32 %v1672_v15, %v1288_v2  ;;  %v713_v42 = vmul.f32 0.05448869, %v521_v21  ;;  %v3017_v10 = vadd.f32 %v2825_v8, %v2440_v48  ;;  %v1311_v4 = vadd.f32 %v7226_v3, %v7278_v29 }
 0x12b   :  { %v1098_v35 = vmul.f32 0.24420136, %v906_v58  ;;  %v1482_v41 = vld [vmem:[#allocation2 + $0x3d8] sm:$0xf]  ;;  %v1865_v39 = vadd.f32 %v1673_v27, %v1289_v0  ;;  %v2657_v56 = vld [vmem:[#allocation2 + $0x600] sm:$0xff]  ;;  %v7319_v49 = vld [vmem:[#allocation2 + $0x610] sm:$0xff]  ;;  %v1335_v0 = vadd.f32 %v7254_v62, %v2248_v26 }
 0x12c   :  { %v1674_v50 = vmul.f32 0.40261996, %v1482_v41  ;;  %v2059_v47 = vld [vmem:[#allocation2 + $0x498] sm:$0xf]  ;;  %v2441_v11 = vadd.f32 %v2249_v9, %v1864_v31  ;;  %3209 = vst.msk [vmem:[#allocation2 + $0x240] sm:$0xff] %vm23_vm0, %v3017_v10  ;;  %v1313_v9 = vadd.f32 %v7241_v22, %v7288_v12 }
 0x12d   :  { %v2636_v23 = vld [vmem:[#allocation2 + $0x558] sm:$0xf]  ;;  %v1290_v43 = vadd.f32 %v1098_v35, %v713_v42  ;;  %v2251_v59 = vmul.f32 0.24420136, %v2059_v47  ;;  %v2442_v15 = vadd.f32 %v7313_v61, %v1865_v39  ;;  %v1695_v8 = vmul.f32 0.40261996, %v7271_v13 }
 0x12e   :  { %v2828_v18 = vmul.f32 0.05448869, %v2636_v23  ;;  %v2272_v45 = vmul.f32 0.24420136, %v7296_v44  ;;  %v2849_v2 = vmul.f32 0.05448869, %v2657_v56  ;;  %v3018_v27 = vadd.f32 %v2826_v57, %v2441_v11 }
 0x12f   :  { %v1866_v21 = vadd.f32 %v1674_v50, %v1290_v43  ;;  %v543_v48 = vld [vmem:[#allocation2 + $0x308] sm:$0xf]  ;;  %v3019_v58 = vadd.f32 %v2827_v52, %v2442_v15  ;;  %v1887_v31 = vadd.f32 %v1695_v8, %v1311_v4  ;;  %v545_v41 = vld [vmem:[#allocation2 + $0x318] sm:$0xf]  ;;  %v1697_v57 = vmul.f32 0.40261996, %v7292_v40 }
 0x130   :  { %v928_v3 = vld [vmem:[#allocation2 + $0x3c8] sm:$0xf]  ;;  %v735_v42 = vmul.f32 0.05448869, %v543_v48  ;;  %3210 = vst.msk [vmem:[#allocation2 + $0x248] sm:$0xf] %vm25_vm1, %v3018_v27 }
 0x131   :  { %v1504_v29 = vld [vmem:[#allocation2 + $0x488] sm:$0xf]  ;;  %v1120_v35 = vmul.f32 0.24420136, %v928_v3  ;;  %v2443_v13 = vadd.f32 %v2251_v59, %v1866_v21  ;;  %v2274_v39 = vmul.f32 0.24420136, %v7306_v55  ;;  %v2464_v50 = vadd.f32 %v2272_v45, %v1887_v31 }
 0x132   :  { %v1696_v10 = vmul.f32 0.40261996, %v1504_v29  ;;  %3211 = vst.msk [vmem:[#allocation2 + $0x250] sm:$0xff] %vm23_vm0, %v3019_v58  ;;  %v2851_v22 = vmul.f32 0.05448869, %v7319_v49  ;;  %v1889_v52 = vadd.f32 %v1697_v57, %v1313_v9  ;;  %v7334_v8 = vld [vmem:[#allocation2 + $0x6c0] sm:$0xff]  ;;  %v1337_v58 = vadd.f32 %v7268_v20, %v7313_v61 }
 0x133   :  { %v1312_v47 = vadd.f32 %v1120_v35, %v735_v42  ;;  %v737_v62 = vmul.f32 0.05448869, %v545_v41  ;;  %v930_v12 = vld [vmem:[#allocation2 + $0x3d8] sm:$0xf]  ;;  %v3020_v26 = vadd.f32 %v2828_v18, %v2443_v13  ;;  %v1719_v11 = vmul.f32 0.40261996, %v7296_v44 }
 0x134   :  { %v1122_v23 = vmul.f32 0.24420136, %v930_v12  ;;  %v1506_v4 = vld [vmem:[#allocation2 + $0x498] sm:$0xf]  ;;  %v3041_v43 = vadd.f32 %v2849_v2, %v2464_v50  ;;  %v2296_v40 = vmul.f32 0.24420136, %v2657_v56  ;;  %v2466_v45 = vadd.f32 %v2274_v39, %v1889_v52 }
 0x135   :  { %v1888_v59 = vadd.f32 %v1696_v10, %v1312_v47  ;;  %v1698_v15 = vmul.f32 0.40261996, %v1506_v4  ;;  %v7336_v27 = vld [vmem:[#allocation2 + $0x6d0] sm:$0xff]  ;;  %3212 = vst.msk [vmem:[#allocation2 + $0x258] sm:$0xf] %vm25_vm1, %v3020_v26  ;;  %v1911_v48 = vadd.f32 %v1719_v11, %v1335_v0 }
 0x136   :  { %v1314_v21 = vadd.f32 %v1122_v23, %v737_v62  ;;  %v2873_v18 = vmul.f32 0.05448869, %v7334_v8  ;;  %v567_v3 = vld [vmem:[#allocation2 + $0x3c8] sm:$0xf]  ;;  %3233 = vst.msk [vmem:[#allocation2 + $0x300] sm:$0xff] %vm23_vm0, %v3041_v43  ;;  %v3043_v31 = vadd.f32 %v2851_v22, %v2466_v45  ;;  %v835_v43 = vld [vmem:[#allocation2 + $0xe0] sm:$0xff] }
 0x137   :  { %v952_v29 = vld [vmem:[#allocation2 + $0x488] sm:$0xf]  ;;  %v2465_v44 = vadd.f32 %v7089_v36, %v1888_v59  ;;  %v759_v2 = vmul.f32 0.05448869, %v567_v3  ;;  %v2488_v35 = vadd.f32 %v2296_v40, %v1911_v48  ;;  %v569_v0 = vld [vmem:[#allocation2 + $0x3d8] sm:$0xf] }
 0x138   :  { %v1144_v9 = vmul.f32 0.24420136, %v952_v29  ;;  %v1528_v56 = vld [vmem:[#allocation2 + $0x548] sm:$0xf]  ;;  %v1890_v42 = vadd.f32 %v1698_v15, %v1314_v21  ;;  %v1721_v50 = vmul.f32 0.40261996, %v7306_v55 }
 0x139   :  { %v1720_v41 = vmul.f32 0.40261996, %v1528_v56  ;;  %v2105_v13 = vld [vmem:[#allocation2 + $0x608] sm:$0xf]  ;;  %v3042_v10 = vadd.f32 %v6994_v30, %v2465_v44  ;;  %v954_v47 = vld [vmem:[#allocation2 + $0x498] sm:$0xf]  ;;  %v3065_v62 = vadd.f32 %v2873_v18, %v2488_v35 }
 0x13a   :  { %v1336_v57 = vadd.f32 %v1144_v9, %v759_v2  ;;  %v2297_v39 = vmul.f32 0.24420136, %v2105_v13  ;;  %3235 = vst.msk [vmem:[#allocation2 + $0x310] sm:$0xff] %vm23_vm0, %v3043_v31  ;;  %v2467_v36 = vadd.f32 %v7091_v1, %v1890_v42  ;;  %v2298_v20 = vmul.f32 0.24420136, %v7319_v49  ;;  %v450_v1 = vld [vmem:[#allocation2 + $0x20] sm:$0xff] }
 0x13b   :  { %v2875_v61 = vmul.f32 0.05448869, %v7336_v27  ;;  %v1530_v22 = vld [vmem:[#allocation2 + $0x558] sm:$0xf]  ;;  %3234 = vst.msk [vmem:[#allocation2 + $0x308] sm:$0xf] %vm25_vm1, %v3042_v10  ;;  %v1913_v26 = vadd.f32 %v1721_v50, %v1337_v58 }
 0x13c   :  { %v1912_v12 = vadd.f32 %v1720_v41, %v1336_v57  ;;  %v761_v30 = vmul.f32 0.05448869, %v569_v0  ;;  %v1146_v52 = vmul.f32 0.24420136, %v954_v47  ;;  %v2107_v23 = vld [vmem:[#allocation2 + $0x618] sm:$0xf]  ;;  %v3044_v55 = vadd.f32 %v6996_v32, %v2467_v36 }
 0x13d   :  { %3257 = vst.msk [vmem:[#allocation2 + $0x3c0] sm:$0xff] %vm23_vm0, %v3065_v62  ;;  %v1722_v4 = vmul.f32 0.40261996, %v1530_v22  ;;  %v2299_v11 = vmul.f32 0.24420136, %v2107_v23  ;;  %v2490_v49 = vadd.f32 %v2298_v20, %v1913_v26  ;;  %v1411_v45 = vld [vmem:[#allocation2 + $0x1a0] sm:$0xff] }
 0x13e   :  { %v2489_v59 = vadd.f32 %v2297_v39, %v1912_v12  ;;  %v1338_v15 = vadd.f32 %v1146_v52, %v761_v30  ;;  %v642_v40 = vmul.f32 0.05448869, %v450_v1  ;;  %v1988_v21 = vld [vmem:[#allocation2 + $0x260] sm:$0xff]  ;;  %3236 = vst.msk [vmem:[#allocation2 + $0x318] sm:$0xf] %vm25_vm1, %v3044_v55  ;;  %v452_v36 = vld [vmem:[#allocation2 + $0x30] sm:$0xff] }
 0x13f   :  { %v2565_v48 = vld [vmem:[#allocation2 + $0x320] sm:$0xff]  ;;  %v1027_v18 = vmul.f32 0.24420136, %v835_v43  ;;  %v1603_v3 = vmul.f32 0.40261996, %v1411_v45  ;;  %v3067_v44 = vadd.f32 %v2875_v61, %v2490_v49  ;;  %v837_v62 = vld [vmem:[#allocation2 + $0xf0] sm:$0xff] }
 0x140   :  { %v2180_v29 = vmul.f32 0.24420136, %v1988_v21  ;;  %v3066_v32 = vadd.f32 %v6998_v33, %v2489_v59  ;;  %v1914_v2 = vadd.f32 %v1722_v4, %v1338_v15  ;;  %v2757_v9 = vmul.f32 0.05448869, %v2565_v48  ;;  %v451_v56 = vld [vmem:[#allocation2 + $0x28] sm:$0xf] }
 0x141   :  { %v836_v58 = vld [vmem:[#allocation2 + $0xe8] sm:$0xf]  ;;  %v1219_v31 = vadd.f32 %v1027_v18, %v642_v40  ;;  %v643_v42 = vmul.f32 0.05448869, %v451_v56  ;;  %3259 = vst.msk [vmem:[#allocation2 + $0x3d0] sm:$0xff] %vm23_vm0, %v3067_v44  ;;  %v1413_v12 = vld [vmem:[#allocation2 + $0x1b0] sm:$0xff] }
 0x142   :  { %v1028_v35 = vmul.f32 0.24420136, %v836_v58  ;;  %v1412_v41 = vld [vmem:[#allocation2 + $0x1a8] sm:$0xf]  ;;  %3258 = vst.msk [vmem:[#allocation2 + $0x3c8] sm:$0xf] %vm25_vm1, %v3066_v32  ;;  %v2491_v13 = vadd.f32 %v2299_v11, %v1914_v2 }
 0x143   :  { %v1604_v0 = vmul.f32 0.40261996, %v1412_v41  ;;  %v1989_v10 = vld [vmem:[#allocation2 + $0x268] sm:$0xf]  ;;  %v1795_v39 = vadd.f32 %v1603_v3, %v1219_v31  ;;  %v644_v61 = vmul.f32 0.05448869, %v452_v36 }
 0x144   :  { %v2566_v57 = vld [vmem:[#allocation2 + $0x328] sm:$0xf]  ;;  %v1220_v50 = vadd.f32 %v1028_v35, %v643_v42  ;;  %v2181_v33 = vmul.f32 0.24420136, %v1989_v10  ;;  %v3068_v20 = vadd.f32 %v7000_v34, %v2491_v13  ;;  %v1029_v22 = vmul.f32 0.24420136, %v837_v62 }
 0x145   :  { %v2758_v47 = vmul.f32 0.05448869, %v2566_v57  ;;  %v1990_v26 = vld [vmem:[#allocation2 + $0x270] sm:$0xff]  ;;  %v2372_v30 = vadd.f32 %v2180_v29, %v1795_v39  ;;  %v1605_v23 = vmul.f32 0.40261996, %v1413_v12  ;;  %v454_v59 = vld [vmem:[#allocation2 + $0x40] sm:$0xff] }
 0x146   :  { %v1796_v52 = vadd.f32 %v1604_v0, %v1220_v50  ;;  %v2182_v55 = vmul.f32 0.24420136, %v1990_v26  ;;  %v2567_v4 = vld [vmem:[#allocation2 + $0x330] sm:$0xff]  ;;  %3260 = vst.msk [vmem:[#allocation2 + $0x3d8] sm:$0xf] %vm25_vm1, %v3068_v20  ;;  %v1221_v11 = vadd.f32 %v1029_v22, %v644_v61  ;;  %v839_v56 = vld [vmem:[#allocation2 + $0x100] sm:$0xff] }
 0x147   :  { %v453_v1 = vld [vmem:[#allocation2 + $0x38] sm:$0xf]  ;;  %v2949_v49 = vadd.f32 %v2757_v9, %v2372_v30  ;;  %v2759_v32 = vmul.f32 0.05448869, %v2567_v4  ;;  %v1415_v58 = vld [vmem:[#allocation2 + $0x1c0] sm:$0xff] }
 0x148   :  { %v838_v43 = vld [vmem:[#allocation2 + $0xf8] sm:$0xf]  ;;  %v2373_v15 = vadd.f32 %v2181_v33, %v1796_v52  ;;  %v645_v40 = vmul.f32 0.05448869, %v453_v1  ;;  %v1797_v21 = vadd.f32 %v1605_v23, %v1221_v11  ;;  %v646_v42 = vmul.f32 0.05448869, %v454_v59 }
 0x149   :  { %v1030_v45 = vmul.f32 0.24420136, %v838_v43  ;;  %v1414_v34 = vld [vmem:[#allocation2 + $0x1b8] sm:$0xf]  ;;  %3141 = vst.msk [vmem:[#allocation2 + $0x20] sm:$0xff] %vm23_vm0, %v2949_v49  ;;  %v1992_v0 = vld [vmem:[#allocation2 + $0x280] sm:$0xff] }
 0x14a   :  { %v1606_v48 = vmul.f32 0.40261996, %v1414_v34  ;;  %v1991_v18 = vld [vmem:[#allocation2 + $0x278] sm:$0xf]  ;;  %v2950_v29 = vadd.f32 %v2758_v47, %v2373_v15  ;;  %v2374_v31 = vadd.f32 %v2182_v55, %v1797_v21  ;;  %v1031_v35 = vmul.f32 0.24420136, %v839_v56 }
 0x14b   :  { %v2568_v3 = vld [vmem:[#allocation2 + $0x338] sm:$0xf]  ;;  %v1222_v44 = vadd.f32 %v1030_v45, %v645_v40  ;;  %v2183_v2 = vmul.f32 0.24420136, %v1991_v18  ;;  %v1607_v9 = vmul.f32 0.40261996, %v1415_v58 }
 0x14c   :  { %3142 = vst.msk [vmem:[#allocation2 + $0x28] sm:$0xf] %vm25_vm1, %v2950_v29  ;;  %v2760_v13 = vmul.f32 0.05448869, %v2568_v3  ;;  %v2569_v10 = vld [vmem:[#allocation2 + $0x340] sm:$0xff]  ;;  %v2951_v39 = vadd.f32 %v2759_v32, %v2374_v31  ;;  %v1223_v50 = vadd.f32 %v1031_v35, %v646_v42  ;;  %v456_v1 = vld [vmem:[#allocation2 + $0x50] sm:$0xff] }
 0x14d   :  { %v1798_v41 = vadd.f32 %v1606_v48, %v1222_v44  ;;  %v455_v57 = vld [vmem:[#allocation2 + $0x48] sm:$0xf]  ;;  %v2184_v33 = vmul.f32 0.24420136, %v1992_v0  ;;  %v2761_v47 = vmul.f32 0.05448869, %v2569_v10 }
 0x14e   :  { %v840_v36 = vld [vmem:[#allocation2 + $0x108] sm:$0xf]  ;;  %v647_v20 = vmul.f32 0.05448869, %v455_v57  ;;  %3143 = vst.msk [vmem:[#allocation2 + $0x30] sm:$0xff] %vm23_vm0, %v2951_v39  ;;  %v1799_v12 = vadd.f32 %v1607_v9, %v1223_v50  ;;  %v841_v43 = vld [vmem:[#allocation2 + $0x110] sm:$0xff] }
 0x14f   :  { %v2375_v62 = vadd.f32 %v2183_v2, %v1798_v41  ;;  %v1032_v61 = vmul.f32 0.24420136, %v840_v36  ;;  %v1416_v22 = vld [vmem:[#allocation2 + $0x1c8] sm:$0xf]  ;;  %v648_v49 = vmul.f32 0.05448869, %v456_v1 }
 0x150   :  { %v1608_v26 = vmul.f32 0.40261996, %v1416_v22  ;;  %v1993_v30 = vld [vmem:[#allocation2 + $0x288] sm:$0xf]  ;;  %v2376_v59 = vadd.f32 %v2184_v33, %v1799_v12  ;;  %v1033_v15 = vmul.f32 0.24420136, %v841_v43 }
 0x151   :  { %v2570_v52 = vld [vmem:[#allocation2 + $0x348] sm:$0xf]  ;;  %v2952_v23 = vadd.f32 %v2760_v13, %v2375_v62  ;;  %v1224_v55 = vadd.f32 %v1032_v61, %v647_v20  ;;  %v2185_v4 = vmul.f32 0.24420136, %v1993_v30  ;;  %v1417_v40 = vld [vmem:[#allocation2 + $0x1d0] sm:$0xff]  ;;  %v458_v2 = vld [vmem:[#allocation2 + $0x60] sm:$0xff] }
 0x152   :  { %v2762_v11 = vmul.f32 0.05448869, %v2570_v52  ;;  %v1994_v45 = vld [vmem:[#allocation2 + $0x290] sm:$0xff]  ;;  %v1609_v21 = vmul.f32 0.40261996, %v1417_v40  ;;  %v2953_v3 = vadd.f32 %v2761_v47, %v2376_v59  ;;  %v1225_v29 = vadd.f32 %v1033_v15, %v648_v49  ;;  %v843_v50 = vld [vmem:[#allocation2 + $0x120] sm:$0xff] }
 0x153   :  { %3144 = vst.msk [vmem:[#allocation2 + $0x38] sm:$0xf] %vm25_vm1, %v2952_v23  ;;  %v1800_v34 = vadd.f32 %v1608_v26, %v1224_v55  ;;  %v2186_v48 = vmul.f32 0.24420136, %v1994_v45  ;;  %v2571_v18 = vld [vmem:[#allocation2 + $0x350] sm:$0xff]  ;;  %v1419_v33 = vld [vmem:[#allocation2 + $0x1e0] sm:$0xff] }
 0x154   :  { %v457_v32 = vld [vmem:[#allocation2 + $0x58] sm:$0xf]  ;;  %3145 = vst.msk [vmem:[#allocation2 + $0x40] sm:$0xff] %vm23_vm0, %v2953_v3  ;;  %v1801_v35 = vadd.f32 %v1609_v21, %v1225_v29  ;;  %v2763_v10 = vmul.f32 0.05448869, %v2571_v18  ;;  %v1996_v12 = vld [vmem:[#allocation2 + $0x2a0] sm:$0xff] }
 0x155   :  { %v842_v44 = vld [vmem:[#allocation2 + $0x118] sm:$0xf]  ;;  %v2377_v56 = vadd.f32 %v2185_v4, %v1800_v34  ;;  %v649_v58 = vmul.f32 0.05448869, %v457_v32  ;;  %v650_v36 = vmul.f32 0.05448869, %v458_v2 }
 0x156   :  { %v1034_v31 = vmul.f32 0.24420136, %v842_v44  ;;  %v1418_v42 = vld [vmem:[#allocation2 + $0x1d8] sm:$0xf]  ;;  %v2378_v47 = vadd.f32 %v2186_v48, %v1801_v35  ;;  %v1035_v62 = vmul.f32 0.24420136, %v843_v50 }
 0x157   :  { %v1610_v9 = vmul.f32 0.40261996, %v1418_v42  ;;  %v1995_v41 = vld [vmem:[#allocation2 + $0x298] sm:$0xf]  ;;  %v2954_v0 = vadd.f32 %v2762_v11, %v2377_v56  ;;  %v1611_v20 = vmul.f32 0.40261996, %v1419_v33 }
 0x158   :  { %v2572_v13 = vld [vmem:[#allocation2 + $0x358] sm:$0xf]  ;;  %v1226_v57 = vadd.f32 %v1034_v31, %v649_v58  ;;  %v2187_v39 = vmul.f32 0.24420136, %v1995_v41  ;;  %v2573_v26 = vld [vmem:[#allocation2 + $0x360] sm:$0xff]  ;;  %v2955_v52 = vadd.f32 %v2763_v10, %v2378_v47  ;;  %v1227_v23 = vadd.f32 %v1035_v62, %v650_v36  ;;  %v460_v29 = vld [vmem:[#allocation2 + $0x70] sm:$0xff] }
 0x159   :  { %3146 = vst.msk [vmem:[#allocation2 + $0x48] sm:$0xf] %vm25_vm1, %v2954_v0  ;;  %v2764_v22 = vmul.f32 0.05448869, %v2572_v13  ;;  %v459_v30 = vld [vmem:[#allocation2 + $0x68] sm:$0xf] }
 0x15a   :  { %v1802_v61 = vadd.f32 %v1610_v9, %v1226_v57  ;;  %v2188_v55 = vmul.f32 0.24420136, %v1996_v12  ;;  %v2765_v4 = vmul.f32 0.05448869, %v2573_v26  ;;  %v844_v11 = vld [vmem:[#allocation2 + $0x128] sm:$0xf]  ;;  %v1803_v15 = vadd.f32 %v1611_v20, %v1227_v23 }
 0x15b   :  { %v651_v43 = vmul.f32 0.05448869, %v459_v30  ;;  %v1036_v59 = vmul.f32 0.24420136, %v844_v11  ;;  %v1420_v49 = vld [vmem:[#allocation2 + $0x1e8] sm:$0xf] }
 0x15c   :  { %v2379_v1 = vadd.f32 %v2187_v39, %v1802_v61  ;;  %3147 = vst.msk [vmem:[#allocation2 + $0x50] sm:$0xff] %vm23_vm0, %v2955_v52  ;;  %v1612_v40 = vmul.f32 0.40261996, %v1420_v49  ;;  %v1997_v45 = vld [vmem:[#allocation2 + $0x2a8] sm:$0xf]  ;;  %v845_v32 = vld [vmem:[#allocation2 + $0x130] sm:$0xff]  ;;  %v2380_v44 = vadd.f32 %v2188_v55, %v1803_v15 }
 0x15d   :  { %v2574_v34 = vld [vmem:[#allocation2 + $0x368] sm:$0xf]  ;;  %v1228_v48 = vadd.f32 %v1036_v59, %v651_v43  ;;  %v2189_v18 = vmul.f32 0.24420136, %v1997_v45  ;;  %v652_v2 = vmul.f32 0.05448869, %v460_v29 }
 0x15e   :  { %v2956_v21 = vadd.f32 %v2764_v22, %v2379_v1  ;;  %v2766_v3 = vmul.f32 0.05448869, %v2574_v34  ;;  %v1037_v56 = vmul.f32 0.24420136, %v845_v32  ;;  %v1421_v58 = vld [vmem:[#allocation2 + $0x1f0] sm:$0xff]  ;;  %v2957_v13 = vadd.f32 %v2765_v4, %v2380_v44  ;;  %v462_v39 = vld [vmem:[#allocation2 + $0x80] sm:$0xff] }
 0x15f   :  { %v1998_v31 = vld [vmem:[#allocation2 + $0x2b0] sm:$0xff]  ;;  %v1804_v42 = vadd.f32 %v1612_v40, %v1228_v48  ;;  %v1613_v35 = vmul.f32 0.40261996, %v1421_v58  ;;  %v461_v10 = vld [vmem:[#allocation2 + $0x78] sm:$0xf]  ;;  %v847_v23 = vld [vmem:[#allocation2 + $0x140] sm:$0xff] }
 0x160   :  { %3148 = vst.msk [vmem:[#allocation2 + $0x58] sm:$0xf] %vm25_vm1, %v2956_v21  ;;  %v2190_v9 = vmul.f32 0.24420136, %v1998_v31  ;;  %v2575_v41 = vld [vmem:[#allocation2 + $0x370] sm:$0xff]  ;;  %v1229_v0 = vadd.f32 %v1037_v56, %v652_v2  ;;  %v1423_v55 = vld [vmem:[#allocation2 + $0x200] sm:$0xff] }
 0x161   :  { %v846_v57 = vld [vmem:[#allocation2 + $0x138] sm:$0xf]  ;;  %v2381_v50 = vadd.f32 %v2189_v18, %v1804_v42  ;;  %v653_v33 = vmul.f32 0.05448869, %v461_v10  ;;  %3149 = vst.msk [vmem:[#allocation2 + $0x60] sm:$0xff] %vm23_vm0, %v2957_v13  ;;  %v2000_v40 = vld [vmem:[#allocation2 + $0x2c0] sm:$0xff] }
 0x162   :  { %v1038_v47 = vmul.f32 0.24420136, %v846_v57  ;;  %v1422_v36 = vld [vmem:[#allocation2 + $0x1f8] sm:$0xf]  ;;  %v1805_v62 = vadd.f32 %v1613_v35, %v1229_v0  ;;  %v2767_v26 = vmul.f32 0.05448869, %v2575_v41 }
 0x163   :  { %v1614_v20 = vmul.f32 0.40261996, %v1422_v36  ;;  %v1999_v61 = vld [vmem:[#allocation2 + $0x2b8] sm:$0xf]  ;;  %v2958_v12 = vadd.f32 %v2766_v3, %v2381_v50  ;;  %v654_v1 = vmul.f32 0.05448869, %v462_v39 }
 0x164   :  { %v2576_v22 = vld [vmem:[#allocation2 + $0x378] sm:$0xf]  ;;  %v1230_v30 = vadd.f32 %v1038_v47, %v653_v33  ;;  %v2191_v52 = vmul.f32 0.24420136, %v1999_v61  ;;  %v2382_v11 = vadd.f32 %v2190_v9, %v1805_v62  ;;  %v1039_v43 = vmul.f32 0.24420136, %v847_v23 }
 0x165   :  { %v2135_v4 = vld [vmem:[#allocation2 + $0x6f8] sm:$0xf]  ;;  %v1615_v59 = vmul.f32 0.40261996, %v1423_v55  ;;  %3150 = vst.msk [vmem:[#allocation2 + $0x68] sm:$0xf] %vm25_vm1, %v2958_v12 }
 0x166   :  { %v1806_v49 = vadd.f32 %v1614_v20, %v1230_v30  ;;  %v2768_v15 = vmul.f32 0.05448869, %v2576_v22  ;;  %v463_v45 = vld [vmem:[#allocation2 + $0x88] sm:$0xf]  ;;  %v2959_v34 = vadd.f32 %v2767_v26, %v2382_v11  ;;  %v1231_v21 = vadd.f32 %v1039_v43, %v654_v1  ;;  %v2577_v18 = vld [vmem:[#allocation2 + $0x380] sm:$0xff]  ;;  %v464_v0 = vld [vmem:[#allocation2 + $0x90] sm:$0xff] }
 0x167   :  { %v2192_v48 = vmul.f32 0.24420136, %v2000_v40  ;;  %v848_v3 = vld [vmem:[#allocation2 + $0x148] sm:$0xf]  ;;  %v655_v32 = vmul.f32 0.05448869, %v463_v45 }
 0x168   :  { %v2383_v29 = vadd.f32 %v2191_v52, %v1806_v49  ;;  %v1040_v44 = vmul.f32 0.24420136, %v848_v3  ;;  %v1424_v2 = vld [vmem:[#allocation2 + $0x208] sm:$0xf]  ;;  %3151 = vst.msk [vmem:[#allocation2 + $0x70] sm:$0xff] %vm23_vm0, %v2959_v34  ;;  %v1807_v56 = vadd.f32 %v1615_v59, %v1231_v21  ;;  %v849_v10 = vld [vmem:[#allocation2 + $0x150] sm:$0xff] }
 0x169   :  { %v1616_v58 = vmul.f32 0.40261996, %v1424_v2  ;;  %v2001_v31 = vld [vmem:[#allocation2 + $0x2c8] sm:$0xf]  ;;  %v7370_v35 = vmul.f32 0.24420136, %v2135_v4 }
 0x16a   :  { %v2578_v42 = vld [vmem:[#allocation2 + $0x388] sm:$0xf]  ;;  %v2960_v9 = vadd.f32 %v2768_v15, %v2383_v29  ;;  %v2769_v41 = vmul.f32 0.05448869, %v2577_v18  ;;  %v1232_v13 = vadd.f32 %v1040_v44, %v655_v32  ;;  %v2384_v57 = vadd.f32 %v2192_v48, %v1807_v56  ;;  %v1425_v33 = vld [vmem:[#allocation2 + $0x210] sm:$0xff]  ;;  %v466_v23 = vld [vmem:[#allocation2 + $0xa0] sm:$0xff] }
 0x16b   :  { %8952 = vst [vmem:[#allocation114_spill] sm:$0xff] %v7370_v35  ;;  %v656_v39 = vmul.f32 0.05448869, %v464_v0  ;;  %v1041_v50 = vmul.f32 0.24420136, %v849_v10  ;;  %v2002_v47 = vld [vmem:[#allocation2 + $0x2d0] sm:$0xff] }
 0x16c   :  { %3152 = vst.msk [vmem:[#allocation2 + $0x78] sm:$0xf] %vm25_vm1, %v2960_v9  ;;  %v1808_v36 = vadd.f32 %v1616_v58, %v1232_v13  ;;  %v2193_v62 = vmul.f32 0.24420136, %v2001_v31  ;;  %v2770_v20 = vmul.f32 0.05448869, %v2578_v42  ;;  %v2961_v22 = vadd.f32 %v2769_v41, %v2384_v57 }
 0x16d   :  { %v1617_v61 = vmul.f32 0.40261996, %v1425_v33  ;;  %v1233_v12 = vadd.f32 %v1041_v50, %v656_v39  ;;  %v2194_v26 = vmul.f32 0.24420136, %v2002_v47  ;;  %v2579_v30 = vld [vmem:[#allocation2 + $0x390] sm:$0xff]  ;;  %v851_v44 = vld [vmem:[#allocation2 + $0x160] sm:$0xff] }
 0x16e   :  { %v465_v52 = vld [vmem:[#allocation2 + $0x98] sm:$0xf]  ;;  %v1584_v4 = vld [vmem:[#allocation2 + $0x708] sm:$0xf]  ;;  %v2385_v11 = vadd.f32 %v2193_v62, %v1808_v36  ;;  %3153 = vst.msk [vmem:[#allocation2 + $0x80] sm:$0xff] %vm23_vm0, %v2961_v22  ;;  %v1427_v2 = vld [vmem:[#allocation2 + $0x220] sm:$0xff] }
 0x16f   :  { %v2688_v55 = vld [vmem:[#allocation2 + $0x6f8] sm:$0xf]  ;;  %v657_v1 = vmul.f32 0.05448869, %v465_v52  ;;  %v1809_v49 = vadd.f32 %v1617_v61, %v1233_v12  ;;  %v2771_v21 = vmul.f32 0.05448869, %v2579_v30 }
 0x170   :  { %v850_v43 = vld [vmem:[#allocation2 + $0x158] sm:$0xf]  ;;  %v2962_v34 = vadd.f32 %v2770_v20, %v2385_v11  ;;  %v658_v18 = vmul.f32 0.05448869, %v466_v23  ;;  %v7374_v56 = vld [vmem:[#allocation2 + $0x2e0] sm:$0xff]  ;;  %v6235_v58 = vld [vmem:[#allocation2 + $0x6f0] sm:$0xff] }
 0x171   :  { %v1426_v59 = vld [vmem:[#allocation2 + $0x218] sm:$0xf]  ;;  %v1042_v15 = vmul.f32 0.24420136, %v850_v43  ;;  %v2386_v3 = vadd.f32 %v2194_v26, %v1809_v49  ;;  %v7376_v31 = vmul.f32 0.05448869, %v6235_v58 }
 0x172   :  { %v1618_v40 = vmul.f32 0.40261996, %v1426_v59  ;;  %v2003_v45 = vld [vmem:[#allocation2 + $0x2d8] sm:$0xf]  ;;  %3154 = vst.msk [vmem:[#allocation2 + $0x88] sm:$0xf] %vm25_vm1, %v2962_v34 }
 0x173   :  { %v2580_v48 = vld [vmem:[#allocation2 + $0x398] sm:$0xf]  ;;  %v1234_v29 = vadd.f32 %v1042_v15, %v657_v1  ;;  %v2195_v32 = vmul.f32 0.24420136, %v2003_v45  ;;  %8953 = vst [vmem:[#allocation115_spill] sm:$0xff] %v7376_v31  ;;  %v2963_v0 = vadd.f32 %v2771_v21, %v2386_v3  ;;  %v1583_v47 = vld [vmem:[#allocation2 + $0x700] sm:$0xff] }
 0x174   :  { %v1043_v42 = vmul.f32 0.24420136, %v851_v44  ;;  %v1619_v9 = vmul.f32 0.40261996, %v1427_v2  ;;  %v7379_v41 = vmul.f32 0.05448869, %v2688_v55 }
 0x175   :  { %v7381_v13 = vmul.f32 0.40261996, %v1584_v4  ;;  %v1810_v10 = vadd.f32 %v1618_v40, %v1234_v29  ;;  %v2772_v57 = vmul.f32 0.05448869, %v2580_v48  ;;  %v2196_v50 = vmul.f32 0.24420136, %v7374_v56 }
 0x176   :  { %8954 = vst [vmem:[#allocation116_spill] sm:$0xff] %v7379_v41  ;;  %v1235_v39 = vadd.f32 %v1043_v42, %v658_v18  ;;  %v467_v33 = vld [vmem:[#allocation2 + $0xa8] sm:$0xf]  ;;  %3155 = vst.msk [vmem:[#allocation2 + $0x90] sm:$0xff] %vm23_vm0, %v2963_v0  ;;  %v2581_v62 = vld [vmem:[#allocation2 + $0x3a0] sm:$0xff] }
 0x177   :  { %8955 = vst [vmem:[#allocation117_spill] sm:$0xff] %v7381_v13  ;;  %v2387_v36 = vadd.f32 %v2195_v32, %v1810_v10  ;;  %v659_v20 = vmul.f32 0.05448869, %v467_v33  ;;  %v852_v61 = vld [vmem:[#allocation2 + $0x168] sm:$0xf]  ;;  %v7487_v13 = vld [vmem:[#allocation2 + $0x330] sm:$0xff] }
 0x178   :  { %v1811_v22 = vadd.f32 %v1619_v9, %v1235_v39  ;;  %v1044_v12 = vmul.f32 0.24420136, %v852_v61  ;;  %v1428_v26 = vld [vmem:[#allocation2 + $0x228] sm:$0xf]  ;;  %v7385_v1 = vmul.f32 0.05448869, %v2581_v62 }
 0x179   :  { %v2005_v30 = vld [vmem:[#allocation2 + $0x2e8] sm:$0xf]  ;;  %v2964_v23 = vadd.f32 %v2772_v57, %v2387_v36  ;;  %v1620_v55 = vmul.f32 0.40261996, %v1428_v26  ;;  %v7387_v49 = vmul.f32 0.24420136, %v1583_v47 }
 0x17a   :  { %v2137_v52 = vld [vmem:[#allocation2 + $0x708] sm:$0xf]  ;;  %v2388_v11 = vadd.f32 %v2196_v50, %v1811_v22  ;;  %v1236_v43 = vadd.f32 %v1044_v12, %v659_v20  ;;  %v2197_v59 = vmul.f32 0.24420136, %v2005_v30  ;;  %v682_v15 = vmul.f32 0.05448869, %v851_v44 }
 0x17b   :  { %v2582_v4 = vld [vmem:[#allocation2 + $0x3a8] sm:$0xf]  ;;  %8956 = vst [vmem:[#allocation118_spill] sm:$0xff] %v7387_v49  ;;  %3156 = vst.msk [vmem:[#allocation2 + $0x98] sm:$0xf] %vm25_vm1, %v2964_v23  ;;  %v2605_v36 = vld [vmem:[#allocation2 + $0x460] sm:$0xff] }
 0x17c   :  { %v491_v40 = vld [vmem:[#allocation2 + $0x168] sm:$0xf]  ;;  %v7390_v45 = vmul.f32 0.24420136, %v2137_v52  ;;  %v2965_v34 = vadd.f32 %v7385_v1, %v2388_v11  ;;  %v1812_v21 = vadd.f32 %v1620_v55, %v1236_v43  ;;  %v2774_v48 = vmul.f32 0.05448869, %v2582_v4 }
 0x17d   :  { %v876_v18 = vld [vmem:[#allocation2 + $0x228] sm:$0xf]  ;;  %v1067_v29 = vmul.f32 0.24420136, %v1427_v2  ;;  %v1643_v32 = vmul.f32 0.40261996, %v7374_v56 }
 0x17e   :  { %8957 = vst [vmem:[#allocation119_spill] sm:$0xff] %v7390_v45  ;;  %v2690_v3 = vld [vmem:[#allocation2 + $0x708] sm:$0xf]  ;;  %3157 = vst.msk [vmem:[#allocation2 + $0xa0] sm:$0xff] %vm23_vm0, %v2965_v34  ;;  %v2389_v58 = vadd.f32 %v2197_v59, %v1812_v21  ;;  %v2220_v42 = vmul.f32 0.24420136, %v2581_v62 }
 0x17f   :  { %v683_v9 = vmul.f32 0.05448869, %v491_v40  ;;  %v1068_v0 = vmul.f32 0.24420136, %v876_v18  ;;  %v1259_v10 = vadd.f32 %v1067_v29, %v682_v15  ;;  %v1452_v44 = vld [vmem:[#allocation2 + $0x2e8] sm:$0xf] }
 0x180   :  { %v2029_v57 = vld [vmem:[#allocation2 + $0x3a8] sm:$0xf]  ;;  %v2966_v33 = vadd.f32 %v2774_v48, %v2389_v58  ;;  %v1644_v61 = vmul.f32 0.40261996, %v1452_v44  ;;  %v2797_v26 = vmul.f32 0.05448869, %v2605_v36 }
 0x181   :  { %v2606_v39 = vld [vmem:[#allocation2 + $0x468] sm:$0xf]  ;;  %v1260_v20 = vadd.f32 %v1068_v0, %v683_v9  ;;  %v2221_v22 = vmul.f32 0.24420136, %v2029_v57  ;;  %v1835_v12 = vadd.f32 %v1643_v32, %v1259_v10  ;;  %v706_v30 = vmul.f32 0.05448869, %v1427_v2 }
 0x182   :  { %v1667_v52 = vmul.f32 0.40261996, %v2581_v62  ;;  %v7395_v23 = vmul.f32 0.05448869, %v1583_v47  ;;  %v7397_v55 = vmul.f32 0.05448869, %v2690_v3 }
 0x183   :  { %3158 = vst.msk [vmem:[#allocation2 + $0xa8] sm:$0xf] %vm25_vm1, %v2966_v33  ;;  %v1836_v4 = vadd.f32 %v1644_v61, %v1260_v20  ;;  %v2798_v11 = vmul.f32 0.05448869, %v2606_v39  ;;  %v7400_v43 = vld [vmem:[#allocation2 + $0x710] sm:$0xff]  ;;  %v2412_v15 = vadd.f32 %v2220_v42, %v1835_v12  ;;  %v1283_v40 = vadd.f32 %v2196_v50, %v706_v30  ;;  %v2629_v34 = vld [vmem:[#allocation2 + $0x520] sm:$0xff] }
 0x184   :  { %8958 = vst [vmem:[#allocation120_spill] sm:$0xff] %v7395_v23  ;;  %8959 = vst [vmem:[#allocation121_spill] sm:$0xff] %v7397_v55  ;;  %v1586_v59 = vld [vmem:[#allocation2 + $0x718] sm:$0xf]  ;;  %v515_v21 = vld [vmem:[#allocation2 + $0x228] sm:$0xf] }
 0x185   :  { %v2413_v48 = vadd.f32 %v2221_v22, %v1836_v4  ;;  %v2244_v18 = vmul.f32 0.24420136, %v2605_v36  ;;  %v2821_v29 = vmul.f32 0.05448869, %v2629_v34  ;;  %v707_v2 = vmul.f32 0.05448869, %v515_v21 }
 0x186   :  { %v2989_v62 = vadd.f32 %v2797_v26, %v2412_v15  ;;  %v1859_v47 = vadd.f32 %v1667_v52, %v1283_v40  ;;  %v900_v32 = vld [vmem:[#allocation2 + $0x2e8] sm:$0xf]  ;;  %v7402_v9 = vmul.f32 0.40261996, %v1586_v59  ;;  %v730_v39 = vmul.f32 0.05448869, %v7374_v56 }
 0x187   :  { %v1476_v3 = vld [vmem:[#allocation2 + $0x3a8] sm:$0xf]  ;;  %v2990_v0 = vadd.f32 %v2798_v11, %v2413_v48  ;;  %v1092_v10 = vmul.f32 0.24420136, %v900_v32  ;;  %v1691_v33 = vmul.f32 0.40261996, %v2605_v36 }
 0x188   :  { %v2053_v58 = vld [vmem:[#allocation2 + $0x468] sm:$0xf]  ;;  %8960 = vst [vmem:[#allocation122_spill] sm:$0xff] %v7402_v9  ;;  %v1668_v44 = vmul.f32 0.40261996, %v1476_v3  ;;  %3181 = vst.msk [vmem:[#allocation2 + $0x160] sm:$0xff] %vm23_vm0, %v2989_v62  ;;  %v2436_v57 = vadd.f32 %v2244_v18, %v1859_v47  ;;  %v1307_v30 = vadd.f32 %v2220_v42, %v730_v39  ;;  %v1331_v47 = vadd.f32 %v7385_v1, %v2244_v18 }
 0x189   :  { %v2630_v50 = vld [vmem:[#allocation2 + $0x528] sm:$0xf]  ;;  %v2139_v20 = vld [vmem:[#allocation2 + $0x718] sm:$0xf]  ;;  %v7407_v61 = vmul.f32 0.24420136, %v7400_v43  ;;  %v1284_v22 = vadd.f32 %v1092_v10, %v707_v2 }
 0x18a   :  { %3182 = vst.msk [vmem:[#allocation2 + $0x168] sm:$0xf] %vm25_vm1, %v2990_v0  ;;  %v2245_v12 = vmul.f32 0.24420136, %v2053_v58  ;;  %v3013_v26 = vadd.f32 %v2821_v29, %v2436_v57  ;;  %v2268_v52 = vmul.f32 0.24420136, %v2629_v34  ;;  %v1883_v56 = vadd.f32 %v1691_v33, %v1307_v30 }
 0x18b   :  { %8961 = vst [vmem:[#allocation123_spill] sm:$0xff] %v7407_v61  ;;  %v2653_v4 = vld [vmem:[#allocation2 + $0x5e0] sm:$0xff]  ;;  %v539_v11 = vld [vmem:[#allocation2 + $0x2e8] sm:$0xf]  ;;  %v1860_v59 = vadd.f32 %v1668_v44, %v1284_v22  ;;  %v2822_v15 = vmul.f32 0.05448869, %v2630_v50 }
 0x18c   :  { %v2845_v40 = vmul.f32 0.05448869, %v2653_v4  ;;  %v731_v21 = vmul.f32 0.05448869, %v539_v11  ;;  %3205 = vst.msk [vmem:[#allocation2 + $0x220] sm:$0xff] %vm23_vm0, %v3013_v26  ;;  %v2460_v3 = vadd.f32 %v2268_v52, %v1883_v56  ;;  %v2677_v39 = vld [vmem:[#allocation2 + $0x6a0] sm:$0xff] }
 0x18d   :  { %v924_v36 = vld [vmem:[#allocation2 + $0x3a8] sm:$0xf]  ;;  %v7412_v32 = vmul.f32 0.24420136, %v2139_v20  ;;  %v2437_v2 = vadd.f32 %v2245_v12, %v1860_v59  ;;  %v1715_v0 = vmul.f32 0.40261996, %v2629_v34 }
 0x18e   :  { %v1500_v48 = vld [vmem:[#allocation2 + $0x468] sm:$0xf]  ;;  %v1116_v29 = vmul.f32 0.24420136, %v924_v36  ;;  %v2292_v10 = vmul.f32 0.24420136, %v2653_v4  ;;  %v3037_v33 = vadd.f32 %v2845_v40, %v2460_v3 }
 0x18f   :  { %v2077_v62 = vld [vmem:[#allocation2 + $0x528] sm:$0xf]  ;;  %8962 = vst [vmem:[#allocation124_spill] sm:$0xff] %v7412_v32  ;;  %v1692_v42 = vmul.f32 0.40261996, %v1500_v48  ;;  %v3014_v44 = vadd.f32 %v2822_v15, %v2437_v2  ;;  %v1907_v26 = vadd.f32 %v1715_v0, %v1331_v47  ;;  %v590_v12 = vld [vmem:[#allocation2 + $0x480] sm:$0xff] }
 0x190   :  { %v2654_v58 = vld [vmem:[#allocation2 + $0x5e8] sm:$0xf]  ;;  %v1308_v57 = vadd.f32 %v1116_v29, %v731_v21  ;;  %v2269_v50 = vmul.f32 0.24420136, %v2077_v62  ;;  %v2869_v30 = vmul.f32 0.05448869, %v2677_v39 }
 0x191   :  { %v563_v22 = vld [vmem:[#allocation2 + $0x3a8] sm:$0xf]  ;;  %v2320_v11 = vmul.f32 0.24420136, %v7334_v8  ;;  %3206 = vst.msk [vmem:[#allocation2 + $0x228] sm:$0xf] %vm25_vm1, %v3014_v44  ;;  %v2484_v34 = vadd.f32 %v2292_v10, %v1907_v26 }
 0x192   :  { %v1884_v1 = vadd.f32 %v1692_v42, %v1308_v57  ;;  %v2846_v18 = vmul.f32 0.05448869, %v2654_v58  ;;  %v755_v20 = vmul.f32 0.05448869, %v563_v22  ;;  %3229 = vst.msk [vmem:[#allocation2 + $0x2e0] sm:$0xff] %vm23_vm0, %v3037_v33  ;;  %v975_v8 = vld [vmem:[#allocation2 + $0x540] sm:$0xff] }
 0x193   :  { %v948_v52 = vld [vmem:[#allocation2 + $0x468] sm:$0xf]  ;;  %v3061_v36 = vadd.f32 %v2869_v30, %v2484_v34  ;;  %v782_v62 = vmul.f32 0.05448869, %v590_v12  ;;  %v1167_v42 = vmul.f32 0.24420136, %v975_v8 }
 0x194   :  { %v1524_v4 = vld [vmem:[#allocation2 + $0x528] sm:$0xf]  ;;  %v2461_v15 = vadd.f32 %v2269_v50, %v1884_v1  ;;  %v1140_v21 = vmul.f32 0.24420136, %v948_v52  ;;  %v1551_v3 = vld [vmem:[#allocation2 + $0x600] sm:$0xff]  ;;  %v592_v10 = vld [vmem:[#allocation2 + $0x490] sm:$0xff] }
 0x195   :  { %v2101_v59 = vld [vmem:[#allocation2 + $0x5e8] sm:$0xf]  ;;  %v1716_v56 = vmul.f32 0.40261996, %v1524_v4  ;;  %3253 = vst.msk [vmem:[#allocation2 + $0x3a0] sm:$0xff] %vm23_vm0, %v3061_v36  ;;  %v1359_v57 = vadd.f32 %v1167_v42, %v782_v62  ;;  %v2705_v26 = vld [vmem:[#allocation2 + $0x780] sm:$0xff] }
 0x196   :  { %v2293_v40 = vmul.f32 0.24420136, %v2101_v59  ;;  %v2678_v48 = vld [vmem:[#allocation2 + $0x6a8] sm:$0xf]  ;;  %v3038_v47 = vadd.f32 %v2846_v18, %v2461_v15  ;;  %v1332_v2 = vadd.f32 %v1140_v21, %v755_v20  ;;  %v1743_v58 = vmul.f32 0.40261996, %v1551_v3 }
 0x197   :  { %v2870_v29 = vmul.f32 0.05448869, %v2678_v48  ;;  %v591_v0 = vld [vmem:[#allocation2 + $0x488] sm:$0xf]  ;;  %v2692_v33 = vld [vmem:[#allocation2 + $0x718] sm:$0xf] }
 0x198   :  { %3230 = vst.msk [vmem:[#allocation2 + $0x2e8] sm:$0xf] %vm25_vm1, %v3038_v47  ;;  %v1908_v44 = vadd.f32 %v1716_v56, %v1332_v2  ;;  %v783_v50 = vmul.f32 0.05448869, %v591_v0  ;;  %v976_v39 = vld [vmem:[#allocation2 + $0x548] sm:$0xf]  ;;  %v1935_v20 = vadd.f32 %v1743_v58, %v1359_v57 }
 0x199   :  { %v1552_v22 = vld [vmem:[#allocation2 + $0x608] sm:$0xf]  ;;  %v1168_v30 = vmul.f32 0.24420136, %v976_v39  ;;  %v7420_v1 = vmul.f32 0.05448869, %v7400_v43 }
 0x19a   :  { %v2485_v18 = vadd.f32 %v2293_v40, %v1908_v44  ;;  %v2897_v12 = vmul.f32 0.05448869, %v2705_v26  ;;  %v2129_v34 = vld [vmem:[#allocation2 + $0x6c8] sm:$0xf]  ;;  %v1744_v4 = vmul.f32 0.40261996, %v1552_v22  ;;  %v2512_v48 = vadd.f32 %v2320_v11, %v1935_v20 }
 0x19b   :  { %8963 = vst [vmem:[#allocation125_spill] sm:$0xff] %v7420_v1  ;;  %v1360_v52 = vadd.f32 %v1168_v30, %v783_v50  ;;  %v2321_v59 = vmul.f32 0.24420136, %v2129_v34  ;;  %v784_v15 = vmul.f32 0.05448869, %v592_v10  ;;  %v977_v62 = vld [vmem:[#allocation2 + $0x550] sm:$0xff] }
 0x19c   :  { %v7422_v21 = vmul.f32 0.05448869, %v2692_v33  ;;  %v1588_v56 = vld [vmem:[#allocation2 + $0x728] sm:$0xf]  ;;  %v3062_v36 = vadd.f32 %v2870_v29, %v2485_v18  ;;  %v1553_v47 = vld [vmem:[#allocation2 + $0x610] sm:$0xff]  ;;  %v3089_v40 = vadd.f32 %v2897_v12, %v2512_v48  ;;  %v1587_v50 = vld [vmem:[#allocation2 + $0x720] sm:$0xff] }
 0x19d   :  { %v1936_v2 = vadd.f32 %v1744_v4, %v1360_v52  ;;  %v1169_v42 = vmul.f32 0.24420136, %v977_v62  ;;  %v1745_v0 = vmul.f32 0.40261996, %v1553_v47  ;;  %v2322_v43 = vmul.f32 0.24420136, %v7336_v27 }
 0x19e   :  { %8964 = vst [vmem:[#allocation126_spill] sm:$0xff] %v7422_v21  ;;  %3254 = vst.msk [vmem:[#allocation2 + $0x3a8] sm:$0xf] %vm25_vm1, %v3062_v36  ;;  %v593_v58 = vld [vmem:[#allocation2 + $0x498] sm:$0xf]  ;;  %v2707_v22 = vld [vmem:[#allocation2 + $0x790] sm:$0xff] }
 0x19f   :  { %v978_v44 = vld [vmem:[#allocation2 + $0x558] sm:$0xf]  ;;  %v2513_v10 = vadd.f32 %v2321_v59, %v1936_v2  ;;  %v1361_v39 = vadd.f32 %v1169_v42, %v784_v15  ;;  %v785_v33 = vmul.f32 0.05448869, %v593_v58  ;;  %v806_v29 = vmul.f32 0.05448869, %v975_v8 }
 0x1a0   :  { %v1554_v57 = vld [vmem:[#allocation2 + $0x618] sm:$0xf]  ;;  %v7426_v11 = vmul.f32 0.40261996, %v1588_v56  ;;  %3281 = vst.msk [vmem:[#allocation2 + $0x480] sm:$0xff] %vm23_vm0, %v3089_v40  ;;  %v1575_v48 = vld [vmem:[#allocation2 + $0x6c0] sm:$0xff] }
 0x1a1   :  { %v2899_v30 = vmul.f32 0.05448869, %v2707_v22  ;;  %v1170_v18 = vmul.f32 0.24420136, %v978_v44  ;;  %v2141_v20 = vld [vmem:[#allocation2 + $0x728] sm:$0xf]  ;;  %v3090_v27 = vadd.f32 %v7002_v37, %v2513_v10  ;;  %v1937_v34 = vadd.f32 %v1745_v0, %v1361_v39 }
 0x1a2   :  { %8965 = vst [vmem:[#allocation127_spill] sm:$0xff] %v7426_v11  ;;  %v1746_v12 = vmul.f32 0.40261996, %v1554_v57  ;;  %v2131_v52 = vld [vmem:[#allocation2 + $0x6d8] sm:$0xf]  ;;  %v2729_v2 = vld [vmem:[#allocation2 + $0x840] sm:$0xff] }
 0x1a3   :  { %v1191_v4 = vmul.f32 0.24420136, %v1551_v3  ;;  %v7430_v36 = vmul.f32 0.24420136, %v1587_v50  ;;  %v1362_v59 = vadd.f32 %v1170_v18, %v785_v33  ;;  %v2323_v15 = vmul.f32 0.24420136, %v2131_v52 }
 0x1a4   :  { %3282 = vst.msk [vmem:[#allocation2 + $0x488] sm:$0xf] %vm25_vm1, %v3090_v27  ;;  %v2514_v8 = vadd.f32 %v2322_v43, %v1937_v34  ;;  %v1767_v42 = vmul.f32 0.40261996, %v1575_v48  ;;  %v2344_v40 = vmul.f32 0.24420136, %v2705_v26 }
 0x1a5   :  { %8966 = vst [vmem:[#allocation128_spill] sm:$0xff] %v7430_v36  ;;  %v1383_v56 = vadd.f32 %v1191_v4, %v806_v29  ;;  %v615_v58 = vld [vmem:[#allocation2 + $0x548] sm:$0xf]  ;;  %v1938_v44 = vadd.f32 %v1746_v12, %v1362_v59  ;;  %v2921_v3 = vmul.f32 0.05448869, %v2729_v2  ;;  %v1577_v48 = vld [vmem:[#allocation2 + $0x6d0] sm:$0xff] }
 0x1a6   :  { %v807_v11 = vmul.f32 0.05448869, %v615_v58  ;;  %v1000_v37 = vld [vmem:[#allocation2 + $0x608] sm:$0xf]  ;;  %v3091_v57 = vadd.f32 %v2899_v30, %v2514_v8  ;;  %v7433_v9 = vmul.f32 0.24420136, %v2141_v20 }
 0x1a7   :  { %v1576_v0 = vld [vmem:[#allocation2 + $0x6c8] sm:$0xf]  ;;  %v1959_v10 = vadd.f32 %v1767_v42, %v1383_v56  ;;  %v1192_v39 = vmul.f32 0.24420136, %v1000_v37  ;;  %v7435_v33 = vmul.f32 0.05448869, %v1587_v50  ;;  %v2515_v18 = vadd.f32 %v2323_v15, %v1938_v44 }
 0x1a8   :  { %8967 = vst [vmem:[#allocation129_spill] sm:$0xff] %v7433_v9  ;;  %v1768_v52 = vmul.f32 0.40261996, %v1576_v0  ;;  %3283 = vst.msk [vmem:[#allocation2 + $0x490] sm:$0xff] %vm23_vm0, %v3091_v57  ;;  %v2153_v26 = vld [vmem:[#allocation2 + $0x788] sm:$0xf] }
 0x1a9   :  { %8968 = vst [vmem:[#allocation130_spill] sm:$0xff] %v7435_v33  ;;  %v2536_v43 = vadd.f32 %v2344_v40, %v1959_v10  ;;  %v1384_v29 = vadd.f32 %v1192_v39, %v807_v11  ;;  %v808_v27 = vmul.f32 0.05448869, %v977_v62  ;;  %v1193_v34 = vmul.f32 0.24420136, %v1553_v47  ;;  %v2731_v20 = vld [vmem:[#allocation2 + $0x850] sm:$0xff] }
 0x1aa   :  { %v2694_v12 = vld [vmem:[#allocation2 + $0x728] sm:$0xf]  ;;  %v1590_v4 = vld [vmem:[#allocation2 + $0x738] sm:$0xf]  ;;  %v3092_v30 = vadd.f32 %v7004_v38, %v2515_v18  ;;  %v2345_v59 = vmul.f32 0.24420136, %v2153_v26 }
 0x1ab   :  { %v2346_v2 = vmul.f32 0.24420136, %v2707_v22  ;;  %v3113_v8 = vadd.f32 %v2921_v3, %v2536_v43  ;;  %v1960_v50 = vadd.f32 %v1768_v52, %v1384_v29  ;;  %v1385_v56 = vadd.f32 %v1193_v34, %v808_v27  ;;  %v617_v42 = vld [vmem:[#allocation2 + $0x558] sm:$0xf]  ;;  %v468_v0 = vld [vmem:[#allocation2 + $0xb0] sm:$0xff]  ;;  %v7499_v9 = vld [vmem:[#allocation2 + $0x1c0] sm:$0xff] }
 0x1ac   :  { %v1769_v15 = vmul.f32 0.40261996, %v1577_v48  ;;  %v1002_v58 = vld [vmem:[#allocation2 + $0x618] sm:$0xf]  ;;  %3284 = vst.msk [vmem:[#allocation2 + $0x498] sm:$0xf] %vm25_vm1, %v3092_v30 }
 0x1ad   :  { %v2923_v11 = vmul.f32 0.05448869, %v2731_v20  ;;  %v809_v40 = vmul.f32 0.05448869, %v617_v42  ;;  %v1194_v62 = vmul.f32 0.24420136, %v1002_v58  ;;  %v2537_v47 = vadd.f32 %v2345_v59, %v1960_v50 }
 0x1ae   :  { %3305 = vst.msk [vmem:[#allocation2 + $0x540] sm:$0xff] %vm23_vm0, %v3113_v8  ;;  %v1961_v44 = vadd.f32 %v1769_v15, %v1385_v56  ;;  %v1578_v38 = vld [vmem:[#allocation2 + $0x6d8] sm:$0xf]  ;;  %v660_v3 = vmul.f32 0.05448869, %v468_v0  ;;  %v7446_v29 = vld [vmem:[#allocation2 + $0x170] sm:$0xff] }
 0x1af   :  { %v2155_v37 = vld [vmem:[#allocation2 + $0x798] sm:$0xf]  ;;  %v1386_v22 = vadd.f32 %v1194_v62, %v809_v40  ;;  %v1770_v57 = vmul.f32 0.40261996, %v1578_v38  ;;  %v7441_v39 = vmul.f32 0.05448869, %v2694_v12  ;;  %v3114_v52 = vadd.f32 %v7039_v24, %v2537_v47 }
 0x1b0   :  { %v2347_v10 = vmul.f32 0.24420136, %v2155_v37  ;;  %v7443_v18 = vmul.f32 0.40261996, %v1590_v4  ;;  %v2538_v43 = vadd.f32 %v2346_v2, %v1961_v44  ;;  %v7448_v26 = vld [vmem:[#allocation2 + $0x230] sm:$0xff]  ;;  %v474_v37 = vld [vmem:[#allocation2 + $0xe0] sm:$0xff] }
 0x1b1   :  { %8969 = vst [vmem:[#allocation131_spill] sm:$0xff] %v7441_v39  ;;  %v1962_v27 = vadd.f32 %v1770_v57, %v1386_v22  ;;  %v1045_v34 = vmul.f32 0.24420136, %v7446_v29  ;;  %v1621_v30 = vmul.f32 0.40261996, %v7448_v26  ;;  %v7452_v59 = vld [vmem:[#allocation2 + $0x2f0] sm:$0xff] }
 0x1b2   :  { %8970 = vst [vmem:[#allocation132_spill] sm:$0xff] %v7443_v18  ;;  %3306 = vst.msk [vmem:[#allocation2 + $0x548] sm:$0xf] %vm25_vm1, %v3114_v52  ;;  %v3115_v12 = vadd.f32 %v2923_v11, %v2538_v43  ;;  %v2198_v4 = vmul.f32 0.24420136, %v7452_v59  ;;  %v1589_v24 = vld [vmem:[#allocation2 + $0x730] sm:$0xff] }
 0x1b3   :  { %v469_v48 = vld [vmem:[#allocation2 + $0xb8] sm:$0xf]  ;;  %v2539_v2 = vadd.f32 %v2347_v10, %v1962_v27  ;;  %v1237_v8 = vadd.f32 %v1045_v34, %v660_v3  ;;  %v7456_v50 = vld [vmem:[#allocation2 + $0x3b0] sm:$0xff]  ;;  %v7461_v0 = vld [vmem:[#allocation2 + $0x1a0] sm:$0xff]  ;;  %v666_v10 = vmul.f32 0.05448869, %v474_v37 }
 0x1b4   :  { %v854_v20 = vld [vmem:[#allocation2 + $0x178] sm:$0xf]  ;;  %v661_v56 = vmul.f32 0.05448869, %v469_v48  ;;  %3307 = vst.msk [vmem:[#allocation2 + $0x550] sm:$0xff] %vm23_vm0, %v3115_v12  ;;  %v7467_v34 = vld [vmem:[#allocation2 + $0x260] sm:$0xff] }
 0x1b5   :  { %v1430_v15 = vld [vmem:[#allocation2 + $0x238] sm:$0xf]  ;;  %v1046_v58 = vmul.f32 0.24420136, %v854_v20  ;;  %v3116_v47 = vadd.f32 %v7041_v25, %v2539_v2  ;;  %v1813_v11 = vadd.f32 %v1621_v30, %v1237_v8  ;;  %v2775_v44 = vmul.f32 0.05448869, %v7456_v50 }
 0x1b6   :  { %v2143_v42 = vld [vmem:[#allocation2 + $0x738] sm:$0xf]  ;;  %v1622_v40 = vmul.f32 0.40261996, %v1430_v15  ;;  %v1051_v3 = vmul.f32 0.24420136, %v7461_v0 }
 0x1b7   :  { %v2007_v62 = vld [vmem:[#allocation2 + $0x2f8] sm:$0xf]  ;;  %v1238_v22 = vadd.f32 %v1046_v58, %v661_v56  ;;  %v7464_v52 = vmul.f32 0.24420136, %v1589_v24  ;;  %3308 = vst.msk [vmem:[#allocation2 + $0x558] sm:$0xf] %vm25_vm1, %v3116_v47  ;;  %v2390_v43 = vadd.f32 %v2198_v4, %v1813_v11 }
 0x1b8   :  { %v2584_v38 = vld [vmem:[#allocation2 + $0x3b8] sm:$0xf]  ;;  %v2199_v57 = vmul.f32 0.24420136, %v2007_v62  ;;  %v7469_v25 = vld [vmem:[#allocation2 + $0x320] sm:$0xff]  ;;  %v1243_v12 = vadd.f32 %v1051_v3, %v666_v10  ;;  %v7516_v45 = vld [vmem:[#allocation2 + $0x1d0] sm:$0xff] }
 0x1b9   :  { %8971 = vst [vmem:[#allocation133_spill] sm:$0xff] %v7464_v52  ;;  %v2776_v27 = vmul.f32 0.05448869, %v2584_v38  ;;  %v1814_v30 = vadd.f32 %v1622_v40, %v1238_v22  ;;  %v1627_v48 = vmul.f32 0.40261996, %v7467_v34  ;;  %v7472_v20 = vld [vmem:[#allocation2 + $0x3e0] sm:$0xff]  ;;  %v2967_v56 = vadd.f32 %v2775_v44, %v2390_v43 }
 0x1ba   :  { %v475_v2 = vld [vmem:[#allocation2 + $0xe8] sm:$0xf]  ;;  %v7474_v8 = vmul.f32 0.24420136, %v2143_v42  ;;  %v2204_v4 = vmul.f32 0.24420136, %v7469_v25 }
 0x1bb   :  { %v667_v15 = vmul.f32 0.05448869, %v475_v2  ;;  %v860_v58 = vld [vmem:[#allocation2 + $0x1a8] sm:$0xf]  ;;  %v2391_v62 = vadd.f32 %v2199_v57, %v1814_v30  ;;  %v1819_v47 = vadd.f32 %v1627_v48, %v1243_v12  ;;  %v7477_v37 = vmul.f32 0.05448869, %v1589_v24 }
 0x1bc   :  { %8972 = vst [vmem:[#allocation134_spill] sm:$0xff] %v7474_v8  ;;  %v1052_v11 = vmul.f32 0.24420136, %v860_v58  ;;  %v1436_v38 = vld [vmem:[#allocation2 + $0x268] sm:$0xf]  ;;  %3159 = vst.msk [vmem:[#allocation2 + $0xb0] sm:$0xff] %vm23_vm0, %v2967_v56 }
 0x1bd   :  { %8973 = vst [vmem:[#allocation135_spill] sm:$0xff] %v7477_v37  ;;  %v2781_v40 = vmul.f32 0.05448869, %v7472_v20  ;;  %v2013_v22 = vld [vmem:[#allocation2 + $0x328] sm:$0xf]  ;;  %v2968_v3 = vadd.f32 %v2776_v27, %v2391_v62  ;;  %v2396_v42 = vadd.f32 %v2204_v4, %v1819_v47  ;;  %v476_v43 = vld [vmem:[#allocation2 + $0xf0] sm:$0xff] }
 0x1be   :  { %v2696_v10 = vld [vmem:[#allocation2 + $0x738] sm:$0xf]  ;;  %v1244_v18 = vadd.f32 %v1052_v11, %v667_v15  ;;  %v1628_v44 = vmul.f32 0.40261996, %v1436_v38  ;;  %v7481_v2 = vld [vmem:[#allocation2 + $0x1b0] sm:$0xff]  ;;  %v7489_v62 = vld [vmem:[#allocation2 + $0x740] sm:$0xff] }
 0x1bf   :  { %v7483_v57 = vld [vmem:[#allocation2 + $0x270] sm:$0xff]  ;;  %v2590_v30 = vld [vmem:[#allocation2 + $0x3e8] sm:$0xf]  ;;  %v668_v12 = vmul.f32 0.05448869, %v476_v43  ;;  %v2973_v48 = vadd.f32 %v2781_v40, %v2396_v42  ;;  %v478_v52 = vld [vmem:[#allocation2 + $0x100] sm:$0xff] }
 0x1c0   :  { %v1053_v24 = vmul.f32 0.24420136, %v7481_v2  ;;  %3160 = vst.msk [vmem:[#allocation2 + $0xb8] sm:$0xf] %vm25_vm1, %v2968_v3  ;;  %v1820_v56 = vadd.f32 %v1628_v44, %v1244_v18  ;;  %v2205_v58 = vmul.f32 0.24420136, %v2013_v22 }
 0x1c1   :  { %v477_v27 = vld [vmem:[#allocation2 + $0xf8] sm:$0xf]  ;;  %v1629_v47 = vmul.f32 0.40261996, %v7483_v57  ;;  %v7492_v4 = vld [vmem:[#allocation2 + $0x3f0] sm:$0xff]  ;;  %3165 = vst.msk [vmem:[#allocation2 + $0xe0] sm:$0xff] %vm23_vm0, %v2973_v48 }
 0x1c2   :  { %v1245_v15 = vadd.f32 %v1053_v24, %v668_v12  ;;  %v669_v11 = vmul.f32 0.05448869, %v477_v27  ;;  %v2397_v38 = vadd.f32 %v2205_v58, %v1820_v56  ;;  %v2782_v43 = vmul.f32 0.05448869, %v2590_v30  ;;  %v862_v8 = vld [vmem:[#allocation2 + $0x1b8] sm:$0xf] }
 0x1c3   :  { %v1438_v3 = vld [vmem:[#allocation2 + $0x278] sm:$0xf]  ;;  %v7495_v40 = vmul.f32 0.05448869, %v2696_v10  ;;  %v2206_v22 = vmul.f32 0.24420136, %v7487_v13 }
 0x1c4   :  { %v1821_v18 = vadd.f32 %v1629_v47, %v1245_v15  ;;  %v1054_v42 = vmul.f32 0.24420136, %v862_v8  ;;  %v2974_v44 = vadd.f32 %v2782_v43, %v2397_v38  ;;  %v2783_v12 = vmul.f32 0.05448869, %v7492_v4  ;;  %v2015_v24 = vld [vmem:[#allocation2 + $0x338] sm:$0xf] }
 0x1c5   :  { %8974 = vst [vmem:[#allocation136_spill] sm:$0xff] %v7495_v40  ;;  %v1630_v48 = vmul.f32 0.40261996, %v1438_v3  ;;  %v670_v56 = vmul.f32 0.05448869, %v478_v52  ;;  %v7501_v30 = vld [vmem:[#allocation2 + $0x280] sm:$0xff] }
 0x1c6   :  { %v2398_v27 = vadd.f32 %v2206_v22, %v1821_v18  ;;  %v1246_v36 = vadd.f32 %v1054_v42, %v669_v11  ;;  %v7504_v10 = vmul.f32 0.24420136, %v7489_v62  ;;  %3166 = vst.msk [vmem:[#allocation2 + $0xe8] sm:$0xf] %vm25_vm1, %v2974_v44  ;;  %v2592_v58 = vld [vmem:[#allocation2 + $0x3f8] sm:$0xf] }
 0x1c7   :  { %v1055_v8 = vmul.f32 0.24420136, %v7499_v9  ;;  %v2207_v38 = vmul.f32 0.24420136, %v2015_v24  ;;  %v7508_v43 = vld [vmem:[#allocation2 + $0x340] sm:$0xff]  ;;  %v7527_v39 = vld [vmem:[#allocation2 + $0x410] sm:$0xff] }
 0x1c8   :  { %8975 = vst [vmem:[#allocation137_spill] sm:$0xff] %v7504_v10  ;;  %v2975_v15 = vadd.f32 %v2783_v12, %v2398_v27  ;;  %v1822_v47 = vadd.f32 %v1630_v48, %v1246_v36  ;;  %v479_v32 = vld [vmem:[#allocation2 + $0x108] sm:$0xf]  ;;  %v1631_v11 = vmul.f32 0.40261996, %v7501_v30  ;;  %v7511_v52 = vld [vmem:[#allocation2 + $0x400] sm:$0xff] }
 0x1c9   :  { %v1247_v18 = vadd.f32 %v1055_v8, %v670_v56  ;;  %v671_v3 = vmul.f32 0.05448869, %v479_v32  ;;  %v2784_v42 = vmul.f32 0.05448869, %v2592_v58  ;;  %v864_v44 = vld [vmem:[#allocation2 + $0x1c8] sm:$0xf] }
 0x1ca   :  { %3167 = vst.msk [vmem:[#allocation2 + $0xf0] sm:$0xff] %vm23_vm0, %v2975_v15  ;;  %v2399_v22 = vadd.f32 %v2207_v38, %v1822_v47  ;;  %v1440_v10 = vld [vmem:[#allocation2 + $0x288] sm:$0xf]  ;;  %v2208_v12 = vmul.f32 0.24420136, %v7508_v43  ;;  %v480_v8 = vld [vmem:[#allocation2 + $0x110] sm:$0xff] }
 0x1cb   :  { %v1823_v61 = vadd.f32 %v1631_v11, %v1247_v18  ;;  %v1056_v36 = vmul.f32 0.24420136, %v864_v44  ;;  %v2017_v24 = vld [vmem:[#allocation2 + $0x348] sm:$0xf]  ;;  %v2785_v48 = vmul.f32 0.05448869, %v7511_v52 }
 0x1cc   :  { %v2976_v27 = vadd.f32 %v2784_v42, %v2399_v22  ;;  %v2594_v56 = vld [vmem:[#allocation2 + $0x408] sm:$0xf]  ;;  %v1632_v35 = vmul.f32 0.40261996, %v1440_v10  ;;  %v672_v15 = vmul.f32 0.05448869, %v480_v8 }
 0x1cd   :  { %v2400_v49 = vadd.f32 %v2208_v12, %v1823_v61  ;;  %v1248_v32 = vadd.f32 %v1056_v36, %v671_v3  ;;  %v7518_v47 = vld [vmem:[#allocation2 + $0x290] sm:$0xff]  ;;  %v2145_v38 = vld [vmem:[#allocation2 + $0x748] sm:$0xf]  ;;  %v2209_v18 = vmul.f32 0.24420136, %v2017_v24  ;;  %v7535_v1 = vld [vmem:[#allocation2 + $0x2a0] sm:$0xff] }
 0x1ce   :  { %v7520_v58 = vld [vmem:[#allocation2 + $0x350] sm:$0xff]  ;;  %3168 = vst.msk [vmem:[#allocation2 + $0xf8] sm:$0xf] %vm25_vm1, %v2976_v27  ;;  %v2786_v11 = vmul.f32 0.05448869, %v2594_v56 }
 0x1cf   :  { %v1057_v22 = vmul.f32 0.24420136, %v7516_v45  ;;  %v2977_v42 = vadd.f32 %v2785_v48, %v2400_v49  ;;  %v1824_v44 = vadd.f32 %v1632_v35, %v1248_v32  ;;  %v1633_v40 = vmul.f32 0.40261996, %v7518_v47  ;;  %v481_v37 = vld [vmem:[#allocation2 + $0x118] sm:$0xf] }
 0x1d0   :  { %v866_v61 = vld [vmem:[#allocation2 + $0x1d8] sm:$0xf]  ;;  %v2210_v10 = vmul.f32 0.24420136, %v7520_v58  ;;  %v673_v12 = vmul.f32 0.05448869, %v481_v37 }
 0x1d1   :  { %v1249_v3 = vadd.f32 %v1057_v22, %v672_v15  ;;  %v1058_v36 = vmul.f32 0.24420136, %v866_v61  ;;  %3169 = vst.msk [vmem:[#allocation2 + $0x100] sm:$0xff] %vm23_vm0, %v2977_v42  ;;  %v2401_v8 = vadd.f32 %v2209_v18, %v1824_v44  ;;  %v1442_v24 = vld [vmem:[#allocation2 + $0x298] sm:$0xf]  ;;  %v482_v48 = vld [vmem:[#allocation2 + $0x120] sm:$0xff] }
 0x1d2   :  { %v2019_v27 = vld [vmem:[#allocation2 + $0x358] sm:$0xf]  ;;  %v1634_v49 = vmul.f32 0.40261996, %v1442_v24  ;;  %v7529_v32 = vld [vmem:[#allocation2 + $0x1e0] sm:$0xff] }
 0x1d3   :  { %v1825_v56 = vadd.f32 %v1633_v40, %v1249_v3  ;;  %v1250_v33 = vadd.f32 %v1058_v36, %v673_v12  ;;  %v2596_v35 = vld [vmem:[#allocation2 + $0x418] sm:$0xf]  ;;  %v7531_v21 = vmul.f32 0.24420136, %v2145_v38  ;;  %v2978_v15 = vadd.f32 %v2786_v11, %v2401_v8  ;;  %v7537_v40 = vld [vmem:[#allocation2 + $0x360] sm:$0xff] }
 0x1d4   :  { %v674_v22 = vmul.f32 0.05448869, %v482_v48  ;;  %v1059_v37 = vmul.f32 0.24420136, %v7529_v32  ;;  %v2787_v18 = vmul.f32 0.05448869, %v7527_v39 }
 0x1d5   :  { %8976 = vst [vmem:[#allocation138_spill] sm:$0xff] %v7531_v21  ;;  %v2402_v61 = vadd.f32 %v2210_v10, %v1825_v56  ;;  %v1826_v42 = vadd.f32 %v1634_v49, %v1250_v33  ;;  %v2211_v44 = vmul.f32 0.24420136, %v2019_v27  ;;  %3170 = vst.msk [vmem:[#allocation2 + $0x108] sm:$0xf] %vm25_vm1, %v2978_v15  ;;  %v7541_v36 = vld [vmem:[#allocation2 + $0x420] sm:$0xff] }
 0x1d6   :  { %v2788_v3 = vmul.f32 0.05448869, %v2596_v35  ;;  %v1251_v12 = vadd.f32 %v1059_v37, %v674_v22  ;;  %v1635_v38 = vmul.f32 0.40261996, %v7535_v1  ;;  %v483_v24 = vld [vmem:[#allocation2 + $0x128] sm:$0xf] }
 0x1d7   :  { %v2979_v11 = vadd.f32 %v2787_v18, %v2402_v61  ;;  %v2403_v8 = vadd.f32 %v2211_v44, %v1826_v42  ;;  %v868_v10 = vld [vmem:[#allocation2 + $0x1e8] sm:$0xf]  ;;  %v2212_v27 = vmul.f32 0.24420136, %v7537_v40  ;;  %v675_v49 = vmul.f32 0.05448869, %v483_v24 }
 0x1d8   :  { %v1444_v56 = vld [vmem:[#allocation2 + $0x2a8] sm:$0xf]  ;;  %v1827_v33 = vadd.f32 %v1635_v38, %v1251_v12  ;;  %v1060_v21 = vmul.f32 0.24420136, %v868_v10  ;;  %v7545_v55 = vmul.f32 0.05448869, %v7489_v62 }
 0x1d9   :  { %v2698_v48 = vld [vmem:[#allocation2 + $0x748] sm:$0xf]  ;;  %3171 = vst.msk [vmem:[#allocation2 + $0x110] sm:$0xff] %vm23_vm0, %v2979_v11  ;;  %v2980_v35 = vadd.f32 %v2788_v3, %v2403_v8  ;;  %v484_v22 = vld [vmem:[#allocation2 + $0x130] sm:$0xff]  ;;  %v2789_v61 = vmul.f32 0.05448869, %v7541_v36 }
 0x1da   :  { %8977 = vst [vmem:[#allocation139_spill] sm:$0xff] %v7545_v55  ;;  %v2021_v15 = vld [vmem:[#allocation2 + $0x368] sm:$0xf]  ;;  %v2404_v37 = vadd.f32 %v2212_v27, %v1827_v33  ;;  %v1252_v18 = vadd.f32 %v1060_v21, %v675_v49  ;;  %v1636_v42 = vmul.f32 0.40261996, %v1444_v56  ;;  %v7549_v44 = vld [vmem:[#allocation2 + $0x1f0] sm:$0xff] }
 0x1db   :  { %v7551_v12 = vld [vmem:[#allocation2 + $0x2b0] sm:$0xff]  ;;  %3172 = vst.msk [vmem:[#allocation2 + $0x118] sm:$0xf] %vm25_vm1, %v2980_v35  ;;  %v2598_v38 = vld [vmem:[#allocation2 + $0x428] sm:$0xf] }
 0x1dc   :  { %v676_v24 = vmul.f32 0.05448869, %v484_v22  ;;  %v1061_v62 = vmul.f32 0.24420136, %v7549_v44  ;;  %v2981_v10 = vadd.f32 %v2789_v61, %v2404_v37  ;;  %v1828_v11 = vadd.f32 %v1636_v42, %v1252_v18  ;;  %v7555_v8 = vld [vmem:[#allocation2 + $0x370] sm:$0xff] }
 0x1dd   :  { %v2213_v3 = vmul.f32 0.24420136, %v2021_v15  ;;  %v7557_v33 = vld [vmem:[#allocation2 + $0x430] sm:$0xff]  ;;  %v485_v27 = vld [vmem:[#allocation2 + $0x138] sm:$0xf] }
 0x1de   :  { %v7559_v21 = vmul.f32 0.05448869, %v2698_v48  ;;  %v1253_v56 = vadd.f32 %v1061_v62, %v676_v24  ;;  %v1637_v49 = vmul.f32 0.40261996, %v7551_v12  ;;  %v677_v55 = vmul.f32 0.05448869, %v485_v27 }
 0x1df   :  { %3173 = vst.msk [vmem:[#allocation2 + $0x120] sm:$0xff] %vm23_vm0, %v2981_v10  ;;  %v2405_v35 = vadd.f32 %v2213_v3, %v1828_v11  ;;  %v2790_v22 = vmul.f32 0.05448869, %v2598_v38  ;;  %v870_v23 = vld [vmem:[#allocation2 + $0x1f8] sm:$0xf]  ;;  %v7565_v24 = vld [vmem:[#allocation2 + $0x200] sm:$0xff] }
 0x1e0   :  { %8978 = vst [vmem:[#allocation140_spill] sm:$0xff] %v7559_v21  ;;  %v1446_v41 = vld [vmem:[#allocation2 + $0x2b8] sm:$0xf]  ;;  %v1829_v37 = vadd.f32 %v1637_v49, %v1253_v56  ;;  %v2214_v15 = vmul.f32 0.24420136, %v7555_v8  ;;  %v486_v21 = vld [vmem:[#allocation2 + $0x140] sm:$0xff] }
 0x1e1   :  { %v2791_v61 = vmul.f32 0.05448869, %v7557_v33  ;;  %v1062_v18 = vmul.f32 0.24420136, %v870_v23  ;;  %v2982_v42 = vadd.f32 %v2790_v22, %v2405_v35  ;;  %v1638_v31 = vmul.f32 0.40261996, %v1446_v41 }
 0x1e2   :  { %v2023_v48 = vld [vmem:[#allocation2 + $0x378] sm:$0xf]  ;;  %v2406_v62 = vadd.f32 %v2214_v15, %v1829_v37  ;;  %v678_v10 = vmul.f32 0.05448869, %v486_v21  ;;  %v7567_v11 = vld [vmem:[#allocation2 + $0x2c0] sm:$0xff]  ;;  %v1593_v23 = vld [vmem:[#allocation2 + $0x750] sm:$0xff] }
 0x1e3   :  { %v1254_v27 = vadd.f32 %v1062_v18, %v677_v55  ;;  %v2600_v53 = vld [vmem:[#allocation2 + $0x438] sm:$0xf]  ;;  %3174 = vst.msk [vmem:[#allocation2 + $0x128] sm:$0xf] %vm25_vm1, %v2982_v42  ;;  %v1063_v3 = vmul.f32 0.24420136, %v7565_v24 }
 0x1e4   :  { %v2147_v38 = vld [vmem:[#allocation2 + $0x758] sm:$0xf]  ;;  %v684_v56 = vmul.f32 0.05448869, %v7446_v29  ;;  %v2983_v49 = vadd.f32 %v2791_v61, %v2406_v62  ;;  %v2215_v35 = vmul.f32 0.24420136, %v2023_v48 }
 0x1e5   :  { %v1830_v41 = vadd.f32 %v1638_v31, %v1254_v27  ;;  %v7572_v22 = vld [vmem:[#allocation2 + $0x380] sm:$0xff]  ;;  %v1069_v37 = vmul.f32 0.24420136, %v7448_v26  ;;  %v2792_v55 = vmul.f32 0.05448869, %v2600_v53  ;;  %v1255_v15 = vadd.f32 %v1063_v3, %v678_v10 }
 0x1e6   :  { %v1639_v21 = vmul.f32 0.40261996, %v7567_v11  ;;  %v487_v18 = vld [vmem:[#allocation2 + $0x148] sm:$0xf]  ;;  %3175 = vst.msk [vmem:[#allocation2 + $0x130] sm:$0xff] %vm23_vm0, %v2983_v49 }
 0x1e7   :  { %v2407_v42 = vadd.f32 %v2215_v35, %v1830_v41  ;;  %v679_v19 = vmul.f32 0.05448869, %v487_v18  ;;  %v872_v29 = vld [vmem:[#allocation2 + $0x208] sm:$0xf]  ;;  %v2216_v31 = vmul.f32 0.24420136, %v7572_v22  ;;  %v1261_v60 = vadd.f32 %v1069_v37, %v684_v56 }
 0x1e8   :  { %v1831_v61 = vadd.f32 %v1639_v21, %v1255_v15  ;;  %v1064_v48 = vmul.f32 0.24420136, %v872_v29  ;;  %v1448_v62 = vld [vmem:[#allocation2 + $0x2c8] sm:$0xf]  ;;  %v7580_v27 = vmul.f32 0.24420136, %v1593_v23 }
 0x1e9   :  { %v7582_v53 = vmul.f32 0.24420136, %v2147_v38  ;;  %v2984_v26 = vadd.f32 %v2792_v55, %v2407_v42  ;;  %v1645_v10 = vmul.f32 0.40261996, %v7452_v59  ;;  %v2793_v49 = vmul.f32 0.05448869, %v7577_v16 }
 0x1ea   :  { %8979 = vst [vmem:[#allocation141_spill] sm:$0xff] %v7580_v27  ;;  %v2408_v3 = vadd.f32 %v2216_v31, %v1831_v61  ;;  %v1256_v41 = vadd.f32 %v1064_v48, %v679_v19  ;;  %v2025_v35 = vld [vmem:[#allocation2 + $0x388] sm:$0xf]  ;;  %v7586_v18 = vld [vmem:[#allocation2 + $0x210] sm:$0xff]  ;;  %v1640_v15 = vmul.f32 0.40261996, %v1448_v62 }
 0x1eb   :  { %8980 = vst [vmem:[#allocation142_spill] sm:$0xff] %v7582_v53  ;;  %3176 = vst.msk [vmem:[#allocation2 + $0x138] sm:$0xf] %vm25_vm1, %v2984_v26  ;;  %v680_v21 = vmul.f32 0.05448869, %v488_v51  ;;  %v7590_v53 = vld [vmem:[#allocation2 + $0x2d0] sm:$0xff] }
 0x1ec   :  { %v2222_v29 = vmul.f32 0.24420136, %v7456_v50  ;;  %v2985_v27 = vadd.f32 %v2793_v49, %v2408_v3  ;;  %v2602_v38 = vld [vmem:[#allocation2 + $0x448] sm:$0xf]  ;;  %v690_v59 = vmul.f32 0.05448869, %v7461_v0  ;;  %v1832_v42 = vadd.f32 %v1640_v15, %v1256_v41 }
 0x1ed   :  { %v2700_v55 = vld [vmem:[#allocation2 + $0x758] sm:$0xf]  ;;  %v2217_v61 = vmul.f32 0.24420136, %v2025_v35  ;;  %v1065_v19 = vmul.f32 0.24420136, %v7586_v18  ;;  %v1837_v50 = vadd.f32 %v1645_v10, %v1261_v60 }
 0x1ee   :  { %v1641_v31 = vmul.f32 0.40261996, %v7590_v53  ;;  %v4365_v56 = vld [vmem:[#allocation2 + $0x78] sm:$0xf]  ;;  %3177 = vst.msk [vmem:[#allocation2 + $0x140] sm:$0xff] %vm23_vm0, %v2985_v27  ;;  %v7596_v37 = vld [vmem:[#allocation2 + $0x390] sm:$0xff] }
 0x1ef   :  { %v489_v51 = vld [vmem:[#allocation2 + $0x158] sm:$0xf]  ;;  %v1075_v48 = vmul.f32 0.24420136, %v7467_v34  ;;  %v2409_v62 = vadd.f32 %v2217_v61, %v1832_v42  ;;  %v2794_v26 = vmul.f32 0.05448869, %v2602_v38  ;;  %v1257_v3 = vadd.f32 %v1065_v19, %v680_v21 }
 0x1f0   :  { %v681_v0 = vmul.f32 0.05448869, %v489_v51  ;;  %v874_v49 = vld [vmem:[#allocation2 + $0x218] sm:$0xf]  ;;  %v7599_v41 = vld [vmem:[#allocation2 + $0x450] sm:$0xff]  ;;  %v2414_v38 = vadd.f32 %v2222_v29, %v1837_v50 }
 0x1f1   :  { %v1066_v35 = vmul.f32 0.24420136, %v874_v49  ;;  %v1450_v15 = vld [vmem:[#allocation2 + $0x2d8] sm:$0xf]  ;;  %v2986_v63 = vadd.f32 %v2794_v26, %v2409_v62  ;;  %v1833_v28 = vadd.f32 %v1641_v31, %v1257_v3  ;;  %v2218_v5 = vmul.f32 0.24420136, %v7596_v37 }
 0x1f2   :  { %v1642_v27 = vmul.f32 0.40261996, %v1450_v15  ;;  %v2027_v14 = vld [vmem:[#allocation2 + $0x398] sm:$0xf]  ;;  %v7602_v46 = vmul.f32 0.05448869, %v1593_v23  ;;  %v1267_v31 = vadd.f32 %v1075_v48, %v690_v59 }
 0x1f3   :  { %v7604_v60 = vmul.f32 0.05448869, %v2700_v55  ;;  %v1258_v34 = vadd.f32 %v1066_v35, %v681_v0  ;;  %v2604_v10 = vld [vmem:[#allocation2 + $0x458] sm:$0xf]  ;;  %v7606_v21 = vmul.f32 0.24420136, %v4365_v56  ;;  %v2410_v42 = vadd.f32 %v2218_v5, %v1833_v28 }
 0x1f4   :  { %8981 = vst [vmem:[#allocation143_spill] sm:$0xff] %v7602_v46  ;;  %3178 = vst.msk [vmem:[#allocation2 + $0x148] sm:$0xf] %vm25_vm1, %v2986_v63  ;;  %v2795_v61 = vmul.f32 0.05448869, %v7599_v41  ;;  %v7610_v19 = vld [vmem:[#allocation2 + $0x470] sm:$0xff] }
 0x1f5   :  { %8982 = vst [vmem:[#allocation144_spill] sm:$0xff] %v7604_v60  ;;  %8983 = vst [vmem:[#allocation145_spill] sm:$0xff] %v7606_v21  ;;  %v4367_v51 = vld [vmem:[#allocation2 + $0x88] sm:$0xf]  ;;  %v1834_v62 = vadd.f32 %v1642_v27, %v1258_v34  ;;  %v2219_v26 = vmul.f32 0.24420136, %v2027_v14 }
 0x1f6   :  { %v2799_v23 = vmul.f32 0.05448869, %v7610_v19  ;;  %v1651_v55 = vmul.f32 0.40261996, %v7469_v25  ;;  %v4750_v3 = vld [vmem:[#allocation2 + $0x88] sm:$0xf]  ;;  %v2987_v29 = vadd.f32 %v2795_v61, %v2410_v42 }
 0x1f7   :  { %v4369_v0 = vld [vmem:[#allocation2 + $0x98] sm:$0xf]  ;;  %v2796_v56 = vmul.f32 0.05448869, %v2604_v10  ;;  %v2411_v63 = vadd.f32 %v2219_v26, %v1834_v62  ;;  %v7616_v10 = vld [vmem:[#allocation2 + $0x4a0] sm:$0xff] }
 0x1f8   :  { %v493_v50 = vld [vmem:[#allocation2 + $0x178] sm:$0xf]  ;;  %v2991_v5 = vadd.f32 %v2799_v23, %v2414_v38  ;;  %3179 = vst.msk [vmem:[#allocation2 + $0x150] sm:$0xff] %vm23_vm0, %v2987_v29  ;;  %v1843_v27 = vadd.f32 %v1651_v55, %v1267_v31  ;;  %v7618_v61 = vmul.f32 0.24420136, %v4367_v51 }
 0x1f9   :  { %v878_v49 = vld [vmem:[#allocation2 + $0x238] sm:$0xf]  ;;  %v685_v28 = vmul.f32 0.05448869, %v493_v50  ;;  %v2988_v21 = vadd.f32 %v2796_v56, %v2411_v63  ;;  %v2228_v38 = vmul.f32 0.24420136, %v7472_v20 }
 0x1fa   :  { %v1070_v35 = vmul.f32 0.24420136, %v878_v49  ;;  %v1454_v15 = vld [vmem:[#allocation2 + $0x2f8] sm:$0xf]  ;;  %3183 = vst.msk [vmem:[#allocation2 + $0x170] sm:$0xff] %vm23_vm0, %v2991_v5  ;;  %8984 = vst [vmem:[#allocation146_spill] sm:$0xff] %v7618_v61 }
 0x1fb   :  { %v1646_v59 = vmul.f32 0.40261996, %v1454_v15  ;;  %v2031_v48 = vld [vmem:[#allocation2 + $0x3b8] sm:$0xf]  ;;  %v499_v62 = vld [vmem:[#allocation2 + $0x1a8] sm:$0xf]  ;;  %v2420_v50 = vadd.f32 %v2228_v38, %v1843_v27 }
 0x1fc   :  { %v2608_v14 = vld [vmem:[#allocation2 + $0x478] sm:$0xf]  ;;  %v1262_v25 = vadd.f32 %v1070_v35, %v685_v28  ;;  %v2223_v42 = vmul.f32 0.24420136, %v2031_v48  ;;  %v7621_v26 = vmul.f32 0.05448869, %v4750_v3 }
 0x1fd   :  { %v4752_v34 = vld [vmem:[#allocation2 + $0x98] sm:$0xf]  ;;  %v7623_v23 = vmul.f32 0.24420136, %v4369_v0  ;;  %3180 = vst.msk [vmem:[#allocation2 + $0x158] sm:$0xf] %vm25_vm1, %v2988_v21 }
 0x1fe   :  { %8985 = vst [vmem:[#allocation147_spill] sm:$0xff] %v7621_v26  ;;  %v1838_v31 = vadd.f32 %v1646_v59, %v1262_v25  ;;  %v2800_v55 = vmul.f32 0.05448869, %v2608_v14  ;;  %v7626_v29 = vmul.f32 0.05448869, %v4752_v34 }
 0x1ff   :  { %8986 = vst [vmem:[#allocation148_spill] sm:$0xff] %v7623_v23  ;;  %v4371_v56 = vld [vmem:[#allocation2 + $0xa8] sm:$0xf]  ;;  %v2805_v49 = vmul.f32 0.05448869, %v7616_v10 }
 0x200   :  { %8987 = vst [vmem:[#allocation149_spill] sm:$0xff] %v7626_v29  ;;  %v4754_v63 = vld [vmem:[#allocation2 + $0xa8] sm:$0xf]  ;;  %v2415_v51 = vadd.f32 %v2223_v42, %v1838_v31  ;;  %v691_v5 = vmul.f32 0.05448869, %v499_v62  ;;  %v7789_v29 = vld [vmem:[#allocation2 + $0x360] sm:$0xff] }
 0x201   :  { %v884_v28 = vld [vmem:[#allocation2 + $0x268] sm:$0xf]  ;;  %v2997_v35 = vadd.f32 %v2805_v49, %v2420_v50  ;;  %v7629_v0 = vmul.f32 0.24420136, %v4371_v56  ;;  %v692_v25 = vmul.f32 0.05448869, %v7481_v2 }
 0x202   :  { %v4387_v20 = vld [vmem:[#allocation2 + $0x168] sm:$0xf]  ;;  %v1076_v3 = vmul.f32 0.24420136, %v884_v28  ;;  %v2992_v21 = vadd.f32 %v2800_v55, %v2415_v51  ;;  %v7633_v38 = vmul.f32 0.05448869, %v4754_v63 }
 0x203   :  { %v1460_v15 = vld [vmem:[#allocation2 + $0x328] sm:$0xf]  ;;  %8988 = vst [vmem:[#allocation150_spill] sm:$0xff] %v7629_v0  ;;  %3189 = vst.msk [vmem:[#allocation2 + $0x1a0] sm:$0xff] %vm23_vm0, %v2997_v35  ;;  %v7635_v42 = vmul.f32 0.24420136, %v4387_v20 }
 0x204   :  { %v4770_v48 = vld [vmem:[#allocation2 + $0x168] sm:$0xf]  ;;  %v1268_v14 = vadd.f32 %v1076_v3, %v691_v5  ;;  %v1652_v34 = vmul.f32 0.40261996, %v1460_v15  ;;  %8989 = vst [vmem:[#allocation151_spill] sm:$0xff] %v7633_v38  ;;  %v7642_v28 = vld [vmem:[#allocation2 + $0x4b0] sm:$0xff] }
 0x205   :  { %v2037_v59 = vld [vmem:[#allocation2 + $0x3e8] sm:$0xf]  ;;  %8990 = vst [vmem:[#allocation152_spill] sm:$0xff] %v7635_v42  ;;  %3184 = vst.msk [vmem:[#allocation2 + $0x178] sm:$0xf] %vm25_vm1, %v2992_v21  ;;  %v7779_v0 = vld [vmem:[#allocation2 + $0x350] sm:$0xff] }
 0x206   :  { %v2614_v27 = vld [vmem:[#allocation2 + $0x4a8] sm:$0xf]  ;;  %v1077_v62 = vmul.f32 0.24420136, %v7483_v57  ;;  %v7639_v31 = vmul.f32 0.05448869, %v4770_v48  ;;  %v1844_v55 = vadd.f32 %v1652_v34, %v1268_v14 }
 0x207   :  { %v4403_v56 = vld [vmem:[#allocation2 + $0x228] sm:$0xf]  ;;  %v2229_v50 = vmul.f32 0.24420136, %v2037_v59  ;;  %v2806_v49 = vmul.f32 0.05448869, %v2614_v27 }
 0x208   :  { %8991 = vst [vmem:[#allocation153_spill] sm:$0xff] %v7639_v31  ;;  %v1269_v51 = vadd.f32 %v1077_v62, %v692_v25  ;;  %v1653_v5 = vmul.f32 0.40261996, %v7487_v13  ;;  %v2230_v63 = vmul.f32 0.24420136, %v7492_v4 }
 0x209   :  { %v2421_v2 = vadd.f32 %v2229_v50, %v1844_v55  ;;  %v501_v20 = vld [vmem:[#allocation2 + $0x1b8] sm:$0xf]  ;;  %v7645_v48 = vmul.f32 0.24420136, %v4403_v56  ;;  %v4786_v42 = vld [vmem:[#allocation2 + $0x228] sm:$0xf] }
 0x20a   :  { %v886_v35 = vld [vmem:[#allocation2 + $0x278] sm:$0xf]  ;;  %v1845_v3 = vadd.f32 %v1653_v5, %v1269_v51  ;;  %v693_v15 = vmul.f32 0.05448869, %v501_v20  ;;  %v2807_v27 = vmul.f32 0.05448869, %v7642_v28 }
 0x20b   :  { %v1078_v21 = vmul.f32 0.24420136, %v886_v35  ;;  %v1462_v57 = vld [vmem:[#allocation2 + $0x338] sm:$0xf]  ;;  %v2998_v14 = vadd.f32 %v2806_v49, %v2421_v2  ;;  %v694_v4 = vmul.f32 0.05448869, %v7499_v9 }
 0x20c   :  { %v2039_v59 = vld [vmem:[#allocation2 + $0x3f8] sm:$0xf]  ;;  %v2422_v34 = vadd.f32 %v2230_v63, %v1845_v3  ;;  %v1654_v25 = vmul.f32 0.40261996, %v1462_v57  ;;  %v1079_v55 = vmul.f32 0.24420136, %v7501_v30 }
 0x20d   :  { %v1270_v13 = vadd.f32 %v1078_v21, %v693_v15  ;;  %3190 = vst.msk [vmem:[#allocation2 + $0x1a8] sm:$0xf] %vm25_vm1, %v2998_v14  ;;  %v2616_v62 = vld [vmem:[#allocation2 + $0x4b8] sm:$0xf]  ;;  %v7651_v50 = vmul.f32 0.05448869, %v4786_v42 }
 0x20e   :  { %v2999_v51 = vadd.f32 %v2807_v27, %v2422_v34  ;;  %v2231_v5 = vmul.f32 0.24420136, %v2039_v59  ;;  %v503_v20 = vld [vmem:[#allocation2 + $0x1c8] sm:$0xf]  ;;  %v1271_v49 = vadd.f32 %v1079_v55, %v694_v4  ;;  %v1655_v2 = vmul.f32 0.40261996, %v7508_v43 }
 0x20f   :  { %v1846_v56 = vadd.f32 %v1654_v25, %v1270_v13  ;;  %v7654_v63 = vld [vmem:[#allocation2 + $0x4c0] sm:$0xff]  ;;  %v695_v35 = vmul.f32 0.05448869, %v503_v20  ;;  %v2808_v15 = vmul.f32 0.05448869, %v2616_v62  ;;  %v7661_v13 = vld [vmem:[#allocation2 + $0x4d0] sm:$0xff] }
 0x210   :  { %3191 = vst.msk [vmem:[#allocation2 + $0x1b0] sm:$0xff] %vm23_vm0, %v2999_v51  ;;  %v888_v21 = vld [vmem:[#allocation2 + $0x288] sm:$0xf]  ;;  %v1847_v57 = vadd.f32 %v1655_v2, %v1271_v49  ;;  %v2232_v30 = vmul.f32 0.24420136, %v7511_v52 }
 0x211   :  { %v2423_v3 = vadd.f32 %v2231_v5, %v1846_v56  ;;  %v1464_v9 = vld [vmem:[#allocation2 + $0x348] sm:$0xf]  ;;  %v1080_v42 = vmul.f32 0.24420136, %v888_v21  ;;  %v2809_v59 = vmul.f32 0.05448869, %v7654_v63 }
 0x212   :  { %v2041_v14 = vld [vmem:[#allocation2 + $0x408] sm:$0xf]  ;;  %v696_v27 = vmul.f32 0.05448869, %v7516_v45  ;;  %v1081_v43 = vmul.f32 0.24420136, %v7518_v47  ;;  %v2424_v25 = vadd.f32 %v2232_v30, %v1847_v57 }
 0x213   :  { %v3000_v34 = vadd.f32 %v2808_v15, %v2423_v3  ;;  %v1272_v4 = vadd.f32 %v1080_v42, %v695_v35  ;;  %v1656_v55 = vmul.f32 0.40261996, %v1464_v9  ;;  %v2618_v62 = vld [vmem:[#allocation2 + $0x4c8] sm:$0xf]  ;;  %v505_v51 = vld [vmem:[#allocation2 + $0x1d8] sm:$0xf] }
 0x214   :  { %v2233_v56 = vmul.f32 0.24420136, %v2041_v14  ;;  %v1273_v52 = vadd.f32 %v1081_v43, %v696_v27  ;;  %v1657_v5 = vmul.f32 0.40261996, %v7520_v58  ;;  %v697_v20 = vmul.f32 0.05448869, %v505_v51 }
 0x215   :  { %3192 = vst.msk [vmem:[#allocation2 + $0x1b8] sm:$0xf] %vm25_vm1, %v3000_v34  ;;  %v3001_v49 = vadd.f32 %v2809_v59, %v2424_v25  ;;  %v1848_v2 = vadd.f32 %v1656_v55, %v1272_v4  ;;  %v890_v3 = vld [vmem:[#allocation2 + $0x298] sm:$0xf]  ;;  %v2810_v47 = vmul.f32 0.05448869, %v2618_v62 }
 0x216   :  { %v1466_v45 = vld [vmem:[#allocation2 + $0x358] sm:$0xf]  ;;  %v1849_v21 = vadd.f32 %v1657_v5, %v1273_v52  ;;  %v2234_v57 = vmul.f32 0.24420136, %v7527_v39  ;;  %v1082_v35 = vmul.f32 0.24420136, %v890_v3 }
 0x217   :  { %v2043_v15 = vld [vmem:[#allocation2 + $0x418] sm:$0xf]  ;;  %3193 = vst.msk [vmem:[#allocation2 + $0x1c0] sm:$0xff] %vm23_vm0, %v3001_v49  ;;  %v2425_v9 = vadd.f32 %v2233_v56, %v1848_v2  ;;  %v2811_v30 = vmul.f32 0.05448869, %v7661_v13  ;;  %v7671_v39 = vld [vmem:[#allocation2 + $0x4e0] sm:$0xff] }
 0x218   :  { %v698_v42 = vmul.f32 0.05448869, %v7529_v32  ;;  %v1083_v58 = vmul.f32 0.24420136, %v7535_v1  ;;  %v2426_v14 = vadd.f32 %v2234_v57, %v1849_v21  ;;  %v1274_v34 = vadd.f32 %v1082_v35, %v697_v20  ;;  %v2620_v43 = vld [vmem:[#allocation2 + $0x4d8] sm:$0xf] }
 0x219   :  { %v1658_v59 = vmul.f32 0.40261996, %v1466_v45  ;;  %v2235_v27 = vmul.f32 0.24420136, %v2043_v15  ;;  %v3002_v25 = vadd.f32 %v2810_v47, %v2425_v9  ;;  %v1659_v55 = vmul.f32 0.40261996, %v7537_v40 }
 0x21a   :  { %v1275_v4 = vadd.f32 %v1083_v58, %v698_v42  ;;  %v507_v62 = vld [vmem:[#allocation2 + $0x1e8] sm:$0xf]  ;;  %v3003_v51 = vadd.f32 %v2811_v30, %v2426_v14  ;;  %v2236_v32 = vmul.f32 0.24420136, %v7541_v36  ;;  %v2812_v45 = vmul.f32 0.05448869, %v2620_v43 }
 0x21b   :  { %v1850_v56 = vadd.f32 %v1658_v59, %v1274_v34  ;;  %v699_v52 = vmul.f32 0.05448869, %v507_v62  ;;  %v892_v5 = vld [vmem:[#allocation2 + $0x2a8] sm:$0xf]  ;;  %3194 = vst.msk [vmem:[#allocation2 + $0x1c8] sm:$0xf] %vm25_vm1, %v3002_v25 }
 0x21c   :  { %v1468_v49 = vld [vmem:[#allocation2 + $0x368] sm:$0xf]  ;;  %v1851_v1 = vadd.f32 %v1659_v55, %v1275_v4  ;;  %v1084_v20 = vmul.f32 0.24420136, %v892_v5  ;;  %3195 = vst.msk [vmem:[#allocation2 + $0x1d0] sm:$0xff] %vm23_vm0, %v3003_v51 }
 0x21d   :  { %v2045_v2 = vld [vmem:[#allocation2 + $0x428] sm:$0xf]  ;;  %v2427_v3 = vadd.f32 %v2235_v27, %v1850_v56  ;;  %v2813_v40 = vmul.f32 0.05448869, %v7671_v39  ;;  %v700_v15 = vmul.f32 0.05448869, %v7549_v44 }
 0x21e   :  { %v4419_v47 = vld [vmem:[#allocation2 + $0x2e8] sm:$0xf]  ;;  %v2428_v21 = vadd.f32 %v2236_v32, %v1851_v1  ;;  %v1276_v57 = vadd.f32 %v1084_v20, %v699_v52  ;;  %v1660_v35 = vmul.f32 0.40261996, %v1468_v49  ;;  %v1085_v9 = vmul.f32 0.24420136, %v7551_v12 }
 0x21f   :  { %v509_v30 = vld [vmem:[#allocation2 + $0x1f8] sm:$0xf]  ;;  %v3004_v42 = vadd.f32 %v2812_v45, %v2427_v3  ;;  %v2237_v58 = vmul.f32 0.24420136, %v2045_v2  ;;  %v2622_v36 = vld [vmem:[#allocation2 + $0x4e8] sm:$0xf] }
 0x220   :  { %v1661_v14 = vmul.f32 0.40261996, %v7555_v8  ;;  %v3005_v34 = vadd.f32 %v2813_v40, %v2428_v21  ;;  %v1852_v59 = vadd.f32 %v1660_v35, %v1276_v57  ;;  %v1277_v27 = vadd.f32 %v1085_v9, %v700_v15  ;;  %v894_v25 = vld [vmem:[#allocation2 + $0x2b8] sm:$0xf]  ;;  %v4802_v55 = vld [vmem:[#allocation2 + $0x2e8] sm:$0xf] }
 0x221   :  { %v701_v43 = vmul.f32 0.05448869, %v509_v30  ;;  %v1470_v4 = vld [vmem:[#allocation2 + $0x378] sm:$0xf]  ;;  %3196 = vst.msk [vmem:[#allocation2 + $0x1d8] sm:$0xf] %vm25_vm1, %v3004_v42 }
 0x222   :  { %v7681_v44 = vld [vmem:[#allocation2 + $0x4f0] sm:$0xff]  ;;  %v1086_v62 = vmul.f32 0.24420136, %v894_v25  ;;  %3197 = vst.msk [vmem:[#allocation2 + $0x1e0] sm:$0xff] %vm23_vm0, %v3005_v34  ;;  %v2429_v12 = vadd.f32 %v2237_v58, %v1852_v59  ;;  %v2814_v51 = vmul.f32 0.05448869, %v2622_v36  ;;  %v1853_v56 = vadd.f32 %v1661_v14, %v1277_v27 }
 0x223   :  { %v2238_v52 = vmul.f32 0.24420136, %v7557_v33  ;;  %v2047_v8 = vld [vmem:[#allocation2 + $0x438] sm:$0xf]  ;;  %v7685_v5 = vmul.f32 0.24420136, %v4419_v47 }
 0x224   :  { %v1278_v49 = vadd.f32 %v1086_v62, %v701_v43  ;;  %v1662_v1 = vmul.f32 0.40261996, %v1470_v4  ;;  %v702_v32 = vmul.f32 0.05448869, %v7565_v24  ;;  %v3370_v20 = vld [vmem:[#allocation2 + $0x1c8] sm:$0xf]  ;;  %v3006_v2 = vadd.f32 %v2814_v51, %v2429_v12 }
 0x225   :  { %v2430_v3 = vadd.f32 %v2238_v52, %v1853_v56  ;;  %v2815_v45 = vmul.f32 0.05448869, %v7681_v44  ;;  %v2624_v40 = vld [vmem:[#allocation2 + $0x4f8] sm:$0xf]  ;;  %v7689_v15 = vmul.f32 0.05448869, %v4802_v55 }
 0x226   :  { %v1854_v21 = vadd.f32 %v1662_v1, %v1278_v49  ;;  %v2239_v57 = vmul.f32 0.24420136, %v2047_v8  ;;  %v1087_v35 = vmul.f32 0.24420136, %v7567_v11  ;;  %v4435_v33 = vld [vmem:[#allocation2 + $0x3a8] sm:$0xf] }
 0x227   :  { %v4818_v9 = vld [vmem:[#allocation2 + $0x3a8] sm:$0xf]  ;;  %v4756_v47 = vld [vmem:[#allocation2 + $0xb8] sm:$0xf]  ;;  %3198 = vst.msk [vmem:[#allocation2 + $0x1e8] sm:$0xf] %vm25_vm1, %v3006_v2  ;;  %v3007_v30 = vadd.f32 %v2815_v45, %v2430_v3 }
 0x228   :  { %v511_v42 = vld [vmem:[#allocation2 + $0x208] sm:$0xf]  ;;  %v3498_v24 = vmul.f32 0.05448869, %v3370_v20  ;;  %v2431_v58 = vadd.f32 %v2239_v57, %v1854_v21  ;;  %v2816_v36 = vmul.f32 0.05448869, %v2624_v40  ;;  %v1279_v14 = vadd.f32 %v1087_v35, %v702_v32 }
 0x229   :  { %v896_v34 = vld [vmem:[#allocation2 + $0x2c8] sm:$0xf]  ;;  %v3627_v59 = vld [vmem:[#allocation2 + $0x1d8] sm:$0xf]  ;;  %3199 = vst.msk [vmem:[#allocation2 + $0x1f0] sm:$0xff] %vm23_vm0, %v3007_v30  ;;  %v7695_v55 = vld [vmem:[#allocation2 + $0x500] sm:$0xff] }
 0x22a   :  { %v1663_v27 = vmul.f32 0.40261996, %v7572_v22  ;;  %v703_v43 = vmul.f32 0.05448869, %v511_v42  ;;  %v3611_v25 = vld [vmem:[#allocation2 + $0x118] sm:$0xf]  ;;  %v3008_v4 = vadd.f32 %v2816_v36, %v2431_v58 }
 0x22b   :  { %v3755_v11 = vmul.f32 0.24420136, %v3627_v59  ;;  %v2240_v12 = vmul.f32 0.24420136, %v7577_v16  ;;  %v1088_v51 = vmul.f32 0.24420136, %v896_v34 }
 0x22c   :  { %v1855_v62 = vadd.f32 %v1663_v27, %v1279_v14  ;;  %v1472_v56 = vld [vmem:[#allocation2 + $0x388] sm:$0xf]  ;;  %v7698_v52 = vmul.f32 0.24420136, %v4435_v33  ;;  %v7700_v8 = vmul.f32 0.05448869, %v4818_v9 }
 0x22d   :  { %v7702_v49 = vmul.f32 0.05448869, %v4756_v47  ;;  %3200 = vst.msk [vmem:[#allocation2 + $0x1f8] sm:$0xf] %vm25_vm1, %v3008_v4  ;;  %v3613_v22 = vld [vmem:[#allocation2 + $0x128] sm:$0xf]  ;;  %v3883_v1 = vadd.f32 %v3755_v11, %v3498_v24  ;;  %v1280_v2 = vadd.f32 %v1088_v51, %v703_v43 }
 0x22e   :  { %8992 = vst [vmem:[#allocation154_spill] sm:$0xff] %v7698_v52  ;;  %v2432_v32 = vadd.f32 %v2240_v12, %v1855_v62  ;;  %v2817_v20 = vmul.f32 0.05448869, %v7695_v55  ;;  %v2049_v3 = vld [vmem:[#allocation2 + $0x448] sm:$0xf] }
 0x22f   :  { %8993 = vst [vmem:[#allocation155_spill] sm:$0xff] %v7702_v49  ;;  %v7706_v45 = vmul.f32 0.24420136, %v3611_v25  ;;  %v4012_v16 = vld [vmem:[#allocation2 + $0x1e8] sm:$0xf] }
 0x230   :  { %v1664_v40 = vmul.f32 0.40261996, %v1472_v56  ;;  %v3996_v21 = vld [vmem:[#allocation2 + $0x128] sm:$0xf]  ;;  %v4140_v57 = vmul.f32 0.40261996, %v4012_v16  ;;  %v3009_v35 = vadd.f32 %v2817_v20, %v2432_v32 }
 0x231   :  { %8994 = vst [vmem:[#allocation156_spill] sm:$0xff] %v7706_v45  ;;  %v2626_v33 = vld [vmem:[#allocation2 + $0x508] sm:$0xf]  ;;  %v7708_v9 = vmul.f32 0.24420136, %v3613_v22  ;;  %v7716_v56 = vld [vmem:[#allocation2 + $0x510] sm:$0xff] }
 0x232   :  { %v3372_v47 = vld [vmem:[#allocation2 + $0x1d8] sm:$0xf]  ;;  %v1856_v30 = vadd.f32 %v1664_v40, %v1280_v2  ;;  %v2241_v42 = vmul.f32 0.24420136, %v2049_v3  ;;  %v3374_v58 = vld [vmem:[#allocation2 + $0x1e8] sm:$0xf]  ;;  %v4268_v36 = vadd.f32 %v4140_v57, %v3883_v1 }
 0x233   :  { %8995 = vst [vmem:[#allocation157_spill] sm:$0xff] %v7708_v9  ;;  %v3629_v24 = vld [vmem:[#allocation2 + $0x1e8] sm:$0xf]  ;;  %3201 = vst.msk [vmem:[#allocation2 + $0x200] sm:$0xff] %vm23_vm0, %v3009_v35  ;;  %v704_v14 = vmul.f32 0.05448869, %v7586_v18 }
 0x234   :  { %v7712_v34 = vmul.f32 0.40261996, %v3996_v21  ;;  %v2433_v59 = vadd.f32 %v2241_v42, %v1856_v30  ;;  %v2818_v27 = vmul.f32 0.05448869, %v2626_v33  ;;  %v1089_v43 = vmul.f32 0.24420136, %v7590_v53 }
 0x235   :  { %v3500_v25 = vmul.f32 0.05448869, %v3372_v47  ;;  %v3376_v11 = vld [vmem:[#allocation2 + $0x1f8] sm:$0xf]  ;;  %v1665_v4 = vmul.f32 0.40261996, %v7596_v37 }
 0x236   :  { %8996 = vst [vmem:[#allocation158_spill] sm:$0xff] %v7712_v34  ;;  %v3502_v62 = vmul.f32 0.05448869, %v3374_v58  ;;  %v3757_v12 = vmul.f32 0.24420136, %v3629_v24  ;;  %v3010_v51 = vadd.f32 %v2818_v27, %v2433_v59  ;;  %v1281_v20 = vadd.f32 %v1089_v43, %v704_v14  ;;  %v516_v14 = vld [vmem:[#allocation2 + $0x230] sm:$0xff] }
 0x237   :  { %v513_v22 = vld [vmem:[#allocation2 + $0x218] sm:$0xf]  ;;  %v2242_v18 = vmul.f32 0.24420136, %v7599_v41  ;;  %v7719_v2 = vmul.f32 0.05448869, %v3376_v11 }
 0x238   :  { %v3631_v1 = vld [vmem:[#allocation2 + $0x1f8] sm:$0xf]  ;;  %3202 = vst.msk [vmem:[#allocation2 + $0x208] sm:$0xf] %vm25_vm1, %v3010_v51  ;;  %v1857_v16 = vadd.f32 %v1665_v4, %v1281_v20  ;;  %v705_v40 = vmul.f32 0.05448869, %v513_v22 }
 0x239   :  { %v4397_v32 = vld [vmem:[#allocation2 + $0x1f8] sm:$0xf]  ;;  %v3759_v57 = vmul.f32 0.24420136, %v3631_v1  ;;  %v2819_v58 = vmul.f32 0.05448869, %v7716_v56 }
 0x23a   :  { %v4525_v3 = vmul.f32 0.24420136, %v4397_v32  ;;  %v898_v53 = vld [vmem:[#allocation2 + $0x2d8] sm:$0xf]  ;;  %v2434_v42 = vadd.f32 %v2242_v18, %v1857_v16  ;;  %v7725_v59 = vld [vmem:[#allocation2 + $0x2f0] sm:$0xff]  ;;  %v3885_v32 = vadd.f32 %v3757_v12, %v3500_v25 }
 0x23b   :  { %v1090_v37 = vmul.f32 0.24420136, %v898_v53  ;;  %v1474_v21 = vld [vmem:[#allocation2 + $0x398] sm:$0xf]  ;;  %v708_v27 = vmul.f32 0.05448869, %v516_v14 }
 0x23c   :  { %v7722_v35 = vadd.f32 %v4525_v3, %v4268_v36  ;;  %v1666_v33 = vmul.f32 0.40261996, %v1474_v21  ;;  %v2051_v47 = vld [vmem:[#allocation2 + $0x458] sm:$0xf]  ;;  %v1093_v43 = vmul.f32 0.24420136, %v7725_v59  ;;  %v3011_v4 = vadd.f32 %v2819_v58, %v2434_v42 }
 0x23d   :  { %v4014_v30 = vld [vmem:[#allocation2 + $0x1f8] sm:$0xf]  ;;  %v1282_v41 = vadd.f32 %v1090_v37, %v705_v40  ;;  %v7728_v11 = vld [vmem:[#allocation2 + $0x3b0] sm:$0xff]  ;;  %v2243_v36 = vmul.f32 0.24420136, %v2051_v47 }
 0x23e   :  { %8997 = vst [vmem:[#allocation159_spill] sm:$0xff] %v7722_v35  ;;  %v2628_v24 = vld [vmem:[#allocation2 + $0x518] sm:$0xf]  ;;  %v1669_v22 = vmul.f32 0.40261996, %v7728_v11  ;;  %v1285_v18 = vadd.f32 %v1093_v43, %v708_v27  ;;  %v7731_v3 = vld [vmem:[#allocation2 + $0x530] sm:$0xff] }
 0x23f   :  { %v1858_v51 = vadd.f32 %v1666_v33, %v1282_v41  ;;  %v517_v1 = vld [vmem:[#allocation2 + $0x238] sm:$0xf]  ;;  %v2820_v20 = vmul.f32 0.05448869, %v2628_v24  ;;  %v3633_v16 = vld [vmem:[#allocation2 + $0x208] sm:$0xf]  ;;  %v3887_v24 = vadd.f32 %v3759_v57, %v3502_v62 }
 0x240   :  { %v902_v53 = vld [vmem:[#allocation2 + $0x2f8] sm:$0xf]  ;;  %3203 = vst.msk [vmem:[#allocation2 + $0x210] sm:$0xff] %vm23_vm0, %v3011_v4  ;;  %v2246_v37 = vmul.f32 0.24420136, %v7610_v19  ;;  %v1861_v33 = vadd.f32 %v1669_v22, %v1285_v18  ;;  %v7748_v45 = vld [vmem:[#allocation2 + $0x3f0] sm:$0xff] }
 0x241   :  { %v2435_v40 = vadd.f32 %v2243_v36, %v1858_v51  ;;  %v709_v21 = vmul.f32 0.05448869, %v517_v1  ;;  %v4142_v14 = vmul.f32 0.40261996, %v4014_v30  ;;  %v4016_v42 = vld [vmem:[#allocation2 + $0x208] sm:$0xf] }
 0x242   :  { %v2823_v47 = vmul.f32 0.05448869, %v7731_v3  ;;  %v4399_v58 = vld [vmem:[#allocation2 + $0x208] sm:$0xf]  ;;  %v1094_v25 = vmul.f32 0.24420136, %v902_v53  ;;  %v2438_v4 = vadd.f32 %v2246_v37, %v1861_v33 }
 0x243   :  { %v3012_v41 = vadd.f32 %v2820_v20, %v2435_v40  ;;  %v1478_v12 = vld [vmem:[#allocation2 + $0x3b8] sm:$0xf]  ;;  %v4270_v27 = vadd.f32 %v4142_v14, %v3885_v32  ;;  %v3761_v43 = vmul.f32 0.24420136, %v3633_v16  ;;  %v522_v30 = vld [vmem:[#allocation2 + $0x260] sm:$0xff]  ;;  %v524_v40 = vld [vmem:[#allocation2 + $0x270] sm:$0xff] }
 0x244   :  { %v2055_v31 = vld [vmem:[#allocation2 + $0x478] sm:$0xf]  ;;  %v1286_v51 = vadd.f32 %v1094_v25, %v709_v21  ;;  %v1670_v19 = vmul.f32 0.40261996, %v1478_v12  ;;  %v7737_v1 = vld [vmem:[#allocation2 + $0x320] sm:$0xff]  ;;  %v3015_v62 = vadd.f32 %v2823_v47, %v2438_v4 }
 0x245   :  { %v2632_v9 = vld [vmem:[#allocation2 + $0x538] sm:$0xf]  ;;  %3204 = vst.msk [vmem:[#allocation2 + $0x218] sm:$0xf] %vm25_vm1, %v3012_v41  ;;  %v2247_v36 = vmul.f32 0.24420136, %v2055_v31  ;;  %v3889_v37 = vadd.f32 %v3761_v43, %v7719_v2 }
 0x246   :  { %v2061_v22 = vld [vmem:[#allocation2 + $0x4a8] sm:$0xf]  ;;  %v4144_v18 = vmul.f32 0.40261996, %v4016_v42  ;;  %v714_v34 = vmul.f32 0.05448869, %v522_v30  ;;  %v1862_v57 = vadd.f32 %v1670_v19, %v1286_v51 }
 0x247   :  { %v1099_v20 = vmul.f32 0.24420136, %v7737_v1  ;;  %v4527_v53 = vmul.f32 0.24420136, %v4399_v58  ;;  %v2824_v32 = vmul.f32 0.05448869, %v2632_v9 }
 0x248   :  { %v7740_v16 = vld [vmem:[#allocation2 + $0x3e0] sm:$0xff]  ;;  %v4272_v21 = vadd.f32 %v4144_v18, %v3887_v24  ;;  %v523_v33 = vld [vmem:[#allocation2 + $0x268] sm:$0xf]  ;;  %3207 = vst.msk [vmem:[#allocation2 + $0x230] sm:$0xff] %vm23_vm0, %v3015_v62  ;;  %v2439_v12 = vadd.f32 %v2247_v36, %v1862_v57  ;;  %v2252_v51 = vmul.f32 0.24420136, %v7616_v10 }
 0x249   :  { %v1291_v14 = vadd.f32 %v1099_v20, %v714_v34  ;;  %v1675_v31 = vmul.f32 0.40261996, %v7740_v16  ;;  %v908_v41 = vld [vmem:[#allocation2 + $0x328] sm:$0xf]  ;;  %v4655_v42 = vadd.f32 %v4527_v53, %v4270_v27  ;;  %v715_v58 = vmul.f32 0.05448869, %v523_v33 }
 0x24a   :  { %v2638_v25 = vld [vmem:[#allocation2 + $0x568] sm:$0xf]  ;;  %v1100_v47 = vmul.f32 0.24420136, %v908_v41  ;;  %v6236_v19 = vld [vmem:[#allocation2 + $0x560] sm:$0xff]  ;;  %v3016_v24 = vadd.f32 %v2824_v32, %v2439_v12  ;;  %v7746_v20 = vld [vmem:[#allocation2 + $0x330] sm:$0xff] }
 0x24b   :  { %v1484_v4 = vld [vmem:[#allocation2 + $0x3e8] sm:$0xf]  ;;  %v1867_v9 = vadd.f32 %v1675_v31, %v1291_v14  ;;  %v2829_v30 = vmul.f32 0.05448869, %v6236_v19  ;;  %v2253_v43 = vmul.f32 0.24420136, %v2061_v22 }
 0x24c   :  { %v1676_v2 = vmul.f32 0.40261996, %v1484_v4  ;;  %v1292_v34 = vadd.f32 %v1100_v47, %v715_v58  ;;  %v716_v18 = vmul.f32 0.05448869, %v524_v40  ;;  %v4018_v27 = vld [vmem:[#allocation2 + $0x218] sm:$0xf] }
 0x24d   :  { %v4401_v53 = vld [vmem:[#allocation2 + $0x218] sm:$0xf]  ;;  %v2444_v62 = vadd.f32 %v2252_v51, %v1867_v9  ;;  %v4146_v57 = vmul.f32 0.40261996, %v4018_v27  ;;  %3208 = vst.msk [vmem:[#allocation2 + $0x238] sm:$0xf] %vm25_vm1, %v3016_v24 }
 0x24e   :  { %v4784_v36 = vld [vmem:[#allocation2 + $0x218] sm:$0xf]  ;;  %v4529_v33 = vmul.f32 0.24420136, %v4401_v53  ;;  %v1868_v10 = vadd.f32 %v1676_v2, %v1292_v34  ;;  %v2830_v58 = vmul.f32 0.05448869, %v2638_v25 }
 0x24f   :  { %v4912_v14 = vmul.f32 0.05448869, %v4784_v36  ;;  %v2063_v31 = vld [vmem:[#allocation2 + $0x4b8] sm:$0xf]  ;;  %v3021_v12 = vadd.f32 %v2829_v30, %v2444_v62  ;;  %v1101_v47 = vmul.f32 0.24420136, %v7746_v20  ;;  %v4274_v9 = vadd.f32 %v4146_v57, %v3889_v37 }
 0x250   :  { %v2640_v41 = vld [vmem:[#allocation2 + $0x578] sm:$0xf]  ;;  %v2254_v4 = vmul.f32 0.24420136, %v7642_v28  ;;  %v4657_v51 = vadd.f32 %v4529_v33, %v4272_v21  ;;  %v2445_v27 = vadd.f32 %v2253_v43, %v1868_v10  ;;  %v7759_v53 = vld [vmem:[#allocation2 + $0x1e8] sm:$0xf] }
 0x251   :  { %v7751_v32 = vld [vmem:[#allocation2 + $0x1d8] sm:$0xf]  ;;  %v5040_v19 = vadd.f32 %v4912_v14, %v4655_v42  ;;  %9001 = vst [vmem:[#allocation163_spill] sm:$0xff] %v7759_v53  ;;  %v7761_v36 = vld [vmem:[#allocation2 + $0x1e8] sm:$0xf]  ;;  %3213 = vst.msk [vmem:[#allocation2 + $0x260] sm:$0xff] %vm23_vm0, %v3021_v12 }
 0x252   :  { %8998 = vst [vmem:[#allocation160_spill] sm:$0xff] %v7751_v32  ;;  %v7753_v22 = vld [vmem:[#allocation2 + $0x1d8] sm:$0xf]  ;;  %9002 = vst [vmem:[#allocation164_spill] sm:$0xff] %v7761_v36  ;;  %v1677_v25 = vmul.f32 0.40261996, %v7748_v45  ;;  %v5042_v28 = vadd.f32 %v7651_v50, %v4657_v51  ;;  %v3022_v37 = vadd.f32 %v2830_v58, %v2445_v27 }
 0x253   :  { %8999 = vst [vmem:[#allocation161_spill] sm:$0xff] %v7753_v22  ;;  %v7755_v40 = vld [vmem:[#allocation2 + $0x1d8] sm:$0xf]  ;;  %v6237_v21 = vld [vmem:[#allocation2 + $0x570] sm:$0xff]  ;;  %v526_v43 = vld [vmem:[#allocation2 + $0x280] sm:$0xff] }
 0x254   :  { %9000 = vst [vmem:[#allocation162_spill] sm:$0xff] %v7755_v40  ;;  %v525_v24 = vld [vmem:[#allocation2 + $0x278] sm:$0xf]  ;;  %v1293_v40 = vadd.f32 %v1101_v47, %v716_v18  ;;  %5168 = vst.msk [vmem:[#allocation2 + $0x1d8] sm:$0xf] %vm25_vm1, %v5040_v19  ;;  %v7767_v57 = vld [vmem:[#allocation2 + $0x340] sm:$0xff] }
 0x255   :  { %v910_v2 = vld [vmem:[#allocation2 + $0x338] sm:$0xf]  ;;  %v717_v30 = vmul.f32 0.05448869, %v525_v24  ;;  %v2831_v42 = vmul.f32 0.05448869, %v6237_v21  ;;  %v4659_v24 = vadd.f32 %v7645_v48, %v4274_v9 }
 0x256   :  { %v1486_v34 = vld [vmem:[#allocation2 + $0x3f8] sm:$0xf]  ;;  %v1102_v62 = vmul.f32 0.24420136, %v910_v2  ;;  %v7769_v33 = vld [vmem:[#allocation2 + $0x400] sm:$0xff]  ;;  %v1869_v14 = vadd.f32 %v1677_v25, %v1293_v40 }
 0x257   :  { %v1678_v12 = vmul.f32 0.40261996, %v1486_v34  ;;  %v718_v18 = vmul.f32 0.05448869, %v526_v43  ;;  %v527_v47 = vld [vmem:[#allocation2 + $0x288] sm:$0xf] }
 0x258   :  { %v1294_v10 = vadd.f32 %v1102_v62, %v717_v30  ;;  %5170 = vst.msk [vmem:[#allocation2 + $0x1e8] sm:$0xf] %vm25_vm1, %v5042_v28  ;;  %3214 = vst.msk [vmem:[#allocation2 + $0x268] sm:$0xf] %vm25_vm1, %v3022_v37  ;;  %v2255_v50 = vmul.f32 0.24420136, %v2063_v31  ;;  %v2446_v2 = vadd.f32 %v2254_v4, %v1869_v14 }
 0x259   :  { %v2832_v58 = vmul.f32 0.05448869, %v2640_v41  ;;  %v1103_v51 = vmul.f32 0.24420136, %v7767_v57  ;;  %v2065_v19 = vld [vmem:[#allocation2 + $0x4c8] sm:$0xf] }
 0x25a   :  { %v4788_v27 = vld [vmem:[#allocation2 + $0x238] sm:$0xf]  ;;  %v1870_v21 = vadd.f32 %v1678_v12, %v1294_v10  ;;  %v1679_v40 = vmul.f32 0.40261996, %v7769_v33  ;;  %v719_v25 = vmul.f32 0.05448869, %v527_v47  ;;  %v3023_v48 = vadd.f32 %v2831_v42, %v2446_v2 }
 0x25b   :  { %v4916_v34 = vmul.f32 0.05448869, %v4788_v27  ;;  %v1295_v30 = vadd.f32 %v1103_v51, %v718_v18  ;;  %v912_v62 = vld [vmem:[#allocation2 + $0x348] sm:$0xf]  ;;  %v7776_v49 = vld [vmem:[#allocation2 + $0x1f8] sm:$0xf] }
 0x25c   :  { %v1488_v43 = vld [vmem:[#allocation2 + $0x408] sm:$0xf]  ;;  %9003 = vst [vmem:[#allocation165_spill] sm:$0xff] %v7776_v49  ;;  %v2447_v9 = vadd.f32 %v2255_v50, %v1870_v21  ;;  %v2256_v31 = vmul.f32 0.24420136, %v7654_v63  ;;  %v528_v37 = vld [vmem:[#allocation2 + $0x290] sm:$0xff] }
 0x25d   :  { %v2642_v28 = vld [vmem:[#allocation2 + $0x588] sm:$0xf]  ;;  %v1104_v41 = vmul.f32 0.24420136, %v912_v62  ;;  %v5044_v4 = vadd.f32 %v4916_v34, %v4659_v24  ;;  %v1871_v14 = vadd.f32 %v1679_v40, %v1295_v30  ;;  %v6238_v10 = vld [vmem:[#allocation2 + $0x580] sm:$0xff]  ;;  %v7781_v27 = vld [vmem:[#allocation2 + $0x410] sm:$0xff] }
 0x25e   :  { %v2833_v12 = vmul.f32 0.05448869, %v6238_v10  ;;  %v1680_v47 = vmul.f32 0.40261996, %v1488_v43  ;;  %v2067_v18 = vld [vmem:[#allocation2 + $0x4d8] sm:$0xf]  ;;  %v3024_v51 = vadd.f32 %v2832_v58, %v2447_v9 }
 0x25f   :  { %3215 = vst.msk [vmem:[#allocation2 + $0x270] sm:$0xff] %vm23_vm0, %v3023_v48  ;;  %v1296_v38 = vadd.f32 %v1104_v41, %v719_v25  ;;  %v720_v42 = vmul.f32 0.05448869, %v528_v37  ;;  %v1105_v50 = vmul.f32 0.24420136, %v7779_v0  ;;  %v2448_v2 = vadd.f32 %v2256_v31, %v1871_v14  ;;  %v530_v40 = vld [vmem:[#allocation2 + $0x2a0] sm:$0xff] }
 0x260   :  { %v529_v63 = vld [vmem:[#allocation2 + $0x298] sm:$0xf]  ;;  %5172 = vst.msk [vmem:[#allocation2 + $0x1f8] sm:$0xf] %vm25_vm1, %v5044_v4  ;;  %v2257_v21 = vmul.f32 0.24420136, %v2065_v19 }
 0x261   :  { %v1681_v24 = vmul.f32 0.40261996, %v7781_v27  ;;  %3216 = vst.msk [vmem:[#allocation2 + $0x278] sm:$0xf] %vm25_vm1, %v3024_v51  ;;  %v1872_v34 = vadd.f32 %v1680_v47, %v1296_v38  ;;  %v1297_v30 = vadd.f32 %v1105_v50, %v720_v42  ;;  %v721_v62 = vmul.f32 0.05448869, %v529_v63 }
 0x262   :  { %v914_v43 = vld [vmem:[#allocation2 + $0x358] sm:$0xf]  ;;  %v4379_v25 = vld [vmem:[#allocation2 + $0x128] sm:$0xf]  ;;  %v3025_v9 = vadd.f32 %v2833_v12, %v2448_v2  ;;  %v2834_v41 = vmul.f32 0.05448869, %v2642_v28 }
 0x263   :  { %v1490_v48 = vld [vmem:[#allocation2 + $0x418] sm:$0xf]  ;;  %v2258_v37 = vmul.f32 0.24420136, %v7661_v13  ;;  %v1106_v10 = vmul.f32 0.24420136, %v914_v43  ;;  %v2449_v4 = vadd.f32 %v2257_v21, %v1872_v34  ;;  %v1873_v31 = vadd.f32 %v1681_v24, %v1297_v30 }
 0x264   :  { %v2644_v58 = vld [vmem:[#allocation2 + $0x598] sm:$0xf]  ;;  %v6239_v19 = vld [vmem:[#allocation2 + $0x590] sm:$0xff]  ;;  %v722_v23 = vmul.f32 0.05448869, %v530_v40  ;;  %v7791_v51 = vld [vmem:[#allocation2 + $0x420] sm:$0xff] }
 0x265   :  { %v2835_v14 = vmul.f32 0.05448869, %v6239_v19  ;;  %v2069_v38 = vld [vmem:[#allocation2 + $0x4e8] sm:$0xf]  ;;  %3217 = vst.msk [vmem:[#allocation2 + $0x280] sm:$0xff] %vm23_vm0, %v3025_v9  ;;  %v1298_v47 = vadd.f32 %v1106_v10, %v721_v62  ;;  %v3026_v12 = vadd.f32 %v2834_v41, %v2449_v4  ;;  %v2450_v13 = vadd.f32 %v2258_v37, %v1873_v31 }
 0x266   :  { %v1682_v42 = vmul.f32 0.40261996, %v1490_v48  ;;  %v2259_v50 = vmul.f32 0.24420136, %v2067_v18  ;;  %v1107_v28 = vmul.f32 0.24420136, %v7789_v29 }
 0x267   :  { %v1683_v63 = vmul.f32 0.40261996, %v7791_v51  ;;  %v531_v2 = vld [vmem:[#allocation2 + $0x2a8] sm:$0xf]  ;;  %v7796_v19 = vmul.f32 0.24420136, %v4379_v25  ;;  %v3027_v62 = vadd.f32 %v2835_v14, %v2450_v13 }
 0x268   :  { %v916_v21 = vld [vmem:[#allocation2 + $0x368] sm:$0xf]  ;;  %v1874_v24 = vadd.f32 %v1682_v42, %v1298_v47  ;;  %v1299_v40 = vadd.f32 %v1107_v28, %v722_v23  ;;  %v723_v34 = vmul.f32 0.05448869, %v531_v2  ;;  %3218 = vst.msk [vmem:[#allocation2 + $0x288] sm:$0xf] %vm25_vm1, %v3026_v12 }
 0x269   :  { %v1108_v30 = vmul.f32 0.24420136, %v916_v21  ;;  %v1492_v43 = vld [vmem:[#allocation2 + $0x428] sm:$0xf]  ;;  %9004 = vst [vmem:[#allocation166_spill] sm:$0xff] %v7796_v19  ;;  %3219 = vst.msk [vmem:[#allocation2 + $0x290] sm:$0xff] %vm23_vm0, %v3027_v62 }
 0x26a   :  { %v2836_v48 = vmul.f32 0.05448869, %v2644_v58  ;;  %v2260_v18 = vmul.f32 0.24420136, %v7671_v39  ;;  %v2646_v9 = vld [vmem:[#allocation2 + $0x5a8] sm:$0xf]  ;;  %v2451_v41 = vadd.f32 %v2259_v50, %v1874_v24  ;;  %v1875_v37 = vadd.f32 %v1683_v63, %v1299_v40 }
 0x26b   :  { %v1300_v10 = vadd.f32 %v1108_v30, %v723_v34  ;;  %v1684_v4 = vmul.f32 0.40261996, %v1492_v43  ;;  %v3615_v31 = vld [vmem:[#allocation2 + $0x138] sm:$0xf]  ;;  %v6240_v23 = vld [vmem:[#allocation2 + $0x5a0] sm:$0xff]  ;;  %v532_v28 = vld [vmem:[#allocation2 + $0x2b0] sm:$0xff] }
 0x26c   :  { %v2837_v47 = vmul.f32 0.05448869, %v6240_v23  ;;  %v2261_v42 = vmul.f32 0.24420136, %v2069_v38  ;;  %v7801_v25 = vld [vmem:[#allocation2 + $0x370] sm:$0xff]  ;;  %v3028_v2 = vadd.f32 %v2836_v48, %v2451_v41  ;;  %v2452_v12 = vadd.f32 %v2260_v18, %v1875_v37 }
 0x26d   :  { %v1876_v14 = vadd.f32 %v1684_v4, %v1300_v10  ;;  %v724_v58 = vmul.f32 0.05448869, %v532_v28  ;;  %v7803_v13 = vld [vmem:[#allocation2 + $0x430] sm:$0xff]  ;;  %v533_v39 = vld [vmem:[#allocation2 + $0x2b8] sm:$0xf] }
 0x26e   :  { %v3998_v50 = vld [vmem:[#allocation2 + $0x138] sm:$0xf]  ;;  %v1109_v21 = vmul.f32 0.24420136, %v7801_v25  ;;  %3220 = vst.msk [vmem:[#allocation2 + $0x298] sm:$0xf] %vm25_vm1, %v3028_v2  ;;  %v3029_v40 = vadd.f32 %v2837_v47, %v2452_v12 }
 0x26f   :  { %v3384_v63 = vld [vmem:[#allocation2 + $0x278] sm:$0xf]  ;;  %v2453_v34 = vadd.f32 %v2261_v42, %v1876_v14  ;;  %v2838_v38 = vmul.f32 0.05448869, %v2646_v9  ;;  %v725_v30 = vmul.f32 0.05448869, %v533_v39 }
 0x270   :  { %v2071_v24 = vld [vmem:[#allocation2 + $0x4f8] sm:$0xf]  ;;  %v1301_v62 = vadd.f32 %v1109_v21, %v724_v58  ;;  %v1685_v48 = vmul.f32 0.40261996, %v7803_v13  ;;  %v7808_v37 = vmul.f32 0.24420136, %v3615_v31 }
 0x271   :  { %v918_v43 = vld [vmem:[#allocation2 + $0x378] sm:$0xf]  ;;  %v3512_v10 = vmul.f32 0.05448869, %v3384_v63  ;;  %v3641_v4 = vld [vmem:[#allocation2 + $0x288] sm:$0xf]  ;;  %v3030_v23 = vadd.f32 %v2838_v38, %v2453_v34 }
 0x272   :  { %v1110_v18 = vmul.f32 0.24420136, %v918_v43  ;;  %v1494_v41 = vld [vmem:[#allocation2 + $0x438] sm:$0xf]  ;;  %9005 = vst [vmem:[#allocation167_spill] sm:$0xff] %v7808_v37  ;;  %3221 = vst.msk [vmem:[#allocation2 + $0x2a0] sm:$0xff] %vm23_vm0, %v3029_v40  ;;  %v1877_v2 = vadd.f32 %v1685_v48, %v1301_v62 }
 0x273   :  { %v4381_v28 = vld [vmem:[#allocation2 + $0x138] sm:$0xf]  ;;  %v3769_v19 = vmul.f32 0.24420136, %v3641_v4  ;;  %v2262_v47 = vmul.f32 0.24420136, %v7681_v44 }
 0x274   :  { %v534_v9 = vld [vmem:[#allocation2 + $0x2c0] sm:$0xff]  ;;  %v2648_v42 = vld [vmem:[#allocation2 + $0x5b8] sm:$0xf]  ;;  %v7812_v12 = vmul.f32 0.40261996, %v3998_v50  ;;  %v1302_v58 = vadd.f32 %v1110_v18, %v725_v30  ;;  %v6241_v63 = vld [vmem:[#allocation2 + $0x5b0] sm:$0xff] }
 0x275   :  { %v4764_v14 = vld [vmem:[#allocation2 + $0x138] sm:$0xf]  ;;  %3222 = vst.msk [vmem:[#allocation2 + $0x2a8] sm:$0xf] %vm25_vm1, %v3030_v23  ;;  %v1686_v31 = vmul.f32 0.40261996, %v1494_v41  ;;  %v2454_v39 = vadd.f32 %v2262_v47, %v1877_v2  ;;  %v3897_v34 = vadd.f32 %v3769_v19, %v3512_v10 }
 0x276   :  { %9006 = vst [vmem:[#allocation168_spill] sm:$0xff] %v7812_v12  ;;  %v2839_v21 = vmul.f32 0.05448869, %v6241_v63  ;;  %v2263_v43 = vmul.f32 0.24420136, %v2071_v24  ;;  %v7815_v40 = vld [vmem:[#allocation2 + $0x380] sm:$0xff] }
 0x277   :  { %v1878_v38 = vadd.f32 %v1686_v31, %v1302_v58  ;;  %v726_v62 = vmul.f32 0.05448869, %v534_v9  ;;  %v1111_v44 = vmul.f32 0.24420136, %v7815_v40  ;;  %v7818_v48 = vld [vmem:[#allocation2 + $0x440] sm:$0xff] }
 0x278   :  { %v3386_v50 = vld [vmem:[#allocation2 + $0x288] sm:$0xf]  ;;  %v3388_v4 = vld [vmem:[#allocation2 + $0x298] sm:$0xf]  ;;  %v3031_v12 = vadd.f32 %v2839_v21, %v2454_v39  ;;  %v7820_v23 = vmul.f32 0.24420136, %v4381_v28 }
 0x279   :  { %v4026_v37 = vld [vmem:[#allocation2 + $0x298] sm:$0xf]  ;;  %v7822_v30 = vmul.f32 0.05448869, %v4764_v14  ;;  %v2455_v41 = vadd.f32 %v2263_v43, %v1878_v38  ;;  %v2840_v19 = vmul.f32 0.05448869, %v2648_v42  ;;  %v1303_v10 = vadd.f32 %v1111_v44, %v726_v62 }
 0x27a   :  { %9007 = vst [vmem:[#allocation169_spill] sm:$0xff] %v7820_v23  ;;  %v4154_v18 = vmul.f32 0.40261996, %v4026_v37  ;;  %v3643_v24 = vld [vmem:[#allocation2 + $0x298] sm:$0xf]  ;;  %3223 = vst.msk [vmem:[#allocation2 + $0x2b0] sm:$0xff] %vm23_vm0, %v3031_v12 }
 0x27b   :  { %9008 = vst [vmem:[#allocation170_spill] sm:$0xff] %v7822_v30  ;;  %v1687_v2 = vmul.f32 0.40261996, %v7818_v48  ;;  %v3514_v47 = vmul.f32 0.05448869, %v3386_v50  ;;  %v3032_v21 = vadd.f32 %v2840_v19, %v2455_v41  ;;  %v6242_v50 = vld [vmem:[#allocation2 + $0x5c0] sm:$0xff] }
 0x27c   :  { %v7826_v9 = vmul.f32 0.05448869, %v3388_v4  ;;  %v4282_v58 = vadd.f32 %v4154_v18, %v3897_v34  ;;  %v2264_v31 = vmul.f32 0.24420136, %v7695_v55  ;;  %v2650_v39 = vld [vmem:[#allocation2 + $0x5c8] sm:$0xf] }
 0x27d   :  { %v3390_v28 = vld [vmem:[#allocation2 + $0x2a8] sm:$0xf]  ;;  %v1879_v37 = vadd.f32 %v1687_v2, %v1303_v10  ;;  %v3771_v43 = vmul.f32 0.24420136, %v3643_v24  ;;  %3224 = vst.msk [vmem:[#allocation2 + $0x2b8] sm:$0xf] %vm25_vm1, %v3032_v21 }
 0x27e   :  { %v3645_v63 = vld [vmem:[#allocation2 + $0x2a8] sm:$0xf]  ;;  %v7829_v38 = vmul.f32 0.05448869, %v3390_v28  ;;  %v2841_v4 = vmul.f32 0.05448869, %v6242_v50 }
 0x27f   :  { %v4028_v14 = vld [vmem:[#allocation2 + $0x2a8] sm:$0xf]  ;;  %v3773_v42 = vmul.f32 0.24420136, %v3645_v63  ;;  %v2456_v44 = vadd.f32 %v2264_v31, %v1879_v37  ;;  %v2842_v2 = vmul.f32 0.05448869, %v2650_v39  ;;  %v3899_v36 = vadd.f32 %v3771_v43, %v3514_v47 }
 0x280   :  { %v535_v12 = vld [vmem:[#allocation2 + $0x2c8] sm:$0xf]  ;;  %v7832_v34 = vmul.f32 0.40261996, %v4028_v14  ;;  %v536_v21 = vld [vmem:[#allocation2 + $0x2d0] sm:$0xff] }
 0x281   :  { %v4411_v62 = vld [vmem:[#allocation2 + $0x2a8] sm:$0xf]  ;;  %v3033_v23 = vadd.f32 %v2841_v4, %v2456_v44  ;;  %v727_v30 = vmul.f32 0.05448869, %v535_v12  ;;  %v7835_v31 = vld [vmem:[#allocation2 + $0x390] sm:$0xff] }
 0x282   :  { %v4539_v55 = vmul.f32 0.24420136, %v4411_v62  ;;  %v920_v18 = vld [vmem:[#allocation2 + $0x388] sm:$0xf]  ;;  %v7837_v37 = vld [vmem:[#allocation2 + $0x450] sm:$0xff] }
 0x283   :  { %v1112_v61 = vmul.f32 0.24420136, %v920_v18  ;;  %v1496_v41 = vld [vmem:[#allocation2 + $0x448] sm:$0xf]  ;;  %3225 = vst.msk [vmem:[#allocation2 + $0x2c0] sm:$0xff] %vm23_vm0, %v3033_v23  ;;  %v6243_v50 = vld [vmem:[#allocation2 + $0x5d0] sm:$0xff] }
 0x284   :  { %v4667_v19 = vadd.f32 %v4539_v55, %v4282_v58  ;;  %v1688_v24 = vmul.f32 0.40261996, %v1496_v41  ;;  %v2073_v10 = vld [vmem:[#allocation2 + $0x508] sm:$0xf]  ;;  %v728_v14 = vmul.f32 0.05448869, %v536_v21 }
 0x285   :  { %v1304_v28 = vadd.f32 %v1112_v61, %v727_v30  ;;  %v2265_v63 = vmul.f32 0.24420136, %v2073_v10  ;;  %v1113_v62 = vmul.f32 0.24420136, %v7835_v31  ;;  %v1689_v12 = vmul.f32 0.40261996, %v7837_v37 }
 0x286   :  { %v2266_v58 = vmul.f32 0.24420136, %v7716_v56  ;;  %v2843_v4 = vmul.f32 0.05448869, %v6243_v50  ;;  %v537_v39 = vld [vmem:[#allocation2 + $0x2d8] sm:$0xf] }
 0x287   :  { %v1880_v44 = vadd.f32 %v1688_v24, %v1304_v28  ;;  %v3392_v55 = vld [vmem:[#allocation2 + $0x2b8] sm:$0xf]  ;;  %v1305_v30 = vadd.f32 %v1113_v62, %v728_v14  ;;  %v729_v49 = vmul.f32 0.05448869, %v537_v39  ;;  %v3901_v14 = vadd.f32 %v3773_v42, %v7826_v9 }
 0x288   :  { %v3647_v23 = vld [vmem:[#allocation2 + $0x2b8] sm:$0xf]  ;;  %v7842_v41 = vmul.f32 0.05448869, %v3392_v55 }
 0x289   :  { %v4030_v61 = vld [vmem:[#allocation2 + $0x2b8] sm:$0xf]  ;;  %v3775_v10 = vmul.f32 0.24420136, %v3647_v23  ;;  %v2457_v21 = vadd.f32 %v2265_v63, %v1880_v44  ;;  %v1881_v46 = vadd.f32 %v1689_v12, %v1305_v30  ;;  %v7847_v63 = vld [vmem:[#allocation2 + $0x470] sm:$0xff] }
 0x28a   :  { %v2652_v18 = vld [vmem:[#allocation2 + $0x5d8] sm:$0xf]  ;;  %v4158_v26 = vmul.f32 0.40261996, %v4030_v61  ;;  %v7849_v44 = vld [vmem:[#allocation2 + $0x5f0] sm:$0xff] }
 0x28b   :  { %v4413_v35 = vld [vmem:[#allocation2 + $0x2b8] sm:$0xf]  ;;  %v3034_v50 = vadd.f32 %v2842_v2, %v2457_v21  ;;  %v2458_v53 = vadd.f32 %v2266_v58, %v1881_v46  ;;  %v2844_v47 = vmul.f32 0.05448869, %v2652_v18  ;;  %v732_v46 = vmul.f32 0.05448869, %v7725_v59 }
 0x28c   :  { %v4796_v60 = vld [vmem:[#allocation2 + $0x2b8] sm:$0xf]  ;;  %v4541_v24 = vmul.f32 0.24420136, %v4413_v35  ;;  %v1507_v2 = vld [vmem:[#allocation2 + $0x4a0] sm:$0xff]  ;;  %v4286_v30 = vadd.f32 %v4158_v26, %v3901_v14 }
 0x28d   :  { %v4924_v28 = vmul.f32 0.05448869, %v4796_v60  ;;  %v922_v56 = vld [vmem:[#allocation2 + $0x398] sm:$0xf]  ;;  %3226 = vst.msk [vmem:[#allocation2 + $0x2c8] sm:$0xf] %vm25_vm1, %v3034_v50  ;;  %v3035_v60 = vadd.f32 %v2843_v4, %v2458_v53 }
 0x28e   :  { %v1114_v22 = vmul.f32 0.24420136, %v922_v56  ;;  %v1498_v32 = vld [vmem:[#allocation2 + $0x458] sm:$0xf]  ;;  %v1117_v12 = vmul.f32 0.24420136, %v7728_v11 }
 0x28f   :  { %v2075_v52 = vld [vmem:[#allocation2 + $0x518] sm:$0xf]  ;;  %v7845_v62 = vadd.f32 %v4924_v28, %v4667_v19  ;;  %v1690_v55 = vmul.f32 0.40261996, %v1498_v32  ;;  %v1693_v9 = vmul.f32 0.40261996, %v7847_v63 }
 0x290   :  { %v2267_v23 = vmul.f32 0.24420136, %v2075_v52  ;;  %v1306_v35 = vadd.f32 %v1114_v22, %v729_v49  ;;  %v541_v43 = vld [vmem:[#allocation2 + $0x2f8] sm:$0xf]  ;;  %v2270_v32 = vmul.f32 0.24420136, %v7731_v3  ;;  %v4284_v49 = vadd.f32 %v7832_v34, %v3899_v36 }
 0x291   :  { %3227 = vst.msk [vmem:[#allocation2 + $0x2d0] sm:$0xff] %vm23_vm0, %v3035_v60  ;;  %v2847_v42 = vmul.f32 0.05448869, %v7849_v44  ;;  %v733_v19 = vmul.f32 0.05448869, %v541_v43  ;;  %v3903_v22 = vadd.f32 %v3775_v10, %v7829_v38  ;;  %v1309_v59 = vadd.f32 %v1117_v12, %v732_v46  ;;  %v1509_v46 = vld [vmem:[#allocation2 + $0x4b0] sm:$0xff] }
 0x292   :  { %v1882_v52 = vadd.f32 %v1690_v55, %v1306_v35  ;;  %v926_v58 = vld [vmem:[#allocation2 + $0x3b8] sm:$0xf]  ;;  %v932_v11 = vld [vmem:[#allocation2 + $0x3e8] sm:$0xf]  ;;  %v738_v60 = vmul.f32 0.05448869, %v7737_v1  ;;  %v4669_v43 = vadd.f32 %v4541_v24, %v4284_v49 }
 0x293   :  { %v1118_v53 = vmul.f32 0.24420136, %v926_v58  ;;  %v1502_v4 = vld [vmem:[#allocation2 + $0x478] sm:$0xf]  ;;  %v1508_v61 = vld [vmem:[#allocation2 + $0x4a8] sm:$0xf]  ;;  %v1885_v56 = vadd.f32 %v1693_v9, %v1309_v59 }
 0x294   :  { %v2079_v39 = vld [vmem:[#allocation2 + $0x538] sm:$0xf]  ;;  %v2459_v18 = vadd.f32 %v2267_v23, %v1882_v52  ;;  %v1694_v3 = vmul.f32 0.40261996, %v1502_v4  ;;  %v547_v35 = vld [vmem:[#allocation2 + $0x328] sm:$0xf] }
 0x295   :  { %v2271_v21 = vmul.f32 0.24420136, %v2079_v39  ;;  %v2656_v28 = vld [vmem:[#allocation2 + $0x5f8] sm:$0xf]  ;;  %v1310_v50 = vadd.f32 %v1118_v53, %v733_v19  ;;  %v1123_v38 = vmul.f32 0.24420136, %v7740_v16  ;;  %v2462_v14 = vadd.f32 %v2270_v32, %v1885_v56 }
 0x296   :  { %v2848_v55 = vmul.f32 0.05448869, %v2656_v28  ;;  %v3036_v36 = vadd.f32 %v2844_v47, %v2459_v18  ;;  %v1699_v34 = vmul.f32 0.40261996, %v1507_v2  ;;  %v739_v10 = vmul.f32 0.05448869, %v547_v35 }
 0x297   :  { %v3649_v12 = vld [vmem:[#allocation2 + $0x2c8] sm:$0xf]  ;;  %v1886_v23 = vadd.f32 %v1694_v3, %v1310_v50  ;;  %v934_v52 = vld [vmem:[#allocation2 + $0x3f8] sm:$0xf]  ;;  %v1315_v1 = vadd.f32 %v1123_v38, %v738_v60  ;;  %v3039_v53 = vadd.f32 %v2847_v42, %v2462_v14  ;;  %v1124_v2 = vmul.f32 0.24420136, %v932_v11 }
 0x298   :  { %v4032_v58 = vld [vmem:[#allocation2 + $0x2c8] sm:$0xf]  ;;  %v1510_v4 = vld [vmem:[#allocation2 + $0x4b8] sm:$0xf]  ;;  %v3777_v9 = vmul.f32 0.24420136, %v3649_v12 }
 0x299   :  { %v4415_v26 = vld [vmem:[#allocation2 + $0x2c8] sm:$0xf]  ;;  %v4160_v19 = vmul.f32 0.40261996, %v4032_v58  ;;  %3228 = vst.msk [vmem:[#allocation2 + $0x2d8] sm:$0xf] %vm25_vm1, %v3036_v36  ;;  %v2463_v16 = vadd.f32 %v2271_v21, %v1886_v23  ;;  %v1891_v42 = vadd.f32 %v1699_v34, %v1315_v1  ;;  %v1316_v21 = vadd.f32 %v1124_v2, %v739_v10 }
 0x29a   :  { %v4543_v59 = vmul.f32 0.24420136, %v4415_v26  ;;  %v4798_v47 = vld [vmem:[#allocation2 + $0x2c8] sm:$0xf]  ;;  %v1700_v39 = vmul.f32 0.40261996, %v1508_v61  ;;  %v3905_v24 = vadd.f32 %v3777_v9, %v7842_v41 }
 0x29b   :  { %v1511_v18 = vld [vmem:[#allocation2 + $0x4c0] sm:$0xff]  ;;  %v4288_v49 = vadd.f32 %v4160_v19, %v3903_v22  ;;  %v4926_v32 = vmul.f32 0.05448869, %v4798_v47  ;;  %v549_v3 = vld [vmem:[#allocation2 + $0x338] sm:$0xf]  ;;  %3231 = vst.msk [vmem:[#allocation2 + $0x2f0] sm:$0xff] %vm23_vm0, %v3039_v53  ;;  %v3040_v60 = vadd.f32 %v2848_v55, %v2463_v16  ;;  %v2468_v36 = vadd.f32 %v7093_v17, %v1891_v42 }
 0x29c   :  { %v4671_v28 = vadd.f32 %v4543_v59, %v4286_v30  ;;  %v7864_v56 = vld [vmem:[#allocation2 + $0x288] sm:$0xf]  ;;  %v740_v11 = vmul.f32 0.05448869, %v7746_v20  ;;  %v1125_v41 = vmul.f32 0.24420136, %v7748_v45  ;;  %v1892_v38 = vadd.f32 %v1700_v39, %v1316_v21 }
 0x29d   :  { %v7866_v50 = vld [vmem:[#allocation2 + $0x288] sm:$0xf]  ;;  %v5054_v61 = vadd.f32 %v4926_v32, %v4669_v43  ;;  %v1701_v22 = vmul.f32 0.40261996, %v1509_v46  ;;  %v741_v30 = vmul.f32 0.05448869, %v549_v3  ;;  %v3045_v9 = vadd.f32 %v7131_v7, %v2468_v36 }
 0x29e   :  { %v7868_v35 = vld [vmem:[#allocation2 + $0x288] sm:$0xf]  ;;  %3232 = vst.msk [vmem:[#allocation2 + $0x2f8] sm:$0xf] %vm25_vm1, %v3040_v60  ;;  %v1126_v12 = vmul.f32 0.24420136, %v934_v52  ;;  %v1317_v55 = vadd.f32 %v1125_v41, %v740_v11  ;;  %v2469_v17 = vadd.f32 %v7095_v54, %v1892_v38 }
 0x29f   :  { %v1702_v58 = vmul.f32 0.40261996, %v1510_v4  ;;  %v551_v26 = vld [vmem:[#allocation2 + $0x348] sm:$0xf]  ;;  %5182 = vst.msk [vmem:[#allocation2 + $0x288] sm:$0xf] %vm25_vm1, %v5054_v61 }
 0x2a0   :  { %v936_v14 = vld [vmem:[#allocation2 + $0x408] sm:$0xf]  ;;  %v742_v20 = vmul.f32 0.05448869, %v7767_v57  ;;  %v1127_v34 = vmul.f32 0.24420136, %v7769_v33  ;;  %v1318_v52 = vadd.f32 %v1126_v12, %v741_v30  ;;  %v1893_v1 = vadd.f32 %v1701_v22, %v1317_v55 }
 0x2a1   :  { %v1512_v23 = vld [vmem:[#allocation2 + $0x4c8] sm:$0xf]  ;;  %v1703_v45 = vmul.f32 0.40261996, %v1511_v18  ;;  %v4034_v10 = vld [vmem:[#allocation2 + $0x2d8] sm:$0xf]  ;;  %v3046_v47 = vadd.f32 %v7133_v6, %v2469_v17 }
 0x2a2   :  { %v4417_v46 = vld [vmem:[#allocation2 + $0x2d8] sm:$0xf]  ;;  %v4162_v4 = vmul.f32 0.40261996, %v4034_v10  ;;  %3237 = vst.msk [vmem:[#allocation2 + $0x320] sm:$0xff] %vm23_vm0, %v3045_v9  ;;  %v1894_v57 = vadd.f32 %v1702_v58, %v1318_v52  ;;  %v1319_v53 = vadd.f32 %v1127_v34, %v742_v20  ;;  %v9009_v32 = vld [vmem:[#allocation57_spill] sm:$0xff] }
 0x2a3   :  { %v4800_v43 = vld [vmem:[#allocation2 + $0x2d8] sm:$0xf]  ;;  %v4545_v19 = vmul.f32 0.24420136, %v4417_v46  ;;  %v743_v33 = vmul.f32 0.05448869, %v551_v26  ;;  %v2470_v3 = vadd.f32 %v9009_v32, %v1893_v1 }
 0x2a4   :  { %v4928_v59 = vmul.f32 0.05448869, %v4800_v43  ;;  %v938_v16 = vld [vmem:[#allocation2 + $0x418] sm:$0xf]  ;;  %v4290_v7 = vadd.f32 %v4162_v4, %v3905_v24  ;;  %v1513_v60 = vld [vmem:[#allocation2 + $0x4d0] sm:$0xff]  ;;  %v9010_v42 = vld [vmem:[#allocation58_spill] sm:$0xff]  ;;  %v1895_v11 = vadd.f32 %v1703_v45, %v1319_v53 }
 0x2a5   :  { %v7882_v2 = vld [vmem:[#allocation2 + $0x298] sm:$0xf]  ;;  %v4673_v18 = vadd.f32 %v4545_v19, %v4288_v49  ;;  %3238 = vst.msk [vmem:[#allocation2 + $0x328] sm:$0xf] %vm25_vm1, %v3046_v47  ;;  %v2471_v21 = vadd.f32 %v9010_v42, %v1894_v57  ;;  %v1128_v6 = vmul.f32 0.24420136, %v936_v14 }
 0x2a6   :  { %v7884_v39 = vld [vmem:[#allocation2 + $0x298] sm:$0xf]  ;;  %v5056_v54 = vadd.f32 %v4928_v59, %v4671_v28  ;;  %v1704_v61 = vmul.f32 0.40261996, %v1512_v23  ;;  %v4675_v24 = vadd.f32 %v7685_v5, %v4290_v7  ;;  %v9011_v28 = vld [vmem:[#allocation77_spill] sm:$0xff]  ;;  %v9012_v14 = vld [vmem:[#allocation78_spill] sm:$0xff] }
 0x2a7   :  { %v553_v41 = vld [vmem:[#allocation2 + $0x358] sm:$0xf]  ;;  %v5058_v30 = vadd.f32 %v7689_v15, %v4673_v18  ;;  %v3047_v36 = vadd.f32 %v9011_v28, %v2470_v3  ;;  %v744_v38 = vmul.f32 0.05448869, %v7779_v0  ;;  %v1515_v12 = vld [vmem:[#allocation2 + $0x4e0] sm:$0xff]  ;;  %v3048_v23 = vadd.f32 %v9012_v14, %v2471_v21  ;;  %v9013_v20 = vld [vmem:[#allocation59_spill] sm:$0xff] }
 0x2a8   :  { %v1514_v22 = vld [vmem:[#allocation2 + $0x4d8] sm:$0xf]  ;;  %5184 = vst.msk [vmem:[#allocation2 + $0x298] sm:$0xf] %vm25_vm1, %v5056_v54  ;;  %v3617_v58 = vld [vmem:[#allocation2 + $0x148] sm:$0xf]  ;;  %v2472_v34 = vadd.f32 %v9013_v20, %v1895_v11  ;;  %v1320_v45 = vadd.f32 %v1128_v6, %v743_v33 }
 0x2a9   :  { %v4804_v49 = vld [vmem:[#allocation2 + $0x2f8] sm:$0xf]  ;;  %v7894_v26 = vld [vmem:[#allocation2 + $0x2a8] sm:$0xf]  ;;  %3239 = vst.msk [vmem:[#allocation2 + $0x330] sm:$0xff] %vm23_vm0, %v3047_v36  ;;  %v1517_v42 = vld [vmem:[#allocation2 + $0x4f0] sm:$0xff] }
 0x2aa   :  { %v4932_v55 = vmul.f32 0.05448869, %v4804_v49  ;;  %v4000_v15 = vld [vmem:[#allocation2 + $0x148] sm:$0xf]  ;;  %5186 = vst.msk [vmem:[#allocation2 + $0x2a8] sm:$0xf] %vm25_vm1, %v5058_v30  ;;  %v1896_v17 = vadd.f32 %v1704_v61, %v1320_v45 }
 0x2ab   :  { %v1129_v5 = vmul.f32 0.24420136, %v7781_v27  ;;  %v745_v10 = vmul.f32 0.05448869, %v553_v41  ;;  %v4383_v46 = vld [vmem:[#allocation2 + $0x148] sm:$0xf] }
 0x2ac   :  { %v5060_v0 = vadd.f32 %v4932_v55, %v4675_v24  ;;  %3240 = vst.msk [vmem:[#allocation2 + $0x338] sm:$0xf] %vm25_vm1, %v3048_v23  ;;  %v9014_v43 = vld [vmem:[#allocation82_spill] sm:$0xff]  ;;  %v1130_v52 = vmul.f32 0.24420136, %v938_v16  ;;  %v9016_v27 = vld [vmem:[#allocation60_spill] sm:$0xff] }
 0x2ad   :  { %v3049_v9 = vadd.f32 %v9014_v43, %v2472_v34  ;;  %v555_v4 = vld [vmem:[#allocation2 + $0x368] sm:$0xf]  ;;  %v1321_v19 = vadd.f32 %v1129_v5, %v744_v38  ;;  %v1705_v59 = vmul.f32 0.40261996, %v1513_v60  ;;  %v746_v1 = vmul.f32 0.05448869, %v7789_v29 }
 0x2ae   :  { %v1131_v47 = vmul.f32 0.24420136, %v7791_v51  ;;  %v940_v57 = vld [vmem:[#allocation2 + $0x428] sm:$0xf]  ;;  %v7905_v53 = vmul.f32 0.24420136, %v3617_v58  ;;  %v2473_v33 = vadd.f32 %v9016_v27, %v1896_v17  ;;  %v1322_v7 = vadd.f32 %v1130_v52, %v745_v10 }
 0x2af   :  { %5188 = vst.msk [vmem:[#allocation2 + $0x2b8] sm:$0xf] %vm25_vm1, %v5060_v0  ;;  %v1706_v18 = vmul.f32 0.40261996, %v1514_v22  ;;  %v1516_v54 = vld [vmem:[#allocation2 + $0x4e8] sm:$0xf]  ;;  %v1897_v16 = vadd.f32 %v1705_v59, %v1321_v19 }
 0x2b0   :  { %9015 = vst [vmem:[#allocation57_spill] sm:$0xff] %v7905_v53  ;;  %3241 = vst.msk [vmem:[#allocation2 + $0x340] sm:$0xff] %vm23_vm0, %v3049_v9  ;;  %v1323_v32 = vadd.f32 %v1131_v47, %v746_v1  ;;  %v1707_v3 = vmul.f32 0.40261996, %v1515_v12  ;;  %v747_v60 = vmul.f32 0.05448869, %v555_v4 }
 0x2b1   :  { %v7910_v29 = vmul.f32 0.40261996, %v4000_v15  ;;  %v7912_v51 = vmul.f32 0.24420136, %v4383_v46  ;;  %v9019_v21 = vld [vmem:[#allocation83_spill] sm:$0xff]  ;;  %v1898_v6 = vadd.f32 %v1706_v18, %v1322_v7  ;;  %v9020_v24 = vld [vmem:[#allocation61_spill] sm:$0xff] }
 0x2b2   :  { %v3050_v11 = vadd.f32 %v9019_v21, %v2473_v33  ;;  %v942_v61 = vld [vmem:[#allocation2 + $0x438] sm:$0xf]  ;;  %v4766_v41 = vld [vmem:[#allocation2 + $0x148] sm:$0xf]  ;;  %v2474_v49 = vadd.f32 %v9020_v24, %v1897_v16  ;;  %v1899_v28 = vadd.f32 %v1707_v3, %v1323_v32  ;;  %v1132_v22 = vmul.f32 0.24420136, %v940_v57 }
 0x2b3   :  { %9017 = vst [vmem:[#allocation58_spill] sm:$0xff] %v7910_v29  ;;  %9018 = vst [vmem:[#allocation77_spill] sm:$0xff] %v7912_v51  ;;  %v4002_v30 = vld [vmem:[#allocation2 + $0x158] sm:$0xf]  ;;  %v9021_v36 = vld [vmem:[#allocation62_spill] sm:$0xff] }
 0x2b4   :  { %3242 = vst.msk [vmem:[#allocation2 + $0x348] sm:$0xf] %vm25_vm1, %v3050_v11  ;;  %v2475_v38 = vadd.f32 %v9021_v36, %v1898_v6  ;;  %v748_v12 = vmul.f32 0.05448869, %v7801_v25  ;;  %v1133_v58 = vmul.f32 0.24420136, %v7803_v13  ;;  %v1324_v10 = vadd.f32 %v1132_v22, %v747_v60 }
 0x2b5   :  { %v557_v55 = vld [vmem:[#allocation2 + $0x378] sm:$0xf]  ;;  %v3398_v23 = vld [vmem:[#allocation2 + $0x328] sm:$0xf]  ;;  %v9022_v34 = vld [vmem:[#allocation87_spill] sm:$0xff] }
 0x2b6   :  { %v1518_v14 = vld [vmem:[#allocation2 + $0x4f8] sm:$0xf]  ;;  %v3051_v45 = vadd.f32 %v9022_v34, %v2474_v49  ;;  %v9023_v15 = vld [vmem:[#allocation63_spill] sm:$0xff]  ;;  %v1708_v46 = vmul.f32 0.40261996, %v1516_v54  ;;  %v1519_v0 = vld [vmem:[#allocation2 + $0x500] sm:$0xff]  ;;  %v1325_v47 = vadd.f32 %v1133_v58, %v748_v12 }
 0x2b7   :  { %v3655_v20 = vld [vmem:[#allocation2 + $0x338] sm:$0xf]  ;;  %v2476_v5 = vadd.f32 %v9023_v15, %v1899_v28  ;;  %v7922_v43 = vmul.f32 0.05448869, %v4766_v41  ;;  %v7924_v9 = vmul.f32 0.40261996, %v4002_v30 }
 0x2b8   :  { %v9026_v17 = vld [vmem:[#allocation88_spill] sm:$0xff]  ;;  %v1709_v25 = vmul.f32 0.40261996, %v1517_v42  ;;  %3243 = vst.msk [vmem:[#allocation2 + $0x350] sm:$0xff] %vm23_vm0, %v3051_v45  ;;  %v1900_v1 = vadd.f32 %v1708_v46, %v1324_v10  ;;  %v749_v57 = vmul.f32 0.05448869, %v557_v55 }
 0x2b9   :  { %9024 = vst [vmem:[#allocation78_spill] sm:$0xff] %v7922_v43  ;;  %9025 = vst [vmem:[#allocation59_spill] sm:$0xff] %v7924_v9  ;;  %v3052_v52 = vadd.f32 %v9026_v17, %v2475_v38  ;;  %v4385_v4 = vld [vmem:[#allocation2 + $0x158] sm:$0xf]  ;;  %v559_v27 = vld [vmem:[#allocation2 + $0x388] sm:$0xf] }
 0x2ba   :  { %v4768_v13 = vld [vmem:[#allocation2 + $0x158] sm:$0xf]  ;;  %v944_v33 = vld [vmem:[#allocation2 + $0x448] sm:$0xf]  ;;  %v3526_v18 = vmul.f32 0.05448869, %v3398_v23  ;;  %v1901_v42 = vadd.f32 %v1709_v25, %v1325_v47 }
 0x2bb   :  { %v9027_v19 = vld [vmem:[#allocation92_spill] sm:$0xff]  ;;  %v1520_v7 = vld [vmem:[#allocation2 + $0x508] sm:$0xf]  ;;  %v3783_v54 = vmul.f32 0.24420136, %v3655_v20  ;;  %v9029_v22 = vld [vmem:[#allocation93_spill] sm:$0xff] }
 0x2bc   :  { %v3053_v59 = vadd.f32 %v9027_v19, %v2476_v5  ;;  %3244 = vst.msk [vmem:[#allocation2 + $0x358] sm:$0xf] %vm25_vm1, %v3052_v52  ;;  %v1134_v16 = vmul.f32 0.24420136, %v942_v61  ;;  %v3400_v32 = vld [vmem:[#allocation2 + $0x338] sm:$0xf] }
 0x2bd   :  { %v9028_v3 = vld [vmem:[#allocation64_spill] sm:$0xff]  ;;  %v750_v21 = vmul.f32 0.05448869, %v7815_v40  ;;  %v1135_v11 = vmul.f32 0.24420136, %v7818_v48  ;;  %v9030_v38 = vld [vmem:[#allocation65_spill] sm:$0xff]  ;;  %v3911_v20 = vadd.f32 %v3783_v54, %v3526_v18 }
 0x2be   :  { %3245 = vst.msk [vmem:[#allocation2 + $0x360] sm:$0xff] %vm23_vm0, %v3053_v59  ;;  %v2477_v60 = vadd.f32 %v9028_v3, %v1900_v1  ;;  %v1326_v6 = vadd.f32 %v1134_v16, %v749_v57  ;;  %v1710_v41 = vmul.f32 0.40261996, %v1518_v14  ;;  %v751_v30 = vmul.f32 0.05448869, %v559_v27  ;;  %v9033_v48 = vld [vmem:[#allocation97_spill] sm:$0xff] }
 0x2bf   :  { %v1136_v24 = vmul.f32 0.24420136, %v944_v33  ;;  %v3657_v49 = vld [vmem:[#allocation2 + $0x348] sm:$0xf]  ;;  %v2478_v61 = vadd.f32 %v9030_v38, %v1901_v42  ;;  %v1327_v12 = vadd.f32 %v1135_v11, %v750_v21  ;;  %v1711_v58 = vmul.f32 0.40261996, %v1519_v0 }
 0x2c0   :  { %v4040_v28 = vld [vmem:[#allocation2 + $0x348] sm:$0xf]  ;;  %v3054_v36 = vadd.f32 %v9029_v22, %v2477_v60  ;;  %v7936_v55 = vmul.f32 0.24420136, %v4385_v4  ;;  %v7938_v23 = vmul.f32 0.05448869, %v4768_v13  ;;  %v1902_v40 = vadd.f32 %v1710_v41, %v1326_v6 }
 0x2c1   :  { %v3402_v34 = vld [vmem:[#allocation2 + $0x348] sm:$0xf]  ;;  %v3055_v14 = vadd.f32 %v9033_v48, %v2478_v61  ;;  %v1903_v45 = vadd.f32 %v1711_v58, %v1327_v12  ;;  %v1328_v15 = vadd.f32 %v1136_v24, %v751_v30  ;;  %v1712_v5 = vmul.f32 0.40261996, %v1520_v7  ;;  %v1521_v10 = vld [vmem:[#allocation2 + $0x510] sm:$0xff]  ;;  %v9038_v60 = vld [vmem:[#allocation68_spill] sm:$0xff] }
 0x2c2   :  { %9031 = vst [vmem:[#allocation82_spill] sm:$0xff] %v7936_v55  ;;  %9032 = vst [vmem:[#allocation60_spill] sm:$0xff] %v7938_v23  ;;  %v3528_v46 = vmul.f32 0.05448869, %v3400_v32  ;;  %v3785_v17 = vmul.f32 0.24420136, %v3657_v49 }
 0x2c3   :  { %3246 = vst.msk [vmem:[#allocation2 + $0x368] sm:$0xf] %vm25_vm1, %v3054_v36  ;;  %v4168_v52 = vmul.f32 0.40261996, %v4040_v28  ;;  %v3404_v25 = vld [vmem:[#allocation2 + $0x358] sm:$0xf]  ;;  %v1904_v47 = vadd.f32 %v1712_v5, %v1328_v15 }
 0x2c4   :  { %v3659_v0 = vld [vmem:[#allocation2 + $0x358] sm:$0xf]  ;;  %3247 = vst.msk [vmem:[#allocation2 + $0x370] sm:$0xff] %vm23_vm0, %v3055_v14  ;;  %v9034_v13 = vld [vmem:[#allocation66_spill] sm:$0xff]  ;;  %v9035_v59 = vld [vmem:[#allocation67_spill] sm:$0xff]  ;;  %v3913_v6 = vadd.f32 %v3785_v17, %v3528_v46 }
 0x2c5   :  { %v4042_v4 = vld [vmem:[#allocation2 + $0x358] sm:$0xf]  ;;  %v2479_v19 = vadd.f32 %v9034_v13, %v1902_v40  ;;  %v2480_v1 = vadd.f32 %v9035_v59, %v1903_v45  ;;  %v3530_v57 = vmul.f32 0.05448869, %v3402_v34  ;;  %v4296_v27 = vadd.f32 %v4168_v52, %v3911_v20  ;;  %v9036_v7 = vld [vmem:[#allocation98_spill] sm:$0xff]  ;;  %v9037_v32 = vld [vmem:[#allocation101_spill] sm:$0xff] }
 0x2c6   :  { %v3532_v33 = vmul.f32 0.05448869, %v3404_v25  ;;  %v561_v18 = vld [vmem:[#allocation2 + $0x398] sm:$0xf]  ;;  %v2481_v42 = vadd.f32 %v9038_v60, %v1904_v47  ;;  %v752_v21 = vmul.f32 0.05448869, %v7835_v31 }
 0x2c7   :  { %v4425_v54 = vld [vmem:[#allocation2 + $0x358] sm:$0xf]  ;;  %v3056_v16 = vadd.f32 %v9036_v7, %v2479_v19  ;;  %v3057_v3 = vadd.f32 %v9037_v32, %v2480_v1  ;;  %v3787_v41 = vmul.f32 0.24420136, %v3659_v0  ;;  %v4170_v30 = vmul.f32 0.40261996, %v4042_v4 }
 0x2c8   :  { %v946_v11 = vld [vmem:[#allocation2 + $0x458] sm:$0xf]  ;;  %v4553_v24 = vmul.f32 0.24420136, %v4425_v54  ;;  %v9039_v28 = vld [vmem:[#allocation102_spill] sm:$0xff]  ;;  %v564_v14 = vld [vmem:[#allocation2 + $0x3b0] sm:$0xff] }
 0x2c9   :  { %v1522_v49 = vld [vmem:[#allocation2 + $0x518] sm:$0xf]  ;;  %3248 = vst.msk [vmem:[#allocation2 + $0x378] sm:$0xf] %vm25_vm1, %v3056_v16  ;;  %v3058_v22 = vadd.f32 %v9039_v28, %v2481_v42  ;;  %v1137_v36 = vmul.f32 0.24420136, %v7837_v37  ;;  %v3915_v15 = vadd.f32 %v3787_v41, %v3530_v57  ;;  %v4298_v5 = vadd.f32 %v4170_v30, %v3913_v6 }
 0x2ca   :  { %3249 = vst.msk [vmem:[#allocation2 + $0x380] sm:$0xff] %vm23_vm0, %v3057_v3  ;;  %v1713_v38 = vmul.f32 0.40261996, %v1521_v10  ;;  %v753_v61 = vmul.f32 0.05448869, %v561_v18  ;;  %v4681_v31 = vadd.f32 %v4553_v24, %v4296_v27  ;;  %v1525_v45 = vld [vmem:[#allocation2 + $0x530] sm:$0xff] }
 0x2cb   :  { %v3406_v12 = vld [vmem:[#allocation2 + $0x368] sm:$0xf]  ;;  %3250 = vst.msk [vmem:[#allocation2 + $0x388] sm:$0xf] %vm25_vm1, %v3058_v22  ;;  %v1329_v48 = vadd.f32 %v1137_v36, %v752_v21  ;;  %v1138_v52 = vmul.f32 0.24420136, %v946_v11 }
 0x2cc   :  { %v3661_v58 = vld [vmem:[#allocation2 + $0x368] sm:$0xf]  ;;  %v3534_v40 = vmul.f32 0.05448869, %v3406_v12  ;;  %v1714_v19 = vmul.f32 0.40261996, %v1522_v49 }
 0x2cd   :  { %v4044_v20 = vld [vmem:[#allocation2 + $0x368] sm:$0xf]  ;;  %v3789_v34 = vmul.f32 0.24420136, %v3661_v58  ;;  %v1905_v4 = vadd.f32 %v1713_v38, %v1329_v48  ;;  %v1330_v13 = vadd.f32 %v1138_v52, %v753_v61  ;;  %v756_v59 = vmul.f32 0.05448869, %v564_v14 }
 0x2ce   :  { %v4427_v46 = vld [vmem:[#allocation2 + $0x368] sm:$0xf]  ;;  %v4172_v25 = vmul.f32 0.40261996, %v4044_v20  ;;  %v1141_v18 = vmul.f32 0.24420136, %v7847_v63 }
 0x2cf   :  { %v4810_v17 = vld [vmem:[#allocation2 + $0x368] sm:$0xf]  ;;  %v4555_v37 = vmul.f32 0.24420136, %v4427_v46  ;;  %v3917_v47 = vadd.f32 %v3789_v34, %v3532_v33  ;;  %v1717_v57 = vmul.f32 0.40261996, %v1525_v45  ;;  %v1906_v21 = vadd.f32 %v1714_v19, %v1330_v13 }
 0x2d0   :  { %v4938_v10 = vmul.f32 0.05448869, %v4810_v17  ;;  %v7954_v0 = vld [vmem:[#allocation2 + $0x328] sm:$0xf]  ;;  %v4300_v54 = vadd.f32 %v4172_v25, %v3915_v15  ;;  %v3408_v16 = vld [vmem:[#allocation2 + $0x378] sm:$0xf]  ;;  %v1333_v30 = vadd.f32 %v1141_v18, %v756_v59 }
 0x2d1   :  { %v7956_v1 = vld [vmem:[#allocation2 + $0x328] sm:$0xf]  ;;  %v4683_v7 = vadd.f32 %v4555_v37, %v4298_v5  ;;  %v3663_v32 = vld [vmem:[#allocation2 + $0x378] sm:$0xf]  ;;  %v9040_v60 = vld [vmem:[#allocation69_spill] sm:$0xff] }
 0x2d2   :  { %v5066_v27 = vadd.f32 %v4938_v10, %v4681_v31  ;;  %v4046_v3 = vld [vmem:[#allocation2 + $0x378] sm:$0xf]  ;;  %v2482_v42 = vadd.f32 %v9040_v60, %v1905_v4  ;;  %v3536_v11 = vmul.f32 0.05448869, %v3408_v16  ;;  %v3791_v6 = vmul.f32 0.24420136, %v3663_v32 }
 0x2d3   :  { %v4174_v41 = vmul.f32 0.40261996, %v4046_v3  ;;  %v2679_v24 = vld [vmem:[#allocation2 + $0x6b0] sm:$0xff]  ;;  %v4429_v33 = vld [vmem:[#allocation2 + $0x378] sm:$0xf]  ;;  %v9041_v63 = vld [vmem:[#allocation105_spill] sm:$0xff]  ;;  %v1909_v10 = vadd.f32 %v1717_v57, %v1333_v30 }
 0x2d4   :  { %5194 = vst.msk [vmem:[#allocation2 + $0x328] sm:$0xf] %vm25_vm1, %v5066_v27  ;;  %v4812_v49 = vld [vmem:[#allocation2 + $0x378] sm:$0xf]  ;;  %v3665_v28 = vld [vmem:[#allocation2 + $0x388] sm:$0xf]  ;;  %v3059_v22 = vadd.f32 %v9041_v63, %v2482_v42  ;;  %v3919_v58 = vadd.f32 %v3791_v6, %v3534_v40 }
 0x2d5   :  { %v9042_v36 = vld [vmem:[#allocation70_spill] sm:$0xff]  ;;  %v565_v61 = vld [vmem:[#allocation2 + $0x3b8] sm:$0xf]  ;;  %v4557_v20 = vmul.f32 0.24420136, %v4429_v33  ;;  %v4302_v46 = vadd.f32 %v4174_v41, %v3917_v47  ;;  %v570_v4 = vld [vmem:[#allocation2 + $0x3e0] sm:$0xff] }
 0x2d6   :  { %v2483_v38 = vadd.f32 %v9042_v36, %v1906_v21  ;;  %v950_v12 = vld [vmem:[#allocation2 + $0x478] sm:$0xf]  ;;  %v4940_v31 = vmul.f32 0.05448869, %v4812_v49  ;;  %v4048_v34 = vld [vmem:[#allocation2 + $0x388] sm:$0xf] }
 0x2d7   :  { %v1526_v48 = vld [vmem:[#allocation2 + $0x538] sm:$0xf]  ;;  %v3793_v17 = vmul.f32 0.24420136, %v3665_v28  ;;  %v4431_v52 = vld [vmem:[#allocation2 + $0x388] sm:$0xf]  ;;  %v4685_v19 = vadd.f32 %v4557_v20, %v4300_v54 }
 0x2d8   :  { %v2103_v14 = vld [vmem:[#allocation2 + $0x5f8] sm:$0xf]  ;;  %3251 = vst.msk [vmem:[#allocation2 + $0x390] sm:$0xff] %vm23_vm0, %v3059_v22  ;;  %v9043_v25 = vld [vmem:[#allocation106_spill] sm:$0xff]  ;;  %v7969_v40 = vld [vmem:[#allocation2 + $0x4a0] sm:$0xff]  ;;  %v5068_v59 = vadd.f32 %v4940_v31, %v4683_v7 }
 0x2d9   :  { %v2680_v45 = vld [vmem:[#allocation2 + $0x6b8] sm:$0xf]  ;;  %v3060_v37 = vadd.f32 %v9043_v25, %v2483_v38  ;;  %v956_v13 = vld [vmem:[#allocation2 + $0x4a8] sm:$0xf]  ;;  %v4176_v27 = vmul.f32 0.40261996, %v4048_v34  ;;  %v3921_v47 = vadd.f32 %v3793_v17, %v3536_v11 }
 0x2da   :  { %v7963_v15 = vld [vmem:[#allocation2 + $0x338] sm:$0xf]  ;;  %v4814_v18 = vld [vmem:[#allocation2 + $0x388] sm:$0xf]  ;;  %v2294_v16 = vmul.f32 0.24420136, %v7849_v44 }
 0x2db   :  { %v7965_v5 = vld [vmem:[#allocation2 + $0x338] sm:$0xf]  ;;  %v571_v32 = vld [vmem:[#allocation2 + $0x3e8] sm:$0xf]  ;;  %v4559_v60 = vmul.f32 0.24420136, %v4431_v52  ;;  %v4304_v41 = vadd.f32 %v4176_v27, %v3919_v58 }
 0x2dc   :  { %v1532_v3 = vld [vmem:[#allocation2 + $0x568] sm:$0xf]  ;;  %v4942_v42 = vmul.f32 0.05448869, %v4814_v18  ;;  %3252 = vst.msk [vmem:[#allocation2 + $0x398] sm:$0xf] %vm25_vm1, %v3060_v37  ;;  %v2486_v54 = vadd.f32 %v2294_v16, %v1909_v10 }
 0x2dd   :  { %v2871_v21 = vmul.f32 0.05448869, %v2679_v24  ;;  %v572_v6 = vld [vmem:[#allocation2 + $0x3f0] sm:$0xff]  ;;  %v7973_v57 = vld [vmem:[#allocation2 + $0x348] sm:$0xf]  ;;  %v4687_v31 = vadd.f32 %v4559_v60, %v4302_v46  ;;  %v6244_v58 = vld [vmem:[#allocation2 + $0x560] sm:$0xff] }
 0x2de   :  { %5196 = vst.msk [vmem:[#allocation2 + $0x338] sm:$0xf] %vm25_vm1, %v5068_v59  ;;  %v757_v7 = vmul.f32 0.05448869, %v565_v61  ;;  %v1142_v30 = vmul.f32 0.24420136, %v950_v12  ;;  %v5070_v49 = vadd.f32 %v4942_v42, %v4685_v19 }
 0x2df   :  { %v7976_v33 = vld [vmem:[#allocation2 + $0x4b0] sm:$0xff]  ;;  %v573_v44 = vld [vmem:[#allocation2 + $0x3f8] sm:$0xf]  ;;  %v1718_v28 = vmul.f32 0.40261996, %v1526_v48  ;;  %v3063_v36 = vadd.f32 %v2871_v21, %v2486_v54 }
 0x2e0   :  { %v2295_v11 = vmul.f32 0.24420136, %v2103_v14  ;;  %v2872_v63 = vmul.f32 0.05448869, %v2680_v45  ;;  %v7978_v22 = vld [vmem:[#allocation2 + $0x348] sm:$0xf]  ;;  %v1334_v24 = vadd.f32 %v1142_v30, %v757_v7 }
 0x2e1   :  { %v762_v38 = vmul.f32 0.05448869, %v570_v4  ;;  %v1147_v20 = vmul.f32 0.24420136, %v7969_v40  ;;  %5198 = vst.msk [vmem:[#allocation2 + $0x348] sm:$0xf] %vm25_vm1, %v5070_v49 }
 0x2e2   :  { %v1723_v61 = vmul.f32 0.40261996, %v6244_v58  ;;  %v763_v12 = vmul.f32 0.05448869, %v571_v32  ;;  %v1148_v34 = vmul.f32 0.24420136, %v956_v13  ;;  %v1910_v48 = vadd.f32 %v1718_v28, %v1334_v24 }
 0x2e3   :  { %v958_v17 = vld [vmem:[#allocation2 + $0x4b8] sm:$0xf]  ;;  %3255 = vst.msk [vmem:[#allocation2 + $0x3b0] sm:$0xff] %vm23_vm0, %v3063_v36  ;;  %v1339_v14 = vadd.f32 %v1147_v20, %v762_v38  ;;  %v1724_v45 = vmul.f32 0.40261996, %v1532_v3  ;;  %v6245_v4 = vld [vmem:[#allocation2 + $0x570] sm:$0xff] }
 0x2e4   :  { %v764_v52 = vmul.f32 0.05448869, %v572_v6  ;;  %v1534_v25 = vld [vmem:[#allocation2 + $0x578] sm:$0xf]  ;;  %v1340_v37 = vadd.f32 %v1148_v34, %v763_v12  ;;  %v1149_v10 = vmul.f32 0.24420136, %v7976_v33  ;;  %v2487_v16 = vadd.f32 %v2295_v11, %v1910_v48 }
 0x2e5   :  { %v1725_v19 = vmul.f32 0.40261996, %v6245_v4  ;;  %v765_v46 = vmul.f32 0.05448869, %v573_v44  ;;  %v4050_v59 = vld [vmem:[#allocation2 + $0x398] sm:$0xf]  ;;  %v1915_v32 = vadd.f32 %v1723_v61, %v1339_v14 }
 0x2e6   :  { %v4433_v27 = vld [vmem:[#allocation2 + $0x398] sm:$0xf]  ;;  %v4178_v13 = vmul.f32 0.40261996, %v4050_v59  ;;  %v1916_v21 = vadd.f32 %v1724_v45, %v1340_v37  ;;  %v3064_v7 = vadd.f32 %v2872_v63, %v2487_v16  ;;  %v1341_v30 = vadd.f32 %v1149_v10, %v764_v52  ;;  %v574_v28 = vld [vmem:[#allocation2 + $0x400] sm:$0xff]  ;;  %v9046_v34 = vld [vmem:[#allocation110_spill] sm:$0xff] }
 0x2e7   :  { %v4816_v18 = vld [vmem:[#allocation2 + $0x398] sm:$0xf]  ;;  %v4561_v60 = vmul.f32 0.24420136, %v4433_v27  ;;  %v1150_v49 = vmul.f32 0.24420136, %v958_v17 }
 0x2e8   :  { %v4944_v42 = vmul.f32 0.05448869, %v4816_v18  ;;  %v4772_v54 = vld [vmem:[#allocation2 + $0x178] sm:$0xf]  ;;  %v960_v36 = vld [vmem:[#allocation2 + $0x4c8] sm:$0xf]  ;;  %v4306_v24 = vadd.f32 %v4178_v13, %v3921_v47  ;;  %v1917_v48 = vadd.f32 %v1725_v19, %v1341_v30 }
 0x2e9   :  { %v9044_v3 = vld [vmem:[#allocation72_spill] sm:$0xff]  ;;  %v4689_v38 = vadd.f32 %v4561_v60, %v4304_v41  ;;  %v9045_v20 = vld [vmem:[#allocation73_spill] sm:$0xff]  ;;  %v1536_v11 = vld [vmem:[#allocation2 + $0x588] sm:$0xf]  ;;  %3256 = vst.msk [vmem:[#allocation2 + $0x3b8] sm:$0xf] %vm25_vm1, %v3064_v7  ;;  %v1342_v14 = vadd.f32 %v1150_v49, %v765_v46 }
 0x2ea   :  { %v2492_v6 = vadd.f32 %v9044_v3, %v1915_v32  ;;  %v5072_v44 = vadd.f32 %v4944_v42, %v4687_v31  ;;  %v2493_v58 = vadd.f32 %v9045_v20, %v1916_v21  ;;  %v7986_v12 = vld [vmem:[#allocation2 + $0x4c0] sm:$0xff]  ;;  %v7988_v61 = vld [vmem:[#allocation2 + $0x358] sm:$0xf]  ;;  %v1726_v45 = vmul.f32 0.40261996, %v1534_v25  ;;  %v9048_v41 = vld [vmem:[#allocation111_spill] sm:$0xff] }
 0x2eb   :  { %v575_v17 = vld [vmem:[#allocation2 + $0x408] sm:$0xf]  ;;  %v962_v52 = vld [vmem:[#allocation2 + $0x4d8] sm:$0xf]  ;;  %v7992_v37 = vmul.f32 0.05448869, %v4772_v54  ;;  %v5074_v47 = vadd.f32 %v7700_v8, %v4689_v38 }
 0x2ec   :  { %v3069_v63 = vadd.f32 %v9046_v34, %v2492_v6  ;;  %5200 = vst.msk [vmem:[#allocation2 + $0x358] sm:$0xf] %vm25_vm1, %v5072_v44  ;;  %v3070_v31 = vadd.f32 %v9048_v41, %v2493_v58  ;;  %v766_v10 = vmul.f32 0.05448869, %v574_v28  ;;  %v576_v4 = vld [vmem:[#allocation2 + $0x410] sm:$0xff]  ;;  %v1918_v18 = vadd.f32 %v1726_v45, %v1342_v14  ;;  %v9050_v16 = vld [vmem:[#allocation154_spill] sm:$0xff] }
 0x2ed   :  { %9047 = vst [vmem:[#allocation83_spill] sm:$0xff] %v7992_v37  ;;  %v9049_v59 = vld [vmem:[#allocation75_spill] sm:$0xff]  ;;  %v1151_v19 = vmul.f32 0.24420136, %v7986_v12  ;;  %v577_v46 = vld [vmem:[#allocation2 + $0x418] sm:$0xf]  ;;  %v4691_v8 = vadd.f32 %v9050_v16, %v4306_v24 }
 0x2ee   :  { %3261 = vst.msk [vmem:[#allocation2 + $0x3e0] sm:$0xff] %vm23_vm0, %v3069_v63  ;;  %v2494_v27 = vadd.f32 %v9049_v59, %v1917_v48  ;;  %v8000_v25 = vld [vmem:[#allocation2 + $0x4d0] sm:$0xff]  ;;  %v6246_v32 = vld [vmem:[#allocation2 + $0x580] sm:$0xff]  ;;  %v767_v60 = vmul.f32 0.05448869, %v575_v17  ;;  %v9052_v3 = vld [vmem:[#allocation76_spill] sm:$0xff] }
 0x2ef   :  { %5202 = vst.msk [vmem:[#allocation2 + $0x368] sm:$0xf] %vm25_vm1, %v5074_v47  ;;  %3262 = vst.msk [vmem:[#allocation2 + $0x3e8] sm:$0xf] %vm25_vm1, %v3070_v31  ;;  %v1727_v13 = vmul.f32 0.40261996, %v6246_v32  ;;  %v2495_v6 = vadd.f32 %v9052_v3, %v1918_v18  ;;  %v1343_v30 = vadd.f32 %v1151_v19, %v766_v10 }
 0x2f0   :  { %v1152_v42 = vmul.f32 0.24420136, %v960_v36  ;;  %v1538_v21 = vld [vmem:[#allocation2 + $0x598] sm:$0xf]  ;;  %v9051_v54 = vld [vmem:[#allocation115_spill] sm:$0xff]  ;;  %v578_v28 = vld [vmem:[#allocation2 + $0x420] sm:$0xff] }
 0x2f1   :  { %v3071_v7 = vadd.f32 %v9051_v54, %v2494_v27  ;;  %v768_v49 = vmul.f32 0.05448869, %v576_v4  ;;  %v8007_v38 = vld [vmem:[#allocation2 + $0x4e0] sm:$0xff]  ;;  %v1728_v20 = vmul.f32 0.40261996, %v1536_v11  ;;  %v9053_v34 = vld [vmem:[#allocation116_spill] sm:$0xff]  ;;  %v1919_v36 = vadd.f32 %v1727_v13, %v1343_v30 }
 0x2f2   :  { %v1344_v44 = vadd.f32 %v1152_v42, %v767_v60  ;;  %v1153_v24 = vmul.f32 0.24420136, %v8000_v25  ;;  %v769_v58 = vmul.f32 0.05448869, %v577_v46  ;;  %v3072_v63 = vadd.f32 %v9053_v34, %v2495_v6  ;;  %v6247_v48 = vld [vmem:[#allocation2 + $0x590] sm:$0xff]  ;;  %v9054_v27 = vld [vmem:[#allocation80_spill] sm:$0xff] }
 0x2f3   :  { %3263 = vst.msk [vmem:[#allocation2 + $0x3f0] sm:$0xff] %vm23_vm0, %v3071_v7  ;;  %v1729_v14 = vmul.f32 0.40261996, %v6247_v48  ;;  %v1154_v45 = vmul.f32 0.24420136, %v962_v52  ;;  %v2496_v18 = vadd.f32 %v9054_v27, %v1919_v36  ;;  %v9055_v32 = vld [vmem:[#allocation81_spill] sm:$0xff] }
 0x2f4   :  { %v579_v17 = vld [vmem:[#allocation2 + $0x428] sm:$0xf]  ;;  %v4820_v47 = vld [vmem:[#allocation2 + $0x3b8] sm:$0xf]  ;;  %v1920_v41 = vadd.f32 %v1728_v20, %v1344_v44  ;;  %v1345_v31 = vadd.f32 %v1153_v24, %v768_v49  ;;  %v770_v10 = vmul.f32 0.05448869, %v578_v28 }
 0x2f5   :  { %v1155_v4 = vmul.f32 0.24420136, %v8007_v38  ;;  %v3625_v59 = vld [vmem:[#allocation2 + $0x1c8] sm:$0xf]  ;;  %v4948_v11 = vmul.f32 0.05448869, %v4820_v47  ;;  %v1346_v19 = vadd.f32 %v1154_v45, %v769_v58 }
 0x2f6   :  { %3264 = vst.msk [vmem:[#allocation2 + $0x3f8] sm:$0xf] %vm25_vm1, %v3072_v63  ;;  %v1730_v46 = vmul.f32 0.40261996, %v1538_v21  ;;  %v964_v16 = vld [vmem:[#allocation2 + $0x4e8] sm:$0xf]  ;;  %v2497_v13 = vadd.f32 %v9055_v32, %v1920_v41  ;;  %v1921_v60 = vadd.f32 %v1729_v14, %v1345_v31 }
 0x2f7   :  { %v1347_v52 = vadd.f32 %v1155_v4, %v770_v10  ;;  %v6248_v42 = vld [vmem:[#allocation2 + $0x5a0] sm:$0xff]  ;;  %v5076_v7 = vadd.f32 %v4948_v11, %v4691_v8  ;;  %v9056_v3 = vld [vmem:[#allocation120_spill] sm:$0xff]  ;;  %v771_v49 = vmul.f32 0.05448869, %v579_v17  ;;  %v580_v28 = vld [vmem:[#allocation2 + $0x430] sm:$0xff] }
 0x2f8   :  { %v1731_v54 = vmul.f32 0.40261996, %v6248_v42  ;;  %v3073_v6 = vadd.f32 %v9056_v3, %v2496_v18  ;;  %v1922_v30 = vadd.f32 %v1730_v46, %v1346_v19  ;;  %v8017_v44 = vld [vmem:[#allocation2 + $0x4f0] sm:$0xff]  ;;  %v1540_v20 = vld [vmem:[#allocation2 + $0x5a8] sm:$0xf]  ;;  %v9058_v58 = vld [vmem:[#allocation160_spill] sm:$0xff] }
 0x2f9   :  { %v8019_v24 = vmul.f32 0.24420136, %v3625_v59  ;;  %v8022_v21 = vmul.f32 0.40261996, %v9058_v58  ;;  %v9060_v34 = vld [vmem:[#allocation121_spill] sm:$0xff]  ;;  %v9064_v17 = vld [vmem:[#allocation86_spill] sm:$0xff] }
 0x2fa   :  { %v3074_v63 = vadd.f32 %v9060_v34, %v2497_v13  ;;  %v9061_v36 = vld [vmem:[#allocation85_spill] sm:$0xff]  ;;  %v966_v14 = vld [vmem:[#allocation2 + $0x4f8] sm:$0xf]  ;;  %5204 = vst.msk [vmem:[#allocation2 + $0x378] sm:$0xf] %vm25_vm1, %v5076_v7  ;;  %v2499_v47 = vadd.f32 %v9064_v17, %v1922_v30  ;;  %v1923_v41 = vadd.f32 %v1731_v54, %v1347_v52  ;;  %v9066_v19 = vld [vmem:[#allocation163_spill] sm:$0xff] }
 0x2fb   :  { %9057 = vst [vmem:[#allocation61_spill] sm:$0xff] %v8019_v24  ;;  %9059 = vst [vmem:[#allocation62_spill] sm:$0xff] %v8022_v21  ;;  %v2498_v48 = vadd.f32 %v9061_v36, %v1921_v60  ;;  %v9062_v45 = vld [vmem:[#allocation161_spill] sm:$0xff]  ;;  %v1156_v31 = vmul.f32 0.24420136, %v964_v16  ;;  %v9068_v13 = vld [vmem:[#allocation126_spill] sm:$0xff] }
 0x2fc   :  { %v8027_v8 = vmul.f32 0.24420136, %v9062_v45  ;;  %3265 = vst.msk [vmem:[#allocation2 + $0x400] sm:$0xff] %vm23_vm0, %v3073_v6  ;;  %v581_v10 = vld [vmem:[#allocation2 + $0x438] sm:$0xf]  ;;  %v9065_v59 = vld [vmem:[#allocation125_spill] sm:$0xff]  ;;  %v3076_v60 = vadd.f32 %v9068_v13, %v2499_v47 }
 0x2fd   :  { %v4782_v4 = vld [vmem:[#allocation2 + $0x208] sm:$0xf]  ;;  %3266 = vst.msk [vmem:[#allocation2 + $0x408] sm:$0xf] %vm25_vm1, %v3074_v63  ;;  %v3075_v11 = vadd.f32 %v9065_v59, %v2498_v48  ;;  %v772_v27 = vmul.f32 0.05448869, %v580_v28  ;;  %v1348_v3 = vadd.f32 %v1156_v31, %v771_v49 }
 0x2fe   :  { %9063 = vst [vmem:[#allocation87_spill] sm:$0xff] %v8027_v8  ;;  %v1157_v18 = vmul.f32 0.24420136, %v8017_v44  ;;  %v8036_v46 = vmul.f32 0.24420136, %v9066_v19  ;;  %v9069_v42 = vld [vmem:[#allocation90_spill] sm:$0xff] }
 0x2ff   :  { %v3414_v32 = vld [vmem:[#allocation2 + $0x3e8] sm:$0xf]  ;;  %v2500_v7 = vadd.f32 %v9069_v42, %v1923_v41  ;;  %v582_v52 = vld [vmem:[#allocation2 + $0x440] sm:$0xff]  ;;  %v1542_v54 = vld [vmem:[#allocation2 + $0x5b8] sm:$0xf]  ;;  %3267 = vst.msk [vmem:[#allocation2 + $0x410] sm:$0xff] %vm23_vm0, %v3075_v11 }
 0x300   :  { %9067 = vst [vmem:[#allocation63_spill] sm:$0xff] %v8036_v46  ;;  %v8040_v16 = vld [vmem:[#allocation2 + $0x500] sm:$0xff]  ;;  %v1732_v6 = vmul.f32 0.40261996, %v1540_v20  ;;  %v1349_v30 = vadd.f32 %v1157_v18, %v772_v27  ;;  %v6249_v28 = vld [vmem:[#allocation2 + $0x5b0] sm:$0xff]  ;;  %v9070_v63 = vld [vmem:[#allocation164_spill] sm:$0xff] }
 0x301   :  { %v1733_v58 = vmul.f32 0.40261996, %v6249_v28  ;;  %v773_v34 = vmul.f32 0.05448869, %v581_v10  ;;  %v8044_v36 = vmul.f32 0.05448869, %v9070_v63 }
 0x302   :  { %v9072_v48 = vld [vmem:[#allocation165_spill] sm:$0xff]  ;;  %v3671_v17 = vld [vmem:[#allocation2 + $0x3f8] sm:$0xf]  ;;  %3268 = vst.msk [vmem:[#allocation2 + $0x418] sm:$0xf] %vm25_vm1, %v3076_v60  ;;  %v9074_v49 = vld [vmem:[#allocation130_spill] sm:$0xff]  ;;  %v1924_v59 = vadd.f32 %v1732_v6, %v1348_v3 }
 0x303   :  { %9071 = vst [vmem:[#allocation88_spill] sm:$0xff] %v8044_v36  ;;  %v8047_v45 = vmul.f32 0.05448869, %v9072_v48  ;;  %v3077_v47 = vadd.f32 %v9074_v49, %v2500_v7  ;;  %v8051_v41 = vmul.f32 0.05448869, %v4782_v4  ;;  %v1925_v20 = vadd.f32 %v1733_v58, %v1349_v30  ;;  %v9075_v42 = vld [vmem:[#allocation91_spill] sm:$0xff] }
 0x304   :  { %v3639_v31 = vld [vmem:[#allocation2 + $0x278] sm:$0xf]  ;;  %v1158_v11 = vmul.f32 0.24420136, %v966_v14  ;;  %v3542_v27 = vmul.f32 0.05448869, %v3414_v32  ;;  %v2501_v28 = vadd.f32 %v9075_v42, %v1924_v59 }
 0x305   :  { %9073 = vst [vmem:[#allocation92_spill] sm:$0xff] %v8047_v45  ;;  %3269 = vst.msk [vmem:[#allocation2 + $0x420] sm:$0xff] %vm23_vm0, %v3077_v47  ;;  %v774_v10 = vmul.f32 0.05448869, %v582_v52  ;;  %v1159_v18 = vmul.f32 0.24420136, %v8040_v16 }
 0x306   :  { %v3416_v19 = vld [vmem:[#allocation2 + $0x3f8] sm:$0xf]  ;;  %v3799_v13 = vmul.f32 0.24420136, %v3671_v17  ;;  %v9076_v63 = vld [vmem:[#allocation95_spill] sm:$0xff]  ;;  %v1350_v48 = vadd.f32 %v1158_v11, %v773_v34  ;;  %v6250_v45 = vld [vmem:[#allocation2 + $0x5c0] sm:$0xff] }
 0x307   :  { %v2502_v60 = vadd.f32 %v9076_v63, %v1925_v20  ;;  %v3673_v7 = vld [vmem:[#allocation2 + $0x408] sm:$0xf]  ;;  %v1734_v4 = vmul.f32 0.40261996, %v1542_v54  ;;  %v1351_v49 = vadd.f32 %v1159_v18, %v774_v10  ;;  %v1735_v3 = vmul.f32 0.40261996, %v6250_v45 }
 0x308   :  { %v8057_v6 = vmul.f32 0.24420136, %v3639_v31  ;;  %v8060_v14 = vmul.f32 0.40261996, %v7864_v56  ;;  %v9079_v32 = vld [vmem:[#allocation131_spill] sm:$0xff]  ;;  %v3927_v45 = vadd.f32 %v3799_v13, %v3542_v27 }
 0x309   :  { %v3078_v52 = vadd.f32 %v9079_v32, %v2501_v28  ;;  %v583_v30 = vld [vmem:[#allocation2 + $0x448] sm:$0xf]  ;;  %v8064_v58 = vmul.f32 0.24420136, %v7866_v50  ;;  %v9081_v47 = vld [vmem:[#allocation135_spill] sm:$0xff]  ;;  %v1926_v34 = vadd.f32 %v1734_v4, %v1350_v48  ;;  %v1927_v20 = vadd.f32 %v1735_v3, %v1351_v49  ;;  %v9082_v50 = vld [vmem:[#allocation96_spill] sm:$0xff] }
 0x30a   :  { %9077 = vst [vmem:[#allocation64_spill] sm:$0xff] %v8057_v6  ;;  %9078 = vst [vmem:[#allocation93_spill] sm:$0xff] %v8060_v14  ;;  %v4056_v17 = vld [vmem:[#allocation2 + $0x408] sm:$0xf]  ;;  %v3079_v59 = vadd.f32 %v9081_v47, %v2502_v60  ;;  %v3544_v10 = vmul.f32 0.05448869, %v3416_v19 }
 0x30b   :  { %9080 = vst [vmem:[#allocation65_spill] sm:$0xff] %v8064_v58  ;;  %v968_v54 = vld [vmem:[#allocation2 + $0x508] sm:$0xf]  ;;  %v3801_v18 = vmul.f32 0.24420136, %v3673_v7  ;;  %v584_v56 = vld [vmem:[#allocation2 + $0x450] sm:$0xff]  ;;  %v2503_v63 = vadd.f32 %v9082_v50, %v1926_v34 }
 0x30c   :  { %v1544_v11 = vld [vmem:[#allocation2 + $0x5c8] sm:$0xf]  ;;  %3270 = vst.msk [vmem:[#allocation2 + $0x428] sm:$0xf] %vm25_vm1, %v3078_v52  ;;  %v8068_v42 = vld [vmem:[#allocation2 + $0x510] sm:$0xff]  ;;  %v9084_v7 = vld [vmem:[#allocation136_spill] sm:$0xff] }
 0x30d   :  { %v3418_v31 = vld [vmem:[#allocation2 + $0x408] sm:$0xf]  ;;  %v3675_v28 = vld [vmem:[#allocation2 + $0x418] sm:$0xf]  ;;  %3271 = vst.msk [vmem:[#allocation2 + $0x430] sm:$0xff] %vm23_vm0, %v3079_v59  ;;  %v9083_v32 = vld [vmem:[#allocation99_spill] sm:$0xff]  ;;  %v3080_v47 = vadd.f32 %v9084_v7, %v2503_v63  ;;  %v3929_v46 = vadd.f32 %v3801_v18, %v3544_v10 }
 0x30e   :  { %v2504_v60 = vadd.f32 %v9083_v32, %v1927_v20  ;;  %v775_v48 = vmul.f32 0.05448869, %v583_v30  ;;  %v585_v4 = vld [vmem:[#allocation2 + $0x458] sm:$0xf]  ;;  %v4184_v49 = vmul.f32 0.40261996, %v4056_v17 }
 0x30f   :  { %v4441_v3 = vld [vmem:[#allocation2 + $0x418] sm:$0xf]  ;;  %v3546_v27 = vmul.f32 0.05448869, %v3418_v31  ;;  %v9085_v52 = vld [vmem:[#allocation139_spill] sm:$0xff] }
 0x310   :  { %v970_v19 = vld [vmem:[#allocation2 + $0x518] sm:$0xf]  ;;  %v3081_v14 = vadd.f32 %v9085_v52, %v2504_v60  ;;  %v1160_v58 = vmul.f32 0.24420136, %v968_v54  ;;  %v4312_v36 = vadd.f32 %v4184_v49, %v3927_v45  ;;  %v3803_v59 = vmul.f32 0.24420136, %v3675_v28 }
 0x311   :  { %v3420_v13 = vld [vmem:[#allocation2 + $0x418] sm:$0xf]  ;;  %v4569_v34 = vmul.f32 0.24420136, %v4441_v3  ;;  %3272 = vst.msk [vmem:[#allocation2 + $0x438] sm:$0xf] %vm25_vm1, %v3080_v47 }
 0x312   :  { %v1546_v6 = vld [vmem:[#allocation2 + $0x5d8] sm:$0xf]  ;;  %3273 = vst.msk [vmem:[#allocation2 + $0x440] sm:$0xff] %vm23_vm0, %v3081_v14  ;;  %v1352_v30 = vadd.f32 %v1160_v58, %v775_v48  ;;  %v1736_v17 = vmul.f32 0.40261996, %v1544_v11  ;;  %v6251_v50 = vld [vmem:[#allocation2 + $0x5d0] sm:$0xff] }
 0x313   :  { %v4058_v21 = vld [vmem:[#allocation2 + $0x418] sm:$0xf]  ;;  %v776_v20 = vmul.f32 0.05448869, %v584_v56  ;;  %v1161_v31 = vmul.f32 0.24420136, %v8068_v42  ;;  %v4697_v58 = vadd.f32 %v4569_v34, %v4312_v36 }
 0x314   :  { %v1737_v63 = vmul.f32 0.40261996, %v6251_v50  ;;  %v777_v32 = vmul.f32 0.05448869, %v585_v4  ;;  %v1162_v60 = vmul.f32 0.24420136, %v970_v19  ;;  %v1928_v18 = vadd.f32 %v1736_v17, %v1352_v30 }
 0x315   :  { %v8079_v54 = vmul.f32 0.24420136, %v7882_v2  ;;  %v4186_v10 = vmul.f32 0.40261996, %v4058_v21  ;;  %v3677_v45 = vld [vmem:[#allocation2 + $0x428] sm:$0xf]  ;;  %v1353_v28 = vadd.f32 %v1161_v31, %v776_v20  ;;  %v3931_v2 = vadd.f32 %v3803_v59, %v3546_v27 }
 0x316   :  { %v8082_v49 = vmul.f32 0.05448869, %v7884_v39  ;;  %v3548_v14 = vmul.f32 0.05448869, %v3420_v13  ;;  %v1354_v11 = vadd.f32 %v1162_v60, %v777_v32  ;;  %v586_v56 = vld [vmem:[#allocation2 + $0x460] sm:$0xff]  ;;  %v9088_v47 = vld [vmem:[#allocation100_spill] sm:$0xff] }
 0x317   :  { %9086 = vst [vmem:[#allocation97_spill] sm:$0xff] %v8079_v54  ;;  %v4314_v48 = vadd.f32 %v4186_v10, %v3929_v46  ;;  %v4443_v3 = vld [vmem:[#allocation2 + $0x428] sm:$0xf]  ;;  %v2505_v4 = vadd.f32 %v9088_v47, %v1928_v18  ;;  %v1929_v19 = vadd.f32 %v1737_v63, %v1353_v28  ;;  %v1738_v52 = vmul.f32 0.40261996, %v1546_v6  ;;  %v9089_v17 = vld [vmem:[#allocation140_spill] sm:$0xff] }
 0x318   :  { %9087 = vst [vmem:[#allocation66_spill] sm:$0xff] %v8082_v49  ;;  %v4826_v7 = vld [vmem:[#allocation2 + $0x428] sm:$0xf]  ;;  %v3805_v50 = vmul.f32 0.24420136, %v3677_v45  ;;  %v9090_v39 = vld [vmem:[#allocation103_spill] sm:$0xff] }
 0x319   :  { %v4060_v21 = vld [vmem:[#allocation2 + $0x428] sm:$0xf]  ;;  %v4954_v54 = vmul.f32 0.05448869, %v4826_v7  ;;  %v4571_v30 = vmul.f32 0.24420136, %v4443_v3  ;;  %v3082_v20 = vadd.f32 %v9089_v17, %v2505_v4  ;;  %v2506_v31 = vadd.f32 %v9090_v39, %v1929_v19 }
 0x31a   :  { %v1930_v13 = vadd.f32 %v1738_v52, %v1354_v11  ;;  %v971_v36 = vld [vmem:[#allocation2 + $0x520] sm:$0xff]  ;;  %v8087_v46 = vld [vmem:[#allocation2 + $0x3e8] sm:$0xf]  ;;  %v778_v18 = vmul.f32 0.05448869, %v586_v56  ;;  %v9091_v28 = vld [vmem:[#allocation143_spill] sm:$0xff] }
 0x31b   :  { %v1547_v34 = vld [vmem:[#allocation2 + $0x5e0] sm:$0xff]  ;;  %v3422_v60 = vld [vmem:[#allocation2 + $0x428] sm:$0xf]  ;;  %v5082_v10 = vadd.f32 %v4954_v54, %v4697_v58  ;;  %v4188_v27 = vmul.f32 0.40261996, %v4060_v21  ;;  %v4699_v59 = vadd.f32 %v4571_v30, %v4314_v48  ;;  %v3083_v3 = vadd.f32 %v9091_v28, %v2506_v31  ;;  %v9092_v52 = vld [vmem:[#allocation104_spill] sm:$0xff] }
 0x31c   :  { %v2124_v32 = vld [vmem:[#allocation2 + $0x6a0] sm:$0xff]  ;;  %v587_v63 = vld [vmem:[#allocation2 + $0x468] sm:$0xf]  ;;  %v3679_v45 = vld [vmem:[#allocation2 + $0x438] sm:$0xf]  ;;  %v2507_v54 = vadd.f32 %v9092_v52, %v1930_v13  ;;  %v3933_v21 = vadd.f32 %v3805_v50, %v3548_v14 }
 0x31d   :  { %v8089_v6 = vld [vmem:[#allocation2 + $0x3e8] sm:$0xf]  ;;  %3274 = vst.msk [vmem:[#allocation2 + $0x448] sm:$0xf] %vm25_vm1, %v3082_v20  ;;  %v2701_v7 = vld [vmem:[#allocation2 + $0x760] sm:$0xff]  ;;  %v4316_v48 = vadd.f32 %v4188_v27, %v3931_v2 }
 0x31e   :  { %v972_v11 = vld [vmem:[#allocation2 + $0x528] sm:$0xf]  ;;  %5210 = vst.msk [vmem:[#allocation2 + $0x3e8] sm:$0xf] %vm25_vm1, %v5082_v10  ;;  %v4062_v4 = vld [vmem:[#allocation2 + $0x438] sm:$0xf] }
 0x31f   :  { %v1548_v47 = vld [vmem:[#allocation2 + $0x5e8] sm:$0xf]  ;;  %v4828_v19 = vld [vmem:[#allocation2 + $0x438] sm:$0xf]  ;;  %v1163_v58 = vmul.f32 0.24420136, %v971_v36 }
 0x320   :  { %v8095_v56 = vld [vmem:[#allocation2 + $0x560] sm:$0xff]  ;;  %v3550_v17 = vmul.f32 0.05448869, %v3422_v60  ;;  %v4956_v30 = vmul.f32 0.05448869, %v4828_v19  ;;  %3275 = vst.msk [vmem:[#allocation2 + $0x450] sm:$0xff] %vm23_vm0, %v3083_v3 }
 0x321   :  { %v2125_v20 = vld [vmem:[#allocation2 + $0x6a8] sm:$0xf]  ;;  %v8098_v39 = vld [vmem:[#allocation2 + $0x3f8] sm:$0xf]  ;;  %v1355_v8 = vadd.f32 %v1163_v58, %v778_v18  ;;  %v1739_v24 = vmul.f32 0.40261996, %v1547_v34 }
 0x322   :  { %v8100_v31 = vld [vmem:[#allocation2 + $0x3f8] sm:$0xf]  ;;  %v2316_v13 = vmul.f32 0.24420136, %v2124_v32  ;;  %v2702_v36 = vld [vmem:[#allocation2 + $0x768] sm:$0xf]  ;;  %v5084_v60 = vadd.f32 %v4956_v30, %v4699_v59 }
 0x323   :  { %v4445_v28 = vld [vmem:[#allocation2 + $0x438] sm:$0xf]  ;;  %v3807_v52 = vmul.f32 0.24420136, %v3679_v45  ;;  %v4190_v37 = vmul.f32 0.40261996, %v4062_v4  ;;  %v1931_v2 = vadd.f32 %v1739_v24, %v1355_v8 }
 0x324   :  { %v9093_v10 = vld [vmem:[#allocation144_spill] sm:$0xff]  ;;  %v779_v14 = vmul.f32 0.05448869, %v587_v63  ;;  %v2893_v50 = vmul.f32 0.05448869, %v2701_v7 }
 0x325   :  { %v3084_v49 = vadd.f32 %v9093_v10, %v2507_v54  ;;  %v1164_v27 = vmul.f32 0.24420136, %v972_v11  ;;  %v1740_v3 = vmul.f32 0.40261996, %v1548_v47  ;;  %v595_v19 = vld [vmem:[#allocation2 + $0x4a8] sm:$0xf]  ;;  %v4318_v32 = vadd.f32 %v4190_v37, %v3933_v21 }
 0x326   :  { %v4573_v9 = vmul.f32 0.24420136, %v4445_v28  ;;  %5212 = vst.msk [vmem:[#allocation2 + $0x3f8] sm:$0xf] %vm25_vm1, %v5084_v60  ;;  %v786_v54 = vmul.f32 0.05448869, %v7969_v40  ;;  %v2508_v4 = vadd.f32 %v2316_v13, %v1931_v2  ;;  %v3935_v60 = vadd.f32 %v3807_v52, %v3550_v17 }
 0x327   :  { %3276 = vst.msk [vmem:[#allocation2 + $0x458] sm:$0xf] %vm25_vm1, %v3084_v49  ;;  %v1171_v34 = vmul.f32 0.24420136, %v8095_v56  ;;  %v4064_v18 = vld [vmem:[#allocation2 + $0x448] sm:$0xf]  ;;  %v1356_v59 = vadd.f32 %v1164_v27, %v779_v14 }
 0x328   :  { %v4447_v45 = vld [vmem:[#allocation2 + $0x448] sm:$0xf]  ;;  %v2317_v63 = vmul.f32 0.24420136, %v2125_v20  ;;  %v8108_v24 = vmul.f32 0.05448869, %v7894_v26  ;;  %v4701_v8 = vadd.f32 %v4573_v9, %v4316_v48  ;;  %v3085_v30 = vadd.f32 %v2893_v50, %v2508_v4 }
 0x329   :  { %v980_v58 = vld [vmem:[#allocation2 + $0x568] sm:$0xf]  ;;  %v2894_v49 = vmul.f32 0.05448869, %v2702_v36  ;;  %v1363_v7 = vadd.f32 %v1171_v34, %v786_v54  ;;  %v4575_v11 = vmul.f32 0.24420136, %v4447_v45  ;;  %v1932_v28 = vadd.f32 %v1740_v3, %v1356_v59 }
 0x32a   :  { %9094 = vst [vmem:[#allocation67_spill] sm:$0xff] %v8108_v24  ;;  %v4830_v47 = vld [vmem:[#allocation2 + $0x448] sm:$0xf]  ;;  %v6252_v40 = vld [vmem:[#allocation2 + $0x620] sm:$0xff]  ;;  %v4192_v37 = vmul.f32 0.40261996, %v4064_v18 }
 0x32b   :  { %v1747_v10 = vmul.f32 0.40261996, %v6252_v40  ;;  %v4958_v21 = vmul.f32 0.05448869, %v4830_v47  ;;  %v787_v55 = vmul.f32 0.05448869, %v595_v19  ;;  %v4703_v14 = vadd.f32 %v4575_v11, %v4318_v32 }
 0x32c   :  { %v982_v13 = vld [vmem:[#allocation2 + $0x578] sm:$0xf]  ;;  %3277 = vst.msk [vmem:[#allocation2 + $0x460] sm:$0xff] %vm23_vm0, %v3085_v30  ;;  %v2509_v20 = vadd.f32 %v2317_v63, %v1932_v28  ;;  %v1172_v2 = vmul.f32 0.24420136, %v980_v58  ;;  %v8111_v9 = vld [vmem:[#allocation2 + $0x570] sm:$0xff]  ;;  %v4320_v32 = vadd.f32 %v4192_v37, %v3935_v60 }
 0x32d   :  { %v1939_v26 = vadd.f32 %v1747_v10, %v1363_v7  ;;  %v597_v48 = vld [vmem:[#allocation2 + $0x4b8] sm:$0xf]  ;;  %v5086_v36 = vadd.f32 %v4958_v21, %v4701_v8  ;;  %v788_v3 = vmul.f32 0.05448869, %v7976_v33  ;;  %v8114_v54 = vld [vmem:[#allocation2 + $0x408] sm:$0xf] }
 0x32e   :  { %v4449_v27 = vld [vmem:[#allocation2 + $0x458] sm:$0xf]  ;;  %v8116_v17 = vld [vmem:[#allocation2 + $0x408] sm:$0xf]  ;;  %v3086_v19 = vadd.f32 %v2894_v49, %v2509_v20  ;;  %v9095_v18 = vld [vmem:[#allocation107_spill] sm:$0xff]  ;;  %v1364_v4 = vadd.f32 %v1172_v2, %v787_v55 }
 0x32f   :  { %v4832_v50 = vld [vmem:[#allocation2 + $0x458] sm:$0xf]  ;;  %v984_v34 = vld [vmem:[#allocation2 + $0x588] sm:$0xf]  ;;  %5214 = vst.msk [vmem:[#allocation2 + $0x408] sm:$0xf] %vm25_vm1, %v5086_v36  ;;  %v2516_v45 = vadd.f32 %v9095_v18, %v1939_v26 }
 0x330   :  { %v4960_v52 = vmul.f32 0.05448869, %v4832_v50  ;;  %v1173_v59 = vmul.f32 0.24420136, %v8111_v9  ;;  %v8121_v63 = vld [vmem:[#allocation2 + $0x580] sm:$0xff]  ;;  %v6253_v7 = vld [vmem:[#allocation2 + $0x630] sm:$0xff] }
 0x331   :  { %v599_v58 = vld [vmem:[#allocation2 + $0x4c8] sm:$0xf]  ;;  %v4577_v8 = vmul.f32 0.24420136, %v4449_v27  ;;  %3278 = vst.msk [vmem:[#allocation2 + $0x468] sm:$0xf] %vm25_vm1, %v3086_v19 }
 0x332   :  { %v5088_v33 = vadd.f32 %v4960_v52, %v4703_v14  ;;  %v1749_v11 = vmul.f32 0.40261996, %v6253_v7  ;;  %v789_v47 = vmul.f32 0.05448869, %v597_v48  ;;  %v8124_v49 = vld [vmem:[#allocation2 + $0x418] sm:$0xf]  ;;  %v1365_v60 = vadd.f32 %v1173_v59, %v788_v3 }
 0x333   :  { %v9096_v30 = vld [vmem:[#allocation25_spill] sm:$0xff]  ;;  %v9097_v40 = vld [vmem:[#allocation71_spill] sm:$0xff]  ;;  %v1174_v55 = vmul.f32 0.24420136, %v982_v13  ;;  %v790_v21 = vmul.f32 0.05448869, %v7986_v12  ;;  %v4705_v12 = vadd.f32 %v4577_v8, %v4320_v32 }
 0x334   :  { %v3093_v28 = vadd.f32 %v9096_v30, %v2516_v45  ;;  %v1940_v10 = vadd.f32 %v9097_v40, %v1364_v4  ;;  %v8128_v37 = vld [vmem:[#allocation2 + $0x590] sm:$0xff]  ;;  %5216 = vst.msk [vmem:[#allocation2 + $0x418] sm:$0xf] %vm25_vm1, %v5088_v33  ;;  %v1175_v14 = vmul.f32 0.24420136, %v8121_v63  ;;  %v6254_v20 = vld [vmem:[#allocation2 + $0x640] sm:$0xff]  ;;  %v1941_v27 = vadd.f32 %v1749_v11, %v1365_v60 }
 0x335   :  { %v1751_v26 = vmul.f32 0.40261996, %v6254_v20  ;;  %v986_v2 = vld [vmem:[#allocation2 + $0x598] sm:$0xf]  ;;  %v9098_v48 = vld [vmem:[#allocation109_spill] sm:$0xff]  ;;  %v1366_v50 = vadd.f32 %v1174_v55, %v789_v47  ;;  %v9099_v4 = vld [vmem:[#allocation26_spill] sm:$0xff] }
 0x336   :  { %3285 = vst.msk [vmem:[#allocation2 + $0x4a0] sm:$0xff] %vm23_vm0, %v3093_v28  ;;  %v2517_v36 = vadd.f32 %v9098_v48, %v1940_v10  ;;  %v791_v52 = vmul.f32 0.05448869, %v599_v58  ;;  %v601_v3 = vld [vmem:[#allocation2 + $0x4d8] sm:$0xf]  ;;  %v1367_v13 = vadd.f32 %v1175_v14, %v790_v21  ;;  %v9100_v33 = vld [vmem:[#allocation113_spill] sm:$0xff] }
 0x337   :  { %v1176_v19 = vmul.f32 0.24420136, %v984_v34  ;;  %v792_v18 = vmul.f32 0.05448869, %v8000_v25  ;;  %v1177_v45 = vmul.f32 0.24420136, %v8128_v37  ;;  %v2518_v7 = vadd.f32 %v9100_v33, %v1941_v27 }
 0x338   :  { %v3094_v59 = vadd.f32 %v9099_v4, %v2517_v36  ;;  %v9101_v30 = vld [vmem:[#allocation74_spill] sm:$0xff]  ;;  %v1943_v28 = vadd.f32 %v1751_v26, %v1367_v13  ;;  %v793_v11 = vmul.f32 0.05448869, %v601_v3  ;;  %v9102_v58 = vld [vmem:[#allocation27_spill] sm:$0xff]  ;;  %v1178_v32 = vmul.f32 0.24420136, %v986_v2 }
 0x339   :  { %v1942_v40 = vadd.f32 %v9101_v30, %v1366_v50  ;;  %v1368_v20 = vadd.f32 %v1176_v19, %v791_v52  ;;  %v1369_v10 = vadd.f32 %v1177_v45, %v792_v18  ;;  %v4834_v47 = vld [vmem:[#allocation2 + $0x468] sm:$0xf]  ;;  %v3095_v34 = vadd.f32 %v9102_v58, %v2518_v7  ;;  %v6255_v55 = vld [vmem:[#allocation2 + $0x650] sm:$0xff]  ;;  %v8148_v50 = vld [vmem:[#allocation2 + $0x5a0] sm:$0xff] }
 0x33a   :  { %3286 = vst.msk [vmem:[#allocation2 + $0x4a8] sm:$0xf] %vm25_vm1, %v3094_v59  ;;  %v9103_v60 = vld [vmem:[#allocation114_spill] sm:$0xff]  ;;  %v1753_v21 = vmul.f32 0.40261996, %v6255_v55  ;;  %v9106_v26 = vld [vmem:[#allocation79_spill] sm:$0xff]  ;;  %v1370_v18 = vadd.f32 %v1178_v32, %v793_v11 }
 0x33b   :  { %v2519_v25 = vadd.f32 %v9103_v60, %v1942_v40  ;;  %v8144_v8 = vmul.f32 0.24420136, %v7954_v0  ;;  %v4962_v14 = vmul.f32 0.05448869, %v4834_v47  ;;  %v9105_v48 = vld [vmem:[#allocation118_spill] sm:$0xff]  ;;  %v1944_v27 = vadd.f32 %v9106_v26, %v1368_v20  ;;  %3287 = vst.msk [vmem:[#allocation2 + $0x4b0] sm:$0xff] %vm23_vm0, %v3095_v34 }
 0x33c   :  { %v2520_v36 = vadd.f32 %v9105_v48, %v1943_v28  ;;  %v988_v52 = vld [vmem:[#allocation2 + $0x5a8] sm:$0xf]  ;;  %v9107_v3 = vld [vmem:[#allocation28_spill] sm:$0xff]  ;;  %v1945_v19 = vadd.f32 %v1753_v21, %v1369_v10  ;;  %v794_v45 = vmul.f32 0.05448869, %v8007_v38  ;;  %v9109_v59 = vld [vmem:[#allocation29_spill] sm:$0xff] }
 0x33d   :  { %9104 = vst [vmem:[#allocation98_spill] sm:$0xff] %v8144_v8  ;;  %v3096_v13 = vadd.f32 %v9107_v3, %v2519_v25  ;;  %v603_v2 = vld [vmem:[#allocation2 + $0x4e8] sm:$0xf]  ;;  %v8154_v0 = vmul.f32 0.40261996, %v7963_v15  ;;  %v5090_v4 = vadd.f32 %v4962_v14, %v4705_v12  ;;  %v9110_v7 = vld [vmem:[#allocation119_spill] sm:$0xff] }
 0x33e   :  { %v3097_v33 = vadd.f32 %v9109_v59, %v2520_v36  ;;  %v2521_v30 = vadd.f32 %v9110_v7, %v1944_v27  ;;  %v8158_v40 = vld [vmem:[#allocation2 + $0x5b0] sm:$0xff]  ;;  %v9112_v47 = vld [vmem:[#allocation84_spill] sm:$0xff]  ;;  %v1179_v11 = vmul.f32 0.24420136, %v8148_v50  ;;  %v6256_v38 = vld [vmem:[#allocation2 + $0x660] sm:$0xff] }
 0x33f   :  { %9108 = vst [vmem:[#allocation101_spill] sm:$0xff] %v8154_v0  ;;  %3288 = vst.msk [vmem:[#allocation2 + $0x4b8] sm:$0xf] %vm25_vm1, %v3096_v13  ;;  %v9111_v28 = vld [vmem:[#allocation123_spill] sm:$0xff]  ;;  %v1946_v10 = vadd.f32 %v9112_v47, %v1370_v18  ;;  %v1755_v58 = vmul.f32 0.40261996, %v6256_v38 }
 0x340   :  { %v2522_v20 = vadd.f32 %v9111_v28, %v1945_v19  ;;  %5218 = vst.msk [vmem:[#allocation2 + $0x428] sm:$0xf] %vm25_vm1, %v5090_v4  ;;  %v9113_v15 = vld [vmem:[#allocation30_spill] sm:$0xff]  ;;  %v795_v34 = vmul.f32 0.05448869, %v603_v2  ;;  %v9114_v21 = vld [vmem:[#allocation31_spill] sm:$0xff]  ;;  %v1371_v36 = vadd.f32 %v1179_v11, %v794_v45 }
 0x341   :  { %3289 = vst.msk [vmem:[#allocation2 + $0x4c0] sm:$0xff] %vm23_vm0, %v3097_v33  ;;  %v3098_v12 = vadd.f32 %v9113_v15, %v2521_v30  ;;  %v1180_v60 = vmul.f32 0.24420136, %v988_v52  ;;  %v796_v25 = vmul.f32 0.05448869, %v8017_v44  ;;  %v9115_v14 = vld [vmem:[#allocation124_spill] sm:$0xff] }
 0x342   :  { %v990_v55 = vld [vmem:[#allocation2 + $0x5b8] sm:$0xf]  ;;  %v3099_v32 = vadd.f32 %v9114_v21, %v2522_v20  ;;  %v2523_v48 = vadd.f32 %v9115_v14, %v1946_v10  ;;  %v1181_v26 = vmul.f32 0.24420136, %v8158_v40  ;;  %v8172_v3 = vmul.f32 0.24420136, %v7965_v5 }
 0x343   :  { %v605_v27 = vld [vmem:[#allocation2 + $0x4f8] sm:$0xf]  ;;  %v8175_v13 = vmul.f32 0.24420136, %v7973_v57  ;;  %v8178_v19 = vmul.f32 0.05448869, %v7978_v22  ;;  %v1372_v44 = vadd.f32 %v1180_v60, %v795_v34  ;;  %v1947_v4 = vadd.f32 %v1755_v58, %v1371_v36 }
 0x344   :  { %3290 = vst.msk [vmem:[#allocation2 + $0x4c8] sm:$0xf] %vm25_vm1, %v3098_v12  ;;  %v8182_v52 = vmul.f32 0.05448869, %v7988_v61  ;;  %v8185_v18 = vmul.f32 0.24420136, %v8087_v46  ;;  %v1373_v33 = vadd.f32 %v1181_v26, %v796_v25 }
 0x345   :  { %9116 = vst [vmem:[#allocation68_spill] sm:$0xff] %v8175_v13  ;;  %v3430_v45 = vld [vmem:[#allocation2 + $0x4a8] sm:$0xf]  ;;  %3291 = vst.msk [vmem:[#allocation2 + $0x4d0] sm:$0xff] %vm23_vm0, %v3099_v32  ;;  %v9119_v5 = vld [vmem:[#allocation32_spill] sm:$0xff] }
 0x346   :  { %9117 = vst [vmem:[#allocation102_spill] sm:$0xff] %v8182_v52  ;;  %9118 = vst [vmem:[#allocation69_spill] sm:$0xff] %v8185_v18  ;;  %v3100_v2 = vadd.f32 %v9119_v5, %v2523_v48  ;;  %v9120_v57 = vld [vmem:[#allocation89_spill] sm:$0xff]  ;;  %v6257_v22 = vld [vmem:[#allocation2 + $0x670] sm:$0xff]  ;;  %v797_v30 = vmul.f32 0.05448869, %v605_v27 }
 0x347   :  { %v1948_v59 = vadd.f32 %v9120_v57, %v1372_v44  ;;  %v1757_v7 = vmul.f32 0.40261996, %v6257_v22  ;;  %v8191_v28 = vmul.f32 0.40261996, %v8098_v39  ;;  %v8194_v61 = vmul.f32 0.24420136, %v8100_v31 }
 0x348   :  { %3292 = vst.msk [vmem:[#allocation2 + $0x4d8] sm:$0xf] %vm25_vm1, %v3100_v2  ;;  %v9122_v46 = vld [vmem:[#allocation128_spill] sm:$0xff]  ;;  %v1182_v47 = vmul.f32 0.24420136, %v990_v55  ;;  %v9123_v38 = vld [vmem:[#allocation129_spill] sm:$0xff] }
 0x349   :  { %9121 = vst [vmem:[#allocation105_spill] sm:$0xff] %v8191_v28  ;;  %v2524_v20 = vadd.f32 %v9122_v46, %v1947_v4  ;;  %v3558_v10 = vmul.f32 0.05448869, %v3430_v45  ;;  %v3687_v11 = vld [vmem:[#allocation2 + $0x4b8] sm:$0xf]  ;;  %v2525_v58 = vadd.f32 %v9123_v38, %v1948_v59  ;;  %v1949_v15 = vadd.f32 %v1757_v7, %v1373_v33  ;;  %v8199_v12 = vld [vmem:[#allocation2 + $0x5c0] sm:$0xff] }
 0x34a   :  { %v8202_v34 = vmul.f32 0.24420136, %v8114_v54  ;;  %v8205_v39 = vmul.f32 0.05448869, %v8116_v17  ;;  %v3815_v31 = vmul.f32 0.24420136, %v3687_v11  ;;  %v1374_v36 = vadd.f32 %v1182_v47, %v797_v30 }
 0x34b   :  { %v9125_v60 = vld [vmem:[#allocation33_spill] sm:$0xff]  ;;  %v3424_v21 = vld [vmem:[#allocation2 + $0x438] sm:$0xf]  ;;  %v9126_v32 = vld [vmem:[#allocation34_spill] sm:$0xff]  ;;  %v798_v26 = vmul.f32 0.05448869, %v8040_v16 }
 0x34c   :  { %9124 = vst [vmem:[#allocation70_spill] sm:$0xff] %v8202_v34  ;;  %v3101_v25 = vadd.f32 %v9125_v60, %v2524_v20  ;;  %v3102_v14 = vadd.f32 %v9126_v32, %v2525_v58  ;;  %v9127_v55 = vld [vmem:[#allocation133_spill] sm:$0xff]  ;;  %v3432_v27 = vld [vmem:[#allocation2 + $0x4b8] sm:$0xf]  ;;  %v3689_v44 = vld [vmem:[#allocation2 + $0x4c8] sm:$0xf]  ;;  %v3943_v5 = vadd.f32 %v3815_v31, %v3558_v10 }
 0x34d   :  { %v2526_v48 = vadd.f32 %v9127_v55, %v1949_v15  ;;  %v1183_v54 = vmul.f32 0.24420136, %v8199_v12  ;;  %v8214_v17 = vmul.f32 0.05448869, %v8124_v49  ;;  %v3681_v45 = vld [vmem:[#allocation2 + $0x448] sm:$0xf] }
 0x34e   :  { %3293 = vst.msk [vmem:[#allocation2 + $0x4e0] sm:$0xff] %vm23_vm0, %v3101_v25  ;;  %v4072_v2 = vld [vmem:[#allocation2 + $0x4c8] sm:$0xf]  ;;  %v9129_v4 = vld [vmem:[#allocation35_spill] sm:$0xff]  ;;  %v8219_v22 = vmul.f32 0.05448869, %v3424_v21 }
 0x34f   :  { %9128 = vst [vmem:[#allocation106_spill] sm:$0xff] %v8214_v17  ;;  %3294 = vst.msk [vmem:[#allocation2 + $0x4e8] sm:$0xf] %vm25_vm1, %v3102_v14  ;;  %v3103_v57 = vadd.f32 %v9129_v4, %v2526_v48  ;;  %v9130_v59 = vld [vmem:[#allocation94_spill] sm:$0xff]  ;;  %v4066_v16 = vld [vmem:[#allocation2 + $0x458] sm:$0xf]  ;;  %v1375_v15 = vadd.f32 %v1183_v54, %v798_v26 }
 0x350   :  { %v1950_v33 = vadd.f32 %v9130_v59, %v1374_v36  ;;  %v4451_v7 = vld [vmem:[#allocation2 + $0x468] sm:$0xf]  ;;  %v3560_v30 = vmul.f32 0.05448869, %v3432_v27  ;;  %v3817_v46 = vmul.f32 0.24420136, %v3689_v44 }
 0x351   :  { %v4200_v20 = vmul.f32 0.40261996, %v4072_v2  ;;  %3295 = vst.msk [vmem:[#allocation2 + $0x4f0] sm:$0xff] %vm23_vm0, %v3103_v57  ;;  %v9131_v49 = vld [vmem:[#allocation134_spill] sm:$0xff]  ;;  %v8223_v10 = vmul.f32 0.24420136, %v3681_v45 }
 0x352   :  { %v2527_v47 = vadd.f32 %v9131_v49, %v1950_v33  ;;  %v607_v11 = vld [vmem:[#allocation2 + $0x508] sm:$0xf]  ;;  %v3691_v58 = vld [vmem:[#allocation2 + $0x4d8] sm:$0xf]  ;;  %v8225_v31 = vmul.f32 0.40261996, %v4066_v16  ;;  %v3945_v45 = vadd.f32 %v3817_v46, %v3560_v30 }
 0x353   :  { %v3434_v38 = vld [vmem:[#allocation2 + $0x4c8] sm:$0xf]  ;;  %v4328_v25 = vadd.f32 %v4200_v20, %v3943_v5  ;;  %v4457_v21 = vld [vmem:[#allocation2 + $0x4d8] sm:$0xf]  ;;  %v8228_v48 = vmul.f32 0.24420136, %v4451_v7 }
 0x354   :  { %v3685_v60 = vld [vmem:[#allocation2 + $0x4a8] sm:$0xf]  ;;  %v9132_v32 = vld [vmem:[#allocation36_spill] sm:$0xff]  ;;  %v6258_v27 = vld [vmem:[#allocation2 + $0x680] sm:$0xff]  ;;  %v3562_v4 = vmul.f32 0.05448869, %v3434_v38 }
 0x355   :  { %v3104_v14 = vadd.f32 %v9132_v32, %v2527_v47  ;;  %v992_v55 = vld [vmem:[#allocation2 + $0x5c8] sm:$0xf]  ;;  %v4074_v36 = vld [vmem:[#allocation2 + $0x4d8] sm:$0xf]  ;;  %v1759_v44 = vmul.f32 0.40261996, %v6258_v27 }
 0x356   :  { %v1568_v2 = vld [vmem:[#allocation2 + $0x688] sm:$0xf]  ;;  %v3819_v57 = vmul.f32 0.24420136, %v3691_v58  ;;  %v4585_v59 = vmul.f32 0.24420136, %v4457_v21 }
 0x357   :  { %3296 = vst.msk [vmem:[#allocation2 + $0x4f8] sm:$0xf] %vm25_vm1, %v3104_v14  ;;  %v8231_v26 = vmul.f32 0.24420136, %v3685_v60  ;;  %v3436_v54 = vld [vmem:[#allocation2 + $0x4d8] sm:$0xf]  ;;  %v1951_v5 = vadd.f32 %v1759_v44, %v1375_v15 }
 0x358   :  { %v799_v33 = vmul.f32 0.05448869, %v607_v11  ;;  %v8233_v16 = vld [vmem:[#allocation2 + $0x5d0] sm:$0xff]  ;;  %v4070_v20 = vld [vmem:[#allocation2 + $0x4b8] sm:$0xf]  ;;  %v4713_v49 = vadd.f32 %v4585_v59, %v4328_v25  ;;  %v9134_v17 = vld [vmem:[#allocation137_spill] sm:$0xff]  ;;  %v3947_v21 = vadd.f32 %v3819_v57, %v3562_v4 }
 0x359   :  { %9133 = vst [vmem:[#allocation72_spill] sm:$0xff] %v8231_v26  ;;  %v4202_v7 = vmul.f32 0.40261996, %v4074_v36  ;;  %v3693_v47 = vld [vmem:[#allocation2 + $0x4e8] sm:$0xf]  ;;  %v2528_v38 = vadd.f32 %v9134_v17, %v1951_v5  ;;  %v9135_v15 = vld [vmem:[#allocation37_spill] sm:$0xff] }
 0x35a   :  { %v4459_v32 = vld [vmem:[#allocation2 + $0x4e8] sm:$0xf]  ;;  %v1184_v30 = vmul.f32 0.24420136, %v992_v55  ;;  %v4453_v46 = vld [vmem:[#allocation2 + $0x4b8] sm:$0xf] }
 0x35b   :  { %v4842_v27 = vld [vmem:[#allocation2 + $0x4e8] sm:$0xf]  ;;  %v3564_v58 = vmul.f32 0.05448869, %v3436_v54  ;;  %v4330_v14 = vadd.f32 %v4202_v7, %v3945_v45  ;;  %v609_v26 = vld [vmem:[#allocation2 + $0x518] sm:$0xf]  ;;  %v3105_v44 = vadd.f32 %v9135_v15, %v2528_v38 }
 0x35c   :  { %v4970_v60 = vmul.f32 0.05448869, %v4842_v27  ;;  %v8236_v34 = vld [vmem:[#allocation2 + $0x4a8] sm:$0xf]  ;;  %v1376_v28 = vadd.f32 %v1184_v30, %v799_v33  ;;  %v1760_v36 = vmul.f32 0.40261996, %v1568_v2 }
 0x35d   :  { %v4076_v11 = vld [vmem:[#allocation2 + $0x4e8] sm:$0xf]  ;;  %v800_v25 = vmul.f32 0.05448869, %v8068_v42  ;;  %v1570_v59 = vld [vmem:[#allocation2 + $0x698] sm:$0xf] }
 0x35e   :  { %v3821_v18 = vmul.f32 0.24420136, %v3693_v47  ;;  %v4587_v52 = vmul.f32 0.24420136, %v4459_v32  ;;  %v5098_v17 = vadd.f32 %v4970_v60, %v4713_v49  ;;  %v1185_v55 = vmul.f32 0.24420136, %v8233_v16 }
 0x35f   :  { %v994_v54 = vld [vmem:[#allocation2 + $0x5d8] sm:$0xf]  ;;  %v8241_v4 = vmul.f32 0.40261996, %v4070_v20  ;;  %v4455_v45 = vld [vmem:[#allocation2 + $0x4c8] sm:$0xf]  ;;  %v1952_v57 = vadd.f32 %v1760_v36, %v1376_v28 }
 0x360   :  { %3297 = vst.msk [vmem:[#allocation2 + $0x500] sm:$0xff] %vm23_vm0, %v3105_v44  ;;  %v6259_v5 = vld [vmem:[#allocation2 + $0x690] sm:$0xff]  ;;  %v1003_v27 = vld [vmem:[#allocation2 + $0x620] sm:$0xff]  ;;  %v8244_v33 = vmul.f32 0.24420136, %v4453_v46  ;;  %v4715_v42 = vadd.f32 %v4587_v52, %v4330_v14  ;;  %v1377_v47 = vadd.f32 %v1185_v55, %v800_v25  ;;  %v9137_v30 = vld [vmem:[#allocation138_spill] sm:$0xff]  ;;  %v8250_v28 = vadd.f32 %v3821_v18, %v3564_v58 }
 0x361   :  { %9136 = vst [vmem:[#allocation73_spill] sm:$0xff] %v8241_v4  ;;  %v1761_v7 = vmul.f32 0.40261996, %v6259_v5  ;;  %v4204_v2 = vmul.f32 0.40261996, %v4076_v11  ;;  %v2529_v20 = vadd.f32 %v9137_v30, %v1952_v57  ;;  %v1005_v46 = vld [vmem:[#allocation2 + $0x630] sm:$0xff] }
 0x362   :  { %5226 = vst.msk [vmem:[#allocation2 + $0x4a8] sm:$0xf] %vm25_vm1, %v5098_v17  ;;  %v619_v49 = vld [vmem:[#allocation2 + $0x568] sm:$0xf]  ;;  %v4461_v32 = vld [vmem:[#allocation2 + $0x4f8] sm:$0xf] }
 0x363   :  { %v4844_v38 = vld [vmem:[#allocation2 + $0x4f8] sm:$0xf]  ;;  %v801_v60 = vmul.f32 0.05448869, %v609_v26  ;;  %v1004_v15 = vld [vmem:[#allocation2 + $0x628] sm:$0xf]  ;;  %v4332_v44 = vadd.f32 %v4204_v2, %v3947_v21  ;;  %v1953_v52 = vadd.f32 %v1761_v7, %v1377_v47 }
 0x364   :  { %v8248_v4 = vmul.f32 0.24420136, %v4455_v45  ;;  %v4972_v36 = vmul.f32 0.05448869, %v4844_v38  ;;  %v9139_v5 = vld [vmem:[#allocation38_spill] sm:$0xff]  ;;  %v1007_v26 = vld [vmem:[#allocation2 + $0x640] sm:$0xff] }
 0x365   :  { %v3106_v11 = vadd.f32 %v9139_v5, %v2529_v20  ;;  %v1186_v14 = vmul.f32 0.24420136, %v994_v54  ;;  %v1762_v17 = vmul.f32 0.40261996, %v1570_v59  ;;  %v621_v25 = vld [vmem:[#allocation2 + $0x578] sm:$0xf] }
 0x366   :  { %9138 = vst [vmem:[#allocation110_spill] sm:$0xff] %v8248_v4  ;;  %v4589_v55 = vmul.f32 0.24420136, %v4461_v32  ;;  %v5100_v13 = vadd.f32 %v4972_v36, %v4715_v42  ;;  %v810_v0 = vmul.f32 0.05448869, %v8095_v56  ;;  %v9140_v45 = vld [vmem:[#allocation141_spill] sm:$0xff] }
 0x367   :  { %v1195_v57 = vmul.f32 0.24420136, %v1003_v27  ;;  %3298 = vst.msk [vmem:[#allocation2 + $0x508] sm:$0xf] %vm25_vm1, %v3106_v11  ;;  %v2530_v18 = vadd.f32 %v9140_v45, %v1953_v52  ;;  %v1378_v58 = vadd.f32 %v1186_v14, %v801_v60  ;;  %v6260_v21 = vld [vmem:[#allocation2 + $0x6e0] sm:$0xff]  ;;  %v9141_v47 = vld [vmem:[#allocation39_spill] sm:$0xff] }
 0x368   :  { %v1771_v2 = vmul.f32 0.40261996, %v6260_v21  ;;  %v811_v38 = vmul.f32 0.05448869, %v619_v49  ;;  %v1006_v30 = vld [vmem:[#allocation2 + $0x638] sm:$0xf] }
 0x369   :  { %5228 = vst.msk [vmem:[#allocation2 + $0x4b8] sm:$0xf] %vm25_vm1, %v5100_v13  ;;  %v1387_v54 = vadd.f32 %v1195_v57, %v810_v0  ;;  %v1196_v59 = vmul.f32 0.24420136, %v1004_v15  ;;  %v812_v7 = vmul.f32 0.05448869, %v8111_v9  ;;  %v3107_v56 = vadd.f32 %v9141_v47, %v2530_v18 }
 0x36a   :  { %v1197_v42 = vmul.f32 0.24420136, %v1005_v46  ;;  %v1954_v27 = vadd.f32 %v1762_v17, %v1378_v58  ;;  %v6261_v32 = vld [vmem:[#allocation2 + $0x6f0] sm:$0xff]  ;;  %v813_v36 = vmul.f32 0.05448869, %v621_v25  ;;  %v9142_v13 = vld [vmem:[#allocation142_spill] sm:$0xff] }
 0x36b   :  { %v1773_v20 = vmul.f32 0.40261996, %v6261_v32  ;;  %v1963_v5 = vadd.f32 %v1771_v2, %v1387_v54  ;;  %v1388_v11 = vadd.f32 %v1196_v59, %v811_v38  ;;  %v1198_v52 = vmul.f32 0.24420136, %v1006_v30  ;;  %v623_v14 = vld [vmem:[#allocation2 + $0x588] sm:$0xf] }
 0x36c   :  { %v1389_v60 = vadd.f32 %v1197_v42, %v812_v7  ;;  %v1008_v49 = vld [vmem:[#allocation2 + $0x648] sm:$0xf]  ;;  %3299 = vst.msk [vmem:[#allocation2 + $0x510] sm:$0xff] %vm23_vm0, %v3107_v56  ;;  %v2531_v0 = vadd.f32 %v9142_v13, %v1954_v27  ;;  %v814_v15 = vmul.f32 0.05448869, %v8121_v63  ;;  %v6262_v46 = vld [vmem:[#allocation2 + $0x700] sm:$0xff] }
 0x36d   :  { %v1199_v9 = vmul.f32 0.24420136, %v1007_v26  ;;  %v1775_v57 = vmul.f32 0.40261996, %v6262_v46  ;;  %v4838_v45 = vld [vmem:[#allocation2 + $0x4c8] sm:$0xf]  ;;  %v1390_v38 = vadd.f32 %v1198_v52, %v813_v36 }
 0x36e   :  { %v4078_v17 = vld [vmem:[#allocation2 + $0x4f8] sm:$0xf]  ;;  %v9143_v18 = vld [vmem:[#allocation9_spill] sm:$0xff]  ;;  %v1965_v2 = vadd.f32 %v1773_v20, %v1389_v60  ;;  %v815_v7 = vmul.f32 0.05448869, %v623_v14  ;;  %v9147_v26 = vld [vmem:[#allocation10_spill] sm:$0xff]  ;;  %v4717_v20 = vadd.f32 %v4589_v55, %v4332_v44 }
 0x36f   :  { %v2540_v58 = vadd.f32 %v9143_v18, %v1963_v5  ;;  %v9144_v25 = vld [vmem:[#allocation108_spill] sm:$0xff]  ;;  %v1391_v59 = vadd.f32 %v1199_v9, %v814_v15  ;;  %v1200_v42 = vmul.f32 0.24420136, %v1008_v49  ;;  %v4463_v56 = vld [vmem:[#allocation2 + $0x508] sm:$0xf]  ;;  %v9146_v27 = vld [vmem:[#allocation41_spill] sm:$0xff] }
 0x370   :  { %v1964_v21 = vadd.f32 %v9144_v25, %v1388_v11  ;;  %v9145_v30 = vld [vmem:[#allocation40_spill] sm:$0xff]  ;;  %v9148_v13 = vld [vmem:[#allocation11_spill] sm:$0xff]  ;;  %v8269_v5 = vmul.f32 0.05448869, %v4838_v45  ;;  %v4206_v11 = vmul.f32 0.40261996, %v4078_v17 }
 0x371   :  { %v3108_v54 = vadd.f32 %v9145_v30, %v2531_v0  ;;  %v4840_v47 = vld [vmem:[#allocation2 + $0x4d8] sm:$0xf]  ;;  %v3117_v63 = vadd.f32 %v9146_v27, %v2540_v58  ;;  %v2542_v46 = vadd.f32 %v9148_v13, %v1965_v2  ;;  %v1967_v36 = vadd.f32 %v1775_v57, %v1391_v59  ;;  %v1009_v60 = vld [vmem:[#allocation2 + $0x650] sm:$0xff]  ;;  %v4846_v52 = vld [vmem:[#allocation2 + $0x508] sm:$0xf] }
 0x372   :  { %v2541_v32 = vadd.f32 %v9147_v26, %v1964_v21  ;;  %v9149_v4 = vld [vmem:[#allocation112_spill] sm:$0xff]  ;;  %v9150_v14 = vld [vmem:[#allocation42_spill] sm:$0xff]  ;;  %v9151_v0 = vld [vmem:[#allocation43_spill] sm:$0xff]  ;;  %v1392_v58 = vadd.f32 %v1200_v42, %v815_v7  ;;  %v8276_v45 = vmul.f32 0.05448869, %v4840_v47  ;;  %v4334_v44 = vadd.f32 %v4206_v11, %v8250_v28 }
 0x373   :  { %v1966_v8 = vadd.f32 %v9149_v4, %v1390_v38  ;;  %3300 = vst.msk [vmem:[#allocation2 + $0x518] sm:$0xf] %vm25_vm1, %v3108_v54  ;;  %v3119_v15 = vadd.f32 %v9151_v0, %v2542_v46  ;;  %v9152_v9 = vld [vmem:[#allocation12_spill] sm:$0xff]  ;;  %v4591_v55 = vmul.f32 0.24420136, %v4463_v56  ;;  %v9155_v2 = vld [vmem:[#allocation13_spill] sm:$0xff] }
 0x374   :  { %3309 = vst.msk [vmem:[#allocation2 + $0x560] sm:$0xff] %vm23_vm0, %v3117_v63  ;;  %v3118_v49 = vadd.f32 %v9150_v14, %v2541_v32  ;;  %v625_v25 = vld [vmem:[#allocation2 + $0x598] sm:$0xf]  ;;  %9153 = vst [vmem:[#allocation111_spill] sm:$0xff] %v8276_v45  ;;  %v4974_v17 = vmul.f32 0.05448869, %v4846_v52  ;;  %v2544_v38 = vadd.f32 %v9155_v2, %v1967_v36 }
 0x375   :  { %v2543_v18 = vadd.f32 %v9152_v9, %v1966_v8  ;;  %v1010_v4 = vld [vmem:[#allocation2 + $0x658] sm:$0xf]  ;;  %3311 = vst.msk [vmem:[#allocation2 + $0x570] sm:$0xff] %vm23_vm0, %v3119_v15  ;;  %v9156_v30 = vld [vmem:[#allocation117_spill] sm:$0xff]  ;;  %v816_v8 = vmul.f32 0.05448869, %v8128_v37 }
 0x376   :  { %3310 = vst.msk [vmem:[#allocation2 + $0x568] sm:$0xf] %vm25_vm1, %v3118_v49  ;;  %v9154_v57 = vld [vmem:[#allocation44_spill] sm:$0xff]  ;;  %v1968_v54 = vadd.f32 %v9156_v30, %v1392_v58  ;;  %v1011_v59 = vld [vmem:[#allocation2 + $0x660] sm:$0xff]  ;;  %v627_v7 = vld [vmem:[#allocation2 + $0x5a8] sm:$0xf]  ;;  %v5102_v42 = vadd.f32 %v4974_v17, %v4717_v20  ;;  %v4719_v49 = vadd.f32 %v4591_v55, %v4334_v44 }
 0x377   :  { %v3120_v21 = vadd.f32 %v9154_v57, %v2543_v18  ;;  %v1201_v47 = vmul.f32 0.24420136, %v1009_v60  ;;  %v6263_v27 = vld [vmem:[#allocation2 + $0x710] sm:$0xff]  ;;  %v817_v56 = vmul.f32 0.05448869, %v625_v25  ;;  %v9157_v32 = vld [vmem:[#allocation45_spill] sm:$0xff] }
 0x378   :  { %v1777_v28 = vmul.f32 0.40261996, %v6263_v27  ;;  %v1012_v63 = vld [vmem:[#allocation2 + $0x668] sm:$0xf]  ;;  %v3121_v13 = vadd.f32 %v9157_v32, %v2544_v38  ;;  %v1202_v36 = vmul.f32 0.24420136, %v1010_v4 }
 0x379   :  { %v3438_v26 = vld [vmem:[#allocation2 + $0x4e8] sm:$0xf]  ;;  %3312 = vst.msk [vmem:[#allocation2 + $0x578] sm:$0xf] %vm25_vm1, %v3120_v21  ;;  %v818_v52 = vmul.f32 0.05448869, %v8148_v50  ;;  %v1393_v20 = vadd.f32 %v1201_v47, %v816_v8 }
 0x37a   :  { %v9158_v46 = vld [vmem:[#allocation14_spill] sm:$0xff]  ;;  %v3440_v14 = vld [vmem:[#allocation2 + $0x4f8] sm:$0xf]  ;;  %5230 = vst.msk [vmem:[#allocation2 + $0x4c8] sm:$0xf] %vm25_vm1, %v5102_v42  ;;  %v1394_v58 = vadd.f32 %v1202_v36, %v817_v56  ;;  %v6264_v25 = vld [vmem:[#allocation2 + $0x720] sm:$0xff] }
 0x37b   :  { %v2545_v11 = vadd.f32 %v9158_v46, %v1968_v54  ;;  %v3695_v37 = vld [vmem:[#allocation2 + $0x4f8] sm:$0xf]  ;;  %v1203_v60 = vmul.f32 0.24420136, %v1011_v59  ;;  %v3697_v0 = vld [vmem:[#allocation2 + $0x508] sm:$0xf]  ;;  %v1969_v21 = vadd.f32 %v1777_v28, %v1393_v20 }
 0x37c   :  { %v4848_v15 = vld [vmem:[#allocation2 + $0x518] sm:$0xf]  ;;  %3313 = vst.msk [vmem:[#allocation2 + $0x580] sm:$0xff] %vm23_vm0, %v3121_v13  ;;  %v9159_v9 = vld [vmem:[#allocation46_spill] sm:$0xff]  ;;  %v1779_v17 = vmul.f32 0.40261996, %v6264_v25 }
 0x37d   :  { %v3122_v18 = vadd.f32 %v9159_v9, %v2545_v11  ;;  %v4080_v57 = vld [vmem:[#allocation2 + $0x508] sm:$0xf]  ;;  %v4976_v4 = vmul.f32 0.05448869, %v4848_v15  ;;  %v819_v50 = vmul.f32 0.05448869, %v627_v7  ;;  %v1395_v38 = vadd.f32 %v1203_v60, %v818_v52 }
 0x37e   :  { %v8292_v2 = vmul.f32 0.05448869, %v3438_v26  ;;  %v9160_v44 = vld [vmem:[#allocation122_spill] sm:$0xff]  ;;  %v1204_v30 = vmul.f32 0.24420136, %v1012_v63  ;;  %v1013_v54 = vld [vmem:[#allocation2 + $0x670] sm:$0xff] }
 0x37f   :  { %3314 = vst.msk [vmem:[#allocation2 + $0x588] sm:$0xf] %vm25_vm1, %v3122_v18  ;;  %v1970_v55 = vadd.f32 %v9160_v44, %v1394_v58  ;;  %v8296_v8 = vmul.f32 0.05448869, %v3440_v14  ;;  %v8298_v59 = vmul.f32 0.24420136, %v3695_v37  ;;  %v5104_v42 = vadd.f32 %v4976_v4, %v4719_v49 }
 0x380   :  { %v3446_v47 = vld [vmem:[#allocation2 + $0x568] sm:$0xf]  ;;  %v9161_v27 = vld [vmem:[#allocation15_spill] sm:$0xff]  ;;  %v629_v32 = vld [vmem:[#allocation2 + $0x5b8] sm:$0xf]  ;;  %v1971_v36 = vadd.f32 %v1779_v17, %v1395_v38  ;;  %v1396_v49 = vadd.f32 %v1204_v30, %v819_v50 }
 0x381   :  { %v2546_v56 = vadd.f32 %v9161_v27, %v1969_v21  ;;  %v1014_v28 = vld [vmem:[#allocation2 + $0x678] sm:$0xf]  ;;  %v8301_v7 = vmul.f32 0.24420136, %v3697_v0  ;;  %v8303_v26 = vmul.f32 0.40261996, %v4080_v57 }
 0x382   :  { %v4082_v13 = vld [vmem:[#allocation2 + $0x518] sm:$0xf]  ;;  %5232 = vst.msk [vmem:[#allocation2 + $0x4d8] sm:$0xf] %vm25_vm1, %v5104_v42  ;;  %v9163_v14 = vld [vmem:[#allocation47_spill] sm:$0xff]  ;;  %v9165_v25 = vld [vmem:[#allocation17_spill] sm:$0xff] }
 0x383   :  { %v9162_v46 = vld [vmem:[#allocation16_spill] sm:$0xff]  ;;  %v3123_v37 = vadd.f32 %v9163_v14, %v2546_v56  ;;  %v820_v20 = vmul.f32 0.05448869, %v8158_v40  ;;  %v3574_v60 = vmul.f32 0.05448869, %v3446_v47  ;;  %v2548_v57 = vadd.f32 %v9165_v25, %v1971_v36  ;;  %v9166_v17 = vld [vmem:[#allocation127_spill] sm:$0xff] }
 0x384   :  { %v2547_v11 = vadd.f32 %v9162_v46, %v1970_v55  ;;  %v4465_v63 = vld [vmem:[#allocation2 + $0x518] sm:$0xf]  ;;  %v3701_v15 = vld [vmem:[#allocation2 + $0x568] sm:$0xf]  ;;  %v1972_v4 = vadd.f32 %v9166_v17, %v1396_v49  ;;  %v1205_v21 = vmul.f32 0.24420136, %v1013_v54 }
 0x385   :  { %v3703_v52 = vld [vmem:[#allocation2 + $0x578] sm:$0xf]  ;;  %3315 = vst.msk [vmem:[#allocation2 + $0x590] sm:$0xff] %vm23_vm0, %v3123_v37  ;;  %v6265_v44 = vld [vmem:[#allocation2 + $0x730] sm:$0xff]  ;;  %v821_v50 = vmul.f32 0.05448869, %v629_v32 }
 0x386   :  { %v3448_v9 = vld [vmem:[#allocation2 + $0x578] sm:$0xf]  ;;  %v1781_v55 = vmul.f32 0.40261996, %v6265_v44  ;;  %v3831_v38 = vmul.f32 0.24420136, %v3703_v52  ;;  %v1397_v36 = vadd.f32 %v1205_v21, %v820_v20 }
 0x387   :  { %v9164_v0 = vld [vmem:[#allocation48_spill] sm:$0xff]  ;;  %v1206_v40 = vmul.f32 0.24420136, %v1014_v28  ;;  %v1015_v30 = vld [vmem:[#allocation2 + $0x680] sm:$0xff]  ;;  %v8314_v42 = vmul.f32 0.40261996, %v4082_v13 }
 0x388   :  { %v3124_v18 = vadd.f32 %v9164_v0, %v2547_v11  ;;  %v4086_v58 = vld [vmem:[#allocation2 + $0x578] sm:$0xf]  ;;  %v3705_v47 = vld [vmem:[#allocation2 + $0x588] sm:$0xf]  ;;  %v9167_v56 = vld [vmem:[#allocation49_spill] sm:$0xff]  ;;  %v1973_v25 = vadd.f32 %v1781_v55, %v1397_v36 }
 0x389   :  { %v4088_v27 = vld [vmem:[#allocation2 + $0x588] sm:$0xf]  ;;  %v3125_v46 = vadd.f32 %v9167_v56, %v2548_v57  ;;  %v8318_v54 = vmul.f32 0.24420136, %v4465_v63  ;;  %v8320_v0 = vmul.f32 0.24420136, %v3701_v15 }
 0x38a   :  { %3316 = vst.msk [vmem:[#allocation2 + $0x598] sm:$0xf] %vm25_vm1, %v3124_v18  ;;  %v9168_v11 = vld [vmem:[#allocation18_spill] sm:$0xff]  ;;  %v3576_v52 = vmul.f32 0.05448869, %v3448_v9  ;;  %v1398_v18 = vadd.f32 %v1206_v40, %v821_v50  ;;  %v9172_v15 = vld [vmem:[#allocation19_spill] sm:$0xff] }
 0x38b   :  { %v2549_v14 = vadd.f32 %v9168_v11, %v1972_v4  ;;  %v631_v37 = vld [vmem:[#allocation2 + $0x5c8] sm:$0xf]  ;;  %9169 = vst [vmem:[#allocation75_spill] sm:$0xff] %v8320_v0  ;;  %v8322_v32 = vmul.f32 0.40261996, %v4086_v58  ;;  %3317 = vst.msk [vmem:[#allocation2 + $0x5a0] sm:$0xff] %vm23_vm0, %v3125_v46  ;;  %v3959_v4 = vadd.f32 %v3831_v38, %v3574_v60  ;;  %v2550_v9 = vadd.f32 %v9172_v15, %v1973_v25 }
 0x38c   :  { %v1592_v49 = vld [vmem:[#allocation2 + $0x748] sm:$0xf]  ;;  %v822_v57 = vmul.f32 0.05448869, %v8199_v12  ;;  %v4469_v20 = vld [vmem:[#allocation2 + $0x578] sm:$0xf] }
 0x38d   :  { %9170 = vst [vmem:[#allocation154_spill] sm:$0xff] %v8322_v32  ;;  %v9171_v28 = vld [vmem:[#allocation50_spill] sm:$0xff]  ;;  %v3833_v21 = vmul.f32 0.24420136, %v3705_v47  ;;  %v4216_v44 = vmul.f32 0.40261996, %v4088_v27 }
 0x38e   :  { %v3126_v13 = vadd.f32 %v9171_v28, %v2549_v14  ;;  %v1016_v17 = vld [vmem:[#allocation2 + $0x688] sm:$0xf]  ;;  %v9173_v50 = vld [vmem:[#allocation132_spill] sm:$0xff]  ;;  %v1207_v40 = vmul.f32 0.24420136, %v1015_v30  ;;  %v6266_v56 = vld [vmem:[#allocation2 + $0x740] sm:$0xff] }
 0x38f   :  { %v3450_v63 = vld [vmem:[#allocation2 + $0x588] sm:$0xf]  ;;  %v1974_v58 = vadd.f32 %v9173_v50, %v1398_v18  ;;  %v1783_v46 = vmul.f32 0.40261996, %v6266_v56  ;;  %v588_v11 = vld [vmem:[#allocation2 + $0x470] sm:$0xff]  ;;  %v9175_v38 = vld [vmem:[#allocation20_spill] sm:$0xff]  ;;  %v4344_v50 = vadd.f32 %v4216_v44, %v3959_v4 }
 0x390   :  { %3318 = vst.msk [vmem:[#allocation2 + $0x5a8] sm:$0xf] %vm25_vm1, %v3126_v13  ;;  %v4471_v14 = vld [vmem:[#allocation2 + $0x588] sm:$0xf]  ;;  %v823_v55 = vmul.f32 0.05448869, %v631_v37  ;;  %v1399_v27 = vadd.f32 %v1207_v40, %v822_v57  ;;  %v3961_v40 = vadd.f32 %v3833_v21, %v3576_v52 }
 0x391   :  { %v1208_v36 = vmul.f32 0.24420136, %v1016_v17  ;;  %v3707_v12 = vld [vmem:[#allocation2 + $0x598] sm:$0xf]  ;;  %v9174_v28 = vld [vmem:[#allocation51_spill] sm:$0xff]  ;;  %v2551_v47 = vadd.f32 %v9175_v38, %v1974_v58 }
 0x392   :  { %v3127_v60 = vadd.f32 %v9174_v28, %v2550_v9  ;;  %v1784_v32 = vmul.f32 0.40261996, %v1592_v49  ;;  %v8332_v0 = vld [vmem:[#allocation2 + $0x530] sm:$0xff]  ;;  %v8336_v25 = vmul.f32 0.24420136, %v4469_v20  ;;  %v9178_v9 = vld [vmem:[#allocation52_spill] sm:$0xff]  ;;  %v1975_v57 = vadd.f32 %v1783_v46, %v1399_v27 }
 0x393   :  { %v8334_v13 = vld [vmem:[#allocation2 + $0x5f0] sm:$0xff]  ;;  %v3578_v30 = vmul.f32 0.05448869, %v3450_v63  ;;  %v4854_v18 = vld [vmem:[#allocation2 + $0x588] sm:$0xf]  ;;  %v1400_v15 = vadd.f32 %v1208_v36, %v823_v55  ;;  %v3128_v58 = vadd.f32 %v9178_v9, %v2551_v47  ;;  %v9179_v63 = vld [vmem:[#allocation21_spill] sm:$0xff]  ;;  %v3937_v46 = vadd.f32 %v8223_v10, %v8219_v22 }
 0x394   :  { %9176 = vst [vmem:[#allocation115_spill] sm:$0xff] %v8336_v25  ;;  %v8338_v56 = vmul.f32 0.24420136, %v4471_v14  ;;  %v3452_v37 = vld [vmem:[#allocation2 + $0x598] sm:$0xf]  ;;  %3319 = vst.msk [vmem:[#allocation2 + $0x5b0] sm:$0xff] %vm23_vm0, %v3127_v60  ;;  %v2552_v4 = vadd.f32 %v9179_v63, %v1975_v57 }
 0x395   :  { %v4473_v17 = vld [vmem:[#allocation2 + $0x598] sm:$0xf]  ;;  %v8342_v49 = vld [vmem:[#allocation2 + $0x6b0] sm:$0xff]  ;;  %v3835_v28 = vmul.f32 0.24420136, %v3707_v12  ;;  %v1976_v44 = vadd.f32 %v1784_v32, %v1400_v15  ;;  %v9181_v9 = vld [vmem:[#allocation53_spill] sm:$0xff] }
 0x396   :  { %9177 = vst [vmem:[#allocation76_spill] sm:$0xff] %v8338_v56  ;;  %v4090_v38 = vld [vmem:[#allocation2 + $0x598] sm:$0xf]  ;;  %v780_v20 = vmul.f32 0.05448869, %v588_v11  ;;  %v8347_v55 = vld [vmem:[#allocation2 + $0x770] sm:$0xff]  ;;  %v3129_v32 = vadd.f32 %v9181_v9, %v2552_v4 }
 0x397   :  { %v4601_v45 = vmul.f32 0.24420136, %v4473_v17  ;;  %3320 = vst.msk [vmem:[#allocation2 + $0x5b8] sm:$0xf] %vm25_vm1, %v3128_v58  ;;  %v1165_v14 = vmul.f32 0.24420136, %v8332_v0  ;;  %v3951_v58 = vadd.f32 %v8298_v59, %v8292_v2  ;;  %v3963_v24 = vadd.f32 %v3835_v28, %v3578_v30 }
 0x398   :  { %v589_v36 = vld [vmem:[#allocation2 + $0x478] sm:$0xf]  ;;  %v8351_v60 = vmul.f32 0.05448869, %v4854_v18  ;;  %v3709_v52 = vld [vmem:[#allocation2 + $0x5a8] sm:$0xf] }
 0x399   :  { %v1741_v21 = vmul.f32 0.40261996, %v8334_v13  ;;  %v974_v11 = vld [vmem:[#allocation2 + $0x538] sm:$0xf]  ;;  %v3580_v12 = vmul.f32 0.05448869, %v3452_v37  ;;  %v4729_v27 = vadd.f32 %v4601_v45, %v4344_v50  ;;  %v1357_v10 = vadd.f32 %v1165_v14, %v780_v20 }
 0x39a   :  { %9180 = vst [vmem:[#allocation116_spill] sm:$0xff] %v8351_v60  ;;  %v4218_v47 = vmul.f32 0.40261996, %v4090_v38  ;;  %v4856_v17 = vld [vmem:[#allocation2 + $0x598] sm:$0xf]  ;;  %v9182_v56 = vld [vmem:[#allocation22_spill] sm:$0xff] }
 0x39b   :  { %v1550_v15 = vld [vmem:[#allocation2 + $0x5f8] sm:$0xf]  ;;  %v4475_v57 = vld [vmem:[#allocation2 + $0x5a8] sm:$0xf]  ;;  %v2553_v22 = vadd.f32 %v9182_v56, %v1976_v44  ;;  %v8359_v18 = vmul.f32 0.24420136, %v8342_v49  ;;  %v1933_v23 = vadd.f32 %v1741_v21, %v1357_v10 }
 0x39c   :  { %v4858_v63 = vld [vmem:[#allocation2 + $0x5a8] sm:$0xf]  ;;  %v4346_v53 = vadd.f32 %v4218_v47, %v3961_v40  ;;  %v3837_v38 = vmul.f32 0.24420136, %v3709_v52  ;;  %3321 = vst.msk [vmem:[#allocation2 + $0x5c0] sm:$0xff] %vm23_vm0, %v3129_v32  ;;  %v610_v52 = vld [vmem:[#allocation2 + $0x520] sm:$0xff]  ;;  %v4322_v32 = vadd.f32 %v8225_v31, %v3937_v46 }
 0x39d   :  { %v3454_v37 = vld [vmem:[#allocation2 + $0x5a8] sm:$0xf]  ;;  %v4986_v45 = vmul.f32 0.05448869, %v4858_v63  ;;  %v2127_v50 = vld [vmem:[#allocation2 + $0x6b8] sm:$0xf]  ;;  %v3953_v63 = vadd.f32 %v8301_v7, %v8296_v8  ;;  %v4336_v8 = vadd.f32 %v8303_v26, %v3951_v58 }
 0x39e   :  { %v8362_v4 = vld [vmem:[#allocation2 + $0x568] sm:$0xf]  ;;  %v2895_v56 = vmul.f32 0.05448869, %v8347_v55  ;;  %v781_v20 = vmul.f32 0.05448869, %v589_v36  ;;  %v2510_v36 = vadd.f32 %v8359_v18, %v1933_v23  ;;  %v3965_v7 = vadd.f32 %v3837_v38, %v3580_v12 }
 0x39f   :  { %v4092_v9 = vld [vmem:[#allocation2 + $0x5a8] sm:$0xf]  ;;  %v8366_v44 = vmul.f32 0.05448869, %v4856_v17  ;;  %v4603_v14 = vmul.f32 0.24420136, %v4475_v57  ;;  %v5114_v30 = vadd.f32 %v4986_v45, %v4729_v27 }
 0x3a0   :  { %v9183_v2 = vld [vmem:[#allocation54_spill] sm:$0xff]  ;;  %v1166_v40 = vmul.f32 0.24420136, %v974_v11  ;;  %v2704_v28 = vld [vmem:[#allocation2 + $0x778] sm:$0xf]  ;;  %v8368_v47 = vld [vmem:[#allocation2 + $0x5e0] sm:$0xff] }
 0x3a1   :  { %v3130_v59 = vadd.f32 %v9183_v2, %v2553_v22  ;;  %9184 = vst [vmem:[#allocation80_spill] sm:$0xff] %v8366_v44  ;;  %v3456_v29 = vld [vmem:[#allocation2 + $0x5b8] sm:$0xf]  ;;  %v1742_v21 = vmul.f32 0.40261996, %v1550_v15  ;;  %v8375_v17 = vld [vmem:[#allocation2 + $0x6a0] sm:$0xff]  ;;  %v4731_v57 = vadd.f32 %v4603_v14, %v4346_v53  ;;  %v3087_v44 = vadd.f32 %v2895_v56, %v2510_v36 }
 0x3a2   :  { %v3711_v22 = vld [vmem:[#allocation2 + $0x5b8] sm:$0xf]  ;;  %v3582_v27 = vmul.f32 0.05448869, %v3454_v37  ;;  %v4220_v11 = vmul.f32 0.40261996, %v4092_v9  ;;  %v1358_v45 = vadd.f32 %v1166_v40, %v781_v20 }
 0x3a3   :  { %3322 = vst.msk [vmem:[#allocation2 + $0x5c8] sm:$0xf] %vm25_vm1, %v3130_v59  ;;  %5242 = vst.msk [vmem:[#allocation2 + $0x568] sm:$0xf] %vm25_vm1, %v5114_v30  ;;  %v4094_v10 = vld [vmem:[#allocation2 + $0x5b8] sm:$0xf] }
 0x3a4   :  { %v8378_v31 = vld [vmem:[#allocation2 + $0x760] sm:$0xff]  ;;  %v611_v46 = vld [vmem:[#allocation2 + $0x528] sm:$0xf]  ;;  %v4477_v2 = vld [vmem:[#allocation2 + $0x5b8] sm:$0xf]  ;;  %v4348_v15 = vadd.f32 %v4220_v11, %v3963_v24  ;;  %3279 = vst.msk [vmem:[#allocation2 + $0x470] sm:$0xff] %vm23_vm0, %v3087_v44  ;;  %v1934_v20 = vadd.f32 %v1742_v21, %v1358_v45  ;;  %v8390_v44 = vadd.f32 %v8228_v48, %v4322_v32 }
 0x3a5   :  { %v4860_v59 = vld [vmem:[#allocation2 + $0x5b8] sm:$0xf]  ;;  %v2319_v23 = vmul.f32 0.24420136, %v2127_v50  ;;  %v8381_v51 = vmul.f32 0.05448869, %v3456_v29 }
 0x3a6   :  { %v3839_v37 = vmul.f32 0.24420136, %v3711_v22  ;;  %v4988_v9 = vmul.f32 0.05448869, %v4860_v59  ;;  %v8383_v53 = vld [vmem:[#allocation2 + $0x820] sm:$0xff]  ;;  %v1017_v45 = vld [vmem:[#allocation2 + $0x690] sm:$0xff] }
 0x3a7   :  { %v2896_v14 = vmul.f32 0.05448869, %v2704_v28  ;;  %v802_v30 = vmul.f32 0.05448869, %v610_v52  ;;  %v1187_v40 = vmul.f32 0.24420136, %v8368_v47  ;;  %v2511_v29 = vadd.f32 %v2319_v23, %v1934_v20 }
 0x3a8   :  { %v996_v26 = vld [vmem:[#allocation2 + $0x5e8] sm:$0xf]  ;;  %v4222_v58 = vmul.f32 0.40261996, %v4094_v10  ;;  %v4605_v38 = vmul.f32 0.24420136, %v4477_v2  ;;  %v5116_v56 = vadd.f32 %v4988_v9, %v4731_v57  ;;  %v8393_v28 = vadd.f32 %v8314_v42, %v3953_v63 }
 0x3a9   :  { %v1572_v12 = vld [vmem:[#allocation2 + $0x6a8] sm:$0xf]  ;;  %v1763_v24 = vmul.f32 0.40261996, %v8375_v17  ;;  %v1379_v50 = vadd.f32 %v1187_v40, %v802_v30  ;;  %v2340_v22 = vmul.f32 0.24420136, %v8378_v31  ;;  %v8396_v52 = vadd.f32 %v8318_v54, %v4336_v8 }
 0x3aa   :  { %v803_v36 = vmul.f32 0.05448869, %v611_v46  ;;  %v2149_v11 = vld [vmem:[#allocation2 + $0x768] sm:$0xf]  ;;  %5244 = vst.msk [vmem:[#allocation2 + $0x578] sm:$0xf] %vm25_vm1, %v5116_v56  ;;  %v4733_v2 = vadd.f32 %v4605_v38, %v4348_v15  ;;  %v3088_v46 = vadd.f32 %v2896_v14, %v2511_v29  ;;  %v8400_v30 = vadd.f32 %v3839_v37, %v3582_v27 }
 0x3ab   :  { %v2726_v59 = vld [vmem:[#allocation2 + $0x828] sm:$0xf]  ;;  %v2917_v9 = vmul.f32 0.05448869, %v8383_v53  ;;  %v633_v20 = vld [vmem:[#allocation2 + $0x5d8] sm:$0xf]  ;;  %v1955_v63 = vadd.f32 %v1763_v24, %v1379_v50  ;;  %v8402_v40 = vadd.f32 %v4222_v58, %v3965_v7 }
 0x3ac   :  { %v3713_v21 = vld [vmem:[#allocation2 + $0x5c8] sm:$0xf]  ;;  %v1018_v48 = vld [vmem:[#allocation2 + $0x698] sm:$0xf]  ;;  %v1188_v54 = vmul.f32 0.24420136, %v996_v26 }
 0x3ad   :  { %v4096_v57 = vld [vmem:[#allocation2 + $0x5c8] sm:$0xf]  ;;  %v3841_v23 = vmul.f32 0.24420136, %v3713_v21  ;;  %v1594_v32 = vld [vmem:[#allocation2 + $0x758] sm:$0xf]  ;;  %v2532_v14 = vadd.f32 %v2340_v22, %v1955_v63 }
 0x3ae   :  { %v4479_v10 = vld [vmem:[#allocation2 + $0x5c8] sm:$0xf]  ;;  %v1764_v8 = vmul.f32 0.40261996, %v1572_v12  ;;  %v8404_v56 = vmul.f32 0.40261996, %v4096_v57  ;;  %v1380_v38 = vadd.f32 %v1188_v54, %v803_v36 }
 0x3af   :  { %v4862_v42 = vld [vmem:[#allocation2 + $0x5c8] sm:$0xf]  ;;  %v8406_v43 = vmul.f32 0.24420136, %v4479_v10  ;;  %3280 = vst.msk [vmem:[#allocation2 + $0x478] sm:$0xf] %vm25_vm1, %v3088_v46  ;;  %v3109_v58 = vadd.f32 %v2917_v9, %v2532_v14 }
 0x3b0   :  { %v4990_v15 = vmul.f32 0.05448869, %v4862_v42  ;;  %v2341_v29 = vmul.f32 0.24420136, %v2149_v11  ;;  %v2918_v21 = vmul.f32 0.05448869, %v2726_v59  ;;  %v1956_v50 = vadd.f32 %v1764_v8, %v1380_v38 }
 0x3b1   :  { %v613_v60 = vld [vmem:[#allocation2 + $0x538] sm:$0xf]  ;;  %v824_v37 = vmul.f32 0.05448869, %v8233_v16  ;;  %v1209_v24 = vmul.f32 0.24420136, %v1017_v45  ;;  %v8414_v59 = vadd.f32 %v3841_v23, %v8381_v51 }
 0x3b2   :  { %v5118_v27 = vadd.f32 %v4990_v15, %v4733_v2  ;;  %v6267_v26 = vld [vmem:[#allocation2 + $0x750] sm:$0xff]  ;;  %v998_v7 = vld [vmem:[#allocation2 + $0x5f8] sm:$0xf]  ;;  %v825_v57 = vmul.f32 0.05448869, %v633_v20  ;;  %3301 = vst.msk [vmem:[#allocation2 + $0x520] sm:$0xff] %vm23_vm0, %v3109_v58  ;;  %v2533_v16 = vadd.f32 %v2341_v29, %v1956_v50 }
 0x3b3   :  { %v1785_v12 = vmul.f32 0.40261996, %v6267_v26  ;;  %v1210_v10 = vmul.f32 0.24420136, %v1018_v48  ;;  %v1574_v25 = vld [vmem:[#allocation2 + $0x6b8] sm:$0xf]  ;;  %v1401_v46 = vadd.f32 %v1209_v24, %v824_v37 }
 0x3b4   :  { %5246 = vst.msk [vmem:[#allocation2 + $0x588] sm:$0xf] %vm25_vm1, %v5118_v27  ;;  %v1786_v22 = vmul.f32 0.40261996, %v1594_v32  ;;  %v804_v36 = vmul.f32 0.05448869, %v8332_v0  ;;  %v3110_v8 = vadd.f32 %v2918_v21, %v2533_v16 }
 0x3b5   :  { %v1189_v11 = vmul.f32 0.24420136, %v8334_v13  ;;  %v1402_v45 = vadd.f32 %v1210_v10, %v825_v57  ;;  %v1765_v2 = vmul.f32 0.40261996, %v8342_v49  ;;  %v2727_v9 = vld [vmem:[#allocation2 + $0x830] sm:$0xff]  ;;  %v1977_v48 = vadd.f32 %v1785_v12, %v1401_v46  ;;  %v2749_v49 = vld [vmem:[#allocation2 + $0x8e0] sm:$0xff] }
 0x3b6   :  { %v2151_v20 = vld [vmem:[#allocation2 + $0x778] sm:$0xf]  ;;  %v2342_v63 = vmul.f32 0.24420136, %v8347_v55  ;;  %v805_v32 = vmul.f32 0.05448869, %v613_v60 }
 0x3b7   :  { %v1381_v42 = vadd.f32 %v1189_v11, %v804_v36  ;;  %v2728_v54 = vld [vmem:[#allocation2 + $0x838] sm:$0xf]  ;;  %v1978_v15 = vadd.f32 %v1786_v22, %v1402_v45  ;;  %v1190_v14 = vmul.f32 0.24420136, %v998_v7  ;;  %v1766_v51 = vmul.f32 0.40261996, %v1574_v25 }
 0x3b8   :  { %v4836_v0 = vld [vmem:[#allocation2 + $0x478] sm:$0xf]  ;;  %v635_v23 = vld [vmem:[#allocation2 + $0x5e8] sm:$0xf]  ;;  %v9185_v27 = vld [vmem:[#allocation23_spill] sm:$0xff] }
 0x3b9   :  { %v4964_v38 = vmul.f32 0.05448869, %v4836_v0  ;;  %v2554_v29 = vadd.f32 %v9185_v27, %v1977_v48  ;;  %v1957_v37 = vadd.f32 %v1765_v2, %v1381_v42  ;;  %v2919_v24 = vmul.f32 0.05448869, %v2727_v9  ;;  %v1020_v26 = vld [vmem:[#allocation2 + $0x6a8] sm:$0xf] }
 0x3ba   :  { %3302 = vst.msk [vmem:[#allocation2 + $0x528] sm:$0xf] %vm25_vm1, %v3110_v8  ;;  %v9186_v12 = vld [vmem:[#allocation24_spill] sm:$0xff]  ;;  %v1382_v50 = vadd.f32 %v1190_v14, %v805_v32  ;;  %v2343_v60 = vmul.f32 0.24420136, %v2151_v20  ;;  %v9187_v25 = vld [vmem:[#allocation55_spill] sm:$0xff] }
 0x3bb   :  { %v2555_v58 = vadd.f32 %v9186_v12, %v1978_v15  ;;  %v826_v57 = vmul.f32 0.05448869, %v8368_v47  ;;  %v1596_v21 = vld [vmem:[#allocation2 + $0x768] sm:$0xf]  ;;  %v5092_v7 = vadd.f32 %v4964_v38, %v8390_v44  ;;  %v3131_v10 = vadd.f32 %v9187_v25, %v2554_v29  ;;  %v9188_v16 = vld [vmem:[#allocation56_spill] sm:$0xff]  ;;  %v2751_v0 = vld [vmem:[#allocation2 + $0x8f0] sm:$0xff] }
 0x3bc   :  { %v2534_v46 = vadd.f32 %v2342_v63, %v1957_v37  ;;  %v1211_v22 = vmul.f32 0.24420136, %v8375_v17  ;;  %v2173_v36 = vld [vmem:[#allocation2 + $0x828] sm:$0xf]  ;;  %v1958_v2 = vadd.f32 %v1766_v51, %v1382_v50  ;;  %v2920_v48 = vmul.f32 0.05448869, %v2728_v54 }
 0x3bd   :  { %v2750_v11 = vld [vmem:[#allocation2 + $0x8e8] sm:$0xf]  ;;  %v3132_v45 = vadd.f32 %v9188_v16, %v2555_v58  ;;  %v1787_v42 = vmul.f32 0.40261996, %v8378_v31  ;;  %v637_v32 = vld [vmem:[#allocation2 + $0x5f8] sm:$0xf]  ;;  %v4735_v58 = vadd.f32 %v8406_v43, %v8402_v40 }
 0x3be   :  { %5220 = vst.msk [vmem:[#allocation2 + $0x438] sm:$0xf] %vm25_vm1, %v5092_v7  ;;  %v3111_v47 = vadd.f32 %v2919_v24, %v2534_v46  ;;  %v1403_v44 = vadd.f32 %v1211_v22, %v826_v57  ;;  %v2364_v20 = vmul.f32 0.24420136, %v8383_v53  ;;  %v827_v63 = vmul.f32 0.05448869, %v635_v23 }
 0x3bf   :  { %3323 = vst.msk [vmem:[#allocation2 + $0x5d0] sm:$0xff] %vm23_vm0, %v3131_v10  ;;  %v1022_v17 = vld [vmem:[#allocation2 + $0x6b8] sm:$0xf]  ;;  %v2535_v8 = vadd.f32 %v2343_v60, %v1958_v2  ;;  %v2941_v15 = vmul.f32 0.05448869, %v2749_v49  ;;  %v8442_v2 = vld [vmem:[#allocation2 + $0x30] sm:$0xff] }
 0x3c0   :  { %3324 = vst.msk [vmem:[#allocation2 + $0x5d8] sm:$0xf] %vm25_vm1, %v3132_v45  ;;  %v1212_v14 = vmul.f32 0.24420136, %v1020_v26  ;;  %v1788_v54 = vmul.f32 0.40261996, %v1596_v21  ;;  %v1979_v31 = vadd.f32 %v1787_v42, %v1403_v44 }
 0x3c1   :  { %v1598_v51 = vld [vmem:[#allocation2 + $0x778] sm:$0xf]  ;;  %3303 = vst.msk [vmem:[#allocation2 + $0x530] sm:$0xff] %vm23_vm0, %v3111_v47  ;;  %v2365_v38 = vmul.f32 0.24420136, %v2173_v36  ;;  %v3112_v37 = vadd.f32 %v2920_v48, %v2535_v8  ;;  %v3329_v36 = vld [vmem:[#allocation2] sm:$0xff]  ;;  %v4352_v48 = vadd.f32 %v8404_v56, %v8400_v30 }
 0x3c2   :  { %v828_v27 = vmul.f32 0.05448869, %v8334_v13  ;;  %v1789_v29 = vmul.f32 0.40261996, %v8347_v55  ;;  %v1404_v53 = vadd.f32 %v1212_v14, %v827_v63  ;;  %v2942_v23 = vmul.f32 0.05448869, %v2750_v11 }
 0x3c3   :  { %v2366_v24 = vmul.f32 0.24420136, %v2727_v9  ;;  %v2175_v12 = vld [vmem:[#allocation2 + $0x838] sm:$0xf]  ;;  %v4467_v49 = vld [vmem:[#allocation2 + $0x528] sm:$0xf]  ;;  %v2556_v50 = vadd.f32 %v2364_v20, %v1979_v31 }
 0x3c4   :  { %v4850_v26 = vld [vmem:[#allocation2 + $0x528] sm:$0xf]  ;;  %v1405_v60 = vadd.f32 %v8359_v18, %v828_v27  ;;  %v829_v57 = vmul.f32 0.05448869, %v637_v32  ;;  %3304 = vst.msk [vmem:[#allocation2 + $0x538] sm:$0xf] %vm25_vm1, %v3112_v37  ;;  %v1980_v13 = vadd.f32 %v1788_v54, %v1404_v53 }
 0x3c5   :  { %v4978_v21 = vmul.f32 0.05448869, %v4850_v26  ;;  %v2943_v7 = vmul.f32 0.05448869, %v2751_v0  ;;  %v1214_v55 = vmul.f32 0.24420136, %v1022_v17  ;;  %v3133_v46 = vadd.f32 %v2941_v15, %v2556_v50 }
 0x3c6   :  { %v2752_v25 = vld [vmem:[#allocation2 + $0x8f8] sm:$0xf]  ;;  %v4595_v10 = vmul.f32 0.24420136, %v4467_v49  ;;  %v1981_v9 = vadd.f32 %v1789_v29, %v1405_v60  ;;  %v1790_v22 = vmul.f32 0.40261996, %v1598_v51  ;;  %v2557_v40 = vadd.f32 %v2365_v38, %v1980_v13 }
 0x3c7   :  { %v5106_v43 = vadd.f32 %v4978_v21, %v8396_v52  ;;  %v1406_v11 = vadd.f32 %v1214_v55, %v829_v57  ;;  %v2367_v16 = vmul.f32 0.24420136, %v2175_v12  ;;  %v3586_v45 = vld [vmem:[#allocation2 + $0x10] sm:$0xff]  ;;  %v8440_v18 = vld [vmem:[#allocation2 + $0x20] sm:$0xff]  ;;  %v4098_v42 = vld [vmem:[#allocation2 + $0x5d8] sm:$0xf] }
 0x3c8   :  { %v4481_v32 = vld [vmem:[#allocation2 + $0x5d8] sm:$0xf]  ;;  %3325 = vst.msk [vmem:[#allocation2 + $0x5e0] sm:$0xff] %vm23_vm0, %v3133_v46  ;;  %v2558_v44 = vadd.f32 %v2366_v24, %v1981_v9  ;;  %v8447_v20 = vld [vmem:[#allocation2 + $0x40] sm:$0xff]  ;;  %v3330_v52 = vld [vmem:[#allocation2 + $0x8] sm:$0xf]  ;;  %v3134_v8 = vadd.f32 %v2942_v23, %v2557_v40  ;;  %v4723_v31 = vadd.f32 %v4595_v10, %v8393_v28 }
 0x3c9   :  { %v4864_v47 = vld [vmem:[#allocation2 + $0x5d8] sm:$0xf]  ;;  %5234 = vst.msk [vmem:[#allocation2 + $0x4e8] sm:$0xf] %vm25_vm1, %v5106_v43  ;;  %v4226_v63 = vmul.f32 0.40261996, %v4098_v42  ;;  %v1982_v54 = vadd.f32 %v1790_v22, %v1406_v11 }
 0x3ca   :  { %v4609_v0 = vmul.f32 0.24420136, %v4481_v32  ;;  %v4992_v17 = vmul.f32 0.05448869, %v4864_v47  ;;  %v3587_v15 = vld [vmem:[#allocation2 + $0x18] sm:$0xf]  ;;  %v3135_v14 = vadd.f32 %v2943_v7, %v2558_v44 }
 0x3cb   :  { %v2944_v51 = vmul.f32 0.05448869, %v2752_v25  ;;  %v3457_v30 = vmul.f32 0.05448869, %v3329_v36  ;;  %v3972_v56 = vld [vmem:[#allocation2 + $0x28] sm:$0xf]  ;;  %v4354_v38 = vadd.f32 %v4226_v63, %v8414_v59  ;;  %v2559_v23 = vadd.f32 %v2367_v16, %v1982_v54 }
 0x3cc   :  { %v5120_v27 = vadd.f32 %v4992_v17, %v4735_v58  ;;  %3326 = vst.msk [vmem:[#allocation2 + $0x5e8] sm:$0xf] %vm25_vm1, %v3134_v8  ;;  %v3714_v29 = vmul.f32 0.24420136, %v3586_v45  ;;  %v4357_v37 = vld [vmem:[#allocation2 + $0x38] sm:$0xf]  ;;  %v4737_v24 = vadd.f32 %v4609_v0, %v4352_v48 }
 0x3cd   :  { %v4742_v53 = vld [vmem:[#allocation2 + $0x48] sm:$0xf]  ;;  %v4852_v12 = vld [vmem:[#allocation2 + $0x538] sm:$0xf]  ;;  %3327 = vst.msk [vmem:[#allocation2 + $0x5f0] sm:$0xff] %vm23_vm0, %v3135_v14  ;;  %v8458_v50 = vld [vmem:[#allocation2 + $0x50] sm:$0xff]  ;;  %v3136_v7 = vadd.f32 %v2944_v51, %v2559_v23 }
 0x3ce   :  { %v4099_v49 = vmul.f32 0.40261996, %v8440_v18  ;;  %v8456_v26 = vmul.f32 0.24420136, %v8442_v2  ;;  %v3332_v28 = vld [vmem:[#allocation2 + $0x18] sm:$0xf]  ;;  %v3842_v60 = vadd.f32 %v3714_v29, %v3457_v30 }
 0x3cf   :  { %v3589_v59 = vld [vmem:[#allocation2 + $0x28] sm:$0xf]  ;;  %5248 = vst.msk [vmem:[#allocation2 + $0x598] sm:$0xf] %vm25_vm1, %v5120_v27  ;;  %v4980_v58 = vmul.f32 0.05448869, %v4852_v12 }
 0x3d0   :  { %v8462_v57 = vmul.f32 0.05448869, %v8447_v20  ;;  %v3458_v21 = vmul.f32 0.05448869, %v3330_v52  ;;  %v3974_v13 = vld [vmem:[#allocation2 + $0x38] sm:$0xf]  ;;  %v4227_v9 = vadd.f32 %v4099_v49, %v3842_v60 }
 0x3d1   :  { %v3715_v55 = vmul.f32 0.24420136, %v3587_v15  ;;  %v4100_v25 = vmul.f32 0.40261996, %v3972_v56  ;;  %v4485_v10 = vmul.f32 0.24420136, %v4357_v37  ;;  %v5108_v46 = vadd.f32 %v4980_v58, %v4723_v31 }
 0x3d2   :  { %v4870_v22 = vmul.f32 0.05448869, %v4742_v53  ;;  %v3459_v36 = vmul.f32 0.05448869, %v3586_v45  ;;  %v4359_v43 = vld [vmem:[#allocation2 + $0x48] sm:$0xf]  ;;  %v4612_v32 = vadd.f32 %v8456_v26, %v4227_v9 }
 0x3d3   :  { %v4744_v40 = vld [vmem:[#allocation2 + $0x58] sm:$0xf]  ;;  %3328 = vst.msk [vmem:[#allocation2 + $0x5f8] sm:$0xf] %vm25_vm1, %v3136_v7  ;;  %v3843_v11 = vadd.f32 %v3715_v55, %v3458_v21  ;;  %v3716_v16 = vmul.f32 0.24420136, %v8440_v18 }
 0x3d4   :  { %v4101_v48 = vmul.f32 0.40261996, %v8442_v2  ;;  %v8468_v42 = vmul.f32 0.24420136, %v8447_v20  ;;  %5236 = vst.msk [vmem:[#allocation2 + $0x4f8] sm:$0xf] %vm25_vm1, %v5108_v46  ;;  %v4997_v30 = vadd.f32 %v8462_v57, %v4612_v32 }
 0x3d5   :  { %v8473_v47 = vmul.f32 0.05448869, %v8458_v50  ;;  %v3460_v45 = vmul.f32 0.05448869, %v3332_v28  ;;  %v3717_v44 = vmul.f32 0.24420136, %v3589_v59  ;;  %v4228_v0 = vadd.f32 %v4100_v25, %v3843_v11 }
 0x3d6   :  { %v4483_v52 = vld [vmem:[#allocation2 + $0x5e8] sm:$0xf]  ;;  %v3844_v17 = vadd.f32 %v3716_v16, %v3459_v36  ;;  %v4102_v8 = vmul.f32 0.40261996, %v3974_v13  ;;  %v8475_v15 = vld [vmem:[#allocation2 + $0x60] sm:$0xff]  ;;  %5125 = vst.msk [vmem:[#allocation2] sm:$0xff] %vm23_vm0, %v4997_v30 }
 0x3d7   :  { %v4866_v63 = vld [vmem:[#allocation2 + $0x5e8] sm:$0xf]  ;;  %v4611_v54 = vmul.f32 0.24420136, %v4483_v52  ;;  %v3845_v56 = vadd.f32 %v3717_v44, %v3460_v45  ;;  %v3591_v31 = vld [vmem:[#allocation2 + $0x38] sm:$0xf]  ;;  %v4613_v27 = vadd.f32 %v4485_v10, %v4228_v0 }
 0x3d8   :  { %v3334_v14 = vld [vmem:[#allocation2 + $0x28] sm:$0xf]  ;;  %v4994_v51 = vmul.f32 0.05448869, %v4866_v63  ;;  %v4229_v29 = vadd.f32 %v4101_v48, %v3844_v17  ;;  %v4487_v37 = vmul.f32 0.24420136, %v4359_v43 }
 0x3d9   :  { %v4872_v53 = vmul.f32 0.05448869, %v4744_v40  ;;  %v3976_v12 = vld [vmem:[#allocation2 + $0x48] sm:$0xf]  ;;  %v4739_v23 = vadd.f32 %v4611_v54, %v4354_v38  ;;  %v4230_v28 = vadd.f32 %v4102_v8, %v3845_v56  ;;  %v3461_v59 = vmul.f32 0.05448869, %v8440_v18 }
 0x3da   :  { %v5122_v49 = vadd.f32 %v4994_v51, %v4737_v24  ;;  %v4361_v58 = vld [vmem:[#allocation2 + $0x58] sm:$0xf]  ;;  %v4746_v60 = vld [vmem:[#allocation2 + $0x68] sm:$0xf]  ;;  %v4998_v21 = vadd.f32 %v4870_v22, %v4613_v27  ;;  %v4614_v13 = vadd.f32 %v8468_v42, %v4229_v29  ;;  %v4103_v7 = vmul.f32 0.40261996, %v8447_v20 }
 0x3db   :  { %v4488_v55 = vmul.f32 0.24420136, %v8458_v50  ;;  %v4747_v25 = vld [vmem:[#allocation2 + $0x70] sm:$0xff]  ;;  %v3336_v10 = vld [vmem:[#allocation2 + $0x38] sm:$0xf]  ;;  %v4615_v24 = vadd.f32 %v4487_v37, %v4230_v28  ;;  %v3846_v46 = vadd.f32 %v8456_v26, %v3461_v59  ;;  %v4749_v8 = vld [vmem:[#allocation2 + $0x80] sm:$0xff] }
 0x3dc   :  { %5250 = vst.msk [vmem:[#allocation2 + $0x5a8] sm:$0xf] %vm25_vm1, %v5122_v49  ;;  %v4868_v38 = vld [vmem:[#allocation2 + $0x5f8] sm:$0xf]  ;;  %v8486_v9 = vmul.f32 0.05448869, %v8475_v15  ;;  %v4999_v20 = vadd.f32 %v8473_v47, %v4614_v13 }
 0x3dd   :  { %v3462_v18 = vmul.f32 0.05448869, %v3334_v14  ;;  %v3593_v36 = vld [vmem:[#allocation2 + $0x48] sm:$0xf]  ;;  %v3978_v22 = vld [vmem:[#allocation2 + $0x58] sm:$0xf]  ;;  %v5000_v48 = vadd.f32 %v4872_v53, %v4615_v24  ;;  %v4231_v32 = vadd.f32 %v4103_v7, %v3846_v46 }
 0x3de   :  { %v4748_v43 = vld [vmem:[#allocation2 + $0x78] sm:$0xf]  ;;  %v4996_v40 = vmul.f32 0.05448869, %v4868_v38  ;;  %5126 = vst.msk [vmem:[#allocation2 + $0x8] sm:$0xf] %vm25_vm1, %v4998_v21 }
 0x3df   :  { %v3719_v11 = vmul.f32 0.24420136, %v3591_v31  ;;  %v4104_v16 = vmul.f32 0.40261996, %v3976_v12  ;;  %v4489_v45 = vmul.f32 0.24420136, %v4361_v58  ;;  %v4616_v14 = vadd.f32 %v4488_v55, %v4231_v32 }
 0x3e0   :  { %v4874_v44 = vmul.f32 0.05448869, %v4746_v60  ;;  %v4363_v52 = vld [vmem:[#allocation2 + $0x68] sm:$0xf]  ;;  %v5124_v26 = vadd.f32 %v4996_v40, %v4739_v23  ;;  %5127 = vst.msk [vmem:[#allocation2 + $0x10] sm:$0xff] %vm23_vm0, %v4999_v20  ;;  %v3850_v12 = vadd.f32 %v8462_v57, %v4488_v55 }
 0x3e1   :  { %v3847_v63 = vadd.f32 %v3719_v11, %v3462_v18  ;;  %v3463_v0 = vmul.f32 0.05448869, %v8442_v2  ;;  %v4105_v17 = vmul.f32 0.40261996, %v8458_v50  ;;  %5128 = vst.msk [vmem:[#allocation2 + $0x18] sm:$0xf] %vm25_vm1, %v5000_v48  ;;  %v5001_v2 = vadd.f32 %v8486_v9, %v4616_v14 }
 0x3e2   :  { %v4490_v54 = vmul.f32 0.24420136, %v8475_v15  ;;  %v8495_v51 = vmul.f32 0.05448869, %v4747_v25  ;;  %v3464_v30 = vmul.f32 0.05448869, %v3336_v10 }
 0x3e3   :  { %5252 = vst.msk [vmem:[#allocation2 + $0x5b8] sm:$0xf] %vm25_vm1, %v5124_v26  ;;  %v4232_v56 = vadd.f32 %v4104_v16, %v3847_v63  ;;  %v3848_v31 = vadd.f32 %v8468_v42, %v3463_v0  ;;  %v3721_v27 = vmul.f32 0.24420136, %v3593_v36  ;;  %v4106_v29 = vmul.f32 0.40261996, %v3978_v22 }
 0x3e4   :  { %v3338_v37 = vld [vmem:[#allocation2 + $0x48] sm:$0xf]  ;;  %v4491_v50 = vmul.f32 0.24420136, %v4363_v52  ;;  %v4876_v53 = vmul.f32 0.05448869, %v4748_v43  ;;  %v3852_v7 = vadd.f32 %v8473_v47, %v4490_v54 }
 0x3e5   :  { %v3980_v23 = vld [vmem:[#allocation2 + $0x68] sm:$0xf]  ;;  %v4617_v49 = vadd.f32 %v4489_v45, %v4232_v56  ;;  %v4233_v28 = vadd.f32 %v4105_v17, %v3848_v31  ;;  %v3849_v59 = vadd.f32 %v3721_v27, %v3464_v30  ;;  %v4107_v58 = vmul.f32 0.40261996, %v8475_v15  ;;  %v3595_v60 = vld [vmem:[#allocation2 + $0x58] sm:$0xf] }
 0x3e6   :  { %5129 = vst.msk [vmem:[#allocation2 + $0x20] sm:$0xff] %vm23_vm0, %v5001_v2  ;;  %v4492_v21 = vmul.f32 0.24420136, %v4747_v25  ;;  %v4877_v42 = vmul.f32 0.05448869, %v4749_v8  ;;  %v4751_v18 = vld [vmem:[#allocation2 + $0x90] sm:$0xff] }
 0x3e7   :  { %v3466_v13 = vmul.f32 0.05448869, %v3338_v37  ;;  %v5002_v10 = vadd.f32 %v4874_v44, %v4617_v49  ;;  %v4618_v38 = vadd.f32 %v4490_v54, %v4233_v28  ;;  %v4234_v24 = vadd.f32 %v4106_v29, %v3849_v59  ;;  %v3340_v57 = vld [vmem:[#allocation2 + $0x58] sm:$0xf]  ;;  %v3597_v55 = vld [vmem:[#allocation2 + $0x68] sm:$0xf] }
 0x3e8   :  { %v4235_v46 = vadd.f32 %v4107_v58, %v3850_v12  ;;  %v9189_v36 = vld [vmem:[#allocation159_spill] sm:$0xff]  ;;  %v3723_v15 = vmul.f32 0.24420136, %v3595_v60  ;;  %v4108_v43 = vmul.f32 0.40261996, %v3980_v23  ;;  %v3854_v32 = vadd.f32 %v8486_v9, %v4492_v21  ;;  %v4753_v54 = vld [vmem:[#allocation2 + $0xa0] sm:$0xff] }
 0x3e9   :  { %v8506_v22 = vadd.f32 %v8051_v41, %v9189_v36  ;;  %v4109_v40 = vmul.f32 0.40261996, %v4747_v25  ;;  %v3982_v20 = vld [vmem:[#allocation2 + $0x78] sm:$0xf]  ;;  %v3984_v11 = vld [vmem:[#allocation2 + $0x88] sm:$0xf]  ;;  %v5003_v47 = vadd.f32 %v8495_v51, %v4618_v38  ;;  %v4619_v16 = vadd.f32 %v4491_v50, %v4234_v24 }
 0x3ea   :  { %5130 = vst.msk [vmem:[#allocation2 + $0x28] sm:$0xf] %vm25_vm1, %v5002_v10  ;;  %v4620_v48 = vadd.f32 %v4492_v21, %v4235_v46  ;;  %v3342_v45 = vld [vmem:[#allocation2 + $0x68] sm:$0xf]  ;;  %v3851_v44 = vadd.f32 %v3723_v15, %v3466_v13  ;;  %v4494_v26 = vmul.f32 0.24420136, %v4749_v8 }
 0x3eb   :  { %v4237_v52 = vadd.f32 %v4109_v40, %v3852_v7  ;;  %v3468_v63 = vmul.f32 0.05448869, %v3340_v57  ;;  %v3599_v41 = vld [vmem:[#allocation2 + $0x78] sm:$0xf]  ;;  %5131 = vst.msk [vmem:[#allocation2 + $0x30] sm:$0xff] %vm23_vm0, %v5003_v47  ;;  %v5004_v0 = vadd.f32 %v4876_v53, %v4619_v16  ;;  %v4755_v53 = vld [vmem:[#allocation2 + $0xb0] sm:$0xff] }
 0x3ec   :  { %v5005_v25 = vadd.f32 %v4877_v42, %v4620_v48  ;;  %v4879_v17 = vmul.f32 0.05448869, %v4751_v18  ;;  %v3725_v14 = vmul.f32 0.24420136, %v3597_v55  ;;  %v4236_v30 = vadd.f32 %v4108_v43, %v3851_v44  ;;  %v3344_v29 = vld [vmem:[#allocation2 + $0x78] sm:$0xf] }
 0x3ed   :  { %v4622_v56 = vadd.f32 %v4494_v26, %v4237_v52  ;;  %v4110_v31 = vmul.f32 0.40261996, %v3982_v20  ;;  %v4111_v27 = vmul.f32 0.40261996, %v4749_v8  ;;  %v8512_v37 = vld [vmem:[#allocation2 + $0x278] sm:$0xf]  ;;  %v3856_v10 = vadd.f32 %v8495_v51, %v4494_v26 }
 0x3ee   :  { %5132 = vst.msk [vmem:[#allocation2 + $0x38] sm:$0xf] %vm25_vm1, %v5004_v0  ;;  %v3853_v9 = vadd.f32 %v3725_v14, %v3468_v63  ;;  %v4496_v2 = vmul.f32 0.24420136, %v4751_v18  ;;  %v3470_v50 = vmul.f32 0.05448869, %v3342_v45 }
 0x3ef   :  { %5133 = vst.msk [vmem:[#allocation2 + $0x40] sm:$0xff] %vm23_vm0, %v5005_v25  ;;  %v3727_v12 = vmul.f32 0.24420136, %v3599_v41  ;;  %v9190_v23 = vld [vmem:[#allocation145_spill] sm:$0xff]  ;;  %v5007_v28 = vadd.f32 %v4879_v17, %v4622_v56  ;;  %v4239_v59 = vadd.f32 %v4111_v27, %v3854_v32  ;;  %v4112_v58 = vmul.f32 0.40261996, %v3984_v11 }
 0x3f0   :  { %v4621_v49 = vadd.f32 %v9190_v23, %v4236_v30  ;;  %v3601_v60 = vld [vmem:[#allocation2 + $0x88] sm:$0xf]  ;;  %v3345_v21 = vld [vmem:[#allocation2 + $0xc0] sm:$0xff]  ;;  %v8517_v8 = vld [vmem:[#allocation2 + $0xd0] sm:$0xff]  ;;  %v4238_v13 = vadd.f32 %v4110_v31, %v3853_v9  ;;  %v4113_v38 = vmul.f32 0.40261996, %v4751_v18 }
 0x3f1   :  { %v3986_v42 = vld [vmem:[#allocation2 + $0x98] sm:$0xf]  ;;  %v3855_v7 = vadd.f32 %v3727_v12, %v3470_v50  ;;  %v8520_v24 = vld [vmem:[#allocation2 + $0xe0] sm:$0xff]  ;;  %v8522_v46 = vld [vmem:[#allocation2 + $0xf0] sm:$0xff]  ;;  %5135 = vst.msk [vmem:[#allocation2 + $0x50] sm:$0xff] %vm23_vm0, %v5007_v28  ;;  %v4624_v15 = vadd.f32 %v4496_v2, %v4239_v59 }
 0x3f2   :  { %v8524_v57 = vld [vmem:[#allocation2 + $0x278] sm:$0xf]  ;;  %v9191_v55 = vld [vmem:[#allocation147_spill] sm:$0xff]  ;;  %v4881_v43 = vmul.f32 0.05448869, %v4753_v54  ;;  %v9192_v11 = vld [vmem:[#allocation146_spill] sm:$0xff]  ;;  %v4241_v47 = vadd.f32 %v4113_v38, %v3856_v10 }
 0x3f3   :  { %v5006_v36 = vadd.f32 %v9191_v55, %v4621_v49  ;;  %v4498_v40 = vmul.f32 0.24420136, %v4753_v54  ;;  %v3346_v20 = vld [vmem:[#allocation2 + $0xc8] sm:$0xf]  ;;  %5180 = vst.msk [vmem:[#allocation2 + $0x278] sm:$0xf] %vm25_vm1, %v7845_v62  ;;  %v4623_v51 = vadd.f32 %v9192_v11, %v4238_v13  ;;  %v4240_v18 = vadd.f32 %v4112_v58, %v3855_v7 }
 0x3f4   :  { %v3472_v16 = vmul.f32 0.05448869, %v3344_v29  ;;  %v8531_v48 = vld [vmem:[#allocation2 + $0x100] sm:$0xff]  ;;  %v3603_v32 = vld [vmem:[#allocation2 + $0xd8] sm:$0xf]  ;;  %v5009_v44 = vadd.f32 %v4881_v43, %v4624_v15  ;;  %v8537_v31 = vld [vmem:[#allocation2 + $0x190] sm:$0xff] }
 0x3f5   :  { %v3988_v45 = vld [vmem:[#allocation2 + $0xe8] sm:$0xf]  ;;  %5134 = vst.msk [vmem:[#allocation2 + $0x48] sm:$0xf] %vm25_vm1, %v5006_v36  ;;  %v4883_v52 = vmul.f32 0.05448869, %v4755_v53  ;;  %v4626_v14 = vadd.f32 %v4498_v40, %v4241_v47 }
 0x3f6   :  { %v3729_v26 = vmul.f32 0.24420136, %v3601_v60  ;;  %v3473_v63 = vmul.f32 0.05448869, %v3345_v21  ;;  %v4373_v41 = vld [vmem:[#allocation2 + $0xf8] sm:$0xf] }
 0x3f7   :  { %v9193_v0 = vld [vmem:[#allocation149_spill] sm:$0xff]  ;;  %v9194_v17 = vld [vmem:[#allocation148_spill] sm:$0xff]  ;;  %v3730_v54 = vmul.f32 0.24420136, %v8517_v8  ;;  %v4758_v30 = vld [vmem:[#allocation2 + $0x108] sm:$0xf]  ;;  %v5011_v28 = vadd.f32 %v4883_v52, %v4626_v14 }
 0x3f8   :  { %v5008_v25 = vadd.f32 %v9193_v0, %v4623_v51  ;;  %v4625_v62 = vadd.f32 %v9194_v17, %v4240_v18  ;;  %v3361_v56 = vld [vmem:[#allocation2 + $0x180] sm:$0xff]  ;;  %5137 = vst.msk [vmem:[#allocation2 + $0x60] sm:$0xff] %vm23_vm0, %v5009_v44  ;;  %v3857_v29 = vadd.f32 %v3729_v26, %v3472_v16  ;;  %v4114_v9 = vmul.f32 0.40261996, %v3986_v42  ;;  %v8546_v12 = vld [vmem:[#allocation2 + $0x1b0] sm:$0xff]  ;;  %v9196_v51 = vld [vmem:[#allocation150_spill] sm:$0xff] }
 0x3f9   :  { %v8539_v27 = vld [vmem:[#allocation2 + $0x1a0] sm:$0xff]  ;;  %v4115_v2 = vmul.f32 0.40261996, %v8520_v24  ;;  %v8544_v50 = vmul.f32 0.24420136, %v8522_v46  ;;  %v9195_v23 = vld [vmem:[#allocation151_spill] sm:$0xff]  ;;  %v3858_v59 = vadd.f32 %v3730_v54, %v3473_v63 }
 0x3fa   :  { %v3362_v53 = vld [vmem:[#allocation2 + $0x188] sm:$0xf]  ;;  %5136 = vst.msk [vmem:[#allocation2 + $0x58] sm:$0xf] %vm25_vm1, %v5008_v25  ;;  %v5010_v49 = vadd.f32 %v9195_v23, %v4625_v62  ;;  %v3474_v58 = vmul.f32 0.05448869, %v3346_v20  ;;  %v4242_v13 = vadd.f32 %v4114_v9, %v3857_v29 }
 0x3fb   :  { %v3619_v60 = vld [vmem:[#allocation2 + $0x198] sm:$0xf]  ;;  %v4004_v21 = vld [vmem:[#allocation2 + $0x1a8] sm:$0xf]  ;;  %v8551_v42 = vmul.f32 0.05448869, %v8531_v48  ;;  %v4243_v36 = vadd.f32 %v4115_v2, %v3858_v59 }
 0x3fc   :  { %v3731_v7 = vmul.f32 0.24420136, %v3603_v32  ;;  %v4116_v10 = vmul.f32 0.40261996, %v3988_v45  ;;  %v8553_v38 = vld [vmem:[#allocation2 + $0x1c0] sm:$0xff]  ;;  %5139 = vst.msk [vmem:[#allocation2 + $0x70] sm:$0xff] %vm23_vm0, %v5011_v28  ;;  %v4627_v18 = vadd.f32 %v9196_v51, %v4242_v13 }
 0x3fd   :  { %v4389_v55 = vld [vmem:[#allocation2 + $0x1b8] sm:$0xf]  ;;  %5138 = vst.msk [vmem:[#allocation2 + $0x68] sm:$0xf] %vm25_vm1, %v5010_v49  ;;  %v4501_v15 = vmul.f32 0.24420136, %v4373_v41  ;;  %v4628_v26 = vadd.f32 %v8544_v50, %v4243_v36 }
 0x3fe   :  { %v3489_v43 = vmul.f32 0.05448869, %v3361_v56  ;;  %v3746_v40 = vmul.f32 0.24420136, %v8537_v31  ;;  %v3377_v20 = vld [vmem:[#allocation2 + $0x240] sm:$0xff]  ;;  %v8558_v11 = vld [vmem:[#allocation2 + $0x250] sm:$0xff]  ;;  %v3859_v47 = vadd.f32 %v3731_v7, %v3474_v58 }
 0x3ff   :  { %v4886_v16 = vmul.f32 0.05448869, %v4758_v30  ;;  %v4131_v32 = vmul.f32 0.40261996, %v8539_v27  ;;  %v4774_v45 = vld [vmem:[#allocation2 + $0x1c8] sm:$0xf]  ;;  %v5013_v9 = vadd.f32 %v8551_v42, %v4628_v26 }
 0x400   :  { %v8562_v44 = vld [vmem:[#allocation2 + $0x260] sm:$0xff]  ;;  %v8564_v52 = vld [vmem:[#allocation2 + $0x270] sm:$0xff]  ;;  %v3874_v63 = vadd.f32 %v3746_v40, %v3489_v43  ;;  %v8568_v41 = vmul.f32 0.24420136, %v8546_v12  ;;  %v3490_v0 = vmul.f32 0.05448869, %v3362_v53  ;;  %v4244_v14 = vadd.f32 %v4116_v10, %v3859_v47 }
 0x401   :  { %v3378_v25 = vld [vmem:[#allocation2 + $0x248] sm:$0xf]  ;;  %v9197_v17 = vld [vmem:[#allocation155_spill] sm:$0xff]  ;;  %v3747_v54 = vmul.f32 0.24420136, %v3619_v60  ;;  %v8571_v56 = vld [vmem:[#allocation2 + $0x280] sm:$0xff] }
 0x402   :  { %v5012_v62 = vadd.f32 %v9197_v17, %v4627_v18  ;;  %v4132_v30 = vmul.f32 0.40261996, %v4004_v21  ;;  %v3635_v29 = vld [vmem:[#allocation2 + $0x258] sm:$0xf]  ;;  %v4259_v2 = vadd.f32 %v4131_v32, %v3874_v63  ;;  %v8575_v23 = vmul.f32 0.05448869, %v8553_v38 }
 0x403   :  { %v4517_v49 = vmul.f32 0.24420136, %v4389_v55  ;;  %v4020_v28 = vld [vmem:[#allocation2 + $0x268] sm:$0xf]  ;;  %v3393_v59 = vld [vmem:[#allocation2 + $0x300] sm:$0xff]  ;;  %v4629_v53 = vadd.f32 %v4501_v15, %v4244_v14  ;;  %v3875_v58 = vadd.f32 %v3747_v54, %v3490_v0  ;;  %v3650_v21 = vld [vmem:[#allocation2 + $0x310] sm:$0xff] }
 0x404   :  { %5140 = vst.msk [vmem:[#allocation2 + $0x78] sm:$0xf] %vm25_vm1, %v5012_v62  ;;  %v3505_v13 = vmul.f32 0.05448869, %v3377_v20  ;;  %v3762_v60 = vmul.f32 0.24420136, %v8558_v11  ;;  %v4644_v10 = vadd.f32 %v8568_v41, %v4259_v2 }
 0x405   :  { %v4035_v7 = vld [vmem:[#allocation2 + $0x320] sm:$0xff]  ;;  %5141 = vst.msk [vmem:[#allocation2 + $0xc0] sm:$0xff] %vm23_vm0, %v5013_v9  ;;  %v4902_v36 = vmul.f32 0.05448869, %v4774_v45  ;;  %v4147_v43 = vmul.f32 0.40261996, %v8562_v44  ;;  %v5014_v51 = vadd.f32 %v4886_v16, %v4629_v53  ;;  %v4260_v18 = vadd.f32 %v4132_v30, %v3875_v58 }
 0x406   :  { %v8583_v55 = vmul.f32 0.24420136, %v8564_v52  ;;  %v4420_v40 = vld [vmem:[#allocation2 + $0x330] sm:$0xff]  ;;  %v3890_v15 = vadd.f32 %v3762_v60, %v3505_v13  ;;  %v3506_v47 = vmul.f32 0.05448869, %v3378_v25  ;;  %v5029_v26 = vadd.f32 %v8575_v23, %v4644_v10  ;;  %v3409_v45 = vld [vmem:[#allocation2 + $0x3c0] sm:$0xff] }
 0x407   :  { %v3394_v20 = vld [vmem:[#allocation2 + $0x308] sm:$0xf]  ;;  %v3651_v32 = vld [vmem:[#allocation2 + $0x318] sm:$0xf]  ;;  %v8587_v63 = vmul.f32 0.05448869, %v8571_v56  ;;  %v4645_v62 = vadd.f32 %v4517_v49, %v4260_v18 }
 0x408   :  { %v3763_v0 = vmul.f32 0.24420136, %v3635_v29  ;;  %v4148_v17 = vmul.f32 0.40261996, %v4020_v28  ;;  %5142 = vst.msk [vmem:[#allocation2 + $0xc8] sm:$0xf] %vm25_vm1, %v5014_v51  ;;  %v4275_v14 = vadd.f32 %v4147_v43, %v3890_v15 }
 0x409   :  { %v4533_v54 = vmul.f32 0.24420136, %v8524_v57  ;;  %v3521_v16 = vmul.f32 0.05448869, %v3393_v59  ;;  %v4805_v30 = vld [vmem:[#allocation2 + $0x340] sm:$0xff]  ;;  %v3666_v9 = vld [vmem:[#allocation2 + $0x3d0] sm:$0xff]  ;;  %v5030_v28 = vadd.f32 %v4902_v36, %v4645_v62 }
 0x40a   :  { %v4051_v25 = vld [vmem:[#allocation2 + $0x3e0] sm:$0xff]  ;;  %5157 = vst.msk [vmem:[#allocation2 + $0x180] sm:$0xff] %vm23_vm0, %v5029_v26  ;;  %v3891_v2 = vadd.f32 %v3763_v0, %v3506_v47  ;;  %v4918_v53 = vmul.f32 0.05448869, %v7868_v35  ;;  %v3778_v58 = vmul.f32 0.24420136, %v3650_v21  ;;  %v4660_v60 = vadd.f32 %v8583_v55, %v4275_v14 }
 0x40b   :  { %v4163_v13 = vmul.f32 0.40261996, %v4035_v7  ;;  %v4436_v29 = vld [vmem:[#allocation2 + $0x3f0] sm:$0xff]  ;;  %v4548_v10 = vmul.f32 0.24420136, %v4420_v40  ;;  %v4821_v26 = vld [vmem:[#allocation2 + $0x400] sm:$0xff] }
 0x40c   :  { %v3522_v49 = vmul.f32 0.05448869, %v3394_v20  ;;  %v3410_v43 = vld [vmem:[#allocation2 + $0x3c8] sm:$0xf]  ;;  %v4276_v51 = vadd.f32 %v4148_v17, %v3891_v2  ;;  %v3906_v57 = vadd.f32 %v3778_v58, %v3521_v16  ;;  %v3779_v59 = vmul.f32 0.24420136, %v3651_v32 }
 0x40d   :  { %v4164_v18 = vmul.f32 0.40261996, %v7956_v1  ;;  %v3667_v15 = vld [vmem:[#allocation2 + $0x3d8] sm:$0xf]  ;;  %5158 = vst.msk [vmem:[#allocation2 + $0x188] sm:$0xf] %vm25_vm1, %v5030_v28  ;;  %v5045_v47 = vadd.f32 %v8587_v63, %v4660_v60 }
 0x40e   :  { %v3537_v35 = vmul.f32 0.05448869, %v3409_v45  ;;  %v3794_v21 = vmul.f32 0.24420136, %v3666_v9  ;;  %v4179_v7 = vmul.f32 0.40261996, %v4051_v25  ;;  %v4661_v36 = vadd.f32 %v4533_v54, %v4276_v51 }
 0x40f   :  { %v4291_v0 = vadd.f32 %v4163_v13, %v3906_v57  ;;  %v4933_v62 = vmul.f32 0.05448869, %v4805_v30  ;;  %v3907_v40 = vadd.f32 %v3779_v59, %v3522_v49  ;;  %v3425_v20 = vld [vmem:[#allocation2 + $0x480] sm:$0xff]  ;;  %v3682_v14 = vld [vmem:[#allocation2 + $0x490] sm:$0xff]  ;;  %5173 = vst.msk [vmem:[#allocation2 + $0x240] sm:$0xff] %vm23_vm0, %v5045_v47 }
 0x410   :  { %v4067_v17 = vld [vmem:[#allocation2 + $0x4a0] sm:$0xff]  ;;  %v3922_v32 = vadd.f32 %v3794_v21, %v3537_v35  ;;  %v4564_v1 = vmul.f32 0.24420136, %v4436_v29  ;;  %v3538_v16 = vmul.f32 0.05448869, %v3410_v43  ;;  %v5046_v58 = vadd.f32 %v4918_v53, %v4661_v36  ;;  %v4452_v9 = vld [vmem:[#allocation2 + $0x4b0] sm:$0xff] }
 0x411   :  { %v3795_v2 = vmul.f32 0.24420136, %v3667_v15  ;;  %v4676_v28 = vadd.f32 %v4548_v10, %v4291_v0  ;;  %v4292_v60 = vadd.f32 %v4164_v18, %v3907_v40  ;;  %v4180_v45 = vmul.f32 0.40261996, %v8089_v6  ;;  %v3426_v25 = vld [vmem:[#allocation2 + $0x488] sm:$0xf] }
 0x412   :  { %v4307_v54 = vadd.f32 %v4179_v7, %v3922_v32  ;;  %v3553_v30 = vmul.f32 0.05448869, %v3425_v20  ;;  %v3810_v49 = vmul.f32 0.24420136, %v3682_v14  ;;  %v4837_v51 = vld [vmem:[#allocation2 + $0x4c0] sm:$0xff]  ;;  %v3698_v10 = vld [vmem:[#allocation2 + $0x550] sm:$0xff] }
 0x413   :  { %v3923_v13 = vadd.f32 %v3795_v2, %v3538_v16  ;;  %v3683_v57 = vld [vmem:[#allocation2 + $0x498] sm:$0xf]  ;;  %5174 = vst.msk [vmem:[#allocation2 + $0x248] sm:$0xf] %vm25_vm1, %v5046_v58  ;;  %v5061_v59 = vadd.f32 %v4933_v62, %v4676_v28  ;;  %v4677_v29 = vadd.f32 %v8172_v3, %v4292_v60  ;;  %v4949_v43 = vmul.f32 0.05448869, %v4821_v26 }
 0x414   :  { %v4195_v15 = vmul.f32 0.40261996, %v4067_v17  ;;  %v3441_v53 = vld [vmem:[#allocation2 + $0x540] sm:$0xff]  ;;  %v4692_v18 = vadd.f32 %v4564_v1, %v4307_v54  ;;  %v3938_v6 = vadd.f32 %v3810_v49, %v3553_v30  ;;  %v4580_v35 = vmul.f32 0.24420136, %v4452_v9  ;;  %v4468_v7 = vld [vmem:[#allocation2 + $0x570] sm:$0xff] }
 0x415   :  { %v4308_v47 = vadd.f32 %v4180_v45, %v3923_v13  ;;  %v4083_v21 = vld [vmem:[#allocation2 + $0x560] sm:$0xff]  ;;  %v3442_v36 = vld [vmem:[#allocation2 + $0x548] sm:$0xf]  ;;  %5189 = vst.msk [vmem:[#allocation2 + $0x300] sm:$0xff] %vm23_vm0, %v5061_v59  ;;  %v5062_v0 = vadd.f32 %v8178_v19, %v4677_v29  ;;  %v3554_v40 = vmul.f32 0.05448869, %v3426_v25 }
 0x416   :  { %v3811_v20 = vmul.f32 0.24420136, %v3683_v57  ;;  %v4196_v62 = vmul.f32 0.40261996, %v8236_v34  ;;  %v5077_v3 = vadd.f32 %v4949_v43, %v4692_v18  ;;  %v4323_v14 = vadd.f32 %v4195_v15, %v3938_v6  ;;  %v4853_v32 = vld [vmem:[#allocation2 + $0x580] sm:$0xff]  ;;  %v8608_v25 = vld [vmem:[#allocation2 + $0x110] sm:$0xff] }
 0x417   :  { %v4693_v26 = vadd.f32 %v8194_v61, %v4308_v47  ;;  %v3569_v17 = vmul.f32 0.05448869, %v3441_v53  ;;  %v3699_v1 = vld [vmem:[#allocation2 + $0x558] sm:$0xf]  ;;  %5190 = vst.msk [vmem:[#allocation2 + $0x308] sm:$0xf] %vm25_vm1, %v5062_v0 }
 0x418   :  { %v4965_v16 = vmul.f32 0.05448869, %v4837_v51  ;;  %v3939_v2 = vadd.f32 %v3811_v20, %v3554_v40  ;;  %v3826_v58 = vmul.f32 0.24420136, %v3698_v10  ;;  %v4211_v28 = vmul.f32 0.40261996, %v4083_v21 }
 0x419   :  { %v3348_v60 = vld [vmem:[#allocation2 + $0xd8] sm:$0xf]  ;;  %5205 = vst.msk [vmem:[#allocation2 + $0x3c0] sm:$0xff] %vm23_vm0, %v5077_v3  ;;  %v5078_v19 = vadd.f32 %v8205_v39, %v4693_v26  ;;  %v4708_v45 = vadd.f32 %v4580_v35, %v4323_v14  ;;  %v4596_v34 = vmul.f32 0.24420136, %v4468_v7 }
 0x41a   :  { %v3570_v9 = vmul.f32 0.05448869, %v3442_v36  ;;  %v3605_v61 = vld [vmem:[#allocation2 + $0xe8] sm:$0xf]  ;;  %v4324_v54 = vadd.f32 %v4196_v62, %v3939_v2  ;;  %v3954_v13 = vadd.f32 %v3826_v58, %v3569_v17  ;;  %v3827_v30 = vmul.f32 0.24420136, %v3699_v1 }
 0x41b   :  { %v4212_v49 = vmul.f32 0.40261996, %v8362_v4  ;;  %v3990_v51 = vld [vmem:[#allocation2 + $0xf8] sm:$0xf]  ;;  %5206 = vst.msk [vmem:[#allocation2 + $0x3c8] sm:$0xf] %vm25_vm1, %v5078_v19  ;;  %v5093_v57 = vadd.f32 %v4965_v16, %v4708_v45 }
 0x41c   :  { %v4981_v59 = vmul.f32 0.05448869, %v4853_v32  ;;  %v3475_v29 = vmul.f32 0.05448869, %v8517_v8  ;;  %v3732_v39 = vmul.f32 0.24420136, %v8520_v24  ;;  %v4709_v43 = vadd.f32 %v8244_v33, %v4324_v54 }
 0x41d   :  { %v4339_v15 = vadd.f32 %v4211_v28, %v3954_v13  ;;  %v3955_v53 = vadd.f32 %v3827_v30, %v3570_v9  ;;  %v4117_v10 = vmul.f32 0.40261996, %v8522_v46  ;;  %v4375_v18 = vld [vmem:[#allocation2 + $0x108] sm:$0xf]  ;;  %v4760_v47 = vld [vmem:[#allocation2 + $0x118] sm:$0xf] }
 0x41e   :  { %5221 = vst.msk [vmem:[#allocation2 + $0x480] sm:$0xff] %vm23_vm0, %v5093_v57  ;;  %v3860_v4 = vadd.f32 %v3732_v39, %v3475_v29  ;;  %v4502_v6 = vmul.f32 0.24420136, %v8531_v48  ;;  %v3476_v35 = vmul.f32 0.05448869, %v3348_v60  ;;  %v5094_v7 = vadd.f32 %v8269_v5, %v4709_v43  ;;  %v4761_v33 = vld [vmem:[#allocation2 + $0x120] sm:$0xff] }
 0x41f   :  { %v3733_v21 = vmul.f32 0.24420136, %v3605_v61  ;;  %v4724_v8 = vadd.f32 %v4596_v34, %v4339_v15  ;;  %v4340_v36 = vadd.f32 %v4212_v49, %v3955_v53  ;;  %v8620_v0 = vmul.f32 0.05448869, %v8608_v25  ;;  %v3350_v40 = vld [vmem:[#allocation2 + $0xe8] sm:$0xf] }
 0x420   :  { %v4245_v20 = vadd.f32 %v4117_v10, %v3860_v4  ;;  %v4118_v3 = vmul.f32 0.40261996, %v3990_v51  ;;  %v4503_v26 = vmul.f32 0.24420136, %v4375_v18  ;;  %v3607_v14 = vld [vmem:[#allocation2 + $0xf8] sm:$0xf] }
 0x421   :  { %v3861_v62 = vadd.f32 %v3733_v21, %v3476_v35  ;;  %v4762_v17 = vld [vmem:[#allocation2 + $0x128] sm:$0xf]  ;;  %5222 = vst.msk [vmem:[#allocation2 + $0x488] sm:$0xf] %vm25_vm1, %v5094_v7  ;;  %v5109_v32 = vadd.f32 %v4981_v59, %v4724_v8  ;;  %v9198_v1 = vld [vmem:[#allocation115_spill] sm:$0xff]  ;;  %v9199_v9 = vld [vmem:[#allocation116_spill] sm:$0xff] }
 0x422   :  { %v4725_v16 = vadd.f32 %v9198_v1, %v4340_v36  ;;  %v4888_v2 = vmul.f32 0.05448869, %v4760_v47  ;;  %v3477_v5 = vmul.f32 0.05448869, %v8520_v24  ;;  %v3992_v58 = vld [vmem:[#allocation2 + $0x108] sm:$0xf]  ;;  %v4630_v28 = vadd.f32 %v4502_v6, %v4245_v20 }
 0x423   :  { %v4246_v60 = vadd.f32 %v4118_v3, %v3861_v62  ;;  %v4119_v19 = vmul.f32 0.40261996, %v8531_v48  ;;  %v4504_v45 = vmul.f32 0.24420136, %v8608_v25  ;;  %v4377_v34 = vld [vmem:[#allocation2 + $0x118] sm:$0xf] }
 0x424   :  { %5237 = vst.msk [vmem:[#allocation2 + $0x540] sm:$0xff] %vm23_vm0, %v5109_v32  ;;  %v5110_v61 = vadd.f32 %v9199_v9, %v4725_v16  ;;  %v3862_v54 = vadd.f32 %v8544_v50, %v3477_v5  ;;  %v3478_v13 = vmul.f32 0.05448869, %v3350_v40  ;;  %v3735_v30 = vmul.f32 0.24420136, %v3607_v14  ;;  %v4763_v49 = vld [vmem:[#allocation2 + $0x130] sm:$0xff] }
 0x425   :  { %v3994_v51 = vld [vmem:[#allocation2 + $0x118] sm:$0xf]  ;;  %v5015_v24 = vadd.f32 %v8620_v0, %v4630_v28  ;;  %v4631_v57 = vadd.f32 %v4503_v26, %v4246_v60  ;;  %v4889_v59 = vmul.f32 0.05448869, %v4761_v33  ;;  %v4120_v29 = vmul.f32 0.40261996, %v3992_v58 }
 0x426   :  { %v3352_v39 = vld [vmem:[#allocation2 + $0xf8] sm:$0xf]  ;;  %v8631_v48 = vld [vmem:[#allocation2 + $0x1c8] sm:$0xf]  ;;  %5238 = vst.msk [vmem:[#allocation2 + $0x548] sm:$0xf] %vm25_vm1, %v5110_v61  ;;  %v4247_v43 = vadd.f32 %v4119_v19, %v3862_v54  ;;  %v3863_v15 = vadd.f32 %v3735_v30, %v3478_v13 }
 0x427   :  { %v4505_v53 = vmul.f32 0.24420136, %v4377_v34  ;;  %v3479_v10 = vmul.f32 0.05448869, %v8522_v46  ;;  %v3609_v50 = vld [vmem:[#allocation2 + $0x108] sm:$0xf]  ;;  %v5016_v18 = vadd.f32 %v4888_v2, %v4631_v57  ;;  %v3866_v46 = vadd.f32 %v8551_v42, %v4504_v45 }
 0x428   :  { %5143 = vst.msk [vmem:[#allocation2 + $0xd0] sm:$0xff] %vm23_vm0, %v5015_v24  ;;  %v4890_v47 = vmul.f32 0.05448869, %v4762_v17  ;;  %v4121_v4 = vmul.f32 0.40261996, %v8608_v25  ;;  %v4632_v21 = vadd.f32 %v4504_v45, %v4247_v43  ;;  %v4248_v7 = vadd.f32 %v4120_v29, %v3863_v15  ;;  %v4765_v1 = vld [vmem:[#allocation2 + $0x140] sm:$0xff] }
 0x429   :  { %v4506_v35 = vmul.f32 0.24420136, %v4761_v33  ;;  %v3864_v8 = vadd.f32 %v4502_v6, %v3479_v10  ;;  %v3480_v36 = vmul.f32 0.05448869, %v3352_v39  ;;  %v3354_v40 = vld [vmem:[#allocation2 + $0x108] sm:$0xf] }
 0x42a   :  { %v8637_v20 = vld [vmem:[#allocation2 + $0x1c8] sm:$0xf]  ;;  %5144 = vst.msk [vmem:[#allocation2 + $0xd8] sm:$0xf] %vm25_vm1, %v5016_v18  ;;  %v4891_v62 = vmul.f32 0.05448869, %v4763_v49  ;;  %v5017_v14 = vadd.f32 %v4889_v59, %v4632_v21  ;;  %v4633_v25 = vadd.f32 %v4505_v53, %v4248_v7 }
 0x42b   :  { %v3737_v3 = vmul.f32 0.24420136, %v3609_v50  ;;  %v4123_v26 = vmul.f32 0.40261996, %v4761_v33  ;;  %5166 = vst.msk [vmem:[#allocation2 + $0x1c8] sm:$0xf] %vm25_vm1, %v8506_v22  ;;  %v4249_v17 = vadd.f32 %v4121_v4, %v3864_v8  ;;  %v3868_v42 = vadd.f32 %v8620_v0, %v4506_v35 }
 0x42c   :  { %v4122_v32 = vmul.f32 0.40261996, %v3994_v51  ;;  %v4508_v2 = vmul.f32 0.24420136, %v4763_v49  ;;  %v3482_v5 = vmul.f32 0.05448869, %v3354_v40  ;;  %v5018_v28 = vadd.f32 %v4890_v47, %v4633_v25 }
 0x42d   :  { %v3865_v6 = vadd.f32 %v3737_v3, %v3480_v36  ;;  %v4251_v16 = vadd.f32 %v4123_v26, %v3866_v46  ;;  %v3356_v58 = vld [vmem:[#allocation2 + $0x118] sm:$0xf]  ;;  %5145 = vst.msk [vmem:[#allocation2 + $0xe0] sm:$0xff] %vm23_vm0, %v5017_v14  ;;  %v4634_v60 = vadd.f32 %v4506_v35, %v4249_v17  ;;  %v4125_v33 = vmul.f32 0.40261996, %v4763_v49  ;;  %v4767_v61 = vld [vmem:[#allocation2 + $0x150] sm:$0xff] }
 0x42e   :  { %v4893_v22 = vmul.f32 0.05448869, %v4765_v1  ;;  %v9200_v34 = vld [vmem:[#allocation156_spill] sm:$0xff]  ;;  %5146 = vst.msk [vmem:[#allocation2 + $0xe8] sm:$0xf] %vm25_vm1, %v5018_v28  ;;  %v9201_v57 = vld [vmem:[#allocation166_spill] sm:$0xff]  ;;  %v3870_v0 = vadd.f32 %v4889_v59, %v4508_v2 }
 0x42f   :  { %v4250_v19 = vadd.f32 %v4122_v32, %v3865_v6  ;;  %v4636_v45 = vadd.f32 %v4508_v2, %v4251_v16  ;;  %v3867_v9 = vadd.f32 %v9200_v34, %v3482_v5  ;;  %v5019_v54 = vadd.f32 %v4891_v62, %v4634_v60  ;;  %v3358_v24 = vld [vmem:[#allocation2 + $0x128] sm:$0xf]  ;;  %v9203_v10 = vld [vmem:[#allocation157_spill] sm:$0xff]  ;;  %v3360_v40 = vld [vmem:[#allocation2 + $0x138] sm:$0xf] }
 0x430   :  { %v4253_v13 = vadd.f32 %v4125_v33, %v3868_v42  ;;  %v4510_v30 = vmul.f32 0.24420136, %v4765_v1  ;;  %v3484_v51 = vmul.f32 0.05448869, %v3356_v58  ;;  %v9202_v43 = vld [vmem:[#allocation158_spill] sm:$0xff]  ;;  %v4769_v47 = vld [vmem:[#allocation2 + $0x160] sm:$0xff] }
 0x431   :  { %v4635_v29 = vadd.f32 %v9201_v57, %v4250_v19  ;;  %v5021_v39 = vadd.f32 %v4893_v22, %v4636_v45  ;;  %v4252_v15 = vadd.f32 %v9202_v43, %v3867_v9  ;;  %5147 = vst.msk [vmem:[#allocation2 + $0xf0] sm:$0xff] %vm23_vm0, %v5019_v54  ;;  %v4895_v53 = vmul.f32 0.05448869, %v4767_v61  ;;  %v9204_v4 = vld [vmem:[#allocation170_spill] sm:$0xff]  ;;  %v9205_v21 = vld [vmem:[#allocation169_spill] sm:$0xff]  ;;  %v9206_v46 = vld [vmem:[#allocation168_spill] sm:$0xff] }
 0x432   :  { %v4638_v49 = vadd.f32 %v4510_v30, %v4253_v13  ;;  %v3869_v50 = vadd.f32 %v9203_v10, %v3484_v51  ;;  %v4127_v18 = vmul.f32 0.40261996, %v4765_v1  ;;  %v4512_v8 = vmul.f32 0.24420136, %v4767_v61  ;;  %v9207_v25 = vld [vmem:[#allocation78_spill] sm:$0xff]  ;;  %v9208_v1 = vld [vmem:[#allocation167_spill] sm:$0xff] }
 0x433   :  { %v5020_v35 = vadd.f32 %v9204_v4, %v4635_v29  ;;  %5149 = vst.msk [vmem:[#allocation2 + $0x100] sm:$0xff] %vm23_vm0, %v5021_v39  ;;  %v4637_v7 = vadd.f32 %v9205_v21, %v4252_v15  ;;  %v3486_v36 = vmul.f32 0.05448869, %v3358_v24  ;;  %v3872_v14 = vadd.f32 %v4891_v62, %v4510_v30  ;;  %v4771_v2 = vld [vmem:[#allocation2 + $0x170] sm:$0xff]  ;;  %v9209_v5 = vld [vmem:[#allocation77_spill] sm:$0xff]  ;;  %v9210_v62 = vld [vmem:[#allocation58_spill] sm:$0xff] }
 0x434   :  { %v5023_v3 = vadd.f32 %v4895_v53, %v4638_v49  ;;  %v4254_v59 = vadd.f32 %v9206_v46, %v3869_v50  ;;  %v4255_v26 = vadd.f32 %v4127_v18, %v3870_v0  ;;  %v4897_v32 = vmul.f32 0.05448869, %v4769_v47  ;;  %v3364_v33 = vld [vmem:[#allocation2 + $0x198] sm:$0xf]  ;;  %v3621_v9 = vld [vmem:[#allocation2 + $0x1a8] sm:$0xf] }
 0x435   :  { %5148 = vst.msk [vmem:[#allocation2 + $0xf8] sm:$0xf] %vm25_vm1, %v5020_v35  ;;  %v5022_v17 = vadd.f32 %v9207_v25, %v4637_v7  ;;  %v3871_v6 = vadd.f32 %v9208_v1, %v3486_v36  ;;  %v4129_v16 = vmul.f32 0.40261996, %v4767_v61  ;;  %v4514_v60 = vmul.f32 0.24420136, %v4769_v47 }
 0x436   :  { %5151 = vst.msk [vmem:[#allocation2 + $0x110] sm:$0xff] %vm23_vm0, %v5023_v3  ;;  %v4639_v58 = vadd.f32 %v9209_v5, %v4254_v59  ;;  %v4640_v28 = vadd.f32 %v4512_v8, %v4255_v26  ;;  %v3488_v42 = vmul.f32 0.05448869, %v3360_v40  ;;  %v3491_v22 = vmul.f32 0.05448869, %v8537_v31  ;;  %v9211_v61 = vld [vmem:[#allocation60_spill] sm:$0xff] }
 0x437   :  { %5150 = vst.msk [vmem:[#allocation2 + $0x108] sm:$0xf] %vm25_vm1, %v5022_v17  ;;  %v4256_v19 = vadd.f32 %v9210_v62, %v3871_v6  ;;  %v4257_v45 = vadd.f32 %v4129_v16, %v3872_v14  ;;  %v3748_v34 = vmul.f32 0.24420136, %v8539_v27  ;;  %v4899_v30 = vmul.f32 0.05448869, %v4771_v2 }
 0x438   :  { %v5024_v54 = vadd.f32 %v9211_v61, %v4639_v58  ;;  %v5025_v13 = vadd.f32 %v4897_v32, %v4640_v28  ;;  %v9212_v51 = vld [vmem:[#allocation57_spill] sm:$0xff]  ;;  %v4775_v57 = vld [vmem:[#allocation2 + $0x1d0] sm:$0xff]  ;;  %v9213_v29 = vld [vmem:[#allocation82_spill] sm:$0xff]  ;;  %v4133_v0 = vmul.f32 0.40261996, %v8546_v12 }
 0x439   :  { %v3873_v24 = vadd.f32 %v9212_v51, %v3488_v42  ;;  %v4641_v39 = vadd.f32 %v9213_v29, %v4256_v19  ;;  %v4642_v43 = vadd.f32 %v4514_v60, %v4257_v45  ;;  %v3876_v15 = vadd.f32 %v3748_v34, %v3491_v22  ;;  %v4006_v49 = vld [vmem:[#allocation2 + $0x1b8] sm:$0xf]  ;;  %v9214_v31 = vld [vmem:[#allocation59_spill] sm:$0xff]  ;;  %v9215_v47 = vld [vmem:[#allocation153_spill] sm:$0xff] }
 0x43a   :  { %5152 = vst.msk [vmem:[#allocation2 + $0x118] sm:$0xf] %vm25_vm1, %v5024_v54  ;;  %v4518_v10 = vmul.f32 0.24420136, %v8553_v38  ;;  %v3492_v50 = vmul.f32 0.05448869, %v3364_v33 }
 0x43b   :  { %5153 = vst.msk [vmem:[#allocation2 + $0x120] sm:$0xff] %vm23_vm0, %v5025_v13  ;;  %v4258_v53 = vadd.f32 %v9214_v31, %v3873_v24  ;;  %v3749_v18 = vmul.f32 0.24420136, %v3621_v9  ;;  %v5026_v4 = vadd.f32 %v9215_v47, %v4641_v39  ;;  %v5027_v35 = vadd.f32 %v4899_v30, %v4642_v43  ;;  %v4777_v8 = vld [vmem:[#allocation2 + $0x1e0] sm:$0xff]  ;;  %v3366_v36 = vld [vmem:[#allocation2 + $0x1a8] sm:$0xf] }
 0x43c   :  { %v4261_v21 = vadd.f32 %v4133_v0, %v3876_v15  ;;  %v4903_v7 = vmul.f32 0.05448869, %v4775_v57  ;;  %v9216_v40 = vld [vmem:[#allocation152_spill] sm:$0xff]  ;;  %v4134_v59 = vmul.f32 0.40261996, %v4006_v49  ;;  %v9217_v17 = vld [vmem:[#allocation162_spill] sm:$0xff] }
 0x43d   :  { %v4643_v3 = vadd.f32 %v9216_v40, %v4258_v53  ;;  %v3877_v46 = vadd.f32 %v3749_v18, %v3492_v50  ;;  %v4519_v26 = vmul.f32 0.24420136, %v8637_v20  ;;  %v3623_v14 = vld [vmem:[#allocation2 + $0x1b8] sm:$0xf]  ;;  %5154 = vst.msk [vmem:[#allocation2 + $0x128] sm:$0xf] %vm25_vm1, %v5026_v4 }
 0x43e   :  { %5155 = vst.msk [vmem:[#allocation2 + $0x130] sm:$0xff] %vm23_vm0, %v5027_v35  ;;  %v4646_v25 = vadd.f32 %v4518_v10, %v4261_v21  ;;  %v4904_v32 = vmul.f32 0.05448869, %v9217_v17  ;;  %v3493_v1 = vmul.f32 0.05448869, %v8539_v27  ;;  %v9218_v16 = vld [vmem:[#allocation83_spill] sm:$0xff] }
 0x43f   :  { %v4135_v6 = vmul.f32 0.40261996, %v8553_v38  ;;  %v5028_v2 = vadd.f32 %v9218_v16, %v4643_v3  ;;  %v4262_v5 = vadd.f32 %v4134_v59, %v3877_v46  ;;  %v4520_v58 = vmul.f32 0.24420136, %v4775_v57  ;;  %v3368_v60 = vld [vmem:[#allocation2 + $0x1b8] sm:$0xf] }
 0x440   :  { %v3494_v28 = vmul.f32 0.05448869, %v3366_v36  ;;  %v5031_v42 = vadd.f32 %v4903_v7, %v4646_v25  ;;  %v3878_v20 = vadd.f32 %v8568_v41, %v3493_v1  ;;  %v4905_v33 = vmul.f32 0.05448869, %v4777_v8  ;;  %v4779_v19 = vld [vmem:[#allocation2 + $0x1f0] sm:$0xff]  ;;  %v9219_v39 = vld [vmem:[#allocation61_spill] sm:$0xff] }
 0x441   :  { %v3751_v62 = vmul.f32 0.24420136, %v3623_v14  ;;  %5156 = vst.msk [vmem:[#allocation2 + $0x138] sm:$0xf] %vm25_vm1, %v5028_v2  ;;  %v4647_v45 = vadd.f32 %v4519_v26, %v4262_v5  ;;  %v4136_v22 = vmul.f32 0.40261996, %v8631_v48  ;;  %v3882_v41 = vadd.f32 %v8575_v23, %v4520_v58 }
 0x442   :  { %v3495_v27 = vmul.f32 0.05448869, %v8546_v12  ;;  %v4522_v38 = vmul.f32 0.24420136, %v4777_v8  ;;  %5159 = vst.msk [vmem:[#allocation2 + $0x190] sm:$0xff] %vm23_vm0, %v5031_v42  ;;  %v4263_v34 = vadd.f32 %v4135_v6, %v3878_v20  ;;  %v4781_v48 = vld [vmem:[#allocation2 + $0x200] sm:$0xff] }
 0x443   :  { %v3879_v9 = vadd.f32 %v3751_v62, %v3494_v28  ;;  %v4137_v61 = vmul.f32 0.40261996, %v4775_v57  ;;  %v3496_v54 = vmul.f32 0.05448869, %v3368_v60  ;;  %v5032_v13 = vadd.f32 %v4904_v32, %v4647_v45  ;;  %v9220_v57 = vld [vmem:[#allocation87_spill] sm:$0xff]  ;;  %v9221_v18 = vld [vmem:[#allocation62_spill] sm:$0xff] }
 0x444   :  { %v3880_v30 = vadd.f32 %v4518_v10, %v3495_v27  ;;  %v4139_v51 = vmul.f32 0.40261996, %v4777_v8  ;;  %v4648_v24 = vadd.f32 %v4520_v58, %v4263_v34  ;;  %v4524_v15 = vmul.f32 0.24420136, %v4779_v19  ;;  %v4783_v23 = vld [vmem:[#allocation2 + $0x210] sm:$0xff]  ;;  %v9222_v36 = vld [vmem:[#allocation88_spill] sm:$0xff] }
 0x445   :  { %v4264_v29 = vadd.f32 %v4136_v22, %v3879_v9  ;;  %v3881_v43 = vadd.f32 %v9219_v39, %v3496_v54  ;;  %5160 = vst.msk [vmem:[#allocation2 + $0x198] sm:$0xf] %vm25_vm1, %v5032_v13  ;;  %v4907_v0 = vmul.f32 0.05448869, %v4779_v19  ;;  %v3884_v31 = vadd.f32 %v4903_v7, %v4522_v38  ;;  %v9223_v3 = vld [vmem:[#allocation63_spill] sm:$0xff]  ;;  %v4785_v7 = vld [vmem:[#allocation2 + $0x220] sm:$0xff] }
 0x446   :  { %v4265_v12 = vadd.f32 %v4137_v61, %v3880_v30  ;;  %v4267_v49 = vadd.f32 %v4139_v51, %v3882_v41  ;;  %v5033_v53 = vadd.f32 %v4905_v33, %v4648_v24  ;;  %v4141_v47 = vmul.f32 0.40261996, %v4779_v19  ;;  %v4787_v1 = vld [vmem:[#allocation2 + $0x230] sm:$0xff]  ;;  %v9224_v16 = vld [vmem:[#allocation92_spill] sm:$0xff]  ;;  %v3637_v42 = vld [vmem:[#allocation2 + $0x268] sm:$0xf] }
 0x447   :  { %v4649_v50 = vadd.f32 %v9220_v57, %v4264_v29  ;;  %v4266_v10 = vadd.f32 %v9221_v18, %v3881_v43  ;;  %v4909_v21 = vmul.f32 0.05448869, %v4781_v48  ;;  %v4526_v8 = vmul.f32 0.24420136, %v4781_v48  ;;  %v4791_v6 = vld [vmem:[#allocation2 + $0x290] sm:$0xff] }
 0x448   :  { %v4650_v4 = vadd.f32 %v4522_v38, %v4265_v12  ;;  %v4652_v35 = vadd.f32 %v4524_v15, %v4267_v49  ;;  %5161 = vst.msk [vmem:[#allocation2 + $0x1a0] sm:$0xff] %vm23_vm0, %v5033_v53  ;;  %v4269_v59 = vadd.f32 %v4141_v47, %v3884_v31  ;;  %v3886_v26 = vadd.f32 %v4905_v33, %v4524_v15  ;;  %v3380_v60 = vld [vmem:[#allocation2 + $0x258] sm:$0xf]  ;;  %v3382_v13 = vld [vmem:[#allocation2 + $0x268] sm:$0xf]  ;;  %v4793_v15 = vld [vmem:[#allocation2 + $0x2a0] sm:$0xff] }
 0x449   :  { %v5034_v40 = vadd.f32 %v9222_v36, %v4649_v50  ;;  %v4651_v46 = vadd.f32 %v9223_v3, %v4266_v10  ;;  %v4911_v17 = vmul.f32 0.05448869, %v4783_v23  ;;  %v4143_v32 = vmul.f32 0.40261996, %v4781_v48  ;;  %v9226_v36 = vld [vmem:[#allocation65_spill] sm:$0xff] }
 0x44a   :  { %v5035_v14 = vadd.f32 %v4907_v0, %v4650_v4  ;;  %v5037_v25 = vadd.f32 %v4909_v21, %v4652_v35  ;;  %v4654_v5 = vadd.f32 %v4526_v8, %v4269_v59  ;;  %v4528_v58 = vmul.f32 0.24420136, %v4783_v23  ;;  %v9225_v4 = vld [vmem:[#allocation64_spill] sm:$0xff] }
 0x44b   :  { %5162 = vst.msk [vmem:[#allocation2 + $0x1a8] sm:$0xf] %vm25_vm1, %v5034_v40  ;;  %v5036_v2 = vadd.f32 %v9224_v16, %v4651_v46  ;;  %v3888_v28 = vadd.f32 %v4907_v0, %v4526_v8  ;;  %v4271_v20 = vadd.f32 %v4143_v32, %v3886_v26  ;;  %v4913_v33 = vmul.f32 0.05448869, %v4785_v7 }
 0x44c   :  { %5163 = vst.msk [vmem:[#allocation2 + $0x1b0] sm:$0xff] %vm23_vm0, %v5035_v14  ;;  %5165 = vst.msk [vmem:[#allocation2 + $0x1c0] sm:$0xff] %vm23_vm0, %v5037_v25  ;;  %v4145_v62 = vmul.f32 0.40261996, %v4783_v23  ;;  %v4530_v19 = vmul.f32 0.24420136, %v4785_v7  ;;  %v5039_v45 = vadd.f32 %v4911_v17, %v4654_v5 }
 0x44d   :  { %5164 = vst.msk [vmem:[#allocation2 + $0x1b8] sm:$0xf] %vm25_vm1, %v5036_v2  ;;  %v4915_v22 = vmul.f32 0.05448869, %v4787_v1  ;;  %v3507_v27 = vmul.f32 0.05448869, %v8558_v11  ;;  %v4656_v34 = vadd.f32 %v4528_v58, %v4271_v20 }
 0x44e   :  { %v3764_v38 = vmul.f32 0.24420136, %v8562_v44  ;;  %v4273_v9 = vadd.f32 %v4145_v62, %v3888_v28  ;;  %v4149_v61 = vmul.f32 0.40261996, %v8564_v52  ;;  %v4534_v54 = vmul.f32 0.24420136, %v8571_v56 }
 0x44f   :  { %5167 = vst.msk [vmem:[#allocation2 + $0x1d0] sm:$0xff] %vm23_vm0, %v5039_v45  ;;  %v4919_v41 = vmul.f32 0.05448869, %v4791_v6  ;;  %v3508_v51 = vmul.f32 0.05448869, %v3380_v60  ;;  %v5041_v29 = vadd.f32 %v4913_v33, %v4656_v34  ;;  %v4795_v23 = vld [vmem:[#allocation2 + $0x2b0] sm:$0xff] }
 0x450   :  { %v3892_v30 = vadd.f32 %v3764_v38, %v3507_v27  ;;  %v3765_v24 = vmul.f32 0.24420136, %v3637_v42  ;;  %v4658_v39 = vadd.f32 %v4530_v19, %v4273_v9  ;;  %v4150_v43 = vmul.f32 0.40261996, %v8512_v37  ;;  %v4797_v14 = vld [vmem:[#allocation2 + $0x2c0] sm:$0xff]  ;;  %v9228_v25 = vld [vmem:[#allocation66_spill] sm:$0xff] }
 0x451   :  { %v3509_v11 = vmul.f32 0.05448869, %v8562_v44  ;;  %v4151_v0 = vmul.f32 0.40261996, %v8571_v56  ;;  %v4536_v49 = vmul.f32 0.24420136, %v4791_v6 }
 0x452   :  { %v4277_v48 = vadd.f32 %v4149_v61, %v3892_v30  ;;  %v3893_v12 = vadd.f32 %v3765_v24, %v3508_v51  ;;  %5169 = vst.msk [vmem:[#allocation2 + $0x1e0] sm:$0xff] %vm23_vm0, %v5041_v29  ;;  %v5043_v31 = vadd.f32 %v4915_v22, %v4658_v39  ;;  %v3510_v57 = vmul.f32 0.05448869, %v3382_v13  ;;  %v9229_v2 = vld [vmem:[#allocation97_spill] sm:$0xff]  ;;  %v9230_v19 = vld [vmem:[#allocation67_spill] sm:$0xff] }
 0x453   :  { %v3894_v53 = vadd.f32 %v8583_v55, %v3509_v11  ;;  %v3511_v50 = vmul.f32 0.05448869, %v8564_v52  ;;  %v4921_v47 = vmul.f32 0.05448869, %v4793_v15  ;;  %v4538_v37 = vmul.f32 0.24420136, %v4793_v15 }
 0x454   :  { %v4662_v18 = vadd.f32 %v4534_v54, %v4277_v48  ;;  %v4278_v10 = vadd.f32 %v4150_v43, %v3893_v12  ;;  %5171 = vst.msk [vmem:[#allocation2 + $0x1f0] sm:$0xff] %vm23_vm0, %v5043_v31  ;;  %v3895_v35 = vadd.f32 %v9225_v4, %v3510_v57  ;;  %v4153_v21 = vmul.f32 0.40261996, %v4791_v6  ;;  %v9227_v52 = vld [vmem:[#allocation93_spill] sm:$0xff]  ;;  %v4803_v34 = vld [vmem:[#allocation2 + $0x2f0] sm:$0xff] }
 0x455   :  { %v4279_v44 = vadd.f32 %v4151_v0, %v3894_v53  ;;  %v3896_v56 = vadd.f32 %v4534_v54, %v3511_v50  ;;  %v3898_v55 = vadd.f32 %v8587_v63, %v4536_v49  ;;  %v4155_v3 = vmul.f32 0.40261996, %v4793_v15  ;;  %v4799_v63 = vld [vmem:[#allocation2 + $0x2d0] sm:$0xff]  ;;  %v4801_v62 = vld [vmem:[#allocation2 + $0x2e0] sm:$0xff]  ;;  %v3396_v15 = vld [vmem:[#allocation2 + $0x318] sm:$0xf] }
 0x456   :  { %v5047_v8 = vadd.f32 %v4919_v41, %v4662_v18  ;;  %v4663_v40 = vadd.f32 %v9226_v36, %v4278_v10  ;;  %v4280_v59 = vadd.f32 %v9227_v52, %v3895_v35  ;;  %v4540_v7 = vmul.f32 0.24420136, %v4795_v23  ;;  %v3395_v9 = vld [vmem:[#allocation2 + $0x310] sm:$0xff]  ;;  %v3652_v61 = vld [vmem:[#allocation2 + $0x320] sm:$0xff]  ;;  %v9231_v36 = vld [vmem:[#allocation98_spill] sm:$0xff] }
 0x457   :  { %v4664_v46 = vadd.f32 %v4536_v49, %v4279_v44  ;;  %v4281_v26 = vadd.f32 %v4153_v21, %v3896_v56  ;;  %v4923_v32 = vmul.f32 0.05448869, %v4795_v23  ;;  %v4283_v1 = vadd.f32 %v4155_v3, %v3898_v55  ;;  %v4037_v51 = vld [vmem:[#allocation2 + $0x330] sm:$0xff]  ;;  %v4422_v24 = vld [vmem:[#allocation2 + $0x340] sm:$0xff] }
 0x458   :  { %5175 = vst.msk [vmem:[#allocation2 + $0x250] sm:$0xff] %vm23_vm0, %v5047_v8  ;;  %v5048_v17 = vadd.f32 %v9228_v25, %v4663_v40  ;;  %v3900_v16 = vadd.f32 %v4919_v41, %v4538_v37  ;;  %v4665_v5 = vadd.f32 %v9229_v2, %v4280_v59  ;;  %v4157_v28 = vmul.f32 0.40261996, %v4795_v23  ;;  %v4807_v50 = vld [vmem:[#allocation2 + $0x350] sm:$0xff]  ;;  %v4809_v56 = vld [vmem:[#allocation2 + $0x360] sm:$0xff] }
 0x459   :  { %v5049_v6 = vadd.f32 %v4921_v47, %v4664_v46  ;;  %v4666_v58 = vadd.f32 %v4538_v37, %v4281_v26  ;;  %v4668_v60 = vadd.f32 %v4540_v7, %v4283_v1  ;;  %v4925_v42 = vmul.f32 0.05448869, %v4797_v14  ;;  %v4811_v26 = vld [vmem:[#allocation2 + $0x370] sm:$0xff] }
 0x45a   :  { %5176 = vst.msk [vmem:[#allocation2 + $0x258] sm:$0xf] %vm25_vm1, %v5048_v17  ;;  %v4542_v20 = vmul.f32 0.24420136, %v4797_v14  ;;  %v3902_v33 = vadd.f32 %v4921_v47, %v4540_v7  ;;  %v5050_v45 = vadd.f32 %v9230_v19, %v4665_v5  ;;  %v4285_v27 = vadd.f32 %v4157_v28, %v3900_v16  ;;  %v4813_v5 = vld [vmem:[#allocation2 + $0x380] sm:$0xff]  ;;  %v9233_v28 = vld [vmem:[#allocation68_spill] sm:$0xff] }
 0x45b   :  { %5177 = vst.msk [vmem:[#allocation2 + $0x260] sm:$0xff] %vm23_vm0, %v5049_v6  ;;  %v5051_v22 = vadd.f32 %v4923_v32, %v4666_v58  ;;  %v4159_v38 = vmul.f32 0.40261996, %v4797_v14  ;;  %v5053_v54 = vadd.f32 %v4925_v42, %v4668_v60  ;;  %v4927_v13 = vmul.f32 0.05448869, %v4799_v63  ;;  %v9232_v14 = vld [vmem:[#allocation101_spill] sm:$0xff] }
 0x45c   :  { %v4544_v30 = vmul.f32 0.24420136, %v4799_v63  ;;  %v3904_v41 = vadd.f32 %v4923_v32, %v4542_v20  ;;  %5178 = vst.msk [vmem:[#allocation2 + $0x268] sm:$0xf] %vm25_vm1, %v5050_v45  ;;  %v4670_v29 = vadd.f32 %v4542_v20, %v4285_v27  ;;  %v4929_v43 = vmul.f32 0.05448869, %v4801_v62 }
 0x45d   :  { %5179 = vst.msk [vmem:[#allocation2 + $0x270] sm:$0xff] %vm23_vm0, %v5051_v22  ;;  %v4287_v39 = vadd.f32 %v4159_v38, %v3902_v33  ;;  %v4161_v11 = vmul.f32 0.40261996, %v4799_v63  ;;  %5181 = vst.msk [vmem:[#allocation2 + $0x280] sm:$0xff] %vm23_vm0, %v5053_v54  ;;  %v4546_v48 = vmul.f32 0.24420136, %v4801_v62 }
 0x45e   :  { %v3523_v12 = vmul.f32 0.05448869, %v3395_v9  ;;  %v3780_v0 = vmul.f32 0.24420136, %v3652_v61  ;;  %v5055_v49 = vadd.f32 %v4927_v13, %v4670_v29  ;;  %v4931_v57 = vmul.f32 0.05448869, %v4803_v34 }
 0x45f   :  { %v4672_v31 = vadd.f32 %v4544_v30, %v4287_v39  ;;  %v4289_v53 = vadd.f32 %v4161_v11, %v3904_v41  ;;  %v4165_v10 = vmul.f32 0.40261996, %v4037_v51  ;;  %v4550_v47 = vmul.f32 0.24420136, %v4422_v24  ;;  %v4815_v45 = vld [vmem:[#allocation2 + $0x390] sm:$0xff]  ;;  %v9234_v22 = vld [vmem:[#allocation102_spill] sm:$0xff] }
 0x460   :  { %v3908_v18 = vadd.f32 %v3780_v0, %v3523_v12  ;;  %v3524_v37 = vmul.f32 0.05448869, %v3396_v15  ;;  %5183 = vst.msk [vmem:[#allocation2 + $0x290] sm:$0xff] %vm23_vm0, %v5055_v49  ;;  %v3525_v4 = vmul.f32 0.05448869, %v3652_v61  ;;  %v4817_v41 = vld [vmem:[#allocation2 + $0x3a0] sm:$0xff] }
 0x461   :  { %v5057_v23 = vadd.f32 %v4929_v43, %v4672_v31  ;;  %v4674_v44 = vadd.f32 %v4546_v48, %v4289_v53  ;;  %v3782_v35 = vmul.f32 0.24420136, %v4037_v51  ;;  %v4935_v8 = vmul.f32 0.05448869, %v4807_v50  ;;  %v3411_v43 = vld [vmem:[#allocation2 + $0x3d0] sm:$0xff]  ;;  %v3668_v11 = vld [vmem:[#allocation2 + $0x3e0] sm:$0xff] }
 0x462   :  { %v4293_v21 = vadd.f32 %v4165_v10, %v3908_v18  ;;  %v3909_v40 = vadd.f32 %v9231_v36, %v3524_v37  ;;  %v4167_v55 = vmul.f32 0.40261996, %v4422_v24  ;;  %v4552_v52 = vmul.f32 0.24420136, %v4807_v50  ;;  %v4819_v49 = vld [vmem:[#allocation2 + $0x3b0] sm:$0xff]  ;;  %v4438_v53 = vld [vmem:[#allocation2 + $0x400] sm:$0xff] }
 0x463   :  { %5185 = vst.msk [vmem:[#allocation2 + $0x2a0] sm:$0xff] %vm23_vm0, %v5057_v23  ;;  %v5059_v3 = vadd.f32 %v4931_v57, %v4674_v44  ;;  %v3910_v46 = vadd.f32 %v3782_v35, %v3525_v4  ;;  %v3527_v59 = vmul.f32 0.05448869, %v4037_v51  ;;  %v4937_v17 = vmul.f32 0.05448869, %v4809_v56  ;;  %v4053_v31 = vld [vmem:[#allocation2 + $0x3f0] sm:$0xff] }
 0x464   :  { %v4678_v7 = vadd.f32 %v4550_v47, %v4293_v21  ;;  %v4294_v25 = vadd.f32 %v9232_v14, %v3909_v40  ;;  %v4554_v32 = vmul.f32 0.24420136, %v4809_v56  ;;  %v4169_v6 = vmul.f32 0.40261996, %v4807_v50  ;;  %v4823_v36 = vld [vmem:[#allocation2 + $0x410] sm:$0xff]  ;;  %v4825_v14 = vld [vmem:[#allocation2 + $0x420] sm:$0xff] }
 0x465   :  { %5187 = vst.msk [vmem:[#allocation2 + $0x2b0] sm:$0xff] %vm23_vm0, %v5059_v3  ;;  %v4295_v1 = vadd.f32 %v4167_v55, %v3910_v46  ;;  %v3912_v16 = vadd.f32 %v4550_v47, %v3527_v59  ;;  %v3529_v2 = vmul.f32 0.05448869, %v4422_v24  ;;  %v4939_v60 = vmul.f32 0.05448869, %v4811_v26 }
 0x466   :  { %v5063_v58 = vadd.f32 %v4935_v8, %v4678_v7  ;;  %v4679_v63 = vadd.f32 %v9233_v28, %v4294_v25  ;;  %v4556_v42 = vmul.f32 0.24420136, %v4811_v26  ;;  %v4171_v19 = vmul.f32 0.40261996, %v4809_v56  ;;  %v3412_v47 = vld [vmem:[#allocation2 + $0x3d8] sm:$0xf] }
 0x467   :  { %v4680_v20 = vadd.f32 %v4552_v52, %v4295_v1  ;;  %v4297_v33 = vadd.f32 %v4169_v6, %v3912_v16  ;;  %v3914_v62 = vadd.f32 %v4552_v52, %v3529_v2  ;;  %v3916_v38 = vadd.f32 %v4935_v8, %v4554_v32  ;;  %v4827_v28 = vld [vmem:[#allocation2 + $0x430] sm:$0xff] }
 0x468   :  { %5191 = vst.msk [vmem:[#allocation2 + $0x310] sm:$0xff] %vm23_vm0, %v5063_v58  ;;  %v5064_v27 = vadd.f32 %v9234_v22, %v4679_v63  ;;  %v4173_v34 = vmul.f32 0.40261996, %v4811_v26  ;;  %v4558_v9 = vmul.f32 0.24420136, %v4813_v5  ;;  %v3918_v29 = vadd.f32 %v4937_v17, %v4556_v42 }
 0x469   :  { %v5065_v61 = vadd.f32 %v4937_v17, %v4680_v20  ;;  %v4682_v54 = vadd.f32 %v4554_v32, %v4297_v33  ;;  %v4299_v13 = vadd.f32 %v4171_v19, %v3914_v62  ;;  %v4941_v30 = vmul.f32 0.05448869, %v4813_v5  ;;  %v9235_v32 = vld [vmem:[#allocation69_spill] sm:$0xff] }
 0x46a   :  { %5192 = vst.msk [vmem:[#allocation2 + $0x318] sm:$0xf] %vm25_vm1, %v5064_v27  ;;  %v4301_v51 = vadd.f32 %v4173_v34, %v3916_v38  ;;  %v4943_v24 = vmul.f32 0.05448869, %v4815_v45  ;;  %v4175_v39 = vmul.f32 0.40261996, %v4813_v5  ;;  %v3920_v0 = vadd.f32 %v4939_v60, %v4558_v9 }
 0x46b   :  { %5193 = vst.msk [vmem:[#allocation2 + $0x320] sm:$0xff] %vm23_vm0, %v5065_v61  ;;  %v5067_v15 = vadd.f32 %v4939_v60, %v4682_v54  ;;  %v4684_v48 = vadd.f32 %v4556_v42, %v4299_v13  ;;  %v4560_v12 = vmul.f32 0.24420136, %v4815_v45  ;;  %v4945_v18 = vmul.f32 0.05448869, %v4817_v41  ;;  %v9236_v60 = vld [vmem:[#allocation105_spill] sm:$0xff] }
 0x46c   :  { %v4686_v57 = vadd.f32 %v4558_v9, %v4301_v51  ;;  %v4303_v50 = vadd.f32 %v4175_v39, %v3918_v29  ;;  %v4177_v10 = vmul.f32 0.40261996, %v4815_v45  ;;  %v4562_v23 = vmul.f32 0.24420136, %v4817_v41  ;;  %v4829_v27 = vld [vmem:[#allocation2 + $0x440] sm:$0xff]  ;;  %v9237_v34 = vld [vmem:[#allocation70_spill] sm:$0xff] }
 0x46d   :  { %5195 = vst.msk [vmem:[#allocation2 + $0x330] sm:$0xff] %vm23_vm0, %v5067_v15  ;;  %v5069_v37 = vadd.f32 %v4941_v30, %v4684_v48  ;;  %v3539_v44 = vmul.f32 0.05448869, %v3411_v43  ;;  %v3796_v4 = vmul.f32 0.24420136, %v3668_v11  ;;  %v9238_v29 = vld [vmem:[#allocation106_spill] sm:$0xff] }
 0x46e   :  { %v5071_v35 = vadd.f32 %v4943_v24, %v4686_v57  ;;  %v4688_v56 = vadd.f32 %v4560_v12, %v4303_v50  ;;  %v4305_v21 = vadd.f32 %v4177_v10, %v3920_v0  ;;  %v4947_v8 = vmul.f32 0.05448869, %v4819_v49  ;;  %v4831_v24 = vld [vmem:[#allocation2 + $0x450] sm:$0xff] }
 0x46f   :  { %5197 = vst.msk [vmem:[#allocation2 + $0x340] sm:$0xff] %vm23_vm0, %v5069_v37  ;;  %v3924_v40 = vadd.f32 %v3796_v4, %v3539_v44  ;;  %v4181_v55 = vmul.f32 0.40261996, %v4053_v31  ;;  %v4566_v3 = vmul.f32 0.24420136, %v4438_v53  ;;  %v3427_v10 = vld [vmem:[#allocation2 + $0x490] sm:$0xff] }
 0x470   :  { %v3540_v46 = vmul.f32 0.05448869, %v3412_v47  ;;  %5199 = vst.msk [vmem:[#allocation2 + $0x350] sm:$0xff] %vm23_vm0, %v5071_v35  ;;  %v5073_v52 = vadd.f32 %v4945_v18, %v4688_v56  ;;  %v4690_v59 = vadd.f32 %v4562_v23, %v4305_v21  ;;  %v3541_v26 = vmul.f32 0.05448869, %v3668_v11  ;;  %v3684_v47 = vld [vmem:[#allocation2 + $0x4a0] sm:$0xff] }
 0x471   :  { %v3798_v7 = vmul.f32 0.24420136, %v4053_v31  ;;  %v4309_v25 = vadd.f32 %v4181_v55, %v3924_v40  ;;  %v4951_v17 = vmul.f32 0.05448869, %v4823_v36  ;;  %v4183_v16 = vmul.f32 0.40261996, %v4438_v53 }
 0x472   :  { %v3925_v1 = vadd.f32 %v9235_v32, %v3540_v46  ;;  %5201 = vst.msk [vmem:[#allocation2 + $0x360] sm:$0xff] %vm23_vm0, %v5073_v52  ;;  %v5075_v6 = vadd.f32 %v4947_v8, %v4690_v59  ;;  %v4568_v5 = vmul.f32 0.24420136, %v4823_v36  ;;  %v3543_v58 = vmul.f32 0.05448869, %v4053_v31  ;;  %v4833_v31 = vld [vmem:[#allocation2 + $0x460] sm:$0xff] }
 0x473   :  { %v3926_v2 = vadd.f32 %v3798_v7, %v3541_v26  ;;  %v4694_v63 = vadd.f32 %v4566_v3, %v4309_v25  ;;  %v4953_v20 = vmul.f32 0.05448869, %v4825_v14  ;;  %v4570_v33 = vmul.f32 0.24420136, %v4825_v14  ;;  %v4835_v35 = vld [vmem:[#allocation2 + $0x470] sm:$0xff]  ;;  %v4454_v21 = vld [vmem:[#allocation2 + $0x4c0] sm:$0xff] }
 0x474   :  { %v4310_v42 = vadd.f32 %v9236_v60, %v3925_v1  ;;  %5203 = vst.msk [vmem:[#allocation2 + $0x370] sm:$0xff] %vm23_vm0, %v5075_v6  ;;  %v3928_v19 = vadd.f32 %v4566_v3, %v3543_v58  ;;  %v4185_v45 = vmul.f32 0.40261996, %v4823_v36  ;;  %v3545_v22 = vmul.f32 0.05448869, %v4438_v53  ;;  %v4069_v56 = vld [vmem:[#allocation2 + $0x4b0] sm:$0xff] }
 0x475   :  { %v4311_v62 = vadd.f32 %v4183_v16, %v3926_v2  ;;  %v5079_v38 = vadd.f32 %v4951_v17, %v4694_v63  ;;  %v4955_v61 = vmul.f32 0.05448869, %v4827_v28  ;;  %v4572_v54 = vmul.f32 0.24420136, %v4827_v28  ;;  %v3428_v3 = vld [vmem:[#allocation2 + $0x498] sm:$0xf] }
 0x476   :  { %v4695_v9 = vadd.f32 %v9237_v34, %v4310_v42  ;;  %v4313_v30 = vadd.f32 %v4185_v45, %v3928_v19  ;;  %v3930_v41 = vadd.f32 %v4568_v5, %v3545_v22  ;;  %v4187_v51 = vmul.f32 0.40261996, %v4825_v14  ;;  %v4839_v32 = vld [vmem:[#allocation2 + $0x4d0] sm:$0xff]  ;;  %v4841_v60 = vld [vmem:[#allocation2 + $0x4e0] sm:$0xff] }
 0x477   :  { %v4696_v13 = vadd.f32 %v4568_v5, %v4311_v62  ;;  %5207 = vst.msk [vmem:[#allocation2 + $0x3d0] sm:$0xff] %vm23_vm0, %v5079_v38  ;;  %v3932_v43 = vadd.f32 %v4951_v17, %v4570_v33  ;;  %v4189_v11 = vmul.f32 0.40261996, %v4827_v28  ;;  %v4574_v15 = vmul.f32 0.24420136, %v4829_v27  ;;  %v4843_v34 = vld [vmem:[#allocation2 + $0x4f0] sm:$0xff] }
 0x478   :  { %v5080_v39 = vadd.f32 %v9238_v29, %v4695_v9  ;;  %v4698_v12 = vadd.f32 %v4570_v33, %v4313_v30  ;;  %v4315_v0 = vadd.f32 %v4187_v51, %v3930_v41  ;;  %v4957_v49 = vmul.f32 0.05448869, %v4829_v27  ;;  %v9239_v33 = vld [vmem:[#allocation72_spill] sm:$0xff] }
 0x479   :  { %v5081_v48 = vadd.f32 %v4953_v20, %v4696_v13  ;;  %v4317_v53 = vadd.f32 %v4189_v11, %v3932_v43  ;;  %v4959_v57 = vmul.f32 0.05448869, %v4831_v24  ;;  %v3934_v50 = vadd.f32 %v4953_v20, %v4572_v54  ;;  %v9241_v11 = vld [vmem:[#allocation110_spill] sm:$0xff] }
 0x47a   :  { %5208 = vst.msk [vmem:[#allocation2 + $0x3d8] sm:$0xf] %vm25_vm1, %v5080_v39  ;;  %v4191_v18 = vmul.f32 0.40261996, %v4829_v27  ;;  %v5083_v37 = vadd.f32 %v4955_v61, %v4698_v12  ;;  %v4700_v23 = vadd.f32 %v4572_v54, %v4315_v0  ;;  %v4576_v44 = vmul.f32 0.24420136, %v4831_v24 }
 0x47b   :  { %5209 = vst.msk [vmem:[#allocation2 + $0x3e0] sm:$0xff] %vm23_vm0, %v5081_v48  ;;  %v3936_v4 = vadd.f32 %v4955_v61, %v4574_v15  ;;  %v4702_v8 = vadd.f32 %v4574_v15, %v4317_v53  ;;  %v4961_v40 = vmul.f32 0.05448869, %v4833_v31  ;;  %v4193_v55 = vmul.f32 0.40261996, %v4831_v24  ;;  %v9240_v61 = vld [vmem:[#allocation73_spill] sm:$0xff] }
 0x47c   :  { %v4319_v36 = vadd.f32 %v4191_v18, %v3934_v50  ;;  %5211 = vst.msk [vmem:[#allocation2 + $0x3f0] sm:$0xff] %vm23_vm0, %v5083_v37  ;;  %v5085_v46 = vadd.f32 %v4957_v49, %v4700_v23  ;;  %v4578_v52 = vmul.f32 0.24420136, %v4833_v31  ;;  %v3555_v59 = vmul.f32 0.05448869, %v3427_v10  ;;  %v4845_v39 = vld [vmem:[#allocation2 + $0x500] sm:$0xff] }
 0x47d   :  { %v3812_v26 = vmul.f32 0.24420136, %v3684_v47  ;;  %v5087_v7 = vadd.f32 %v4959_v57, %v4702_v8  ;;  %v4321_v25 = vadd.f32 %v4193_v55, %v3936_v4  ;;  %v4963_v17 = vmul.f32 0.05448869, %v4835_v35  ;;  %v4847_v57 = vld [vmem:[#allocation2 + $0x510] sm:$0xff] }
 0x47e   :  { %v4704_v14 = vadd.f32 %v4576_v44, %v4319_v36  ;;  %5213 = vst.msk [vmem:[#allocation2 + $0x400] sm:$0xff] %vm23_vm0, %v5085_v46  ;;  %v4197_v16 = vmul.f32 0.40261996, %v4069_v56  ;;  %v4582_v6 = vmul.f32 0.24420136, %v4454_v21  ;;  %v9242_v50 = vld [vmem:[#allocation111_spill] sm:$0xff] }
 0x47f   :  { %v3940_v1 = vadd.f32 %v3812_v26, %v3555_v59  ;;  %v3556_v2 = vmul.f32 0.05448869, %v3428_v3  ;;  %5215 = vst.msk [vmem:[#allocation2 + $0x410] sm:$0xff] %vm23_vm0, %v5087_v7  ;;  %v4706_v58 = vadd.f32 %v4578_v52, %v4321_v25  ;;  %v3557_v28 = vmul.f32 0.05448869, %v3684_v47  ;;  %v3443_v55 = vld [vmem:[#allocation2 + $0x550] sm:$0xff] }
 0x480   :  { %v5089_v5 = vadd.f32 %v4961_v40, %v4704_v14  ;;  %v3814_v63 = vmul.f32 0.24420136, %v4069_v56  ;;  %v4967_v20 = vmul.f32 0.05448869, %v4839_v32  ;;  %v4199_v19 = vmul.f32 0.40261996, %v4454_v21 }
 0x481   :  { %v4325_v42 = vadd.f32 %v4197_v16, %v3940_v1  ;;  %v3941_v62 = vadd.f32 %v9239_v33, %v3556_v2  ;;  %v5091_v45 = vadd.f32 %v4963_v17, %v4706_v58  ;;  %v4584_v27 = vmul.f32 0.24420136, %v4839_v32  ;;  %v3700_v3 = vld [vmem:[#allocation2 + $0x560] sm:$0xff]  ;;  %v4851_v7 = vld [vmem:[#allocation2 + $0x530] sm:$0xff] }
 0x482   :  { %5217 = vst.msk [vmem:[#allocation2 + $0x420] sm:$0xff] %vm23_vm0, %v5089_v5  ;;  %v3942_v22 = vadd.f32 %v3814_v63, %v3557_v28  ;;  %v3559_v38 = vmul.f32 0.05448869, %v4069_v56  ;;  %v4969_v13 = vmul.f32 0.05448869, %v4841_v60  ;;  %v4849_v56 = vld [vmem:[#allocation2 + $0x520] sm:$0xff] }
 0x483   :  { %v4710_v9 = vadd.f32 %v4582_v6, %v4325_v42  ;;  %v4326_v54 = vadd.f32 %v9240_v61, %v3941_v62  ;;  %v4586_v30 = vmul.f32 0.24420136, %v4841_v60  ;;  %5219 = vst.msk [vmem:[#allocation2 + $0x430] sm:$0xff] %vm23_vm0, %v5091_v45  ;;  %v4201_v24 = vmul.f32 0.40261996, %v4839_v32  ;;  %v4085_v14 = vld [vmem:[#allocation2 + $0x570] sm:$0xff] }
 0x484   :  { %v4327_v41 = vadd.f32 %v4199_v19, %v3942_v22  ;;  %v3944_v51 = vadd.f32 %v4582_v6, %v3559_v38  ;;  %v3561_v29 = vmul.f32 0.05448869, %v4454_v21  ;;  %v4971_v48 = vmul.f32 0.05448869, %v4843_v34  ;;  %v4470_v25 = vld [vmem:[#allocation2 + $0x580] sm:$0xff]  ;;  %v4855_v33 = vld [vmem:[#allocation2 + $0x590] sm:$0xff] }
 0x485   :  { %v5095_v43 = vadd.f32 %v4967_v20, %v4710_v9  ;;  %v4711_v15 = vadd.f32 %v9241_v11, %v4326_v54  ;;  %v4588_v12 = vmul.f32 0.24420136, %v4843_v34  ;;  %v4203_v53 = vmul.f32 0.40261996, %v4841_v60  ;;  %v3444_v6 = vld [vmem:[#allocation2 + $0x558] sm:$0xf] }
 0x486   :  { %v4712_v0 = vadd.f32 %v4584_v27, %v4327_v41  ;;  %v4329_v49 = vadd.f32 %v4201_v24, %v3944_v51  ;;  %v3946_v31 = vadd.f32 %v4584_v27, %v3561_v29  ;;  %v3948_v10 = vadd.f32 %v4967_v20, %v4586_v30  ;;  %v4857_v61 = vld [vmem:[#allocation2 + $0x5a0] sm:$0xff]  ;;  %v4859_v11 = vld [vmem:[#allocation2 + $0x5b0] sm:$0xff] }
 0x487   :  { %5223 = vst.msk [vmem:[#allocation2 + $0x490] sm:$0xff] %vm23_vm0, %v5095_v43  ;;  %v5096_v18 = vadd.f32 %v9242_v50, %v4711_v15  ;;  %v4205_v47 = vmul.f32 0.40261996, %v4843_v34  ;;  %v4590_v37 = vmul.f32 0.24420136, %v4845_v39  ;;  %v3950_v36 = vadd.f32 %v4969_v13, %v4588_v12 }
 0x488   :  { %v5097_v23 = vadd.f32 %v4969_v13, %v4712_v0  ;;  %v4714_v44 = vadd.f32 %v4586_v30, %v4329_v49  ;;  %v4331_v4 = vadd.f32 %v4203_v53, %v3946_v31  ;;  %v4973_v35 = vmul.f32 0.05448869, %v4845_v39  ;;  %v9243_v30 = vld [vmem:[#allocation75_spill] sm:$0xff] }
 0x489   :  { %5224 = vst.msk [vmem:[#allocation2 + $0x498] sm:$0xf] %vm25_vm1, %v5096_v18  ;;  %v4333_v21 = vadd.f32 %v4205_v47, %v3948_v10  ;;  %v4975_v8 = vmul.f32 0.05448869, %v4847_v57  ;;  %v4207_v40 = vmul.f32 0.40261996, %v4845_v39  ;;  %v3952_v26 = vadd.f32 %v4971_v48, %v4590_v37 }
 0x48a   :  { %5225 = vst.msk [vmem:[#allocation2 + $0x4a0] sm:$0xff] %vm23_vm0, %v5097_v23  ;;  %v5099_v46 = vadd.f32 %v4971_v48, %v4714_v44  ;;  %v4716_v52 = vadd.f32 %v4588_v12, %v4331_v4  ;;  %v4592_v59 = vmul.f32 0.24420136, %v4847_v57  ;;  %v4977_v1 = vmul.f32 0.05448869, %v4849_v56  ;;  %v9244_v48 = vld [vmem:[#allocation154_spill] sm:$0xff] }
 0x48b   :  { %v4718_v17 = vadd.f32 %v4590_v37, %v4333_v21  ;;  %v4335_v32 = vadd.f32 %v4207_v40, %v3950_v36  ;;  %v4209_v16 = vmul.f32 0.40261996, %v4847_v57  ;;  %v4594_v5 = vmul.f32 0.24420136, %v4849_v56  ;;  %v4861_v18 = vld [vmem:[#allocation2 + $0x5c0] sm:$0xff]  ;;  %v9245_v47 = vld [vmem:[#allocation76_spill] sm:$0xff] }
 0x48c   :  { %5227 = vst.msk [vmem:[#allocation2 + $0x4b0] sm:$0xff] %vm23_vm0, %v5099_v46  ;;  %v5101_v2 = vadd.f32 %v4973_v35, %v4716_v52  ;;  %v3571_v58 = vmul.f32 0.05448869, %v3443_v55  ;;  %v3828_v28 = vmul.f32 0.24420136, %v3700_v3  ;;  %v9246_v36 = vld [vmem:[#allocation80_spill] sm:$0xff] }
 0x48d   :  { %v5103_v63 = vadd.f32 %v4975_v8, %v4718_v17  ;;  %v4720_v60 = vadd.f32 %v4592_v59, %v4335_v32  ;;  %v4337_v42 = vadd.f32 %v4209_v16, %v3952_v26  ;;  %v4979_v20 = vmul.f32 0.05448869, %v4851_v7  ;;  %v4863_v8 = vld [vmem:[#allocation2 + $0x5d0] sm:$0xff]  ;;  %v5253_v16 = vld [vmem:[#allocation2] sm:$0xff] }
 0x48e   :  { %5229 = vst.msk [vmem:[#allocation2 + $0x4c0] sm:$0xff] %vm23_vm0, %v5101_v2  ;;  %v3956_v62 = vadd.f32 %v3828_v28, %v3571_v58  ;;  %v4213_v19 = vmul.f32 0.40261996, %v4085_v14  ;;  %v4598_v45 = vmul.f32 0.24420136, %v4470_v25 }
 0x48f   :  { %v3572_v22 = vmul.f32 0.05448869, %v3444_v6  ;;  %5231 = vst.msk [vmem:[#allocation2 + $0x4d0] sm:$0xff] %vm23_vm0, %v5103_v63  ;;  %v5105_v27 = vadd.f32 %v4977_v1, %v4720_v60  ;;  %v4722_v38 = vadd.f32 %v4594_v5, %v4337_v42  ;;  %v3573_v34 = vmul.f32 0.05448869, %v3700_v3  ;;  %v5381_v6 = vld [vmem:[#allocation2 + $0x1] sm:$0xff] }
 0x490   :  { %v3830_v9 = vmul.f32 0.24420136, %v4085_v14  ;;  %v4341_v54 = vadd.f32 %v4213_v19, %v3956_v62  ;;  %v4983_v13 = vmul.f32 0.05448869, %v4855_v33  ;;  %v4215_v51 = vmul.f32 0.40261996, %v4470_v25 }
 0x491   :  { %v3957_v41 = vadd.f32 %v9243_v30, %v3572_v22  ;;  %5233 = vst.msk [vmem:[#allocation2 + $0x4e0] sm:$0xff] %vm23_vm0, %v5105_v27  ;;  %v5107_v24 = vadd.f32 %v4979_v20, %v4722_v38  ;;  %v4600_v39 = vmul.f32 0.24420136, %v4855_v33  ;;  %v3575_v43 = vmul.f32 0.05448869, %v4085_v14  ;;  %v4865_v14 = vld [vmem:[#allocation2 + $0x5e0] sm:$0xff] }
 0x492   :  { %v3958_v29 = vadd.f32 %v3830_v9, %v3573_v34  ;;  %v4726_v15 = vadd.f32 %v4598_v45, %v4341_v54  ;;  %v4985_v0 = vmul.f32 0.05448869, %v4857_v61  ;;  %v4602_v49 = vmul.f32 0.24420136, %v4857_v61  ;;  %v4867_v63 = vld [vmem:[#allocation2 + $0x5f0] sm:$0xff]  ;;  %v5573_v60 = vld [vmem:[#allocation2 + $0x2] sm:$0xff] }
 0x493   :  { %v4342_v12 = vadd.f32 %v9244_v48, %v3957_v41  ;;  %5235 = vst.msk [vmem:[#allocation2 + $0x4f0] sm:$0xff] %vm23_vm0, %v5107_v24  ;;  %v3960_v53 = vadd.f32 %v4598_v45, %v3575_v43  ;;  %v4217_v57 = vmul.f32 0.40261996, %v4855_v33  ;;  %v3577_v50 = vmul.f32 0.05448869, %v4470_v25  ;;  %v5765_v19 = vld [vmem:[#allocation2 + $0x3] sm:$0xff] }
 0x494   :  { %v4343_v31 = vadd.f32 %v4215_v51, %v3958_v29  ;;  %v5111_v10 = vadd.f32 %v4983_v13, %v4726_v15  ;;  %v4987_v23 = vmul.f32 0.05448869, %v4859_v11  ;;  %v4604_v44 = vmul.f32 0.24420136, %v4859_v11  ;;  %v5957_v45 = vld [vmem:[#allocation2 + $0x4] sm:$0xff]  ;;  %v5254_v22 = vld [vmem:[#allocation2 + $0x10] sm:$0xff] }
 0x495   :  { %v4727_v37 = vadd.f32 %v9245_v47, %v4342_v12  ;;  %v4345_v35 = vadd.f32 %v4217_v57, %v3960_v53  ;;  %v3962_v56 = vadd.f32 %v4600_v39, %v3577_v50  ;;  %v4219_v21 = vmul.f32 0.40261996, %v4857_v61  ;;  %v5382_v27 = vld [vmem:[#allocation2 + $0x11] sm:$0xff]  ;;  %v5383_v48 = vld [vmem:[#allocation2 + $0x21] sm:$0xff] }
 0x496   :  { %v4728_v4 = vadd.f32 %v4600_v39, %v4343_v31  ;;  %5239 = vst.msk [vmem:[#allocation2 + $0x550] sm:$0xff] %vm23_vm0, %v5111_v10  ;;  %v3964_v55 = vadd.f32 %v4983_v13, %v4602_v49  ;;  %v4221_v3 = vmul.f32 0.40261996, %v4859_v11  ;;  %v4606_v46 = vmul.f32 0.24420136, %v4861_v18  ;;  %v5574_v54 = vld [vmem:[#allocation2 + $0x12] sm:$0xff] }
 0x497   :  { %v5112_v40 = vadd.f32 %v9246_v36, %v4727_v37  ;;  %v4730_v59 = vadd.f32 %v4602_v49, %v4345_v35  ;;  %v4347_v26 = vadd.f32 %v4219_v21, %v3962_v56  ;;  %v4989_v7 = vmul.f32 0.05448869, %v4861_v18  ;;  %v5766_v24 = vld [vmem:[#allocation2 + $0x13] sm:$0xff]  ;;  %v5255_v39 = vld [vmem:[#allocation2 + $0x20] sm:$0xff] }
 0x498   :  { %v5113_v52 = vadd.f32 %v4985_v0, %v4728_v4  ;;  %v4349_v25 = vadd.f32 %v4221_v3, %v3964_v55  ;;  %v4991_v17 = vmul.f32 0.05448869, %v4863_v8  ;;  %v3966_v32 = vadd.f32 %v4985_v0, %v4604_v44  ;;  %v5958_v29 = vld [vmem:[#allocation2 + $0x14] sm:$0xff]  ;;  %v5575_v12 = vld [vmem:[#allocation2 + $0x22] sm:$0xff] }
 0x499   :  { %5240 = vst.msk [vmem:[#allocation2 + $0x558] sm:$0xf] %vm25_vm1, %v5112_v40  ;;  %v4223_v1 = vmul.f32 0.40261996, %v4861_v18  ;;  %v5115_v2 = vadd.f32 %v4987_v23, %v4730_v59  ;;  %v4732_v5 = vadd.f32 %v4604_v44, %v4347_v26  ;;  %v4608_v58 = vmul.f32 0.24420136, %v4863_v8 }
 0x49a   :  { %5241 = vst.msk [vmem:[#allocation2 + $0x560] sm:$0xff] %vm23_vm0, %v5113_v52  ;;  %v3968_v28 = vadd.f32 %v4987_v23, %v4606_v46  ;;  %v4734_v42 = vadd.f32 %v4606_v46, %v4349_v25  ;;  %v4225_v33 = vmul.f32 0.40261996, %v4863_v8  ;;  %v4610_v62 = vmul.f32 0.24420136, %v4865_v14  ;;  %v5767_v53 = vld [vmem:[#allocation2 + $0x23] sm:$0xff] }
 0x49b   :  { %v4351_v20 = vadd.f32 %v4223_v1, %v3966_v32  ;;  %5243 = vst.msk [vmem:[#allocation2 + $0x570] sm:$0xff] %vm23_vm0, %v5115_v2  ;;  %v5117_v38 = vadd.f32 %v4989_v7, %v4732_v5  ;;  %v4993_v34 = vmul.f32 0.05448869, %v4865_v14  ;;  %v5317_v9 = vmul.f32 0.05448869, %v5253_v16  ;;  %v5256_v57 = vld [vmem:[#allocation2 + $0x30] sm:$0xff] }
 0x49c   :  { %v5445_v61 = vmul.f32 0.24420136, %v5381_v6  ;;  %v5119_v13 = vadd.f32 %v4991_v17, %v4734_v42  ;;  %v4353_v41 = vadd.f32 %v4225_v33, %v3968_v28  ;;  %v4995_v51 = vmul.f32 0.05448869, %v4867_v63  ;;  %v5384_v50 = vld [vmem:[#allocation2 + $0x31] sm:$0xff]  ;;  %v5959_v21 = vld [vmem:[#allocation2 + $0x24] sm:$0xff] }
 0x49d   :  { %v4736_v30 = vadd.f32 %v4608_v58, %v4351_v20  ;;  %5245 = vst.msk [vmem:[#allocation2 + $0x580] sm:$0xff] %vm23_vm0, %v5117_v38  ;;  %v5637_v11 = vmul.f32 0.40261996, %v5573_v60  ;;  %v5318_v15 = vmul.f32 0.05448869, %v5254_v22  ;;  %v5576_v18 = vld [vmem:[#allocation2 + $0x32] sm:$0xff] }
 0x49e   :  { %v5509_v43 = vadd.f32 %v5445_v61, %v5317_v9  ;;  %5247 = vst.msk [vmem:[#allocation2 + $0x590] sm:$0xff] %vm23_vm0, %v5119_v13  ;;  %v4738_v49 = vadd.f32 %v4610_v62, %v4353_v41  ;;  %v5446_v31 = vmul.f32 0.24420136, %v5382_v27  ;;  %v5829_v47 = vmul.f32 0.24420136, %v5765_v19  ;;  %v5768_v8 = vld [vmem:[#allocation2 + $0x33] sm:$0xff] }
 0x49f   :  { %v5121_v0 = vadd.f32 %v4993_v34, %v4736_v30  ;;  %v6021_v37 = vmul.f32 0.05448869, %v5957_v45  ;;  %v5319_v23 = vmul.f32 0.05448869, %v5255_v39  ;;  %v5638_v35 = vmul.f32 0.40261996, %v5574_v54 }
 0x4a0   :  { %v5701_v10 = vadd.f32 %v5637_v11, %v5509_v43  ;;  %v5123_v44 = vadd.f32 %v4995_v51, %v4738_v49  ;;  %v5510_v4 = vadd.f32 %v5446_v31, %v5318_v15  ;;  %v5447_v56 = vmul.f32 0.24420136, %v5383_v48  ;;  %v5257_v36 = vld [vmem:[#allocation2 + $0x40] sm:$0xff]  ;;  %v5960_v25 = vld [vmem:[#allocation2 + $0x34] sm:$0xff] }
 0x4a1   :  { %5249 = vst.msk [vmem:[#allocation2 + $0x5a0] sm:$0xff] %vm23_vm0, %v5121_v0  ;;  %v5385_v40 = vld [vmem:[#allocation2 + $0x41] sm:$0xff]  ;;  %v5830_v3 = vmul.f32 0.24420136, %v5766_v24  ;;  %v6022_v46 = vmul.f32 0.05448869, %v5958_v29 }
 0x4a2   :  { %v5893_v55 = vadd.f32 %v5829_v47, %v5701_v10  ;;  %v5320_v52 = vmul.f32 0.05448869, %v5256_v57  ;;  %5251 = vst.msk [vmem:[#allocation2 + $0x5b0] sm:$0xff] %vm23_vm0, %v5123_v44  ;;  %v5702_v59 = vadd.f32 %v5638_v35, %v5510_v4  ;;  %v5511_v26 = vadd.f32 %v5447_v56, %v5319_v23  ;;  %v5577_v17 = vld [vmem:[#allocation2 + $0x42] sm:$0xff]  ;;  %v5258_v60 = vld [vmem:[#allocation2 + $0x50] sm:$0xff] }
 0x4a3   :  { %v5639_v7 = vmul.f32 0.40261996, %v5575_v12  ;;  %v5448_v14 = vmul.f32 0.24420136, %v5384_v50  ;;  %v5831_v1 = vmul.f32 0.24420136, %v5767_v53 }
 0x4a4   :  { %v6085_v32 = vadd.f32 %v6021_v37, %v5893_v55  ;;  %v5640_v16 = vmul.f32 0.40261996, %v5576_v18  ;;  %v5321_v6 = vmul.f32 0.05448869, %v5257_v36  ;;  %v5769_v2 = vld [vmem:[#allocation2 + $0x43] sm:$0xff]  ;;  %v5894_v5 = vadd.f32 %v5830_v3, %v5702_v59  ;;  %v5386_v42 = vld [vmem:[#allocation2 + $0x51] sm:$0xff] }
 0x4a5   :  { %v5703_v58 = vadd.f32 %v5639_v7, %v5511_v26  ;;  %v5512_v28 = vadd.f32 %v5448_v14, %v5320_v52  ;;  %v5449_v63 = vmul.f32 0.24420136, %v5385_v40  ;;  %v5578_v20 = vld [vmem:[#allocation2 + $0x52] sm:$0xff]  ;;  %v6023_v33 = vmul.f32 0.05448869, %v5959_v21  ;;  %v5961_v45 = vld [vmem:[#allocation2 + $0x44] sm:$0xff] }
 0x4a6   :  { %6149 = vst.msk [vmem:[#allocation6] sm:$0xff] %vm23_vm0, %v6085_v32  ;;  %v5832_v62 = vmul.f32 0.24420136, %v5768_v8  ;;  %v5641_v19 = vmul.f32 0.40261996, %v5577_v17  ;;  %v5770_v22 = vld [vmem:[#allocation2 + $0x53] sm:$0xff]  ;;  %v6086_v27 = vadd.f32 %v6022_v46, %v5894_v5 }
 0x4a7   :  { %v5895_v38 = vadd.f32 %v5831_v1, %v5703_v58  ;;  %v5704_v34 = vadd.f32 %v5640_v16, %v5512_v28  ;;  %v5513_v9 = vadd.f32 %v5449_v63, %v5321_v6  ;;  %v5259_v61 = vld [vmem:[#allocation2 + $0x60] sm:$0xff]  ;;  %v6024_v30 = vmul.f32 0.05448869, %v5960_v25  ;;  %v5962_v24 = vld [vmem:[#allocation2 + $0x54] sm:$0xff] }
 0x4a8   :  { %v5387_v54 = vld [vmem:[#allocation2 + $0x61] sm:$0xff]  ;;  %v5322_v41 = vmul.f32 0.05448869, %v5258_v60  ;;  %v5450_v51 = vmul.f32 0.24420136, %v5386_v42  ;;  %6150 = vst.msk [vmem:[#allocation6 + $0x8] sm:$0xff] %vm23_vm0, %v6086_v27 }
 0x4a9   :  { %v5579_v13 = vld [vmem:[#allocation2 + $0x62] sm:$0xff]  ;;  %v6087_v39 = vadd.f32 %v6023_v33, %v5895_v38  ;;  %v5896_v43 = vadd.f32 %v5832_v62, %v5704_v34  ;;  %v5705_v11 = vadd.f32 %v5641_v19, %v5513_v9  ;;  %v5833_v15 = vmul.f32 0.24420136, %v5769_v2  ;;  %v5260_v12 = vld [vmem:[#allocation2 + $0x70] sm:$0xff] }
 0x4aa   :  { %v5771_v29 = vld [vmem:[#allocation2 + $0x63] sm:$0xff]  ;;  %v5388_v0 = vld [vmem:[#allocation2 + $0x71] sm:$0xff]  ;;  %v5514_v49 = vadd.f32 %v5450_v51, %v5322_v41  ;;  %v5642_v31 = vmul.f32 0.40261996, %v5578_v20  ;;  %v5323_v53 = vmul.f32 0.05448869, %v5259_v61 }
 0x4ab   :  { %v5963_v48 = vld [vmem:[#allocation2 + $0x64] sm:$0xff]  ;;  %v5451_v57 = vmul.f32 0.24420136, %v5387_v54  ;;  %v5580_v50 = vld [vmem:[#allocation2 + $0x72] sm:$0xff]  ;;  %6151 = vst.msk [vmem:[#allocation6 + $0x10] sm:$0xff] %vm23_vm0, %v6087_v39  ;;  %v6088_v10 = vadd.f32 %v6024_v30, %v5896_v43  ;;  %v5897_v47 = vadd.f32 %v5833_v15, %v5705_v11 }
 0x4ac   :  { %v5772_v18 = vld [vmem:[#allocation2 + $0x73] sm:$0xff]  ;;  %v6025_v37 = vmul.f32 0.05448869, %v5961_v45  ;;  %v5834_v23 = vmul.f32 0.24420136, %v5770_v22  ;;  %v5261_v4 = vld [vmem:[#allocation2 + $0xc0] sm:$0xff]  ;;  %v5706_v56 = vadd.f32 %v5642_v31, %v5514_v49 }
 0x4ad   :  { %v5964_v44 = vld [vmem:[#allocation2 + $0x74] sm:$0xff]  ;;  %v5389_v35 = vld [vmem:[#allocation2 + $0xc1] sm:$0xff]  ;;  %v5515_v21 = vadd.f32 %v5451_v57, %v5323_v53  ;;  %v5643_v8 = vmul.f32 0.40261996, %v5579_v13  ;;  %v5324_v36 = vmul.f32 0.05448869, %v5260_v12 }
 0x4ae   :  { %v5581_v40 = vld [vmem:[#allocation2 + $0xc2] sm:$0xff]  ;;  %6152 = vst.msk [vmem:[#allocation6 + $0x18] sm:$0xff] %vm23_vm0, %v6088_v10  ;;  %v6089_v46 = vadd.f32 %v6025_v37, %v5897_v47  ;;  %v6026_v52 = vmul.f32 0.05448869, %v5962_v24  ;;  %v5835_v59 = vmul.f32 0.24420136, %v5771_v29  ;;  %v5898_v14 = vadd.f32 %v5834_v23, %v5706_v56 }
 0x4af   :  { %v5269_v55 = vld [vmem:[#allocation2 + $0x180] sm:$0xff]  ;;  %v5452_v26 = vmul.f32 0.24420136, %v5388_v0  ;;  %v5707_v25 = vadd.f32 %v5643_v8, %v5515_v21  ;;  %v6027_v17 = vmul.f32 0.05448869, %v5963_v48 }
 0x4b0   :  { %v5397_v3 = vld [vmem:[#allocation2 + $0x181] sm:$0xff]  ;;  %v5325_v32 = vmul.f32 0.05448869, %v5261_v4  ;;  %6153 = vst.msk [vmem:[#allocation6 + $0x20] sm:$0xff] %vm23_vm0, %v6089_v46  ;;  %v5644_v2 = vmul.f32 0.40261996, %v5580_v50  ;;  %v6090_v63 = vadd.f32 %v6026_v52, %v5898_v14 }
 0x4b1   :  { %v5773_v7 = vld [vmem:[#allocation2 + $0xc3] sm:$0xff]  ;;  %v5516_v6 = vadd.f32 %v5452_v26, %v5324_v36  ;;  %v5836_v5 = vmul.f32 0.24420136, %v5772_v18  ;;  %v5453_v58 = vmul.f32 0.24420136, %v5389_v35  ;;  %v5899_v60 = vadd.f32 %v5835_v59, %v5707_v25 }
 0x4b2   :  { %v5589_v1 = vld [vmem:[#allocation2 + $0x182] sm:$0xff]  ;;  %v6028_v42 = vmul.f32 0.05448869, %v5964_v44  ;;  %v5333_v20 = vmul.f32 0.05448869, %v5269_v55  ;;  %6154 = vst.msk [vmem:[#allocation6 + $0x28] sm:$0xff] %vm23_vm0, %v6090_v63 }
 0x4b3   :  { %v5277_v16 = vld [vmem:[#allocation2 + $0x240] sm:$0xff]  ;;  %v5708_v19 = vadd.f32 %v5644_v2, %v5516_v6  ;;  %v5517_v45 = vadd.f32 %v5453_v58, %v5325_v32  ;;  %v5645_v22 = vmul.f32 0.40261996, %v5581_v40  ;;  %v5461_v27 = vmul.f32 0.24420136, %v5397_v3 }
 0x4b4   :  { %v5965_v28 = vld [vmem:[#allocation2 + $0xc4] sm:$0xff]  ;;  %v6091_v9 = vadd.f32 %v6027_v17, %v5899_v60  ;;  %v5837_v61 = vmul.f32 0.24420136, %v5773_v7  ;;  %v5653_v54 = vmul.f32 0.40261996, %v5589_v1 }
 0x4b5   :  { %v5781_v33 = vld [vmem:[#allocation2 + $0x183] sm:$0xff]  ;;  %v5341_v13 = vmul.f32 0.05448869, %v5277_v16  ;;  %v5900_v41 = vadd.f32 %v5836_v5, %v5708_v19  ;;  %v5709_v51 = vadd.f32 %v5645_v22, %v5517_v45  ;;  %v5525_v24 = vadd.f32 %v5461_v27, %v5333_v20  ;;  %v5390_v20 = vld [vmem:[#allocation2 + $0xd1] sm:$0xff] }
 0x4b6   :  { %v5405_v62 = vld [vmem:[#allocation2 + $0x241] sm:$0xff]  ;;  %6155 = vst.msk [vmem:[#allocation6 + $0x30] sm:$0xff] %vm23_vm0, %v6091_v9  ;;  %v6029_v15 = vmul.f32 0.05448869, %v5965_v28  ;;  %v5845_v48 = vmul.f32 0.24420136, %v5781_v33 }
 0x4b7   :  { %v5973_v38 = vld [vmem:[#allocation2 + $0x184] sm:$0xff]  ;;  %v5469_v29 = vmul.f32 0.24420136, %v5405_v62  ;;  %v6092_v31 = vadd.f32 %v6028_v42, %v5900_v41  ;;  %v5901_v53 = vadd.f32 %v5837_v61, %v5709_v51  ;;  %v5717_v57 = vadd.f32 %v5653_v54, %v5525_v24  ;;  %v5262_v42 = vld [vmem:[#allocation2 + $0xd0] sm:$0xff] }
 0x4b8   :  { %v5597_v34 = vld [vmem:[#allocation2 + $0x242] sm:$0xff]  ;;  %v6037_v37 = vmul.f32 0.05448869, %v5973_v38  ;;  %v5582_v61 = vld [vmem:[#allocation2 + $0xd2] sm:$0xff] }
 0x4b9   :  { %v5789_v30 = vld [vmem:[#allocation2 + $0x243] sm:$0xff]  ;;  %v5661_v12 = vmul.f32 0.40261996, %v5597_v34  ;;  %v5533_v50 = vadd.f32 %v5469_v29, %v5341_v13  ;;  %6156 = vst.msk [vmem:[#allocation6 + $0x38] sm:$0xff] %vm23_vm0, %v6092_v31  ;;  %v6093_v56 = vadd.f32 %v6029_v15, %v5901_v53  ;;  %v5909_v21 = vadd.f32 %v5845_v48, %v5717_v57  ;;  %v5774_v15 = vld [vmem:[#allocation2 + $0xd3] sm:$0xff] }
 0x4ba   :  { %v5285_v39 = vld [vmem:[#allocation2 + $0x300] sm:$0xff]  ;;  %v5853_v36 = vmul.f32 0.24420136, %v5789_v30  ;;  %v5454_v31 = vmul.f32 0.24420136, %v5390_v20  ;;  %v5966_v53 = vld [vmem:[#allocation2 + $0xd4] sm:$0xff] }
 0x4bb   :  { %v5413_v43 = vld [vmem:[#allocation2 + $0x301] sm:$0xff]  ;;  %v5349_v23 = vmul.f32 0.05448869, %v5285_v39  ;;  %v5725_v8 = vadd.f32 %v5661_v12, %v5533_v50  ;;  %6157 = vst.msk [vmem:[#allocation6 + $0x40] sm:$0xff] %vm23_vm0, %v6093_v56  ;;  %v6101_v25 = vadd.f32 %v6037_v37, %v5909_v21  ;;  %v5264_v56 = vld [vmem:[#allocation2 + $0xf0] sm:$0xff] }
 0x4bc   :  { %v5605_v11 = vld [vmem:[#allocation2 + $0x302] sm:$0xff]  ;;  %v5477_v44 = vmul.f32 0.24420136, %v5413_v43  ;;  %v5392_v21 = vld [vmem:[#allocation2 + $0xf1] sm:$0xff] }
 0x4bd   :  { %v5981_v0 = vld [vmem:[#allocation2 + $0x244] sm:$0xff]  ;;  %v5669_v52 = vmul.f32 0.40261996, %v5605_v11  ;;  %v5917_v17 = vadd.f32 %v5853_v36, %v5725_v8  ;;  %6165 = vst.msk [vmem:[#allocation6 + $0x80] sm:$0xff] %vm23_vm0, %v6101_v25  ;;  %v5326_v11 = vmul.f32 0.05448869, %v5262_v42 }
 0x4be   :  { %v5797_v49 = vld [vmem:[#allocation2 + $0x303] sm:$0xff]  ;;  %v5541_v46 = vadd.f32 %v5477_v44, %v5349_v23  ;;  %v6045_v32 = vmul.f32 0.05448869, %v5981_v0  ;;  %v5584_v8 = vld [vmem:[#allocation2 + $0xf2] sm:$0xff] }
 0x4bf   :  { %v5293_v18 = vld [vmem:[#allocation2 + $0x3c0] sm:$0xff]  ;;  %v5861_v1 = vmul.f32 0.24420136, %v5797_v49  ;;  %v5266_v42 = vld [vmem:[#allocation2 + $0x110] sm:$0xff] }
 0x4c0   :  { %v5421_v10 = vld [vmem:[#allocation2 + $0x3c1] sm:$0xff]  ;;  %v5357_v59 = vmul.f32 0.05448869, %v5293_v18  ;;  %v5733_v5 = vadd.f32 %v5669_v52, %v5541_v46  ;;  %v6109_v33 = vadd.f32 %v6045_v32, %v5917_v17  ;;  %v5776_v46 = vld [vmem:[#allocation2 + $0xf3] sm:$0xff]  ;;  %v6030_v32 = vmul.f32 0.05448869, %v5966_v53 }
 0x4c1   :  { %v5613_v47 = vld [vmem:[#allocation2 + $0x3c2] sm:$0xff]  ;;  %v5485_v26 = vmul.f32 0.24420136, %v5421_v10  ;;  %v5646_v10 = vmul.f32 0.40261996, %v5582_v61  ;;  %v5394_v20 = vld [vmem:[#allocation2 + $0x111] sm:$0xff] }
 0x4c2   :  { %v5989_v4 = vld [vmem:[#allocation2 + $0x304] sm:$0xff]  ;;  %v5677_v28 = vmul.f32 0.40261996, %v5613_v47  ;;  %v5925_v27 = vadd.f32 %v5861_v1, %v5733_v5  ;;  %6173 = vst.msk [vmem:[#allocation6 + $0xc0] sm:$0xff] %vm23_vm0, %v6109_v33  ;;  %v5328_v1 = vmul.f32 0.05448869, %v5264_v56 }
 0x4c3   :  { %v5805_v35 = vld [vmem:[#allocation2 + $0x3c3] sm:$0xff]  ;;  %v5549_v58 = vadd.f32 %v5485_v26, %v5357_v59  ;;  %v6053_v62 = vmul.f32 0.05448869, %v5989_v4  ;;  %v5518_v4 = vadd.f32 %v5454_v31, %v5326_v11  ;;  %v5840_v61 = vmul.f32 0.24420136, %v5776_v46  ;;  %v5396_v11 = vld [vmem:[#allocation2 + $0x131] sm:$0xff] }
 0x4c4   :  { %v5997_v40 = vld [vmem:[#allocation2 + $0x3c4] sm:$0xff]  ;;  %v5869_v19 = vmul.f32 0.24420136, %v5805_v35 }
 0x4c5   :  { %v5301_v55 = vld [vmem:[#allocation2 + $0x480] sm:$0xff]  ;;  %v5741_v38 = vadd.f32 %v5677_v28, %v5549_v58  ;;  %v6061_v34 = vmul.f32 0.05448869, %v5997_v40  ;;  %v6117_v29 = vadd.f32 %v6053_v62, %v5925_v27  ;;  %v5838_v40 = vmul.f32 0.24420136, %v5774_v15  ;;  %v5778_v27 = vld [vmem:[#allocation2 + $0x113] sm:$0xff] }
 0x4c6   :  { %v5429_v3 = vld [vmem:[#allocation2 + $0x481] sm:$0xff]  ;;  %v5365_v63 = vmul.f32 0.05448869, %v5301_v55  ;;  %v5710_v26 = vadd.f32 %v5646_v10, %v5518_v4  ;;  %v5648_v62 = vmul.f32 0.40261996, %v5584_v8  ;;  %v5270_v10 = vld [vmem:[#allocation2 + $0x190] sm:$0xff] }
 0x4c7   :  { %v5621_v7 = vld [vmem:[#allocation2 + $0x482] sm:$0xff]  ;;  %v5493_v45 = vmul.f32 0.24420136, %v5429_v3  ;;  %v5933_v39 = vadd.f32 %v5869_v19, %v5741_v38  ;;  %6181 = vst.msk [vmem:[#allocation6 + $0x100] sm:$0xff] %vm23_vm0, %v6117_v29  ;;  %v5330_v29 = vmul.f32 0.05448869, %v5266_v42 }
 0x4c8   :  { %v5813_v14 = vld [vmem:[#allocation2 + $0x483] sm:$0xff]  ;;  %v5685_v30 = vmul.f32 0.40261996, %v5621_v7  ;;  %v5902_v58 = vadd.f32 %v5838_v40, %v5710_v26  ;;  %v5398_v40 = vld [vmem:[#allocation2 + $0x191] sm:$0xff] }
 0x4c9   :  { %v6005_v16 = vld [vmem:[#allocation2 + $0x484] sm:$0xff]  ;;  %v5557_v13 = vadd.f32 %v5493_v45, %v5365_v63  ;;  %v5877_v41 = vmul.f32 0.24420136, %v5813_v14  ;;  %v6125_v50 = vadd.f32 %v6061_v34, %v5933_v39  ;;  %v5590_v26 = vld [vmem:[#allocation2 + $0x192] sm:$0xff] }
 0x4ca   :  { %v5309_v6 = vld [vmem:[#allocation2 + $0x540] sm:$0xff]  ;;  %v6069_v43 = vmul.f32 0.05448869, %v6005_v16  ;;  %v5456_v16 = vmul.f32 0.24420136, %v5392_v21  ;;  %v6094_v38 = vadd.f32 %v6030_v32, %v5902_v58  ;;  %v5782_v32 = vld [vmem:[#allocation2 + $0x193] sm:$0xff] }
 0x4cb   :  { %v5437_v2 = vld [vmem:[#allocation2 + $0x541] sm:$0xff]  ;;  %v5373_v9 = vmul.f32 0.05448869, %v5309_v6  ;;  %v5749_v12 = vadd.f32 %v5685_v30, %v5557_v13  ;;  %6189 = vst.msk [vmem:[#allocation6 + $0x140] sm:$0xff] %vm23_vm0, %v6125_v50  ;;  %v5968_v6 = vld [vmem:[#allocation2 + $0xf4] sm:$0xff] }
 0x4cc   :  { %v5629_v60 = vld [vmem:[#allocation2 + $0x542] sm:$0xff]  ;;  %v5501_v51 = vmul.f32 0.24420136, %v5437_v2  ;;  %v5520_v33 = vadd.f32 %v5456_v16, %v5328_v1  ;;  %6158 = vst.msk [vmem:[#allocation6 + $0x48] sm:$0xff] %vm23_vm0, %v6094_v38  ;;  %v5654_v42 = vmul.f32 0.40261996, %v5590_v26 }
 0x4cd   :  { %v5821_v22 = vld [vmem:[#allocation2 + $0x543] sm:$0xff]  ;;  %v5693_v49 = vmul.f32 0.40261996, %v5629_v60  ;;  %v5941_v23 = vadd.f32 %v5877_v41, %v5749_v12  ;;  %v5400_v38 = vld [vmem:[#allocation2 + $0x1b1] sm:$0xff] }
 0x4ce   :  { %v5263_v54 = vld [vmem:[#allocation2 + $0xe0] sm:$0xff]  ;;  %v5565_v0 = vadd.f32 %v5501_v51, %v5373_v9  ;;  %v5885_v18 = vmul.f32 0.24420136, %v5821_v22  ;;  %v5586_v22 = vld [vmem:[#allocation2 + $0x112] sm:$0xff]  ;;  %v5712_v41 = vadd.f32 %v5648_v62, %v5520_v33 }
 0x4cf   :  { %v6013_v24 = vld [vmem:[#allocation2 + $0x544] sm:$0xff]  ;;  %v5327_v47 = vmul.f32 0.05448869, %v5263_v54  ;;  %v6133_v52 = vadd.f32 %v6069_v43, %v5941_v23  ;;  %v5970_v54 = vld [vmem:[#allocation2 + $0x114] sm:$0xff]  ;;  %v5842_v23 = vmul.f32 0.24420136, %v5778_v27 }
 0x4d0   :  { %v5391_v48 = vld [vmem:[#allocation2 + $0xe1] sm:$0xff]  ;;  %v5757_v44 = vadd.f32 %v5693_v49, %v5565_v0  ;;  %v6077_v36 = vmul.f32 0.05448869, %v6013_v24  ;;  %v5268_v43 = vld [vmem:[#allocation2 + $0x130] sm:$0xff]  ;;  %v5458_v0 = vmul.f32 0.24420136, %v5394_v20  ;;  %v5904_v31 = vadd.f32 %v5840_v61, %v5712_v41 }
 0x4d1   :  { %v5583_v57 = vld [vmem:[#allocation2 + $0xe2] sm:$0xff]  ;;  %v5455_v35 = vmul.f32 0.24420136, %v5391_v48  ;;  %6197 = vst.msk [vmem:[#allocation6 + $0x180] sm:$0xff] %vm23_vm0, %v6133_v52  ;;  %v6032_v48 = vmul.f32 0.05448869, %v5968_v6 }
 0x4d2   :  { %v5775_v37 = vld [vmem:[#allocation2 + $0xe3] sm:$0xff]  ;;  %v5647_v55 = vmul.f32 0.40261996, %v5583_v57  ;;  %v5949_v59 = vadd.f32 %v5885_v18, %v5757_v44  ;;  %v5588_v18 = vld [vmem:[#allocation2 + $0x132] sm:$0xff]  ;;  %v6034_v21 = vmul.f32 0.05448869, %v5970_v54 }
 0x4d3   :  { %v5967_v3 = vld [vmem:[#allocation2 + $0xe4] sm:$0xff]  ;;  %v5519_v7 = vadd.f32 %v5455_v35, %v5327_v47  ;;  %v5839_v63 = vmul.f32 0.24420136, %v5775_v37  ;;  %v5522_v47 = vadd.f32 %v5458_v0, %v5330_v29  ;;  %v5650_v37 = vmul.f32 0.40261996, %v5586_v22  ;;  %v5974_v20 = vld [vmem:[#allocation2 + $0x194] sm:$0xff] }
 0x4d4   :  { %v5265_v14 = vld [vmem:[#allocation2 + $0x100] sm:$0xff]  ;;  %v6141_v5 = vadd.f32 %v6077_v36, %v5949_v59  ;;  %v6031_v9 = vmul.f32 0.05448869, %v5967_v3  ;;  %v6096_v35 = vadd.f32 %v6032_v48, %v5904_v31  ;;  %v5332_v8 = vmul.f32 0.05448869, %v5268_v43  ;;  %v5780_v36 = vld [vmem:[#allocation2 + $0x133] sm:$0xff] }
 0x4d5   :  { %v5393_v25 = vld [vmem:[#allocation2 + $0x101] sm:$0xff]  ;;  %v5711_v28 = vadd.f32 %v5647_v55, %v5519_v7  ;;  %v5329_v19 = vmul.f32 0.05448869, %v5265_v14  ;;  %v5714_v55 = vadd.f32 %v5650_v37, %v5522_v47  ;;  %v5460_v52 = vmul.f32 0.24420136, %v5396_v11  ;;  %v5972_v59 = vld [vmem:[#allocation2 + $0x134] sm:$0xff] }
 0x4d6   :  { %v5585_v17 = vld [vmem:[#allocation2 + $0x102] sm:$0xff]  ;;  %v5457_v45 = vmul.f32 0.24420136, %v5393_v25  ;;  %6205 = vst.msk [vmem:[#allocation6 + $0x1c0] sm:$0xff] %vm23_vm0, %v6141_v5  ;;  %6160 = vst.msk [vmem:[#allocation6 + $0x58] sm:$0xff] %vm23_vm0, %v6096_v35  ;;  %v5272_v27 = vld [vmem:[#allocation2 + $0x1b0] sm:$0xff] }
 0x4d7   :  { %v5777_v2 = vld [vmem:[#allocation2 + $0x103] sm:$0xff]  ;;  %v5903_v34 = vadd.f32 %v5839_v63, %v5711_v28  ;;  %v5649_v24 = vmul.f32 0.40261996, %v5585_v17  ;;  %v5652_v25 = vmul.f32 0.40261996, %v5588_v18  ;;  %v5906_v1 = vadd.f32 %v5842_v23, %v5714_v55  ;;  %v5274_v47 = vld [vmem:[#allocation2 + $0x1d0] sm:$0xff] }
 0x4d8   :  { %v5969_v60 = vld [vmem:[#allocation2 + $0x104] sm:$0xff]  ;;  %v5521_v51 = vadd.f32 %v5457_v45, %v5329_v19  ;;  %v5841_v12 = vmul.f32 0.24420136, %v5777_v2  ;;  %v5334_v17 = vmul.f32 0.05448869, %v5270_v10  ;;  %v5524_v6 = vadd.f32 %v5460_v52, %v5332_v8  ;;  %v5402_v37 = vld [vmem:[#allocation2 + $0x1d1] sm:$0xff] }
 0x4d9   :  { %v5267_v13 = vld [vmem:[#allocation2 + $0x120] sm:$0xff]  ;;  %v6095_v15 = vadd.f32 %v6031_v9, %v5903_v34  ;;  %v6033_v57 = vmul.f32 0.05448869, %v5969_v60  ;;  %v5462_v2 = vmul.f32 0.24420136, %v5398_v40  ;;  %v6098_v62 = vadd.f32 %v6034_v21, %v5906_v1  ;;  %v5592_v34 = vld [vmem:[#allocation2 + $0x1b2] sm:$0xff] }
 0x4da   :  { %v5395_v30 = vld [vmem:[#allocation2 + $0x121] sm:$0xff]  ;;  %v5713_v53 = vadd.f32 %v5649_v24, %v5521_v51  ;;  %v5331_v50 = vmul.f32 0.05448869, %v5267_v13  ;;  %v5844_v60 = vmul.f32 0.24420136, %v5780_v36  ;;  %v5716_v45 = vadd.f32 %v5652_v25, %v5524_v6  ;;  %v5276_v25 = vld [vmem:[#allocation2 + $0x1f0] sm:$0xff] }
 0x4db   :  { %v5587_v39 = vld [vmem:[#allocation2 + $0x122] sm:$0xff]  ;;  %6159 = vst.msk [vmem:[#allocation6 + $0x50] sm:$0xff] %vm23_vm0, %v6095_v15  ;;  %v5459_v44 = vmul.f32 0.24420136, %v5395_v30  ;;  %v5526_v22 = vadd.f32 %v5462_v2, %v5334_v17  ;;  %v6036_v9 = vmul.f32 0.05448869, %v5972_v59 }
 0x4dc   :  { %v5779_v49 = vld [vmem:[#allocation2 + $0x123] sm:$0xff]  ;;  %v5905_v56 = vadd.f32 %v5841_v12, %v5713_v53  ;;  %v5651_v46 = vmul.f32 0.40261996, %v5587_v39  ;;  %v5784_v30 = vld [vmem:[#allocation2 + $0x1b3] sm:$0xff]  ;;  %6162 = vst.msk [vmem:[#allocation6 + $0x68] sm:$0xff] %vm23_vm0, %v6098_v62  ;;  %v5908_v51 = vadd.f32 %v5844_v60, %v5716_v45 }
 0x4dd   :  { %v5971_v4 = vld [vmem:[#allocation2 + $0x124] sm:$0xff]  ;;  %v5523_v3 = vadd.f32 %v5459_v44, %v5331_v50  ;;  %v5843_v14 = vmul.f32 0.24420136, %v5779_v49  ;;  %v5718_v24 = vadd.f32 %v5654_v42, %v5526_v22  ;;  %v5846_v29 = vmul.f32 0.24420136, %v5782_v32  ;;  %v5976_v39 = vld [vmem:[#allocation2 + $0x1b4] sm:$0xff] }
 0x4de   :  { %v6097_v7 = vadd.f32 %v6033_v57, %v5905_v56  ;;  %v5271_v5 = vld [vmem:[#allocation2 + $0x1a0] sm:$0xff]  ;;  %v6035_v63 = vmul.f32 0.05448869, %v5971_v4  ;;  %v5336_v12 = vmul.f32 0.05448869, %v5272_v27  ;;  %v6100_v53 = vadd.f32 %v6036_v9, %v5908_v51  ;;  %v5594_v56 = vld [vmem:[#allocation2 + $0x1d2] sm:$0xff] }
 0x4df   :  { %v5715_v16 = vadd.f32 %v5651_v46, %v5523_v3  ;;  %v5399_v58 = vld [vmem:[#allocation2 + $0x1a1] sm:$0xff]  ;;  %v5335_v61 = vmul.f32 0.05448869, %v5271_v5  ;;  %v5464_v0 = vmul.f32 0.24420136, %v5400_v38  ;;  %v5910_v57 = vadd.f32 %v5846_v29, %v5718_v24  ;;  %v5786_v46 = vld [vmem:[#allocation2 + $0x1d3] sm:$0xff] }
 0x4e0   :  { %v5591_v28 = vld [vmem:[#allocation2 + $0x1a2] sm:$0xff]  ;;  %6161 = vst.msk [vmem:[#allocation6 + $0x60] sm:$0xff] %vm23_vm0, %v6097_v7  ;;  %v5463_v54 = vmul.f32 0.24420136, %v5399_v58  ;;  %v6038_v50 = vmul.f32 0.05448869, %v5974_v20 }
 0x4e1   :  { %v5783_v33 = vld [vmem:[#allocation2 + $0x1a3] sm:$0xff]  ;;  %v5907_v19 = vadd.f32 %v5843_v14, %v5715_v16  ;;  %v5655_v48 = vmul.f32 0.40261996, %v5591_v28  ;;  %v5528_v44 = vadd.f32 %v5464_v0, %v5336_v12  ;;  %v5656_v4 = vmul.f32 0.40261996, %v5592_v34  ;;  %6164 = vst.msk [vmem:[#allocation6 + $0x78] sm:$0xff] %vm23_vm0, %v6100_v53 }
 0x4e2   :  { %v5975_v13 = vld [vmem:[#allocation2 + $0x1a4] sm:$0xff]  ;;  %v5527_v15 = vadd.f32 %v5463_v54, %v5335_v61  ;;  %v5847_v18 = vmul.f32 0.24420136, %v5783_v33  ;;  %v6102_v36 = vadd.f32 %v6038_v50, %v5910_v57  ;;  %v5848_v55 = vmul.f32 0.24420136, %v5784_v30  ;;  %v5978_v6 = vld [vmem:[#allocation2 + $0x1d4] sm:$0xff] }
 0x4e3   :  { %v6099_v41 = vadd.f32 %v6035_v63, %v5907_v19  ;;  %v5273_v43 = vld [vmem:[#allocation2 + $0x1c0] sm:$0xff]  ;;  %v6039_v40 = vmul.f32 0.05448869, %v5975_v13  ;;  %v5720_v59 = vadd.f32 %v5656_v4, %v5528_v44  ;;  %v6040_v26 = vmul.f32 0.05448869, %v5976_v39  ;;  %v5404_v60 = vld [vmem:[#allocation2 + $0x1f1] sm:$0xff] }
 0x4e4   :  { %v5401_v11 = vld [vmem:[#allocation2 + $0x1c1] sm:$0xff]  ;;  %v5719_v23 = vadd.f32 %v5655_v48, %v5527_v15  ;;  %v5337_v35 = vmul.f32 0.05448869, %v5273_v43  ;;  %v5338_v7 = vmul.f32 0.05448869, %v5274_v47  ;;  %6166 = vst.msk [vmem:[#allocation6 + $0x88] sm:$0xff] %vm23_vm0, %v6102_v36 }
 0x4e5   :  { %v5593_v49 = vld [vmem:[#allocation2 + $0x1c2] sm:$0xff]  ;;  %6163 = vst.msk [vmem:[#allocation6 + $0x70] sm:$0xff] %vm23_vm0, %v6099_v41  ;;  %v5465_v3 = vmul.f32 0.24420136, %v5401_v11  ;;  %v5466_v16 = vmul.f32 0.24420136, %v5402_v37  ;;  %v5912_v5 = vadd.f32 %v5848_v55, %v5720_v59 }
 0x4e6   :  { %v5785_v31 = vld [vmem:[#allocation2 + $0x1c3] sm:$0xff]  ;;  %v5911_v52 = vadd.f32 %v5847_v18, %v5719_v23  ;;  %v5657_v32 = vmul.f32 0.40261996, %v5593_v49  ;;  %v5658_v33 = vmul.f32 0.40261996, %v5594_v56  ;;  %v5596_v45 = vld [vmem:[#allocation2 + $0x1f2] sm:$0xff] }
 0x4e7   :  { %v5977_v10 = vld [vmem:[#allocation2 + $0x1c4] sm:$0xff]  ;;  %v5529_v17 = vadd.f32 %v5465_v3, %v5337_v35  ;;  %v5849_v1 = vmul.f32 0.24420136, %v5785_v31  ;;  %v5530_v20 = vadd.f32 %v5466_v16, %v5338_v7  ;;  %v6104_v22 = vadd.f32 %v6040_v26, %v5912_v5  ;;  %v5788_v9 = vld [vmem:[#allocation2 + $0x1f3] sm:$0xff] }
 0x4e8   :  { %v5275_v21 = vld [vmem:[#allocation2 + $0x1e0] sm:$0xff]  ;;  %v6103_v2 = vadd.f32 %v6039_v40, %v5911_v52  ;;  %v6041_v58 = vmul.f32 0.05448869, %v5977_v10  ;;  %v5850_v27 = vmul.f32 0.24420136, %v5786_v46  ;;  %v5278_v41 = vld [vmem:[#allocation2 + $0x250] sm:$0xff] }
 0x4e9   :  { %v5403_v8 = vld [vmem:[#allocation2 + $0x1e1] sm:$0xff]  ;;  %v5339_v28 = vmul.f32 0.05448869, %v5275_v21  ;;  %v5721_v42 = vadd.f32 %v5657_v32, %v5529_v17  ;;  %v5340_v34 = vmul.f32 0.05448869, %v5276_v25  ;;  %v5722_v54 = vadd.f32 %v5658_v33, %v5530_v20  ;;  %v5406_v51 = vld [vmem:[#allocation2 + $0x251] sm:$0xff] }
 0x4ea   :  { %v5595_v14 = vld [vmem:[#allocation2 + $0x1e2] sm:$0xff]  ;;  %v5467_v62 = vmul.f32 0.24420136, %v5403_v8  ;;  %6167 = vst.msk [vmem:[#allocation6 + $0x90] sm:$0xff] %vm23_vm0, %v6103_v2  ;;  %v5468_v30 = vmul.f32 0.24420136, %v5404_v60 }
 0x4eb   :  { %v5787_v63 = vld [vmem:[#allocation2 + $0x1e3] sm:$0xff]  ;;  %v5659_v38 = vmul.f32 0.40261996, %v5595_v14  ;;  %v5913_v61 = vadd.f32 %v5849_v1, %v5721_v42  ;;  %v5598_v24 = vld [vmem:[#allocation2 + $0x252] sm:$0xff]  ;;  %6168 = vst.msk [vmem:[#allocation6 + $0x98] sm:$0xff] %vm23_vm0, %v6104_v22  ;;  %v5914_v12 = vadd.f32 %v5850_v27, %v5722_v54 }
 0x4ec   :  { %v5979_v19 = vld [vmem:[#allocation2 + $0x1e4] sm:$0xff]  ;;  %v5531_v13 = vadd.f32 %v5467_v62, %v5339_v28  ;;  %v6042_v29 = vmul.f32 0.05448869, %v5978_v6  ;;  %v5851_v39 = vmul.f32 0.24420136, %v5787_v63  ;;  %v5980_v11 = vld [vmem:[#allocation2 + $0x1f4] sm:$0xff]  ;;  %v5532_v49 = vadd.f32 %v5468_v30, %v5340_v34 }
 0x4ed   :  { %v5660_v43 = vmul.f32 0.40261996, %v5596_v45  ;;  %v5790_v15 = vld [vmem:[#allocation2 + $0x253] sm:$0xff]  ;;  %v6105_v48 = vadd.f32 %v6041_v58, %v5913_v61  ;;  %v5279_v31 = vld [vmem:[#allocation2 + $0x260] sm:$0xff]  ;;  %v6043_v50 = vmul.f32 0.05448869, %v5979_v19 }
 0x4ee   :  { %v5723_v0 = vadd.f32 %v5659_v38, %v5531_v13  ;;  %v5407_v53 = vld [vmem:[#allocation2 + $0x261] sm:$0xff]  ;;  %v5342_v18 = vmul.f32 0.05448869, %v5278_v41  ;;  %v5470_v10 = vmul.f32 0.24420136, %v5406_v51  ;;  %v5982_v47 = vld [vmem:[#allocation2 + $0x254] sm:$0xff]  ;;  %v6106_v23 = vadd.f32 %v6042_v29, %v5914_v12 }
 0x4ef   :  { %v5599_v57 = vld [vmem:[#allocation2 + $0x262] sm:$0xff]  ;;  %6169 = vst.msk [vmem:[#allocation6 + $0xa0] sm:$0xff] %vm23_vm0, %v6105_v48  ;;  %v5724_v4 = vadd.f32 %v5660_v43, %v5532_v49  ;;  %v5852_v35 = vmul.f32 0.24420136, %v5788_v9  ;;  %v5280_v21 = vld [vmem:[#allocation2 + $0x270] sm:$0xff] }
 0x4f0   :  { %v5791_v37 = vld [vmem:[#allocation2 + $0x263] sm:$0xff]  ;;  %v5915_v44 = vadd.f32 %v5851_v39, %v5723_v0  ;;  %v5408_v8 = vld [vmem:[#allocation2 + $0x271] sm:$0xff]  ;;  %v5534_v36 = vadd.f32 %v5470_v10, %v5342_v18  ;;  %v5662_v40 = vmul.f32 0.40261996, %v5598_v24  ;;  %v5343_v55 = vmul.f32 0.05448869, %v5279_v31 }
 0x4f1   :  { %v5983_v56 = vld [vmem:[#allocation2 + $0x264] sm:$0xff]  ;;  %v5471_v3 = vmul.f32 0.24420136, %v5407_v53  ;;  %v5600_v46 = vld [vmem:[#allocation2 + $0x272] sm:$0xff]  ;;  %6170 = vst.msk [vmem:[#allocation6 + $0xa8] sm:$0xff] %vm23_vm0, %v6106_v23  ;;  %v5916_v26 = vadd.f32 %v5852_v35, %v5724_v4 }
 0x4f2   :  { %v5792_v52 = vld [vmem:[#allocation2 + $0x273] sm:$0xff]  ;;  %v6107_v59 = vadd.f32 %v6043_v50, %v5915_v44  ;;  %v6044_v7 = vmul.f32 0.05448869, %v5980_v11  ;;  %v5854_v14 = vmul.f32 0.24420136, %v5790_v15  ;;  %v5281_v17 = vld [vmem:[#allocation2 + $0x280] sm:$0xff]  ;;  %v5726_v1 = vadd.f32 %v5662_v40, %v5534_v36 }
 0x4f3   :  { %v5984_v25 = vld [vmem:[#allocation2 + $0x274] sm:$0xff]  ;;  %v5409_v32 = vld [vmem:[#allocation2 + $0x281] sm:$0xff]  ;;  %v5535_v16 = vadd.f32 %v5471_v3, %v5343_v55  ;;  %v5663_v6 = vmul.f32 0.40261996, %v5599_v57  ;;  %v5344_v2 = vmul.f32 0.05448869, %v5280_v21 }
 0x4f4   :  { %v5601_v5 = vld [vmem:[#allocation2 + $0x282] sm:$0xff]  ;;  %v5282_v58 = vld [vmem:[#allocation2 + $0x290] sm:$0xff]  ;;  %6171 = vst.msk [vmem:[#allocation6 + $0xb0] sm:$0xff] %vm23_vm0, %v6107_v59  ;;  %v6108_v63 = vadd.f32 %v6044_v7, %v5916_v26  ;;  %v6046_v60 = vmul.f32 0.05448869, %v5982_v47  ;;  %v5918_v62 = vadd.f32 %v5854_v14, %v5726_v1 }
 0x4f5   :  { %v5410_v28 = vld [vmem:[#allocation2 + $0x291] sm:$0xff]  ;;  %v5855_v42 = vmul.f32 0.24420136, %v5791_v37  ;;  %v5472_v20 = vmul.f32 0.24420136, %v5408_v8  ;;  %v5793_v33 = vld [vmem:[#allocation2 + $0x283] sm:$0xff]  ;;  %v5727_v19 = vadd.f32 %v5663_v6, %v5535_v16 }
 0x4f6   :  { %v6047_v45 = vmul.f32 0.05448869, %v5983_v56  ;;  %v5345_v22 = vmul.f32 0.05448869, %v5281_v17  ;;  %v5602_v27 = vld [vmem:[#allocation2 + $0x292] sm:$0xff]  ;;  %v5283_v38 = vld [vmem:[#allocation2 + $0x2a0] sm:$0xff]  ;;  %v6110_v30 = vadd.f32 %v6046_v60, %v5918_v62 }
 0x4f7   :  { %6172 = vst.msk [vmem:[#allocation6 + $0xb8] sm:$0xff] %vm23_vm0, %v6108_v63  ;;  %v5536_v34 = vadd.f32 %v5472_v20, %v5344_v2  ;;  %v5664_v9 = vmul.f32 0.40261996, %v5600_v46  ;;  %v5856_v61 = vmul.f32 0.24420136, %v5792_v52  ;;  %v5985_v13 = vld [vmem:[#allocation2 + $0x284] sm:$0xff]  ;;  %v5919_v41 = vadd.f32 %v5855_v42, %v5727_v19 }
 0x4f8   :  { %v5473_v54 = vmul.f32 0.24420136, %v5409_v32  ;;  %v6048_v51 = vmul.f32 0.05448869, %v5984_v25  ;;  %v5346_v24 = vmul.f32 0.05448869, %v5282_v58 }
 0x4f9   :  { %v5794_v29 = vld [vmem:[#allocation2 + $0x293] sm:$0xff]  ;;  %v5411_v39 = vld [vmem:[#allocation2 + $0x2a1] sm:$0xff]  ;;  %v5728_v43 = vadd.f32 %v5664_v9, %v5536_v34  ;;  %v5665_v15 = vmul.f32 0.40261996, %v5601_v5  ;;  %v5474_v48 = vmul.f32 0.24420136, %v5410_v28  ;;  %v6111_v49 = vadd.f32 %v6047_v45, %v5919_v41 }
 0x4fa   :  { %v5537_v11 = vadd.f32 %v5473_v54, %v5345_v22  ;;  %v5986_v12 = vld [vmem:[#allocation2 + $0x294] sm:$0xff]  ;;  %v5603_v0 = vld [vmem:[#allocation2 + $0x2a2] sm:$0xff]  ;;  %6174 = vst.msk [vmem:[#allocation6 + $0xc8] sm:$0xff] %vm23_vm0, %v6110_v30  ;;  %v5857_v31 = vmul.f32 0.24420136, %v5793_v33 }
 0x4fb   :  { %v5666_v53 = vmul.f32 0.40261996, %v5602_v27  ;;  %v5347_v57 = vmul.f32 0.05448869, %v5283_v38  ;;  %v5795_v50 = vld [vmem:[#allocation2 + $0x2a3] sm:$0xff]  ;;  %v5920_v18 = vadd.f32 %v5856_v61, %v5728_v43  ;;  %v5538_v47 = vadd.f32 %v5474_v48, %v5346_v24  ;;  %v5284_v23 = vld [vmem:[#allocation2 + $0x2b0] sm:$0xff] }
 0x4fc   :  { %v5729_v10 = vadd.f32 %v5665_v15, %v5537_v11  ;;  %v5475_v37 = vmul.f32 0.24420136, %v5411_v39  ;;  %v5412_v44 = vld [vmem:[#allocation2 + $0x2b1] sm:$0xff]  ;;  %6175 = vst.msk [vmem:[#allocation6 + $0xd0] sm:$0xff] %vm23_vm0, %v6111_v49  ;;  %v6049_v35 = vmul.f32 0.05448869, %v5985_v13 }
 0x4fd   :  { %v5604_v4 = vld [vmem:[#allocation2 + $0x2b2] sm:$0xff]  ;;  %v5858_v56 = vmul.f32 0.24420136, %v5794_v29  ;;  %v5667_v21 = vmul.f32 0.40261996, %v5603_v0  ;;  %v5987_v8 = vld [vmem:[#allocation2 + $0x2a4] sm:$0xff]  ;;  %v6112_v40 = vadd.f32 %v6048_v51, %v5920_v18  ;;  %v5730_v3 = vadd.f32 %v5666_v53, %v5538_v47 }
 0x4fe   :  { %v5796_v36 = vld [vmem:[#allocation2 + $0x2b3] sm:$0xff]  ;;  %v5921_v55 = vadd.f32 %v5857_v31, %v5729_v10  ;;  %v5539_v46 = vadd.f32 %v5475_v37, %v5347_v57  ;;  %v6050_v7 = vmul.f32 0.05448869, %v5986_v12  ;;  %v5348_v14 = vmul.f32 0.05448869, %v5284_v23  ;;  %v5287_v58 = vld [vmem:[#allocation2 + $0x320] sm:$0xff] }
 0x4ff   :  { %v5286_v52 = vld [vmem:[#allocation2 + $0x310] sm:$0xff]  ;;  %v5476_v25 = vmul.f32 0.24420136, %v5412_v44  ;;  %6176 = vst.msk [vmem:[#allocation6 + $0xd8] sm:$0xff] %vm23_vm0, %v6112_v40  ;;  %v5922_v16 = vadd.f32 %v5858_v56, %v5730_v3  ;;  %v5859_v2 = vmul.f32 0.24420136, %v5795_v50 }
 0x500   :  { %v5414_v59 = vld [vmem:[#allocation2 + $0x311] sm:$0xff]  ;;  %v6113_v1 = vadd.f32 %v6049_v35, %v5921_v55  ;;  %v5731_v6 = vadd.f32 %v5667_v21, %v5539_v46  ;;  %v5415_v28 = vld [vmem:[#allocation2 + $0x321] sm:$0xff]  ;;  %v5668_v60 = vmul.f32 0.40261996, %v5604_v4  ;;  %v5350_v42 = vmul.f32 0.05448869, %v5286_v52 }
 0x501   :  { %v5606_v26 = vld [vmem:[#allocation2 + $0x312] sm:$0xff]  ;;  %v5540_v63 = vadd.f32 %v5476_v25, %v5348_v14  ;;  %v5478_v20 = vmul.f32 0.24420136, %v5414_v59  ;;  %v5607_v33 = vld [vmem:[#allocation2 + $0x322] sm:$0xff]  ;;  %v6114_v19 = vadd.f32 %v6050_v7, %v5922_v16  ;;  %v6051_v22 = vmul.f32 0.05448869, %v5987_v8 }
 0x502   :  { %v5988_v17 = vld [vmem:[#allocation2 + $0x2b4] sm:$0xff]  ;;  %v5799_v62 = vld [vmem:[#allocation2 + $0x323] sm:$0xff]  ;;  %6177 = vst.msk [vmem:[#allocation6 + $0xe0] sm:$0xff] %vm23_vm0, %v6113_v1  ;;  %v5923_v45 = vadd.f32 %v5859_v2, %v5731_v6  ;;  %v5860_v27 = vmul.f32 0.24420136, %v5796_v36 }
 0x503   :  { %v5798_v32 = vld [vmem:[#allocation2 + $0x313] sm:$0xff]  ;;  %v5991_v38 = vld [vmem:[#allocation2 + $0x324] sm:$0xff]  ;;  %v5732_v61 = vadd.f32 %v5668_v60, %v5540_v63  ;;  %v5542_v54 = vadd.f32 %v5478_v20, %v5350_v42  ;;  %v5670_v13 = vmul.f32 0.40261996, %v5606_v26  ;;  %v5351_v30 = vmul.f32 0.05448869, %v5287_v58 }
 0x504   :  { %v5990_v5 = vld [vmem:[#allocation2 + $0x314] sm:$0xff]  ;;  %v5289_v51 = vld [vmem:[#allocation2 + $0x340] sm:$0xff]  ;;  %6178 = vst.msk [vmem:[#allocation6 + $0xe8] sm:$0xff] %vm23_vm0, %v6114_v19  ;;  %v6115_v29 = vadd.f32 %v6051_v22, %v5923_v45  ;;  %v6052_v39 = vmul.f32 0.05448869, %v5988_v17 }
 0x505   :  { %v5288_v34 = vld [vmem:[#allocation2 + $0x330] sm:$0xff]  ;;  %v5417_v24 = vld [vmem:[#allocation2 + $0x341] sm:$0xff]  ;;  %v5862_v43 = vmul.f32 0.24420136, %v5798_v32  ;;  %v5479_v11 = vmul.f32 0.24420136, %v5415_v28  ;;  %v5924_v48 = vadd.f32 %v5860_v27, %v5732_v61  ;;  %v5734_v12 = vadd.f32 %v5670_v13, %v5542_v54 }
 0x506   :  { %v5416_v9 = vld [vmem:[#allocation2 + $0x331] sm:$0xff]  ;;  %v6054_v0 = vmul.f32 0.05448869, %v5990_v5  ;;  %v5352_v49 = vmul.f32 0.05448869, %v5288_v34  ;;  %v5609_v31 = vld [vmem:[#allocation2 + $0x342] sm:$0xff] }
 0x507   :  { %v5608_v41 = vld [vmem:[#allocation2 + $0x332] sm:$0xff]  ;;  %6179 = vst.msk [vmem:[#allocation6 + $0xf0] sm:$0xff] %vm23_vm0, %v6115_v29  ;;  %v5543_v57 = vadd.f32 %v5479_v11, %v5351_v30  ;;  %v5671_v50 = vmul.f32 0.40261996, %v5607_v33  ;;  %v5863_v18 = vmul.f32 0.24420136, %v5799_v62  ;;  %v6116_v37 = vadd.f32 %v6052_v39, %v5924_v48 }
 0x508   :  { %v5800_v15 = vld [vmem:[#allocation2 + $0x333] sm:$0xff]  ;;  %v5480_v10 = vmul.f32 0.24420136, %v5416_v9  ;;  %v5926_v23 = vadd.f32 %v5862_v43, %v5734_v12  ;;  %v6055_v44 = vmul.f32 0.05448869, %v5991_v38  ;;  %v5801_v35 = vld [vmem:[#allocation2 + $0x343] sm:$0xff] }
 0x509   :  { %v5290_v53 = vld [vmem:[#allocation2 + $0x350] sm:$0xff]  ;;  %v5353_v4 = vmul.f32 0.05448869, %v5289_v51  ;;  %v5735_v21 = vadd.f32 %v5671_v50, %v5543_v57  ;;  %v5672_v36 = vmul.f32 0.40261996, %v5608_v41  ;;  %v5993_v55 = vld [vmem:[#allocation2 + $0x344] sm:$0xff] }
 0x50a   :  { %v5992_v47 = vld [vmem:[#allocation2 + $0x334] sm:$0xff]  ;;  %v5544_v8 = vadd.f32 %v5480_v10, %v5352_v49  ;;  %v5481_v40 = vmul.f32 0.24420136, %v5417_v24  ;;  %6180 = vst.msk [vmem:[#allocation6 + $0xf8] sm:$0xff] %vm23_vm0, %v6116_v37  ;;  %v6118_v46 = vadd.f32 %v6054_v0, %v5926_v23  ;;  %v5864_v52 = vmul.f32 0.24420136, %v5800_v15 }
 0x50b   :  { %v5418_v56 = vld [vmem:[#allocation2 + $0x351] sm:$0xff]  ;;  %v5673_v59 = vmul.f32 0.40261996, %v5609_v31  ;;  %v5354_v26 = vmul.f32 0.05448869, %v5290_v53  ;;  %v5927_v14 = vadd.f32 %v5863_v18, %v5735_v21  ;;  %v5291_v1 = vld [vmem:[#allocation2 + $0x360] sm:$0xff] }
 0x50c   :  { %v5610_v3 = vld [vmem:[#allocation2 + $0x352] sm:$0xff]  ;;  %v5736_v25 = vadd.f32 %v5672_v36, %v5544_v8  ;;  %v5545_v17 = vadd.f32 %v5481_v40, %v5353_v4  ;;  %v5482_v32 = vmul.f32 0.24420136, %v5418_v56  ;;  %v5419_v16 = vld [vmem:[#allocation2 + $0x361] sm:$0xff]  ;;  %6182 = vst.msk [vmem:[#allocation6 + $0x108] sm:$0xff] %vm23_vm0, %v6118_v46 }
 0x50d   :  { %v5802_v7 = vld [vmem:[#allocation2 + $0x353] sm:$0xff]  ;;  %v5611_v6 = vld [vmem:[#allocation2 + $0x362] sm:$0xff]  ;;  %v6056_v2 = vmul.f32 0.05448869, %v5992_v47  ;;  %v5865_v5 = vmul.f32 0.24420136, %v5801_v35  ;;  %v6119_v60 = vadd.f32 %v6055_v44, %v5927_v14 }
 0x50e   :  { %v5674_v58 = vmul.f32 0.40261996, %v5610_v3  ;;  %v5994_v28 = vld [vmem:[#allocation2 + $0x354] sm:$0xff]  ;;  %v5803_v63 = vld [vmem:[#allocation2 + $0x363] sm:$0xff]  ;;  %v5928_v42 = vadd.f32 %v5864_v52, %v5736_v25  ;;  %v5737_v20 = vadd.f32 %v5673_v59, %v5545_v17  ;;  %v5546_v33 = vadd.f32 %v5482_v32, %v5354_v26 }
 0x50f   :  { %v5292_v62 = vld [vmem:[#allocation2 + $0x370] sm:$0xff]  ;;  %v6057_v22 = vmul.f32 0.05448869, %v5993_v55  ;;  %v5355_v27 = vmul.f32 0.05448869, %v5291_v1  ;;  %v5995_v34 = vld [vmem:[#allocation2 + $0x364] sm:$0xff] }
 0x510   :  { %v5420_v19 = vld [vmem:[#allocation2 + $0x371] sm:$0xff]  ;;  %v5483_v38 = vmul.f32 0.24420136, %v5419_v16  ;;  %6183 = vst.msk [vmem:[#allocation6 + $0x110] sm:$0xff] %vm23_vm0, %v6119_v60  ;;  %v6120_v61 = vadd.f32 %v6056_v2, %v5928_v42  ;;  %v5929_v54 = vadd.f32 %v5865_v5, %v5737_v20  ;;  %v5738_v13 = vadd.f32 %v5674_v58, %v5546_v33  ;;  %v5295_v57 = vld [vmem:[#allocation2 + $0x3e0] sm:$0xff] }
 0x511   :  { %v5612_v45 = vld [vmem:[#allocation2 + $0x372] sm:$0xff]  ;;  %v5866_v30 = vmul.f32 0.24420136, %v5802_v7  ;;  %v5675_v39 = vmul.f32 0.40261996, %v5611_v6  ;;  %v5423_v50 = vld [vmem:[#allocation2 + $0x3e1] sm:$0xff] }
 0x512   :  { %v5804_v9 = vld [vmem:[#allocation2 + $0x373] sm:$0xff]  ;;  %v5547_v29 = vadd.f32 %v5483_v38, %v5355_v27  ;;  %v5356_v43 = vmul.f32 0.05448869, %v5292_v62  ;;  %v5484_v11 = vmul.f32 0.24420136, %v5420_v19  ;;  %6184 = vst.msk [vmem:[#allocation6 + $0x118] sm:$0xff] %vm23_vm0, %v6120_v61  ;;  %v6121_v12 = vadd.f32 %v6057_v22, %v5929_v54 }
 0x513   :  { %v5996_v41 = vld [vmem:[#allocation2 + $0x374] sm:$0xff]  ;;  %v5930_v0 = vadd.f32 %v5866_v30, %v5738_v13  ;;  %v6058_v49 = vmul.f32 0.05448869, %v5994_v28  ;;  %v5867_v31 = vmul.f32 0.24420136, %v5803_v63  ;;  %v5615_v23 = vld [vmem:[#allocation2 + $0x3e2] sm:$0xff] }
 0x514   :  { %v5294_v51 = vld [vmem:[#allocation2 + $0x3d0] sm:$0xff]  ;;  %v5739_v18 = vadd.f32 %v5675_v39, %v5547_v29  ;;  %v5548_v10 = vadd.f32 %v5484_v11, %v5356_v43  ;;  %v5676_v47 = vmul.f32 0.40261996, %v5612_v45  ;;  %6185 = vst.msk [vmem:[#allocation6 + $0x120] sm:$0xff] %vm23_vm0, %v6121_v12  ;;  %v6059_v56 = vmul.f32 0.05448869, %v5995_v34 }
 0x515   :  { %v5422_v24 = vld [vmem:[#allocation2 + $0x3d1] sm:$0xff]  ;;  %v5358_v37 = vmul.f32 0.05448869, %v5294_v51  ;;  %v6122_v35 = vadd.f32 %v6058_v49, %v5930_v0  ;;  %v5868_v21 = vmul.f32 0.24420136, %v5804_v9  ;;  %v5807_v36 = vld [vmem:[#allocation2 + $0x3e3] sm:$0xff] }
 0x516   :  { %v5614_v15 = vld [vmem:[#allocation2 + $0x3d2] sm:$0xff]  ;;  %v5486_v8 = vmul.f32 0.24420136, %v5422_v24  ;;  %v5931_v40 = vadd.f32 %v5867_v31, %v5739_v18  ;;  %v5740_v55 = vadd.f32 %v5676_v47, %v5548_v10  ;;  %v6060_v3 = vmul.f32 0.05448869, %v5996_v41  ;;  %v5297_v59 = vld [vmem:[#allocation2 + $0x400] sm:$0xff] }
 0x517   :  { %v5806_v48 = vld [vmem:[#allocation2 + $0x3d3] sm:$0xff]  ;;  %v5359_v46 = vmul.f32 0.05448869, %v5295_v57  ;;  %6186 = vst.msk [vmem:[#allocation6 + $0x128] sm:$0xff] %vm23_vm0, %v6122_v35  ;;  %v5678_v7 = vmul.f32 0.40261996, %v5614_v15 }
 0x518   :  { %v5998_v53 = vld [vmem:[#allocation2 + $0x3d4] sm:$0xff]  ;;  %v5550_v26 = vadd.f32 %v5486_v8, %v5358_v37  ;;  %v5870_v14 = vmul.f32 0.24420136, %v5806_v48  ;;  %v5487_v25 = vmul.f32 0.24420136, %v5423_v50  ;;  %v5999_v17 = vld [vmem:[#allocation2 + $0x3e4] sm:$0xff]  ;;  %v6123_v32 = vadd.f32 %v6059_v56, %v5931_v40 }
 0x519   :  { %v5296_v44 = vld [vmem:[#allocation2 + $0x3f0] sm:$0xff]  ;;  %v5932_v1 = vadd.f32 %v5868_v21, %v5740_v55  ;;  %v6062_v16 = vmul.f32 0.05448869, %v5998_v53  ;;  %v5425_v5 = vld [vmem:[#allocation2 + $0x401] sm:$0xff]  ;;  %v5679_v63 = vmul.f32 0.40261996, %v5615_v23 }
 0x51a   :  { %v5424_v4 = vld [vmem:[#allocation2 + $0x3f1] sm:$0xff]  ;;  %v5360_v6 = vmul.f32 0.05448869, %v5296_v44  ;;  %v5742_v58 = vadd.f32 %v5678_v7, %v5550_v26  ;;  %v5551_v28 = vadd.f32 %v5487_v25, %v5359_v46  ;;  %v5617_v20 = vld [vmem:[#allocation2 + $0x402] sm:$0xff]  ;;  %6187 = vst.msk [vmem:[#allocation6 + $0x130] sm:$0xff] %vm23_vm0, %v6123_v32 }
 0x51b   :  { %v5616_v52 = vld [vmem:[#allocation2 + $0x3f2] sm:$0xff]  ;;  %v5488_v60 = vmul.f32 0.24420136, %v5424_v4  ;;  %v6124_v33 = vadd.f32 %v6060_v3, %v5932_v1  ;;  %v5871_v62 = vmul.f32 0.24420136, %v5807_v36  ;;  %v5809_v22 = vld [vmem:[#allocation2 + $0x403] sm:$0xff] }
 0x51c   :  { %v5808_v2 = vld [vmem:[#allocation2 + $0x3f3] sm:$0xff]  ;;  %v5680_v19 = vmul.f32 0.40261996, %v5616_v52  ;;  %v5361_v45 = vmul.f32 0.05448869, %v5297_v59  ;;  %v5934_v27 = vadd.f32 %v5870_v14, %v5742_v58  ;;  %v5743_v38 = vadd.f32 %v5679_v63, %v5551_v28  ;;  %v6001_v24 = vld [vmem:[#allocation2 + $0x404] sm:$0xff] }
 0x51d   :  { %v6000_v42 = vld [vmem:[#allocation2 + $0x3f4] sm:$0xff]  ;;  %v5552_v34 = vadd.f32 %v5488_v60, %v5360_v6  ;;  %v5489_v9 = vmul.f32 0.24420136, %v5425_v5  ;;  %6188 = vst.msk [vmem:[#allocation6 + $0x138] sm:$0xff] %vm23_vm0, %v6124_v33  ;;  %v6063_v30 = vmul.f32 0.05448869, %v5999_v17 }
 0x51e   :  { %v5298_v61 = vld [vmem:[#allocation2 + $0x410] sm:$0xff]  ;;  %v5872_v41 = vmul.f32 0.24420136, %v5808_v2  ;;  %v5681_v51 = vmul.f32 0.40261996, %v5617_v20  ;;  %v6126_v39 = vadd.f32 %v6062_v16, %v5934_v27  ;;  %v5935_v43 = vadd.f32 %v5871_v62, %v5743_v38  ;;  %v5299_v48 = vld [vmem:[#allocation2 + $0x420] sm:$0xff] }
 0x51f   :  { %v5426_v54 = vld [vmem:[#allocation2 + $0x411] sm:$0xff]  ;;  %v5744_v11 = vadd.f32 %v5680_v19, %v5552_v34  ;;  %v5553_v15 = vadd.f32 %v5489_v9, %v5361_v45  ;;  %v5427_v12 = vld [vmem:[#allocation2 + $0x421] sm:$0xff]  ;;  %v6064_v49 = vmul.f32 0.05448869, %v6000_v42  ;;  %v5362_v31 = vmul.f32 0.05448869, %v5298_v61 }
 0x520   :  { %v5618_v13 = vld [vmem:[#allocation2 + $0x412] sm:$0xff]  ;;  %v5619_v0 = vld [vmem:[#allocation2 + $0x422] sm:$0xff]  ;;  %v5490_v53 = vmul.f32 0.24420136, %v5426_v54  ;;  %6190 = vst.msk [vmem:[#allocation6 + $0x148] sm:$0xff] %vm23_vm0, %v6126_v39  ;;  %v6127_v18 = vadd.f32 %v6063_v30, %v5935_v43 }
 0x521   :  { %v5810_v29 = vld [vmem:[#allocation2 + $0x413] sm:$0xff]  ;;  %v5811_v50 = vld [vmem:[#allocation2 + $0x423] sm:$0xff]  ;;  %v5936_v10 = vadd.f32 %v5872_v41, %v5744_v11  ;;  %v5745_v47 = vadd.f32 %v5681_v51, %v5553_v15  ;;  %v5873_v37 = vmul.f32 0.24420136, %v5809_v22  ;;  %v5682_v56 = vmul.f32 0.40261996, %v5618_v13 }
 0x522   :  { %v6002_v57 = vld [vmem:[#allocation2 + $0x414] sm:$0xff]  ;;  %v6003_v23 = vld [vmem:[#allocation2 + $0x424] sm:$0xff]  ;;  %v5554_v35 = vadd.f32 %v5490_v53, %v5362_v31  ;;  %v5363_v21 = vmul.f32 0.05448869, %v5299_v48  ;;  %v5491_v8 = vmul.f32 0.24420136, %v5427_v12 }
 0x523   :  { %v5300_v44 = vld [vmem:[#allocation2 + $0x430] sm:$0xff]  ;;  %6191 = vst.msk [vmem:[#allocation6 + $0x150] sm:$0xff] %vm23_vm0, %v6127_v18  ;;  %v6128_v55 = vadd.f32 %v6064_v49, %v5936_v10  ;;  %v5937_v3 = vadd.f32 %v5873_v37, %v5745_v47  ;;  %v6065_v46 = vmul.f32 0.05448869, %v6001_v24  ;;  %v5874_v52 = vmul.f32 0.24420136, %v5810_v29 }
 0x524   :  { %v5428_v4 = vld [vmem:[#allocation2 + $0x431] sm:$0xff]  ;;  %v5746_v14 = vadd.f32 %v5682_v56, %v5554_v35  ;;  %v5555_v25 = vadd.f32 %v5491_v8, %v5363_v21  ;;  %v5683_v17 = vmul.f32 0.40261996, %v5619_v0  ;;  %v5364_v32 = vmul.f32 0.05448869, %v5300_v44  ;;  %v5303_v16 = vld [vmem:[#allocation2 + $0x4a0] sm:$0xff] }
 0x525   :  { %v5620_v36 = vld [vmem:[#allocation2 + $0x432] sm:$0xff]  ;;  %v5431_v6 = vld [vmem:[#allocation2 + $0x4a1] sm:$0xff]  ;;  %6192 = vst.msk [vmem:[#allocation6 + $0x158] sm:$0xff] %vm23_vm0, %v6128_v55  ;;  %v6129_v2 = vadd.f32 %v6065_v46, %v5937_v3  ;;  %v6066_v5 = vmul.f32 0.05448869, %v6002_v57 }
 0x526   :  { %v5812_v40 = vld [vmem:[#allocation2 + $0x433] sm:$0xff]  ;;  %v5875_v58 = vmul.f32 0.24420136, %v5811_v50  ;;  %v5492_v28 = vmul.f32 0.24420136, %v5428_v4  ;;  %v5938_v60 = vadd.f32 %v5874_v52, %v5746_v14  ;;  %v5747_v42 = vadd.f32 %v5683_v17, %v5555_v25  ;;  %v5623_v62 = vld [vmem:[#allocation2 + $0x4a2] sm:$0xff] }
 0x527   :  { %v6004_v59 = vld [vmem:[#allocation2 + $0x434] sm:$0xff]  ;;  %v6067_v20 = vmul.f32 0.05448869, %v6003_v23  ;;  %6193 = vst.msk [vmem:[#allocation6 + $0x160] sm:$0xff] %vm23_vm0, %v6129_v2  ;;  %v5684_v22 = vmul.f32 0.40261996, %v5620_v36 }
 0x528   :  { %v5302_v26 = vld [vmem:[#allocation2 + $0x490] sm:$0xff]  ;;  %v5556_v45 = vadd.f32 %v5492_v28, %v5364_v32  ;;  %v5876_v27 = vmul.f32 0.24420136, %v5812_v40  ;;  %v6130_v9 = vadd.f32 %v6066_v5, %v5938_v60  ;;  %v5939_v61 = vadd.f32 %v5875_v58, %v5747_v42  ;;  %v5815_v30 = vld [vmem:[#allocation2 + $0x4a3] sm:$0xff] }
 0x529   :  { %v5430_v7 = vld [vmem:[#allocation2 + $0x491] sm:$0xff]  ;;  %v5366_v33 = vmul.f32 0.05448869, %v5302_v26  ;;  %v6068_v54 = vmul.f32 0.05448869, %v6004_v59  ;;  %v6007_v43 = vld [vmem:[#allocation2 + $0x4a4] sm:$0xff] }
 0x52a   :  { %v5622_v1 = vld [vmem:[#allocation2 + $0x492] sm:$0xff]  ;;  %v5494_v38 = vmul.f32 0.24420136, %v5430_v7  ;;  %v5367_v13 = vmul.f32 0.05448869, %v5303_v16  ;;  %v5748_v51 = vadd.f32 %v5684_v22, %v5556_v45  ;;  %6194 = vst.msk [vmem:[#allocation6 + $0x168] sm:$0xff] %vm23_vm0, %v6130_v9  ;;  %v6131_v15 = vadd.f32 %v6067_v20, %v5939_v61 }
 0x52b   :  { %v5814_v63 = vld [vmem:[#allocation2 + $0x493] sm:$0xff]  ;;  %v5686_v29 = vmul.f32 0.40261996, %v5622_v1  ;;  %v5495_v39 = vmul.f32 0.24420136, %v5431_v6  ;;  %v5305_v18 = vld [vmem:[#allocation2 + $0x4c0] sm:$0xff] }
 0x52c   :  { %v5304_v19 = vld [vmem:[#allocation2 + $0x4b0] sm:$0xff]  ;;  %v5558_v24 = vadd.f32 %v5494_v38, %v5366_v33  ;;  %v5878_v48 = vmul.f32 0.24420136, %v5814_v63  ;;  %v5687_v12 = vmul.f32 0.40261996, %v5623_v62  ;;  %v5940_v31 = vadd.f32 %v5876_v27, %v5748_v51  ;;  %v5433_v10 = vld [vmem:[#allocation2 + $0x4c1] sm:$0xff] }
 0x52d   :  { %v6006_v34 = vld [vmem:[#allocation2 + $0x494] sm:$0xff]  ;;  %v5368_v0 = vmul.f32 0.05448869, %v5304_v19  ;;  %v5559_v57 = vadd.f32 %v5495_v39, %v5367_v13  ;;  %v5625_v47 = vld [vmem:[#allocation2 + $0x4c2] sm:$0xff]  ;;  %6195 = vst.msk [vmem:[#allocation6 + $0x170] sm:$0xff] %vm23_vm0, %v6131_v15 }
 0x52e   :  { %v5432_v41 = vld [vmem:[#allocation2 + $0x4b1] sm:$0xff]  ;;  %v5750_v53 = vadd.f32 %v5686_v29, %v5558_v24  ;;  %v6070_v37 = vmul.f32 0.05448869, %v6006_v34  ;;  %v5879_v23 = vmul.f32 0.24420136, %v5815_v30  ;;  %v5817_v35 = vld [vmem:[#allocation2 + $0x4c3] sm:$0xff]  ;;  %v6132_v56 = vadd.f32 %v6068_v54, %v5940_v31 }
 0x52f   :  { %v5624_v11 = vld [vmem:[#allocation2 + $0x4b2] sm:$0xff]  ;;  %v5496_v50 = vmul.f32 0.24420136, %v5432_v41  ;;  %v5751_v8 = vadd.f32 %v5687_v12, %v5559_v57  ;;  %v6071_v46 = vmul.f32 0.05448869, %v6007_v43  ;;  %v6009_v26 = vld [vmem:[#allocation2 + $0x4c4] sm:$0xff] }
 0x530   :  { %v5816_v49 = vld [vmem:[#allocation2 + $0x4b3] sm:$0xff]  ;;  %v5688_v44 = vmul.f32 0.40261996, %v5624_v11  ;;  %v5942_v21 = vadd.f32 %v5878_v48, %v5750_v53  ;;  %v5369_v52 = vmul.f32 0.05448869, %v5305_v18  ;;  %6196 = vst.msk [vmem:[#allocation6 + $0x178] sm:$0xff] %vm23_vm0, %v6132_v56 }
 0x531   :  { %v6008_v4 = vld [vmem:[#allocation2 + $0x4b4] sm:$0xff]  ;;  %v5560_v36 = vadd.f32 %v5496_v50, %v5368_v0  ;;  %v5497_v59 = vmul.f32 0.24420136, %v5433_v10  ;;  %v5943_v25 = vadd.f32 %v5879_v23, %v5751_v8  ;;  %v5880_v32 = vmul.f32 0.24420136, %v5816_v49  ;;  %v5307_v16 = vld [vmem:[#allocation2 + $0x4e0] sm:$0xff] }
 0x532   :  { %v5306_v40 = vld [vmem:[#allocation2 + $0x4d0] sm:$0xff]  ;;  %v6134_v14 = vadd.f32 %v6070_v37, %v5942_v21  ;;  %v5435_v6 = vld [vmem:[#allocation2 + $0x4e1] sm:$0xff]  ;;  %v5689_v5 = vmul.f32 0.40261996, %v5625_v47  ;;  %v6072_v33 = vmul.f32 0.05448869, %v6008_v4 }
 0x533   :  { %v5434_v55 = vld [vmem:[#allocation2 + $0x4d1] sm:$0xff]  ;;  %v5752_v17 = vadd.f32 %v5688_v44, %v5560_v36  ;;  %v5561_v2 = vadd.f32 %v5497_v59, %v5369_v52  ;;  %v5370_v58 = vmul.f32 0.05448869, %v5306_v40  ;;  %v5627_v63 = vld [vmem:[#allocation2 + $0x4e2] sm:$0xff]  ;;  %v6135_v42 = vadd.f32 %v6071_v46, %v5943_v25 }
 0x534   :  { %v5626_v3 = vld [vmem:[#allocation2 + $0x4d2] sm:$0xff]  ;;  %v5498_v28 = vmul.f32 0.24420136, %v5434_v55  ;;  %v5819_v60 = vld [vmem:[#allocation2 + $0x4e3] sm:$0xff]  ;;  %6198 = vst.msk [vmem:[#allocation6 + $0x188] sm:$0xff] %vm23_vm0, %v6134_v14 }
 0x535   :  { %v5818_v7 = vld [vmem:[#allocation2 + $0x4d3] sm:$0xff]  ;;  %v5944_v20 = vadd.f32 %v5880_v32, %v5752_v17  ;;  %v5881_v62 = vmul.f32 0.24420136, %v5817_v35  ;;  %v6011_v19 = vld [vmem:[#allocation2 + $0x4e4] sm:$0xff]  ;;  %v5753_v27 = vadd.f32 %v5689_v5, %v5561_v2  ;;  %v5690_v34 = vmul.f32 0.40261996, %v5626_v3 }
 0x536   :  { %v6010_v1 = vld [vmem:[#allocation2 + $0x4d4] sm:$0xff]  ;;  %v5562_v38 = vadd.f32 %v5498_v28, %v5370_v58  ;;  %v5371_v9 = vmul.f32 0.05448869, %v5307_v16  ;;  %6199 = vst.msk [vmem:[#allocation6 + $0x190] sm:$0xff] %vm23_vm0, %v6135_v42  ;;  %v6073_v41 = vmul.f32 0.05448869, %v6009_v26 }
 0x537   :  { %v5308_v45 = vld [vmem:[#allocation2 + $0x4f0] sm:$0xff]  ;;  %v6136_v30 = vadd.f32 %v6072_v33, %v5944_v20  ;;  %v5882_v51 = vmul.f32 0.24420136, %v5818_v7  ;;  %v5499_v24 = vmul.f32 0.24420136, %v5435_v6  ;;  %v5945_v39 = vadd.f32 %v5881_v62, %v5753_v27  ;;  %v5311_v12 = vld [vmem:[#allocation2 + $0x560] sm:$0xff] }
 0x538   :  { %v5436_v22 = vld [vmem:[#allocation2 + $0x4f1] sm:$0xff]  ;;  %v5754_v43 = vadd.f32 %v5690_v34, %v5562_v38  ;;  %v6074_v11 = vmul.f32 0.05448869, %v6010_v1  ;;  %v5372_v15 = vmul.f32 0.05448869, %v5308_v45  ;;  %v5439_v23 = vld [vmem:[#allocation2 + $0x561] sm:$0xff] }
 0x539   :  { %v5628_v61 = vld [vmem:[#allocation2 + $0x4f2] sm:$0xff]  ;;  %6200 = vst.msk [vmem:[#allocation6 + $0x198] sm:$0xff] %vm23_vm0, %v6136_v30  ;;  %v5563_v0 = vadd.f32 %v5499_v24, %v5371_v9  ;;  %v5691_v49 = vmul.f32 0.40261996, %v5627_v63  ;;  %v5883_v31 = vmul.f32 0.24420136, %v5819_v60  ;;  %v6137_v50 = vadd.f32 %v6073_v41, %v5945_v39 }
 0x53a   :  { %v5310_v54 = vld [vmem:[#allocation2 + $0x550] sm:$0xff]  ;;  %v5500_v53 = vmul.f32 0.24420136, %v5436_v22  ;;  %v5946_v18 = vadd.f32 %v5882_v51, %v5754_v43  ;;  %v6075_v10 = vmul.f32 0.05448869, %v6011_v19  ;;  %v5631_v8 = vld [vmem:[#allocation2 + $0x562] sm:$0xff] }
 0x53b   :  { %v5438_v13 = vld [vmem:[#allocation2 + $0x551] sm:$0xff]  ;;  %v5374_v47 = vmul.f32 0.05448869, %v5310_v54  ;;  %v5755_v44 = vadd.f32 %v5691_v49, %v5563_v0  ;;  %v5692_v35 = vmul.f32 0.40261996, %v5628_v61  ;;  %6201 = vst.msk [vmem:[#allocation6 + $0x1a0] sm:$0xff] %vm23_vm0, %v6137_v50 }
 0x53c   :  { %v5820_v29 = vld [vmem:[#allocation2 + $0x4f3] sm:$0xff]  ;;  %v5564_v4 = vadd.f32 %v5500_v53, %v5372_v15  ;;  %v5502_v56 = vmul.f32 0.24420136, %v5438_v13  ;;  %v6138_v36 = vadd.f32 %v6074_v11, %v5946_v18  ;;  %v5375_v3 = vmul.f32 0.05448869, %v5311_v12  ;;  %v5823_v46 = vld [vmem:[#allocation2 + $0x563] sm:$0xff] }
 0x53d   :  { %v5630_v48 = vld [vmem:[#allocation2 + $0x552] sm:$0xff]  ;;  %v5884_v40 = vmul.f32 0.24420136, %v5820_v29  ;;  %v5947_v52 = vadd.f32 %v5883_v31, %v5755_v44  ;;  %v5503_v7 = vmul.f32 0.24420136, %v5439_v23  ;;  %v6015_v6 = vld [vmem:[#allocation2 + $0x564] sm:$0xff] }
 0x53e   :  { %v6012_v57 = vld [vmem:[#allocation2 + $0x4f4] sm:$0xff]  ;;  %v5694_v55 = vmul.f32 0.40261996, %v5630_v48  ;;  %v5756_v59 = vadd.f32 %v5692_v35, %v5564_v4  ;;  %v5566_v26 = vadd.f32 %v5502_v56, %v5374_v47  ;;  %6202 = vst.msk [vmem:[#allocation6 + $0x1a8] sm:$0xff] %vm23_vm0, %v6138_v36  ;;  %v5695_v16 = vmul.f32 0.40261996, %v5631_v8 }
 0x53f   :  { %v5822_v37 = vld [vmem:[#allocation2 + $0x553] sm:$0xff]  ;;  %v6076_v32 = vmul.f32 0.05448869, %v6012_v57  ;;  %v6139_v5 = vadd.f32 %v6075_v10, %v5947_v52  ;;  %v5567_v63 = vadd.f32 %v5503_v7, %v5375_v3  ;;  %v5313_v60 = vld [vmem:[#allocation2 + $0x580] sm:$0xff]  ;;  %v5887_v34 = vmul.f32 0.24420136, %v5823_v46 }
 0x540   :  { %v6014_v21 = vld [vmem:[#allocation2 + $0x554] sm:$0xff]  ;;  %v5886_v1 = vmul.f32 0.24420136, %v5822_v37  ;;  %v5948_v58 = vadd.f32 %v5884_v40, %v5756_v59  ;;  %v5758_v28 = vadd.f32 %v5694_v55, %v5566_v26  ;;  %v5441_v42 = vld [vmem:[#allocation2 + $0x581] sm:$0xff]  ;;  %v5377_v41 = vmul.f32 0.05448869, %v5313_v60 }
 0x541   :  { %v5312_v14 = vld [vmem:[#allocation2 + $0x570] sm:$0xff]  ;;  %v5633_v20 = vld [vmem:[#allocation2 + $0x582] sm:$0xff]  ;;  %v6078_v33 = vmul.f32 0.05448869, %v6014_v21  ;;  %6203 = vst.msk [vmem:[#allocation6 + $0x1b0] sm:$0xff] %vm23_vm0, %v6139_v5  ;;  %v5759_v38 = vadd.f32 %v5695_v16, %v5567_v63 }
 0x542   :  { %v5440_v25 = vld [vmem:[#allocation2 + $0x571] sm:$0xff]  ;;  %v5376_v62 = vmul.f32 0.05448869, %v5312_v14  ;;  %v6140_v22 = vadd.f32 %v6076_v32, %v5948_v58  ;;  %v5950_v27 = vadd.f32 %v5886_v1, %v5758_v28  ;;  %v5825_v9 = vld [vmem:[#allocation2 + $0x583] sm:$0xff]  ;;  %v5505_v51 = vmul.f32 0.24420136, %v5441_v42 }
 0x543   :  { %v5632_v17 = vld [vmem:[#allocation2 + $0x572] sm:$0xff]  ;;  %v5504_v19 = vmul.f32 0.24420136, %v5440_v25  ;;  %v6017_v24 = vld [vmem:[#allocation2 + $0x584] sm:$0xff]  ;;  %v5951_v39 = vadd.f32 %v5887_v34, %v5759_v38  ;;  %v6079_v43 = vmul.f32 0.05448869, %v6015_v6 }
 0x544   :  { %v5824_v2 = vld [vmem:[#allocation2 + $0x573] sm:$0xff]  ;;  %v5696_v30 = vmul.f32 0.40261996, %v5632_v17  ;;  %6204 = vst.msk [vmem:[#allocation6 + $0x1b8] sm:$0xff] %vm23_vm0, %v6140_v22  ;;  %v6142_v29 = vadd.f32 %v6078_v33, %v5950_v27  ;;  %v5315_v48 = vld [vmem:[#allocation2 + $0x5a0] sm:$0xff]  ;;  %v5569_v0 = vadd.f32 %v5505_v51, %v5377_v41 }
 0x545   :  { %v6016_v45 = vld [vmem:[#allocation2 + $0x574] sm:$0xff]  ;;  %v5568_v13 = vadd.f32 %v5504_v19, %v5376_v62  ;;  %v5888_v11 = vmul.f32 0.24420136, %v5824_v2  ;;  %v5697_v49 = vmul.f32 0.40261996, %v5633_v20  ;;  %v5443_v57 = vld [vmem:[#allocation2 + $0x5a1] sm:$0xff]  ;;  %v6143_v50 = vadd.f32 %v6079_v43, %v5951_v39 }
 0x546   :  { %v5314_v61 = vld [vmem:[#allocation2 + $0x590] sm:$0xff]  ;;  %6206 = vst.msk [vmem:[#allocation6 + $0x1c8] sm:$0xff] %vm23_vm0, %v6142_v29  ;;  %v6080_v18 = vmul.f32 0.05448869, %v6016_v45  ;;  %v5635_v37 = vld [vmem:[#allocation2 + $0x5a2] sm:$0xff] }
 0x547   :  { %v5442_v54 = vld [vmem:[#allocation2 + $0x591] sm:$0xff]  ;;  %v5760_v12 = vadd.f32 %v5696_v30, %v5568_v13  ;;  %v5378_v31 = vmul.f32 0.05448869, %v5314_v61  ;;  %v5761_v4 = vadd.f32 %v5697_v49, %v5569_v0  ;;  %v5889_v35 = vmul.f32 0.24420136, %v5825_v9  ;;  %v5827_v21 = vld [vmem:[#allocation2 + $0x5a3] sm:$0xff] }
 0x548   :  { %v5634_v15 = vld [vmem:[#allocation2 + $0x592] sm:$0xff]  ;;  %v5506_v10 = vmul.f32 0.24420136, %v5442_v54  ;;  %v5379_v56 = vmul.f32 0.05448869, %v5315_v48  ;;  %6207 = vst.msk [vmem:[#allocation6 + $0x1d0] sm:$0xff] %vm23_vm0, %v6143_v50 }
 0x549   :  { %v5826_v53 = vld [vmem:[#allocation2 + $0x593] sm:$0xff]  ;;  %v5952_v44 = vadd.f32 %v5888_v11, %v5760_v12  ;;  %v6081_v36 = vmul.f32 0.05448869, %v6017_v24  ;;  %v5698_v55 = vmul.f32 0.40261996, %v5634_v15  ;;  %v5953_v52 = vadd.f32 %v5889_v35, %v5761_v4  ;;  %v6019_v32 = vld [vmem:[#allocation2 + $0x5a4] sm:$0xff] }
 0x54a   :  { %v6018_v47 = vld [vmem:[#allocation2 + $0x594] sm:$0xff]  ;;  %v5570_v40 = vadd.f32 %v5506_v10, %v5378_v31  ;;  %v5507_v3 = vmul.f32 0.24420136, %v5443_v57  ;;  %v5890_v59 = vmul.f32 0.24420136, %v5826_v53 }
 0x54b   :  { %v5316_v23 = vld [vmem:[#allocation2 + $0x5b0] sm:$0xff]  ;;  %v6144_v46 = vadd.f32 %v6080_v18, %v5952_v44  ;;  %v5699_v17 = vmul.f32 0.40261996, %v5635_v37  ;;  %v6145_v16 = vadd.f32 %v6081_v36, %v5953_v52  ;;  %v6082_v6 = vmul.f32 0.05448869, %v6018_v47 }
 0x54c   :  { %v5444_v8 = vld [vmem:[#allocation2 + $0x5b1] sm:$0xff]  ;;  %v5380_v26 = vmul.f32 0.05448869, %v5316_v23  ;;  %v5762_v14 = vadd.f32 %v5698_v55, %v5570_v40  ;;  %v5571_v25 = vadd.f32 %v5507_v3, %v5379_v56  ;;  %v5891_v2 = vmul.f32 0.24420136, %v5827_v21 }
 0x54d   :  { %v5636_v7 = vld [vmem:[#allocation2 + $0x5b2] sm:$0xff]  ;;  %v5508_v1 = vmul.f32 0.24420136, %v5444_v8  ;;  %6208 = vst.msk [vmem:[#allocation6 + $0x1d8] sm:$0xff] %vm23_vm0, %v6144_v46  ;;  %6209 = vst.msk [vmem:[#allocation6 + $0x1e0] sm:$0xff] %vm23_vm0, %v6145_v16 }
 0x54e   :  { %v5828_v5 = vld [vmem:[#allocation2 + $0x5b3] sm:$0xff]  ;;  %v5954_v58 = vadd.f32 %v5890_v59, %v5762_v14  ;;  %v5763_v28 = vadd.f32 %v5699_v17, %v5571_v25  ;;  %v5700_v60 = vmul.f32 0.40261996, %v5636_v7  ;;  %v6083_v42 = vmul.f32 0.05448869, %v6019_v32 }
 0x54f   :  { %v5572_v63 = vadd.f32 %v5508_v1, %v5380_v26  ;;  %v6020_v20 = vld [vmem:[#allocation2 + $0x5b4] sm:$0xff]  ;;  %v5892_v45 = vmul.f32 0.24420136, %v5828_v5 }
 0x550   :  { %v6146_v33 = vadd.f32 %v6082_v6, %v5954_v58  ;;  %v5955_v62 = vadd.f32 %v5891_v2, %v5763_v28  ;;  %v6084_v38 = vmul.f32 0.05448869, %v6020_v20 }
 0x551   :  { %v5764_v19 = vadd.f32 %v5700_v60, %v5572_v63 }
 0x552   :  { %6210 = vst.msk [vmem:[#allocation6 + $0x1e8] sm:$0xff] %vm23_vm0, %v6146_v33  ;;  %v6147_v22 = vadd.f32 %v6083_v42, %v5955_v62 }
 0x553   :  { %v5956_v27 = vadd.f32 %v5892_v45, %v5764_v19 }
 0x554   :  { %6211 = vst.msk [vmem:[#allocation6 + $0x1f0] sm:$0xff] %vm23_vm0, %v6147_v22 }
 0x555   :  { %v6148_v34 = vadd.f32 %v6084_v38, %v5956_v27 }
 0x557   :  { %6212 = vst.msk [vmem:[#allocation6 + $0x1f8] sm:$0xff] %vm23_vm0, %v6148_v34 }
 0x558   :  { %6299 = shalt.err (!%p6296_p9)
}
 0x559   :  { %6224 = dma.vmem_to_hbm [thread:$0]  %s6219_s13, 8192, %s8846_s1, [#allocation5], %s6313_s9, %s6313_s9, %s6314_s10  }
 0x55a   :  { %6310 = dma.done.wait [#allocation5], 8192  }
 0x55b   :  { %6311 = vsyncadd [#allocation5], 4294959104 }
 0x55c   :  { %6228 = vsyncpa [#allocation4], 1 }
 0x55d   :  { %6229 = vsyncpa [#allocation5], 1 }

</bundles_post_ra>
